<compile_context>
chip_gen: v7x
topology: tpu7x:2x2x1
jax: 0.10.0
libtpu: 0.0.40
codegen_flags: <defaults>
</compile_context>

<pallas_src>
import functools

import jax
import jax.numpy as jnp
from jax.experimental import pallas as pl
from jax.experimental.pallas import tpu as pltpu

LANE = 128
_EPS = 1e-6  # NAFNet LayerNorm2d eps (note: differs from torch.nn.LayerNorm's 1e-5)


def _round_up(n, m):
    return ((n + m - 1) // m) * m


def _layernorm(v, w, b, true_c, n_pad):
    # Channel LayerNorm on a zero-lane-padded (HW, Cp) tensor.  Padded lanes of
    # `v` are zero; the variance is corrected exactly for the n_pad padded
    # lanes (each contributes mu^2 to the raw squared sum).  Padded w/b are
    # zero so padded output lanes stay zero.
    inv_c = 1.0 / true_c
    mu = jnp.sum(v, axis=-1, keepdims=True) * inv_c
    d = v - mu
    raw = jnp.sum(d * d, axis=-1, keepdims=True)
    var = (raw - n_pad * mu * mu) * inv_c
    return d * jax.lax.rsqrt(var + _EPS) * w + b


def _dwconv3x3(x, w_ref, b_ref, flat, H, W):
    # 3x3 depthwise conv, padding=1, stride=1 on flattened-spatial (HW, Ch).
    # Shifts via pltpu.roll; edge handling:
    #   horizontal: a wrapped sample for dx=+1 / dx=-1 always comes from source
    #     column 0 / W-1, so those source columns are zeroed once per direction
    #     and reused by all three taps of that dx.
    #   vertical: rows wrapped by dy=+/-1 are zeroed once per dy group (last /
    #     first W flattened rows).
    HW = H * W
    col = flat % W
    x_cp = jnp.where(col == 0, 0.0, x)        # source for dx = +1 taps
    x_cm = jnp.where(col == W - 1, 0.0, x)    # source for dx = -1 taps
    src = {-1: x_cm, 0: x, 1: x_cp}

    acc = None
    for dy in (-1, 0, 1):
        grp = None
        for dx in (-1, 0, 1):
            off = dy * W + dx
            k = (dy + 1) * 3 + (dx + 1)       # torch weight index ky*3 + kx
            s = src[dx]
            if off != 0:
                # want shifted[i] = s[i + off]  ==  np.roll(s, -off)
                s = pltpu.roll(s, shift=(-off) % HW, axis=0)
            t = s * w_ref[k:k + 1, :]         # static ref row slice, broadcast
            grp = t if grp is None else grp + t
        if dy == 1:
            grp = jnp.where(flat < HW - W, grp, 0.0)
        elif dy == -1:
            grp = jnp.where(flat >= W, grp, 0.0)
        acc = grp if acc is None else acc + grp
    return acc + b_ref[...]                   # bias folded in once


def nafblock_kernel(x_ref,
                    n1w_ref, n1b_ref, c1w_ref, c1b_ref, c2w_ref, c2b_ref,
                    scaw_ref, scab_ref, c3w_ref, c3b_ref,
                    n2w_ref, n2b_ref, c4w_ref, c4b_ref, c5w_ref, c5b_ref,
                    beta_ref, gamma_ref, out_ref, *, H, W, C):
    HW = H * W
    inp = x_ref[...]                                    # (HW, Cp), pads are 0
    n_pad = float(inp.shape[-1] - C)
    flat = jax.lax.broadcasted_iota(jnp.int32, (HW, 1), 0)   # hoisted iota

    # ---- branch 1: norm1 -> conv1(1x1) -> dwconv3x3 -> SimpleGate -> SCA
    #      -> conv3(1x1) -> residual
    x = _layernorm(inp, n1w_ref[...], n1b_ref[...], C, n_pad)
    x = jnp.dot(x, c1w_ref[...], preferred_element_type=jnp.float32) + c1b_ref[...]
    x = _dwconv3x3(x, c2w_ref, c2b_ref, flat, H, W)
    half = x.shape[-1] // 2                             # multiple of 128
    g = x[:, :half] * x[:, half:]                       # SimpleGate (aligned)

    pooled = jnp.mean(g, axis=0, keepdims=True)         # global avg pool (1, Dhp)
    sca = jnp.dot(pooled, scaw_ref[...],
                  preferred_element_type=jnp.float32) + scab_ref[...]
    g = g * sca

    g = jnp.dot(g, c3w_ref[...], preferred_element_type=jnp.float32) + c3b_ref[...]
    y = inp + g * beta_ref[...]

    # ---- branch 2 (FFN): norm2 -> conv4(1x1) -> SimpleGate -> conv5(1x1) -> residual
    f = _layernorm(y, n2w_ref[...], n2b_ref[...], C, n_pad)
    f = jnp.dot(f, c4w_ref[...], preferred_element_type=jnp.float32) + c4b_ref[...]
    fhalf = f.shape[-1] // 2
    f = f[:, :fhalf] * f[:, fhalf:]
    f = jnp.dot(f, c5w_ref[...], preferred_element_type=jnp.float32) + c5b_ref[...]

    out_ref[...] = y + f * gamma_ref[...]


_PARAM_ORDER = ['n1w', 'n1b', 'c1w', 'c1b', 'c2w', 'c2b', 'scaw', 'scab',
                'c3w', 'c3b', 'n2w', 'n2b', 'c4w', 'c4b', 'c5w', 'c5b',
                'beta', 'gamma']


def _pad_cols(a, n):
    return jnp.pad(a, [(0, 0)] * (a.ndim - 1) + [(0, n - a.shape[-1])])


def _pad_rows(a, n):
    return jnp.pad(a, [(0, n - a.shape[0])] + [(0, 0)] * (a.ndim - 1))


def _split_pad_cols(a, half, halfp):
    # Split the last axis into its two SimpleGate halves and pad each half to
    # `halfp` lanes so the in-kernel gate split lands on a 128-lane boundary.
    return jnp.concatenate([_pad_cols(a[..., :half], halfp),
                            _pad_cols(a[..., half:], halfp)], axis=-1)


def nafblock_pallas(x_nchw, params):
    B, C, H, W = x_nchw.shape
    HW = H * W
    DW = params['c1w'].shape[1]
    FFN = params['c4w'].shape[1]
    Dh, Fh = DW // 2, FFN // 2
    Cp, Dhp, Fhp = (_round_up(n, LANE) for n in (C, Dh, Fh))

    # NCHW -> (B, HW, Cp): spatial on sublanes, channels zero-padded to a full
    # 128-lane width on lanes (lane-dense DMA/stores, full-width MXU K/N).
    x = jnp.transpose(x_nchw, (0, 2, 3, 1)).reshape(B, HW, C)
    x = _pad_cols(x, Cp)

    pp = {
        'n1w': _pad_cols(params['n1w'], Cp),
        'n1b': _pad_cols(params['n1b'], Cp),
        'c1w': _pad_rows(_split_pad_cols(params['c1w'], Dh, Dhp), Cp),
        'c1b': _split_pad_cols(params['c1b'], Dh, Dhp),
        'c2w': _split_pad_cols(params['c2w'], Dh, Dhp),
        'c2b': _split_pad_cols(params['c2b'], Dh, Dhp),
        'scaw': _pad_rows(_pad_cols(params['scaw'], Dhp), Dhp),
        'scab': _pad_cols(params['scab'], Dhp),
        'c3w': _pad_rows(_pad_cols(params['c3w'], Cp), Dhp),
        'c3b': _pad_cols(params['c3b'], Cp),
        'n2w': _pad_cols(params['n2w'], Cp),
        'n2b': _pad_cols(params['n2b'], Cp),
        'c4w': _pad_rows(_split_pad_cols(params['c4w'], Fh, Fhp), Cp),
        'c4b': _split_pad_cols(params['c4b'], Fh, Fhp),
        'c5w': _pad_rows(_pad_cols(params['c5w'], Cp), Fhp),
        'c5b': _pad_cols(params['c5b'], Cp),
        'beta': _pad_cols(params['beta'], Cp),
        'gamma': _pad_cols(params['gamma'], Cp),
    }
    args = [pp[k] for k in _PARAM_ORDER]

    def full_spec(p):
        return pl.BlockSpec(p.shape, lambda b: (0,) * p.ndim)

    in_specs = ([pl.BlockSpec((None, HW, Cp), lambda b: (b, 0, 0))]
                + [full_spec(p) for p in args])

    out = pl.pallas_call(
        functools.partial(nafblock_kernel, H=H, W=W, C=C),
        out_shape=jax.ShapeDtypeStruct((B, HW, Cp), jnp.float32),
        grid=(B,),
        in_specs=in_specs,
        out_specs=pl.BlockSpec((None, HW, Cp), lambda b: (b, 0, 0)),
        compiler_params=pltpu.CompilerParams(
            dimension_semantics=("parallel",),
            vmem_limit_bytes=64 * 1024 * 1024),
    )(x, *args)

    out = out[:, :, :C].reshape(B, H, W, C)
    return jnp.transpose(out, (0, 3, 1, 2))


def nafblock_ref(x_nchw, params):
    # Pure-JAX reference (independent of the kernel's roll/pad tricks).
    x = jnp.transpose(x_nchw, (0, 2, 3, 1))            # NHWC

    def ln(v, w, b, eps=_EPS):
        mu = v.mean(-1, keepdims=True)
        var = ((v - mu) ** 2).mean(-1, keepdims=True)
        return (v - mu) / jnp.sqrt(var + eps) * w[0] + b[0]

    inp = x
    h = ln(x, params['n1w'], params['n1b'])
    h = jnp.einsum('bhwc,cd->bhwd', h, params['c1w']) + params['c1b'][0]
    dw_kernel = params['c2w'].reshape(3, 3, 1, -1)     # HWIO, groups == channels
    h = jax.lax.conv_general_dilated(
        h, dw_kernel, (1, 1), 'SAME',
        dimension_numbers=('NHWC', 'HWIO', 'NHWC'),
        feature_group_count=h.shape[-1]) + params['c2b'][0]
    h1, h2 = jnp.split(h, 2, axis=-1)
    h = h1 * h2
    sca = jnp.mean(h, axis=(1, 2), keepdims=True)
    sca = jnp.einsum('bijc,cd->bijd', sca, params['scaw']) + params['scab'][0]
    h = h * sca
    h = jnp.einsum('bhwc,cd->bhwd', h, params['c3w']) + params['c3b'][0]
    y = inp + h * params['beta'][0]
    h = ln(y, params['n2w'], params['n2b'])
    h = jnp.einsum('bhwc,cd->bhwd', h, params['c4w']) + params['c4b'][0]
    h1, h2 = jnp.split(h, 2, axis=-1)
    h = h1 * h2
    h = jnp.einsum('bhwc,cd->bhwd', h, params['c5w']) + params['c5b'][0]
    out = y + h * params['gamma'][0]
    return jnp.transpose(out, (0, 3, 1, 2))


if __name__ == "__main__":
    B, C, H, W = 2, 4, 16, 16
    DW, FFN = 2 * C, 2 * C                             # DW_Expand=2, FFN_Expand=2

    key = jax.random.PRNGKey(0)
    ks = jax.random.split(key, 20)

    def p(i, shape, scale=0.2):
        return scale * jax.random.normal(ks[i], shape, dtype=jnp.float32)

    params = {
        'n1w': 1.0 + p(0, (1, C)), 'n1b': p(1, (1, C)),
        'c1w': p(2, (C, DW)),      'c1b': p(3, (1, DW)),
        'c2w': p(4, (9, DW)),      'c2b': p(5, (1, DW)),       # depthwise 3x3, (ky*3+kx, ch)
        'scaw': p(6, (DW // 2, DW // 2)), 'scab': p(7, (1, DW // 2)),
        'c3w': p(8, (DW // 2, C)), 'c3b': p(9, (1, C)),
        'n2w': 1.0 + p(10, (1, C)), 'n2b': p(11, (1, C)),
        'c4w': p(12, (C, FFN)),    'c4b': p(13, (1, FFN)),
        'c5w': p(14, (FFN // 2, C)), 'c5b': p(15, (1, C)),
        # PyTorch inits beta/gamma to zeros (which would make the block an
        # identity); use small nonzero values so both branches are exercised.
        'beta': p(16, (1, C)), 'gamma': p(17, (1, C)),
    }

    x = jax.random.normal(ks[19], (B, C, H, W), dtype=jnp.float32)

    out = jax.block_until_ready(nafblock_pallas(x, params))
    ref = nafblock_ref(x, params)

    assert out.shape == x.shape
    assert jnp.allclose(out, ref, atol=1e-4, rtol=1e-4), \
        float(jnp.max(jnp.abs(out - ref)))
    print("KERNEL_OK")
</pallas_src>

<mosaic_0001>
module attributes {stable_mosaic.version = 11 : i64} {
  func.func @nafblock_kernel(%arg0: i32, %arg1: memref<1x256x128xf32, #tpu.memory_space<vmem>>, %arg2: memref<1x128xf32, #tpu.memory_space<vmem>>, %arg3: memref<1x128xf32, #tpu.memory_space<vmem>>, %arg4: memref<128x256xf32, #tpu.memory_space<vmem>>, %arg5: memref<1x256xf32, #tpu.memory_space<vmem>>, %arg6: memref<9x256xf32, #tpu.memory_space<vmem>>, %arg7: memref<1x256xf32, #tpu.memory_space<vmem>>, %arg8: memref<128x128xf32, #tpu.memory_space<vmem>>, %arg9: memref<1x128xf32, #tpu.memory_space<vmem>>, %arg10: memref<128x128xf32, #tpu.memory_space<vmem>>, %arg11: memref<1x128xf32, #tpu.memory_space<vmem>>, %arg12: memref<1x128xf32, #tpu.memory_space<vmem>>, %arg13: memref<1x128xf32, #tpu.memory_space<vmem>>, %arg14: memref<128x256xf32, #tpu.memory_space<vmem>>, %arg15: memref<1x256xf32, #tpu.memory_space<vmem>>, %arg16: memref<128x128xf32, #tpu.memory_space<vmem>>, %arg17: memref<1x128xf32, #tpu.memory_space<vmem>>, %arg18: memref<1x128xf32, #tpu.memory_space<vmem>>, %arg19: memref<1x128xf32, #tpu.memory_space<vmem>>, %arg20: memref<1x256x128xf32, #tpu.memory_space<vmem>>) attributes {dimension_semantics = [#tpu.dimension_semantics<parallel>], iteration_bounds = array<i64: 2>, scalar_prefetch = 0 : i64, scratch_operands = 0 : i64, tpu.core_type = #tpu.core_type<tc>, window_params = [{transform_indices = @transform_0, window_bounds = array<i64: 1, 256, 128>}, {pipeline_mode = #tpu.pipeline_mode<synchronous>, transform_indices = @transform_1, window_bounds = array<i64: 1, 128>}, {pipeline_mode = #tpu.pipeline_mode<synchronous>, transform_indices = @transform_2, window_bounds = array<i64: 1, 128>}, {pipeline_mode = #tpu.pipeline_mode<synchronous>, transform_indices = @transform_3, window_bounds = array<i64: 128, 256>}, {pipeline_mode = #tpu.pipeline_mode<synchronous>, transform_indices = @transform_4, window_bounds = array<i64: 1, 256>}, {pipeline_mode = #tpu.pipeline_mode<synchronous>, transform_indices = @transform_5, window_bounds = array<i64: 9, 256>}, {pipeline_mode = #tpu.pipeline_mode<synchronous>, transform_indices = @transform_6, window_bounds = array<i64: 1, 256>}, {pipeline_mode = #tpu.pipeline_mode<synchronous>, transform_indices = @transform_7, window_bounds = array<i64: 128, 128>}, {pipeline_mode = #tpu.pipeline_mode<synchronous>, transform_indices = @transform_8, window_bounds = array<i64: 1, 128>}, {pipeline_mode = #tpu.pipeline_mode<synchronous>, transform_indices = @transform_9, window_bounds = array<i64: 128, 128>}, {pipeline_mode = #tpu.pipeline_mode<synchronous>, transform_indices = @transform_10, window_bounds = array<i64: 1, 128>}, {pipeline_mode = #tpu.pipeline_mode<synchronous>, transform_indices = @transform_11, window_bounds = array<i64: 1, 128>}, {pipeline_mode = #tpu.pipeline_mode<synchronous>, transform_indices = @transform_12, window_bounds = array<i64: 1, 128>}, {pipeline_mode = #tpu.pipeline_mode<synchronous>, transform_indices = @transform_13, window_bounds = array<i64: 128, 256>}, {pipeline_mode = #tpu.pipeline_mode<synchronous>, transform_indices = @transform_14, window_bounds = array<i64: 1, 256>}, {pipeline_mode = #tpu.pipeline_mode<synchronous>, transform_indices = @transform_15, window_bounds = array<i64: 128, 128>}, {pipeline_mode = #tpu.pipeline_mode<synchronous>, transform_indices = @transform_16, window_bounds = array<i64: 1, 128>}, {pipeline_mode = #tpu.pipeline_mode<synchronous>, transform_indices = @transform_17, window_bounds = array<i64: 1, 128>}, {pipeline_mode = #tpu.pipeline_mode<synchronous>, transform_indices = @transform_18, window_bounds = array<i64: 1, 128>}, {transform_indices = @transform_19, window_bounds = array<i64: 1, 256, 128>}]} {
    %c0 = arith.constant 0 : index
    %c0_0 = arith.constant 0 : index
    %c0_1 = arith.constant 0 : index
    %0 = vector.load %arg1[%c0, %c0_0, %c0_1] : memref<1x256x128xf32, #tpu.memory_space<vmem>>, vector<1x256x128xf32>
    %1 = vector.shape_cast %0 : vector<1x256x128xf32> to vector<256x128xf32>
    %2 = tpu.iota {dimensions = array<i32: 0>} : vector<256x1xi32>
    %c0_2 = arith.constant 0 : index
    %c0_3 = arith.constant 0 : index
    %3 = vector.load %arg2[%c0_2, %c0_3] : memref<1x128xf32, #tpu.memory_space<vmem>>, vector<1x128xf32>
    %c0_4 = arith.constant 0 : index
    %c0_5 = arith.constant 0 : index
    %4 = vector.load %arg3[%c0_4, %c0_5] : memref<1x128xf32, #tpu.memory_space<vmem>>, vector<1x128xf32>
    %cst = arith.constant dense<0.000000e+00> : vector<256xf32>
    %5 = vector.multi_reduction <add>, %1, %cst [1] : vector<256x128xf32> to vector<256xf32>
    %6 = vector.shape_cast %5 : vector<256xf32> to vector<256x1xf32>
    %cst_6 = arith.constant 2.500000e-01 : f32
    %7 = vector.broadcast %cst_6 : f32 to vector<256x1xf32>
    %8 = arith.mulf %6, %7 : vector<256x1xf32>
    %9 = vector.broadcast %8 : vector<256x1xf32> to vector<256x128xf32>
    %10 = arith.subf %1, %9 : vector<256x128xf32>
    %11 = arith.mulf %10, %10 : vector<256x128xf32>
    %cst_7 = arith.constant dense<0.000000e+00> : vector<256xf32>
    %12 = vector.multi_reduction <add>, %11, %cst_7 [1] : vector<256x128xf32> to vector<256xf32>
    %13 = vector.shape_cast %12 : vector<256xf32> to vector<256x1xf32>
    %cst_8 = arith.constant 1.240000e+02 : f32
    %14 = vector.broadcast %cst_8 : f32 to vector<256x1xf32>
    %15 = arith.mulf %14, %8 : vector<256x1xf32>
    %16 = arith.mulf %15, %8 : vector<256x1xf32>
    %17 = arith.subf %13, %16 : vector<256x1xf32>
    %cst_9 = arith.constant 2.500000e-01 : f32
    %18 = vector.broadcast %cst_9 : f32 to vector<256x1xf32>
    %19 = arith.mulf %17, %18 : vector<256x1xf32>
    %cst_10 = arith.constant 9.99999997E-7 : f32
    %20 = vector.broadcast %cst_10 : f32 to vector<256x1xf32>
    %21 = arith.addf %19, %20 : vector<256x1xf32>
    %22 = math.rsqrt %21 : vector<256x1xf32>
    %23 = vector.broadcast %22 : vector<256x1xf32> to vector<256x128xf32>
    %24 = arith.mulf %10, %23 : vector<256x128xf32>
    %25 = vector.broadcast %3 : vector<1x128xf32> to vector<256x128xf32>
    %26 = arith.mulf %24, %25 : vector<256x128xf32>
    %27 = vector.broadcast %4 : vector<1x128xf32> to vector<256x128xf32>
    %28 = arith.addf %26, %27 : vector<256x128xf32>
    %c0_11 = arith.constant 0 : index
    %c0_12 = arith.constant 0 : index
    %29 = vector.load %arg4[%c0_11, %c0_12] : memref<128x256xf32, #tpu.memory_space<vmem>>, vector<128x256xf32>
    %cst_13 = arith.constant dense<0.000000e+00> : vector<256x256xf32>
    %30 = tpu.matmul %28, %29, %cst_13 {dimension_numbers = #tpu.dot_dimension_numbers<[1], [0], [0], [1], [0, 0, 1, 1], [], []>} : vector<256x128xf32>, vector<128x256xf32>, vector<256x256xf32> -> vector<256x256xf32>
    %c0_14 = arith.constant 0 : index
    %c0_15 = arith.constant 0 : index
    %31 = vector.load %arg5[%c0_14, %c0_15] : memref<1x256xf32, #tpu.memory_space<vmem>>, vector<1x256xf32>
    %32 = vector.broadcast %31 : vector<1x256xf32> to vector<256x256xf32>
    %33 = arith.addf %30, %32 : vector<256x256xf32>
    %c16_i32 = arith.constant 16 : i32
    %c0_i32 = arith.constant 0 : i32
    %34 = arith.cmpi eq, %c16_i32, %c0_i32 : i32
    %c1_i32 = arith.constant 1 : i32
    %35 = arith.select %34, %c1_i32, %c16_i32 : i32
    %36 = vector.broadcast %35 : i32 to vector<256x1xi32>
    %37 = arith.remsi %2, %36 : vector<256x1xi32>
    %c0_i32_16 = arith.constant 0 : i32
    %38 = vector.broadcast %c0_i32_16 : i32 to vector<256x1xi32>
    %39 = arith.cmpi ne, %37, %38 : vector<256x1xi32>
    %c0_i32_17 = arith.constant 0 : i32
    %40 = vector.broadcast %c0_i32_17 : i32 to vector<256x1xi32>
    %41 = arith.cmpi slt, %37, %40 : vector<256x1xi32>
    %c0_i32_18 = arith.constant 0 : i32
    %42 = arith.cmpi slt, %35, %c0_i32_18 : i32
    %43 = vector.broadcast %42 : i1 to vector<256x1xi1>
    %44 = vector.broadcast %43 : vector<256x1xi1> to vector<256x1xi1>
    %45 = arith.xori %41, %44 : vector<256x1xi1>
    %46 = arith.andi %45, %39 : vector<256x1xi1>
    %47 = vector.broadcast %35 : i32 to vector<256x1xi32>
    %48 = arith.addi %37, %47 : vector<256x1xi32>
    %49 = arith.select %46, %48, %37 : vector<256x1xi1>, vector<256x1xi32>
    %c0_i32_19 = arith.constant 0 : i32
    %50 = vector.broadcast %c0_i32_19 : i32 to vector<256x1xi32>
    %51 = arith.cmpi eq, %49, %50 : vector<256x1xi32>
    %cst_20 = arith.constant 0.000000e+00 : f32
    %52 = vector.shape_cast %51 : vector<256x1xi1> to vector<256x1xi1>
    %53 = vector.broadcast %52 : vector<256x1xi1> to vector<256x256xi1>
    %54 = vector.broadcast %cst_20 : f32 to vector<256x256xf32>
    %55 = arith.select %53, %54, %33 : vector<256x256xi1>, vector<256x256xf32>
    %c15_i32 = arith.constant 15 : i32
    %56 = vector.broadcast %c15_i32 : i32 to vector<256x1xi32>
    %57 = arith.cmpi eq, %49, %56 : vector<256x1xi32>
    %cst_21 = arith.constant 0.000000e+00 : f32
    %58 = vector.shape_cast %57 : vector<256x1xi1> to vector<256x1xi1>
    %59 = vector.broadcast %58 : vector<256x1xi1> to vector<256x256xi1>
    %60 = vector.broadcast %cst_21 : f32 to vector<256x256xf32>
    %61 = arith.select %59, %60, %33 : vector<256x256xi1>, vector<256x256xf32>
    %c17_i32 = arith.constant 17 : i32
    %62 = tpu.dynamic_rotate %61 by %c17_i32 dim 0 : vector<256x256xf32>, i32 -> vector<256x256xf32>
    %c0_22 = arith.constant 0 : index
    %c0_23 = arith.constant 0 : index
    %63 = vector.load %arg6[%c0_22, %c0_23] : memref<9x256xf32, #tpu.memory_space<vmem>>, vector<1x256xf32>
    %64 = vector.broadcast %63 : vector<1x256xf32> to vector<256x256xf32>
    %65 = arith.mulf %62, %64 : vector<256x256xf32>
    %c16_i32_24 = arith.constant 16 : i32
    %66 = tpu.dynamic_rotate %33 by %c16_i32_24 dim 0 : vector<256x256xf32>, i32 -> vector<256x256xf32>
    %c1 = arith.constant 1 : index
    %c0_25 = arith.constant 0 : index
    %67 = vector.load %arg6[%c1, %c0_25] : memref<9x256xf32, #tpu.memory_space<vmem>>, vector<1x256xf32>
    %68 = vector.broadcast %67 : vector<1x256xf32> to vector<256x256xf32>
    %69 = arith.mulf %66, %68 : vector<256x256xf32>
    %70 = arith.addf %65, %69 : vector<256x256xf32>
    %c15_i32_26 = arith.constant 15 : i32
    %71 = tpu.dynamic_rotate %55 by %c15_i32_26 dim 0 : vector<256x256xf32>, i32 -> vector<256x256xf32>
    %c2 = arith.constant 2 : index
    %c0_27 = arith.constant 0 : index
    %72 = vector.load %arg6[%c2, %c0_27] : memref<9x256xf32, #tpu.memory_space<vmem>>, vector<1x256xf32>
    %73 = vector.broadcast %72 : vector<1x256xf32> to vector<256x256xf32>
    %74 = arith.mulf %71, %73 : vector<256x256xf32>
    %75 = arith.addf %70, %74 : vector<256x256xf32>
    %c16_i32_28 = arith.constant 16 : i32
    %76 = vector.broadcast %c16_i32_28 : i32 to vector<256x1xi32>
    %77 = arith.cmpi sge, %2, %76 : vector<256x1xi32>
    %cst_29 = arith.constant 0.000000e+00 : f32
    %78 = vector.shape_cast %77 : vector<256x1xi1> to vector<256x1xi1>
    %79 = vector.broadcast %78 : vector<256x1xi1> to vector<256x256xi1>
    %80 = vector.broadcast %cst_29 : f32 to vector<256x256xf32>
    %81 = arith.select %79, %75, %80 : vector<256x256xi1>, vector<256x256xf32>
    %c1_i32_30 = arith.constant 1 : i32
    %82 = tpu.dynamic_rotate %61 by %c1_i32_30 dim 0 : vector<256x256xf32>, i32 -> vector<256x256xf32>
    %c3 = arith.constant 3 : index
    %c0_31 = arith.constant 0 : index
    %83 = vector.load %arg6[%c3, %c0_31] : memref<9x256xf32, #tpu.memory_space<vmem>>, vector<1x256xf32>
    %84 = vector.broadcast %83 : vector<1x256xf32> to vector<256x256xf32>
    %85 = arith.mulf %82, %84 : vector<256x256xf32>
    %c4 = arith.constant 4 : index
    %c0_32 = arith.constant 0 : index
    %86 = vector.load %arg6[%c4, %c0_32] : memref<9x256xf32, #tpu.memory_space<vmem>>, vector<1x256xf32>
    %87 = vector.broadcast %86 : vector<1x256xf32> to vector<256x256xf32>
    %88 = arith.mulf %33, %87 : vector<256x256xf32>
    %89 = arith.addf %85, %88 : vector<256x256xf32>
    %c255_i32 = arith.constant 255 : i32
    %90 = tpu.dynamic_rotate %55 by %c255_i32 dim 0 : vector<256x256xf32>, i32 -> vector<256x256xf32>
    %c5 = arith.constant 5 : index
    %c0_33 = arith.constant 0 : index
    %91 = vector.load %arg6[%c5, %c0_33] : memref<9x256xf32, #tpu.memory_space<vmem>>, vector<1x256xf32>
    %92 = vector.broadcast %91 : vector<1x256xf32> to vector<256x256xf32>
    %93 = arith.mulf %90, %92 : vector<256x256xf32>
    %94 = arith.addf %89, %93 : vector<256x256xf32>
    %95 = arith.addf %81, %94 : vector<256x256xf32>
    %c241_i32 = arith.constant 241 : i32
    %96 = tpu.dynamic_rotate %61 by %c241_i32 dim 0 : vector<256x256xf32>, i32 -> vector<256x256xf32>
    %c6 = arith.constant 6 : index
    %c0_34 = arith.constant 0 : index
    %97 = vector.load %arg6[%c6, %c0_34] : memref<9x256xf32, #tpu.memory_space<vmem>>, vector<1x256xf32>
    %98 = vector.broadcast %97 : vector<1x256xf32> to vector<256x256xf32>
    %99 = arith.mulf %96, %98 : vector<256x256xf32>
    %c240_i32 = arith.constant 240 : i32
    %100 = tpu.dynamic_rotate %33 by %c240_i32 dim 0 : vector<256x256xf32>, i32 -> vector<256x256xf32>
    %c7 = arith.constant 7 : index
    %c0_35 = arith.constant 0 : index
    %101 = vector.load %arg6[%c7, %c0_35] : memref<9x256xf32, #tpu.memory_space<vmem>>, vector<1x256xf32>
    %102 = vector.broadcast %101 : vector<1x256xf32> to vector<256x256xf32>
    %103 = arith.mulf %100, %102 : vector<256x256xf32>
    %104 = arith.addf %99, %103 : vector<256x256xf32>
    %c239_i32 = arith.constant 239 : i32
    %105 = tpu.dynamic_rotate %55 by %c239_i32 dim 0 : vector<256x256xf32>, i32 -> vector<256x256xf32>
    %c8 = arith.constant 8 : index
    %c0_36 = arith.constant 0 : index
    %106 = vector.load %arg6[%c8, %c0_36] : memref<9x256xf32, #tpu.memory_space<vmem>>, vector<1x256xf32>
    %107 = vector.broadcast %106 : vector<1x256xf32> to vector<256x256xf32>
    %108 = arith.mulf %105, %107 : vector<256x256xf32>
    %109 = arith.addf %104, %108 : vector<256x256xf32>
    %c240_i32_37 = arith.constant 240 : i32
    %110 = vector.broadcast %c240_i32_37 : i32 to vector<256x1xi32>
    %111 = arith.cmpi slt, %2, %110 : vector<256x1xi32>
    %cst_38 = arith.constant 0.000000e+00 : f32
    %112 = vector.shape_cast %111 : vector<256x1xi1> to vector<256x1xi1>
    %113 = vector.broadcast %112 : vector<256x1xi1> to vector<256x256xi1>
    %114 = vector.broadcast %cst_38 : f32 to vector<256x256xf32>
    %115 = arith.select %113, %109, %114 : vector<256x256xi1>, vector<256x256xf32>
    %116 = arith.addf %95, %115 : vector<256x256xf32>
    %c0_39 = arith.constant 0 : index
    %c0_40 = arith.constant 0 : index
    %117 = vector.load %arg7[%c0_39, %c0_40] : memref<1x256xf32, #tpu.memory_space<vmem>>, vector<1x256xf32>
    %118 = vector.broadcast %117 : vector<1x256xf32> to vector<256x256xf32>
    %119 = arith.addf %116, %118 : vector<256x256xf32>
    %120 = vector.extract_strided_slice %119 {offsets = [0, 0], sizes = [256, 128], strides = [1, 1]} : vector<256x256xf32> to vector<256x128xf32>
    %121 = vector.extract_strided_slice %119 {offsets = [0, 128], sizes = [256, 128], strides = [1, 1]} : vector<256x256xf32> to vector<256x128xf32>
    %122 = arith.mulf %120, %121 : vector<256x128xf32>
    %cst_41 = arith.constant dense<0.000000e+00> : vector<128xf32>
    %123 = vector.multi_reduction <add>, %122, %cst_41 [0] : vector<256x128xf32> to vector<128xf32>
    %124 = vector.shape_cast %123 : vector<128xf32> to vector<1x128xf32>
    %cst_42 = arith.constant 2.560000e+02 : f32
    %125 = vector.broadcast %cst_42 : f32 to vector<1x128xf32>
    %126 = arith.divf %124, %125 : vector<1x128xf32>
    %c0_43 = arith.constant 0 : index
    %c0_44 = arith.constant 0 : index
    %127 = vector.load %arg8[%c0_43, %c0_44] : memref<128x128xf32, #tpu.memory_space<vmem>>, vector<128x128xf32>
    %cst_45 = arith.constant dense<0.000000e+00> : vector<1x128xf32>
    %128 = tpu.matmul %126, %127, %cst_45 {dimension_numbers = #tpu.dot_dimension_numbers<[1], [0], [0], [1], [0, 0, 1, 1], [], []>} : vector<1x128xf32>, vector<128x128xf32>, vector<1x128xf32> -> vector<1x128xf32>
    %c0_46 = arith.constant 0 : index
    %c0_47 = arith.constant 0 : index
    %129 = vector.load %arg9[%c0_46, %c0_47] : memref<1x128xf32, #tpu.memory_space<vmem>>, vector<1x128xf32>
    %130 = arith.addf %128, %129 : vector<1x128xf32>
    %131 = vector.broadcast %130 : vector<1x128xf32> to vector<256x128xf32>
    %132 = arith.mulf %122, %131 : vector<256x128xf32>
    %c0_48 = arith.constant 0 : index
    %c0_49 = arith.constant 0 : index
    %133 = vector.load %arg10[%c0_48, %c0_49] : memref<128x128xf32, #tpu.memory_space<vmem>>, vector<128x128xf32>
    %cst_50 = arith.constant dense<0.000000e+00> : vector<256x128xf32>
    %134 = tpu.matmul %132, %133, %cst_50 {dimension_numbers = #tpu.dot_dimension_numbers<[1], [0], [0], [1], [0, 0, 1, 1], [], []>} : vector<256x128xf32>, vector<128x128xf32>, vector<256x128xf32> -> vector<256x128xf32>
    %c0_51 = arith.constant 0 : index
    %c0_52 = arith.constant 0 : index
    %135 = vector.load %arg11[%c0_51, %c0_52] : memref<1x128xf32, #tpu.memory_space<vmem>>, vector<1x128xf32>
    %136 = vector.broadcast %135 : vector<1x128xf32> to vector<256x128xf32>
    %137 = arith.addf %134, %136 : vector<256x128xf32>
    %c0_53 = arith.constant 0 : index
    %c0_54 = arith.constant 0 : index
    %138 = vector.load %arg18[%c0_53, %c0_54] : memref<1x128xf32, #tpu.memory_space<vmem>>, vector<1x128xf32>
    %139 = vector.broadcast %138 : vector<1x128xf32> to vector<256x128xf32>
    %140 = arith.mulf %137, %139 : vector<256x128xf32>
    %141 = arith.addf %1, %140 : vector<256x128xf32>
    %c0_55 = arith.constant 0 : index
    %c0_56 = arith.constant 0 : index
    %142 = vector.load %arg12[%c0_55, %c0_56] : memref<1x128xf32, #tpu.memory_space<vmem>>, vector<1x128xf32>
    %c0_57 = arith.constant 0 : index
    %c0_58 = arith.constant 0 : index
    %143 = vector.load %arg13[%c0_57, %c0_58] : memref<1x128xf32, #tpu.memory_space<vmem>>, vector<1x128xf32>
    %cst_59 = arith.constant dense<0.000000e+00> : vector<256xf32>
    %144 = vector.multi_reduction <add>, %141, %cst_59 [1] : vector<256x128xf32> to vector<256xf32>
    %145 = vector.shape_cast %144 : vector<256xf32> to vector<256x1xf32>
    %cst_60 = arith.constant 2.500000e-01 : f32
    %146 = vector.broadcast %cst_60 : f32 to vector<256x1xf32>
    %147 = arith.mulf %145, %146 : vector<256x1xf32>
    %148 = vector.broadcast %147 : vector<256x1xf32> to vector<256x128xf32>
    %149 = arith.subf %141, %148 : vector<256x128xf32>
    %150 = arith.mulf %149, %149 : vector<256x128xf32>
    %cst_61 = arith.constant dense<0.000000e+00> : vector<256xf32>
    %151 = vector.multi_reduction <add>, %150, %cst_61 [1] : vector<256x128xf32> to vector<256xf32>
    %152 = vector.shape_cast %151 : vector<256xf32> to vector<256x1xf32>
    %cst_62 = arith.constant 1.240000e+02 : f32
    %153 = vector.broadcast %cst_62 : f32 to vector<256x1xf32>
    %154 = arith.mulf %153, %147 : vector<256x1xf32>
    %155 = arith.mulf %154, %147 : vector<256x1xf32>
    %156 = arith.subf %152, %155 : vector<256x1xf32>
    %cst_63 = arith.constant 2.500000e-01 : f32
    %157 = vector.broadcast %cst_63 : f32 to vector<256x1xf32>
    %158 = arith.mulf %156, %157 : vector<256x1xf32>
    %cst_64 = arith.constant 9.99999997E-7 : f32
    %159 = vector.broadcast %cst_64 : f32 to vector<256x1xf32>
    %160 = arith.addf %158, %159 : vector<256x1xf32>
    %161 = math.rsqrt %160 : vector<256x1xf32>
    %162 = vector.broadcast %161 : vector<256x1xf32> to vector<256x128xf32>
    %163 = arith.mulf %149, %162 : vector<256x128xf32>
    %164 = vector.broadcast %142 : vector<1x128xf32> to vector<256x128xf32>
    %165 = arith.mulf %163, %164 : vector<256x128xf32>
    %166 = vector.broadcast %143 : vector<1x128xf32> to vector<256x128xf32>
    %167 = arith.addf %165, %166 : vector<256x128xf32>
    %c0_65 = arith.constant 0 : index
    %c0_66 = arith.constant 0 : index
    %168 = vector.load %arg14[%c0_65, %c0_66] : memref<128x256xf32, #tpu.memory_space<vmem>>, vector<128x256xf32>
    %cst_67 = arith.constant dense<0.000000e+00> : vector<256x256xf32>
    %169 = tpu.matmul %167, %168, %cst_67 {dimension_numbers = #tpu.dot_dimension_numbers<[1], [0], [0], [1], [0, 0, 1, 1], [], []>} : vector<256x128xf32>, vector<128x256xf32>, vector<256x256xf32> -> vector<256x256xf32>
    %c0_68 = arith.constant 0 : index
    %c0_69 = arith.constant 0 : index
    %170 = vector.load %arg15[%c0_68, %c0_69] : memref<1x256xf32, #tpu.memory_space<vmem>>, vector<1x256xf32>
    %171 = vector.broadcast %170 : vector<1x256xf32> to vector<256x256xf32>
    %172 = arith.addf %169, %171 : vector<256x256xf32>
    %173 = vector.extract_strided_slice %172 {offsets = [0, 0], sizes = [256, 128], strides = [1, 1]} : vector<256x256xf32> to vector<256x128xf32>
    %174 = vector.extract_strided_slice %172 {offsets = [0, 128], sizes = [256, 128], strides = [1, 1]} : vector<256x256xf32> to vector<256x128xf32>
    %175 = arith.mulf %173, %174 : vector<256x128xf32>
    %c0_70 = arith.constant 0 : index
    %c0_71 = arith.constant 0 : index
    %176 = vector.load %arg16[%c0_70, %c0_71] : memref<128x128xf32, #tpu.memory_space<vmem>>, vector<128x128xf32>
    %cst_72 = arith.constant dense<0.000000e+00> : vector<256x128xf32>
    %177 = tpu.matmul %175, %176, %cst_72 {dimension_numbers = #tpu.dot_dimension_numbers<[1], [0], [0], [1], [0, 0, 1, 1], [], []>} : vector<256x128xf32>, vector<128x128xf32>, vector<256x128xf32> -> vector<256x128xf32>
    %c0_73 = arith.constant 0 : index
    %c0_74 = arith.constant 0 : index
    %178 = vector.load %arg17[%c0_73, %c0_74] : memref<1x128xf32, #tpu.memory_space<vmem>>, vector<1x128xf32>
    %179 = vector.broadcast %178 : vector<1x128xf32> to vector<256x128xf32>
    %180 = arith.addf %177, %179 : vector<256x128xf32>
    %c0_75 = arith.constant 0 : index
    %c0_76 = arith.constant 0 : index
    %181 = vector.load %arg19[%c0_75, %c0_76] : memref<1x128xf32, #tpu.memory_space<vmem>>, vector<1x128xf32>
    %182 = vector.broadcast %181 : vector<1x128xf32> to vector<256x128xf32>
    %183 = arith.mulf %180, %182 : vector<256x128xf32>
    %184 = arith.addf %141, %183 : vector<256x128xf32>
    %c0_77 = arith.constant 0 : index
    %c0_78 = arith.constant 0 : index
    %c0_79 = arith.constant 0 : index
    %185 = vector.load %arg20[%c0_77, %c0_78, %c0_79] : memref<1x256x128xf32, #tpu.memory_space<vmem>>, vector<1x256x128xf32>
    %186 = vector.shape_cast %185 : vector<1x256x128xf32> to vector<256x128xf32>
    %187 = vector.shape_cast %184 : vector<256x128xf32> to vector<1x256x128xf32>
    tpu.vector_store %arg20[%c0_77, %c0_78, %c0_79], %187 {strides = array<i32>} : memref<1x256x128xf32, #tpu.memory_space<vmem>>, vector<1x256x128xf32>,
    return
  }
  func.func @transform_0(%arg0: i32) -> (i32, i32, i32) {
    %c0_i32 = arith.constant 0 : i32
    %c0_i32_0 = arith.constant 0 : i32
    %c0_i32_1 = arith.constant 0 : i32
    return %arg0, %c0_i32, %c0_i32_0 : i32, i32, i32
  }
  func.func @transform_1(%arg0: i32) -> (i32, i32) {
    %c0_i32 = arith.constant 0 : i32
    %c0_i32_0 = arith.constant 0 : i32
    %c0_i32_1 = arith.constant 0 : i32
    return %c0_i32, %c0_i32_0 : i32, i32
  }
  func.func @transform_2(%arg0: i32) -> (i32, i32) {
    %c0_i32 = arith.constant 0 : i32
    %c0_i32_0 = arith.constant 0 : i32
    %c0_i32_1 = arith.constant 0 : i32
    return %c0_i32, %c0_i32_0 : i32, i32
  }
  func.func @transform_3(%arg0: i32) -> (i32, i32) {
    %c0_i32 = arith.constant 0 : i32
    %c0_i32_0 = arith.constant 0 : i32
    %c0_i32_1 = arith.constant 0 : i32
    return %c0_i32, %c0_i32_0 : i32, i32
  }
  func.func @transform_4(%arg0: i32) -> (i32, i32) {
    %c0_i32 = arith.constant 0 : i32
    %c0_i32_0 = arith.constant 0 : i32
    %c0_i32_1 = arith.constant 0 : i32
    return %c0_i32, %c0_i32_0 : i32, i32
  }
  func.func @transform_5(%arg0: i32) -> (i32, i32) {
    %c0_i32 = arith.constant 0 : i32
    %c0_i32_0 = arith.constant 0 : i32
    %c0_i32_1 = arith.constant 0 : i32
    return %c0_i32, %c0_i32_0 : i32, i32
  }
  func.func @transform_6(%arg0: i32) -> (i32, i32) {
    %c0_i32 = arith.constant 0 : i32
    %c0_i32_0 = arith.constant 0 : i32
    %c0_i32_1 = arith.constant 0 : i32
    return %c0_i32, %c0_i32_0 : i32, i32
  }
  func.func @transform_7(%arg0: i32) -> (i32, i32) {
    %c0_i32 = arith.constant 0 : i32
    %c0_i32_0 = arith.constant 0 : i32
    %c0_i32_1 = arith.constant 0 : i32
    return %c0_i32, %c0_i32_0 : i32, i32
  }
  func.func @transform_8(%arg0: i32) -> (i32, i32) {
    %c0_i32 = arith.constant 0 : i32
    %c0_i32_0 = arith.constant 0 : i32
    %c0_i32_1 = arith.constant 0 : i32
    return %c0_i32, %c0_i32_0 : i32, i32
  }
  func.func @transform_9(%arg0: i32) -> (i32, i32) {
    %c0_i32 = arith.constant 0 : i32
    %c0_i32_0 = arith.constant 0 : i32
    %c0_i32_1 = arith.constant 0 : i32
    return %c0_i32, %c0_i32_0 : i32, i32
  }
  func.func @transform_10(%arg0: i32) -> (i32, i32) {
    %c0_i32 = arith.constant 0 : i32
    %c0_i32_0 = arith.constant 0 : i32
    %c0_i32_1 = arith.constant 0 : i32
    return %c0_i32, %c0_i32_0 : i32, i32
  }
  func.func @transform_11(%arg0: i32) -> (i32, i32) {
    %c0_i32 = arith.constant 0 : i32
    %c0_i32_0 = arith.constant 0 : i32
    %c0_i32_1 = arith.constant 0 : i32
    return %c0_i32, %c0_i32_0 : i32, i32
  }
  func.func @transform_12(%arg0: i32) -> (i32, i32) {
    %c0_i32 = arith.constant 0 : i32
    %c0_i32_0 = arith.constant 0 : i32
    %c0_i32_1 = arith.constant 0 : i32
    return %c0_i32, %c0_i32_0 : i32, i32
  }
  func.func @transform_13(%arg0: i32) -> (i32, i32) {
    %c0_i32 = arith.constant 0 : i32
    %c0_i32_0 = arith.constant 0 : i32
    %c0_i32_1 = arith.constant 0 : i32
    return %c0_i32, %c0_i32_0 : i32, i32
  }
  func.func @transform_14(%arg0: i32) -> (i32, i32) {
    %c0_i32 = arith.constant 0 : i32
    %c0_i32_0 = arith.constant 0 : i32
    %c0_i32_1 = arith.constant 0 : i32
    return %c0_i32, %c0_i32_0 : i32, i32
  }
  func.func @transform_15(%arg0: i32) -> (i32, i32) {
    %c0_i32 = arith.constant 0 : i32
    %c0_i32_0 = arith.constant 0 : i32
    %c0_i32_1 = arith.constant 0 : i32
    return %c0_i32, %c0_i32_0 : i32, i32
  }
  func.func @transform_16(%arg0: i32) -> (i32, i32) {
    %c0_i32 = arith.constant 0 : i32
    %c0_i32_0 = arith.constant 0 : i32
    %c0_i32_1 = arith.constant 0 : i32
    return %c0_i32, %c0_i32_0 : i32, i32
  }
  func.func @transform_17(%arg0: i32) -> (i32, i32) {
    %c0_i32 = arith.constant 0 : i32
    %c0_i32_0 = arith.constant 0 : i32
    %c0_i32_1 = arith.constant 0 : i32
    return %c0_i32, %c0_i32_0 : i32, i32
  }
  func.func @transform_18(%arg0: i32) -> (i32, i32) {
    %c0_i32 = arith.constant 0 : i32
    %c0_i32_0 = arith.constant 0 : i32
    %c0_i32_1 = arith.constant 0 : i32
    return %c0_i32, %c0_i32_0 : i32, i32
  }
  func.func @transform_19(%arg0: i32) -> (i32, i32, i32) {
    %c0_i32 = arith.constant 0 : i32
    %c0_i32_0 = arith.constant 0 : i32
    %c0_i32_1 = arith.constant 0 : i32
    return %arg0, %c0_i32, %c0_i32_0 : i32, i32, i32
  }
}

</mosaic_0001>

<bundles_post_ra>
// kernel: tpu_custom_call.1
= control target key start
LH: loop header
LB: loop body
LE: loop exit
PB: predicated region body
PF: predicated region fallthrough
CT: control target
= control target key end

     0   :  { %s12770_s0 = inlined_call_operand.hbm [shape: f32[2,256,128], index: 0, kind: input, shape index: {}]   ;;  %s12771_s1 = inlined_call_operand.hbm [shape: f32[1,128], index: 1, kind: input, shape index: {}]   ;;  %s12772_s2 = inlined_call_operand.hbm [shape: f32[1,128], index: 2, kind: input, shape index: {}]   ;;  %s12773_s3 = inlined_call_operand.hbm [shape: f32[128,256], index: 3, kind: input, shape index: {}]   ;;  %s12774_s4 = inlined_call_operand.hbm [shape: f32[1,256], index: 4, kind: input, shape index: {}]   ;;  %s12775_s5 = inlined_call_operand.hbm [shape: f32[9,256], index: 5, kind: input, shape index: {}]   ;;  %s12776_s6 = inlined_call_operand.hbm [shape: f32[1,256], index: 6, kind: input, shape index: {}]   ;;  %s12777_s7 = inlined_call_operand.hbm [shape: f32[128,128], index: 7, kind: input, shape index: {}]   ;;  %s12778_s8 = inlined_call_operand.hbm [shape: f32[1,128], index: 8, kind: input, shape index: {}]   ;;  %s12779_s9 = inlined_call_operand.hbm [shape: f32[128,128], index: 9, kind: input, shape index: {}]   ;;  %s12780_s10 = inlined_call_operand.hbm [shape: f32[1,128], index: 10, kind: input, shape index: {}]   ;;  %s12781_s11 = inlined_call_operand.hbm [shape: f32[1,128], index: 11, kind: input, shape index: {}]   ;;  %s12782_s12 = inlined_call_operand.hbm [shape: f32[1,128], index: 12, kind: input, shape index: {}]   ;;  %s12783_s13 = inlined_call_operand.hbm [shape: f32[128,256], index: 13, kind: input, shape index: {}]   ;;  %s12784_s14 = inlined_call_operand.hbm [shape: f32[1,256], index: 14, kind: input, shape index: {}]   ;;  %s12785_s15 = inlined_call_operand.hbm [shape: f32[128,128], index: 15, kind: input, shape index: {}]   ;;  %s12786_s16 = inlined_call_operand.hbm [shape: f32[1,128], index: 16, kind: input, shape index: {}]   ;;  %s12787_s17 = inlined_call_operand.hbm [shape: f32[1,128], index: 17, kind: input, shape index: {}]   ;;  %s12788_s18 = inlined_call_operand.hbm [shape: f32[1,128], index: 18, kind: input, shape index: {}]   ;;  %s12789_s19 = inlined_call_operand.hbm [shape: f32[2,256,128], index: 19, kind: output, shape index: {}]  }
   0x1   :  { %12969 = sst [smem:[#allocation108_spill]] %s12770_s0 }
   0x2   :  { %12970 = sst [smem:[#allocation109_spill]] %s12771_s1 }
   0x3   :  { %12971 = sst [smem:[#allocation110_spill]] %s12772_s2 }
   0x4   :  { %12972 = sst [smem:[#allocation111_spill]] %s12773_s3 }
   0x5   :  { %12973 = sst [smem:[#allocation112_spill]] %s12774_s4 }
   0x6   :  { %12974 = sst [smem:[#allocation113_spill]] %s12775_s5 }
   0x7   :  { %12975 = sst [smem:[#allocation114_spill]] %s12776_s6 }
   0x8   :  { %12976 = sst [smem:[#allocation115_spill]] %s12789_s19 }
   0x9   :  { %24 = vsyncpa [#allocation3], 0 }
   0xa   :  { %26 = vsyncpa [#allocation3 + $0x1], 0 }
   0xb   :  { %27 = vsyncpa [#allocation6], 0 }
   0xc   :  { %28 = vsyncpa [#allocation9], 0 }
   0xd   :  { %29 = vsyncpa [#allocation12], 0 }
   0xe   :  { %30 = vsyncpa [#allocation15], 0 }
   0xf   :  { %31 = vsyncpa [#allocation18], 0 }
  0x10   :  { %32 = vsyncpa [#allocation21], 0 }
  0x11   :  { %33 = vsyncpa [#allocation24], 0 }
  0x12   :  { %34 = vsyncpa [#allocation27], 0 }
  0x13   :  { %35 = vsyncpa [#allocation30], 0 }
  0x14   :  { %36 = vsyncpa [#allocation4], 0 }
  0x15   :  { %38 = vsyncpa [#allocation4 + $0x1], 0  ;;  %s7976_s0 = smov 0   ;;  %s7978_s30 = smov 0  }
  0x16   :  { %s7980_s20 = smov 0   ;;  %s7982_s21 = smov 0  }
  0x17 LB: > { %12977 = sst [smem:[#allocation44_spill]] %s7833_s0  ;;  %s7847_s1 = smov [#allocation5]   ;;  %s7845_s21 = sphi %s7982_s21, %s8440_s21   ;;  %s7841_s20 = sphi %s7980_s20, %s13572_s20   ;;  %s7837_s30 = sphi %s7978_s30, %s13569_s30   ;;  %s7833_s0 = sphi %s7976_s0, %s13571_s0  }
  0x18   : > { %12978 = sst [smem:[#allocation45_spill]] %s7837_s30  ;;  %s492_s22 = sshll.u32 %s7847_s1, 4  ;;  %s8002_s22 = int_to_ptr.vmem [resolvable:$true] %s492_s22 }
  0x19   : > { %12979 = sst [smem:[#allocation46_spill]] %s7841_s20  ;;  %s7997_s2 = sadd.s32 4294967295, %s7845_s21  }
  0x1a   : > { %12980 = sst [smem:[#allocation47_spill]] %s7845_s21  ;;  %p6294_p0 = scmp.ge.s32.totalorder %s7845_s21, 1 }
  0x1b   : > { %12981 = sst [smem:[#allocation48_spill]] %s7997_s2  ;;  %p12805_p1 = scmp.eq.s32.totalorder %s7997_s2, 0 }
  0x1c   : > { %p479_p2 = scmp.lt.s32.totalorder %s7845_s21, 3  ;;  %s7848_s24 = smov [#allocation8]  }
  0x1d   : > { %s513_s25 = sshll.u32 %s7848_s24, 4  ;;  %s7849_s26 = smov [#allocation11]   ;;  %s8011_s25 = int_to_ptr.vmem [resolvable:$true] %s513_s25 }
  0x1e   : > { %p8004_p3 = pnand %p6294_p0, %p479_p2  ;;  %s537_s27 = sshll.u32 %s7849_s26, 4  ;;  %s8019_s27 = int_to_ptr.vmem [resolvable:$true] %s537_s27 }
  0x1f   : > { %s12985_s1 = sld [smem:[#allocation109_spill]] }
  0x20   : > { %s12982_s23 = scalar_select %p8004_p3, 1, 0 }
  0x21   : > { %p6889_p5 = pneg %p8004_p3 }
  0x22   : > { %12983 = sst [smem:[#allocation49_spill]] %s12982_s23 }
  0x23   : > { %p8015_p6 = pnand %p6889_p5, %p12805_p1 }
  0x25   : > { %s7209_s19 = scalar_lea.hbm %s12985_s1, 16  ;;  %p8029_p8 = pneg %p8015_p6 }
  0x26   : > { %p7210_p7 = scmp.ne.s32.totalorder %s12985_s1, %s7209_s19  ;;  %p7216_p11 = scmp.lt.u32.totalorder %s7209_s19, %s12985_s1 }
  0x28   : > { %p7212_p9 = pnand %p8029_p8, %p7210_p7 }
  0x2a   : > { %p7213_p10 = pneg %p7212_p9 }
  0x2c   : > { %p7218_p12 = pnand %p7216_p11, %p7213_p10 }
  0x2e   : > { %7221 = shalt.err (!%p7218_p12)
}
  0x2f   : > { %s7222_s0 = scalar_lea.vmem %s8002_s22, 16  ;;  %s7229_s23 = scalar_lea.vmem %s8002_s22, 32 }
  0x30   : > { %p7223_p13 = scmp.ne.s32.totalorder %s8002_s22, %s7222_s0  ;;  %p7230_p5 = scmp.lt.s32.totalorder %s8002_s22, %s8002_s22 }
  0x31   : > { %p7231_p7 = scmp.lt.s32.totalorder %s7229_s23, %s7222_s0 }
  0x32   : > { %p7225_p0 = pnand %p7223_p13, %p8029_p8 }
  0x33   : > { %p7232_p9 = por %p7231_p7, %p7230_p5 }
  0x34   : > { %p7226_p2 = pneg %p7225_p0 }
  0x36   : > { %p7233_p4 = pnand %p7232_p9, %p7226_p2 }
  0x38   : > { %7236 = shalt.err (!%p7233_p4)
}
  0x39   : > { %6892 = dma.hbm_to_vmem [thread:$0]  (!%p8015_p6), %s12985_s1, 16, %s8002_s22, [#allocation6]  }
  0x3a   : > { %s12987_s26 = sld [smem:[#allocation111_spill]] }
  0x40   : > { %s7237_s30 = scalar_lea.hbm %s12987_s26, 4096 }
  0x41   : > { %p7238_p10 = scmp.ne.s32.totalorder %s12987_s26, %s7237_s30  ;;  %p7244_p4 = scmp.lt.u32.totalorder %s7237_s30, %s12987_s26 }
  0x43   : > { %p7240_p11 = pnand %p7238_p10, %p8029_p8 }
  0x45   : > { %p7241_p12 = pneg %p7240_p11 }
  0x47   : > { %p7246_p13 = pnand %p7244_p4, %p7241_p12 }
  0x49   : > { %7249 = shalt.err (!%p7246_p13)
}
  0x4a   : > { %s7250_s22 = scalar_lea.vmem %s8011_s25, 4096  ;;  %p7258_p7 = scmp.lt.s32.totalorder %s8011_s25, %s8011_s25 }
  0x4b   : > { %p7251_p0 = scmp.ne.s32.totalorder %s8011_s25, %s7250_s22  ;;  %p7259_p9 = scmp.lt.s32.totalorder %s7250_s22, %s7250_s22 }
  0x4d   : > { %p7253_p2 = pnand %p7251_p0, %p8029_p8  ;;  %p7260_p10 = por %p7259_p9, %p7258_p7 }
  0x4f   : > { %p7254_p5 = pneg %p7253_p2 }
  0x51   : > { %p7261_p11 = pnand %p7260_p10, %p7254_p5 }
  0x53   : > { %7264 = shalt.err (!%p7261_p11)
}
  0x54   : > { %s12807_s20 = smov 256   ;;  %s12808_s30 = smov 16  }
  0x55   : > { %6898 = dma.hbm_to_vmem [thread:$0]  (!%p8015_p6), %s12987_s26, 4096, %s8011_s25, [#allocation9], %s12807_s20, %s12807_s20, %s12808_s30  }
  0x56   : > { %s12988_s5 = sld [smem:[#allocation113_spill]] }
  0x5c   : > { %s7265_s29 = scalar_lea.hbm %s12988_s5, 512 }
  0x5d   : > { %p7266_p12 = scmp.ne.s32.totalorder %s12988_s5, %s7265_s29  ;;  %p7272_p0 = scmp.lt.u32.totalorder %s7265_s29, %s12988_s5 }
  0x5f   : > { %p7268_p4 = pnand %p7266_p12, %p8029_p8 }
  0x61   : > { %p7269_p13 = pneg %p7268_p4 }
  0x63   : > { %p7274_p2 = pnand %p7272_p0, %p7269_p13 }
  0x65   : > { %7277 = shalt.err (!%p7274_p2)
}
  0x66   : > { %s7278_s25 = scalar_lea.vmem %s8019_s27, 512  ;;  %p7286_p10 = scmp.lt.s32.totalorder %s8019_s27, %s8019_s27 }
  0x67   : > { %p7279_p5 = scmp.ne.s32.totalorder %s8019_s27, %s7278_s25  ;;  %p7287_p11 = scmp.lt.s32.totalorder %s7278_s25, %s7278_s25 }
  0x69   : > { %p7281_p7 = pnand %p7279_p5, %p8029_p8  ;;  %p7288_p12 = por %p7287_p11, %p7286_p10 }
  0x6b   : > { %p7282_p9 = pneg %p7281_p7 }
  0x6d   : > { %p7289_p4 = pnand %p7288_p12, %p7282_p9 }
  0x6f   : > { %7292 = shalt.err (!%p7289_p4)
}
  0x70   : > { %6904 = dma.hbm_to_vmem [thread:$0]  (!%p8015_p6), %s12988_s5, 512, %s8019_s27, [#allocation12], %s12807_s20, %s12807_s20, %s12808_s30  }
  0x71   : > { %s7852_s19 = smov [#allocation14]   ;;  %s7293_s0 = scalar_lea.hbm %s12777_s7, 2048 }
  0x72   : > { %s561_s2 = sshll.u32 %s7852_s19, 4  ;;  %p7294_p13 = scmp.ne.s32.totalorder %s12777_s7, %s7293_s0  ;;  %s562_s2 = int_to_ptr.vmem [resolvable:$true] %s561_s2 }
  0x73   : > { %p7300_p5 = scmp.lt.u32.totalorder %s7293_s0, %s12777_s7 }
  0x74   : > { %p7296_p0 = pnand %p7294_p13, %p8029_p8 }
  0x76   : > { %p7297_p2 = pneg %p7296_p0 }
  0x78   : > { %p7302_p7 = pnand %p7300_p5, %p7297_p2 }
  0x7a   : > { %7305 = shalt.err (!%p7302_p7)
}
  0x7b   : > { %s7306_s27 = scalar_lea.vmem %s562_s2, 2048  ;;  %p7314_p12 = scmp.lt.s32.totalorder %s562_s2, %s562_s2 }
  0x7c   : > { %p7307_p9 = scmp.ne.s32.totalorder %s562_s2, %s7306_s27  ;;  %p7315_p4 = scmp.lt.s32.totalorder %s7306_s27, %s7306_s27 }
  0x7e   : > { %p7309_p10 = pnand %p7307_p9, %p8029_p8  ;;  %p7316_p1 = por %p7315_p4, %p7314_p12 }
  0x80   : > { %p7310_p11 = pneg %p7309_p10 }
  0x82   : > { %p7317_p3 = pnand %p7316_p1, %p7310_p11 }
  0x84   : > { %7320 = shalt.err (!%p7317_p3)
}
  0x85   : > { %s12809_s1 = smov 128   ;;  %s12811_s21 = smov 8  }
  0x86   : > { %6910 = dma.hbm_to_vmem [thread:$0]  (!%p8015_p6), %s12777_s7, 2048, %s562_s2, [#allocation15], %s12809_s1, %s12809_s1, %s12811_s21  }
  0x87   : > { %s7855_s28 = smov [#allocation17]   ;;  %s7856_s0 = smov [#allocation20]  }
  0x88   : > { %s585_s29 = sshll.u32 %s7855_s28, 4  ;;  %s610_s23 = sshll.u32 %s7856_s0, 4  ;;  %s586_s29 = int_to_ptr.vmem [resolvable:$true] %s585_s29  ;;  %s8124_s23 = int_to_ptr.vmem [resolvable:$true] %s610_s23 }
  0x89   : > { %s7321_s27 = scalar_lea.hbm %s12779_s9, 2048 }
  0x8a   : > { %p7322_p1 = scmp.ne.s32.totalorder %s12779_s9, %s7321_s27  ;;  %p7328_p0 = scmp.lt.u32.totalorder %s7321_s27, %s12779_s9 }
  0x8c   : > { %p7324_p3 = pnand %p7322_p1, %p8029_p8 }
  0x8e   : > { %p7325_p13 = pneg %p7324_p3 }
  0x90   : > { %p7330_p2 = pnand %p7328_p0, %p7325_p13 }
  0x92   : > { %7333 = shalt.err (!%p7330_p2)
}
  0x93   : > { %s7334_s19 = scalar_lea.vmem %s586_s29, 2048  ;;  %p7342_p10 = scmp.lt.s32.totalorder %s586_s29, %s586_s29 }
  0x94   : > { %p7335_p5 = scmp.ne.s32.totalorder %s586_s29, %s7334_s19  ;;  %p7343_p11 = scmp.lt.s32.totalorder %s7334_s19, %s7334_s19 }
  0x96   : > { %p7337_p7 = pnand %p7335_p5, %p8029_p8  ;;  %p7344_p12 = por %p7343_p11, %p7342_p10 }
  0x98   : > { %p7338_p9 = pneg %p7337_p7 }
  0x9a   : > { %p7345_p4 = pnand %p7344_p12, %p7338_p9 }
  0x9c   : > { %7348 = shalt.err (!%p7345_p4)
}
  0x9d   : > { %6916 = dma.hbm_to_vmem [thread:$0]  (!%p8015_p6), %s12779_s9, 2048, %s586_s29, [#allocation18], %s12809_s1, %s12809_s1, %s12811_s21  }
  0x9e   : > { %s7349_s22 = scalar_lea.hbm %s12781_s11, 16 }
  0x9f   : > { %p7350_p1 = scmp.ne.s32.totalorder %s12781_s11, %s7349_s22  ;;  %p7356_p0 = scmp.lt.u32.totalorder %s7349_s22, %s12781_s11 }
  0xa1   : > { %p7352_p3 = pnand %p7350_p1, %p8029_p8 }
  0xa3   : > { %p7353_p13 = pneg %p7352_p3 }
  0xa5   : > { %p7358_p2 = pnand %p7356_p0, %p7353_p13 }
  0xa7   : > { %7361 = shalt.err (!%p7358_p2)
}
  0xa8   : > { %s7362_s29 = scalar_lea.vmem %s8124_s23, 16  ;;  %s7369_s19 = scalar_lea.vmem %s8124_s23, 32 }
  0xa9   : > { %p7363_p5 = scmp.ne.s32.totalorder %s8124_s23, %s7362_s29  ;;  %p7370_p10 = scmp.lt.s32.totalorder %s8124_s23, %s8124_s23 }
  0xaa   : > { %p7371_p11 = scmp.lt.s32.totalorder %s7369_s19, %s7362_s29 }
  0xab   : > { %p7365_p7 = pnand %p7363_p5, %p8029_p8 }
  0xac   : > { %p7372_p12 = por %p7371_p11, %p7370_p10 }
  0xad   : > { %p7366_p9 = pneg %p7365_p7 }
  0xaf   : > { %p7373_p4 = pnand %p7372_p12, %p7366_p9 }
  0xb1   : > { %7376 = shalt.err (!%p7373_p4)
}
  0xb2   : > { %6922 = dma.hbm_to_vmem [thread:$0]  (!%p8015_p6), %s12781_s11, 16, %s8124_s23, [#allocation21]  }
  0xb3   : > { %s7857_s28 = smov [#allocation23]   ;;  %s7858_s22 = smov [#allocation26]  }
  0xb4   : > { %s631_s0 = sshll.u32 %s7857_s28, 4  ;;  %s655_s25 = sshll.u32 %s7858_s22, 4  ;;  %s632_s0 = int_to_ptr.vmem [resolvable:$true] %s631_s0  ;;  %s8171_s25 = int_to_ptr.vmem [resolvable:$true] %s655_s25 }
  0xb5   : > { %s7377_s2 = scalar_lea.hbm %s12783_s13, 4096 }
  0xb6   : > { %p7378_p1 = scmp.ne.s32.totalorder %s12783_s13, %s7377_s2  ;;  %p7384_p0 = scmp.lt.u32.totalorder %s7377_s2, %s12783_s13 }
  0xb8   : > { %p7380_p3 = pnand %p7378_p1, %p8029_p8 }
  0xba   : > { %p7381_p13 = pneg %p7380_p3 }
  0xbc   : > { %p7386_p2 = pnand %p7384_p0, %p7381_p13 }
  0xbe   : > { %7389 = shalt.err (!%p7386_p2)
}
  0xbf   : > { %s7390_s30 = scalar_lea.vmem %s632_s0, 4096  ;;  %p7398_p10 = scmp.lt.s32.totalorder %s632_s0, %s632_s0 }
  0xc0   : > { %p7391_p5 = scmp.ne.s32.totalorder %s632_s0, %s7390_s30  ;;  %p7399_p11 = scmp.lt.s32.totalorder %s7390_s30, %s7390_s30 }
  0xc2   : > { %p7393_p7 = pnand %p7391_p5, %p8029_p8  ;;  %p7400_p12 = por %p7399_p11, %p7398_p10 }
  0xc4   : > { %p7394_p9 = pneg %p7393_p7 }
  0xc6   : > { %p7401_p4 = pnand %p7400_p12, %p7394_p9 }
  0xc8   : > { %7404 = shalt.err (!%p7401_p4)
}
  0xc9   : > { %s12989_s28 = smov 16   ;;  %s12990_s22 = smov 256  }
  0xca   : > { %6928 = dma.hbm_to_vmem [thread:$0]  (!%p8015_p6), %s12783_s13, 4096, %s632_s0, [#allocation24], %s12990_s22, %s12990_s22, %s12989_s28  }
  0xcb   : > { %s7405_s19 = scalar_lea.hbm %s12785_s15, 2048 }
  0xcc   : > { %p7406_p1 = scmp.ne.s32.totalorder %s12785_s15, %s7405_s19  ;;  %p7412_p0 = scmp.lt.u32.totalorder %s7405_s19, %s12785_s15 }
  0xce   : > { %p7408_p3 = pnand %p7406_p1, %p8029_p8 }
  0xd0   : > { %p7409_p13 = pneg %p7408_p3 }
  0xd2   : > { %p7414_p2 = pnand %p7412_p0, %p7409_p13 }
  0xd4   : > { %7417 = shalt.err (!%p7414_p2)
}
  0xd5   : > { %s7418_s0 = scalar_lea.vmem %s8171_s25, 2048  ;;  %p7426_p10 = scmp.lt.s32.totalorder %s8171_s25, %s8171_s25 }
  0xd6   : > { %p7419_p5 = scmp.ne.s32.totalorder %s8171_s25, %s7418_s0  ;;  %p7427_p11 = scmp.lt.s32.totalorder %s7418_s0, %s7418_s0 }
  0xd8   : > { %p7421_p7 = pnand %p7419_p5, %p8029_p8  ;;  %p7428_p12 = por %p7427_p11, %p7426_p10 }
  0xda   : > { %p7422_p9 = pneg %p7421_p7 }
  0xdc   : > { %p7429_p4 = pnand %p7428_p12, %p7422_p9 }
  0xde   : > { %7432 = shalt.err (!%p7429_p4)
}
  0xdf   : > { %s12991_s1 = smov 128   ;;  %s7859_s27 = smov [#allocation29]  }
  0xe0   : > { %6934 = dma.hbm_to_vmem [thread:$0]  (!%p8015_p6), %s12785_s15, 2048, %s8171_s25, [#allocation27], %s12991_s1, %s12991_s1, %s12811_s21  }
  0xe1   : > { %s680_s26 = sshll.u32 %s7859_s27, 4  ;;  %s7860_s2 = smov [#allocation7]   ;;  %s681_s26 = int_to_ptr.vmem [resolvable:$true] %s680_s26 }
  0xe2   : > { %s503_s29 = sshll.u32 %s7860_s2, 4  ;;  %s7433_s23 = scalar_lea.hbm %s12787_s17, 16  ;;  %s8220_s29 = int_to_ptr.vmem [resolvable:$true] %s503_s29 }
  0xe3   : > { %p7434_p1 = scmp.ne.s32.totalorder %s12787_s17, %s7433_s23  ;;  %p7440_p0 = scmp.lt.u32.totalorder %s7433_s23, %s12787_s17 }
  0xe5   : > { %p7436_p3 = pnand %p7434_p1, %p8029_p8 }
  0xe7   : > { %p7437_p13 = pneg %p7436_p3 }
  0xe9   : > { %p7442_p2 = pnand %p7440_p0, %p7437_p13 }
  0xeb   : > { %7445 = shalt.err (!%p7442_p2)
}
  0xec   : > { %s7446_s22 = scalar_lea.vmem %s681_s26, 16  ;;  %s7453_s27 = scalar_lea.vmem %s681_s26, 32 }
  0xed   : > { %p7447_p5 = scmp.ne.s32.totalorder %s681_s26, %s7446_s22  ;;  %p7454_p10 = scmp.lt.s32.totalorder %s681_s26, %s681_s26 }
  0xee   : > { %p7455_p11 = scmp.lt.s32.totalorder %s7453_s27, %s7446_s22 }
  0xef   : > { %p7449_p7 = pnand %p7447_p5, %p8029_p8 }
  0xf0   : > { %p7456_p12 = por %p7455_p11, %p7454_p10 }
  0xf1   : > { %p7450_p9 = pneg %p7449_p7 }
  0xf3   : > { %p7457_p4 = pnand %p7456_p12, %p7450_p9 }
  0xf5   : > { %7460 = shalt.err (!%p7457_p4)
}
  0xf6   : > { %6940 = dma.hbm_to_vmem [thread:$0]  (!%p8015_p6), %s12787_s17, 16, %s681_s26, [#allocation30]  }
  0xf7   : > { %s12992_s30 = sld [smem:[#allocation110_spill]] }
  0xfd   : > { %s12993_s28 = smov %s12992_s30  ;;  %s7461_s0 = scalar_lea.hbm %s12992_s30, 16 }
  0xfe   : > { %p7462_p1 = scmp.ne.s32.totalorder %s12993_s28, %s7461_s0  ;;  %p7468_p0 = scmp.lt.u32.totalorder %s7461_s0, %s12993_s28 }
 0x100   : > { %p7464_p3 = pnand %p7462_p1, %p8029_p8 }
 0x102   : > { %p7465_p13 = pneg %p7464_p3 }
 0x104   : > { %p7470_p2 = pnand %p7468_p0, %p7465_p13 }
 0x106   : > { %7473 = shalt.err (!%p7470_p2)
}
 0x107   : > { %s7474_s26 = scalar_lea.vmem %s8220_s29, 16  ;;  %s7481_s21 = scalar_lea.vmem %s8220_s29, 32 }
 0x108   : > { %p7475_p5 = scmp.ne.s32.totalorder %s8220_s29, %s7474_s26  ;;  %p7482_p10 = scmp.lt.s32.totalorder %s8220_s29, %s8220_s29 }
 0x109   : > { %p7483_p11 = scmp.lt.s32.totalorder %s7481_s21, %s7474_s26 }
 0x10a   : > { %p7477_p7 = pnand %p7475_p5, %p8029_p8 }
 0x10b   : > { %p7484_p12 = por %p7483_p11, %p7482_p10 }
 0x10c   : > { %p7478_p9 = pneg %p7477_p7 }
 0x10e   : > { %p7485_p4 = pnand %p7484_p12, %p7478_p9 }
 0x110   : > { %7488 = shalt.err (!%p7485_p4)
}
 0x111   : > { %6895 = dma.hbm_to_vmem [thread:$0]  (!%p8015_p6), %s12993_s28, 16, %s8220_s29, [#allocation6]  }
 0x112   : > { %s7861_s20 = smov [#allocation10]   ;;  %s7862_s30 = smov [#allocation13]  }
 0x113   : > { %s527_s23 = sshll.u32 %s7861_s20, 4  ;;  %s551_s0 = sshll.u32 %s7862_s30, 4  ;;  %s528_s23 = int_to_ptr.vmem [resolvable:$true] %s527_s23  ;;  %s8264_s0 = int_to_ptr.vmem [resolvable:$true] %s551_s0 }
 0x114   : > { %s12994_s4 = sld [smem:[#allocation112_spill]] }
 0x11a   : > { %s7489_s27 = scalar_lea.hbm %s12994_s4, 32 }
 0x11b   : > { %p7490_p1 = scmp.ne.s32.totalorder %s12994_s4, %s7489_s27  ;;  %p7496_p0 = scmp.lt.u32.totalorder %s7489_s27, %s12994_s4 }
 0x11d   : > { %p7492_p3 = pnand %p7490_p1, %p8029_p8 }
 0x11f   : > { %p7493_p13 = pneg %p7492_p3 }
 0x121   : > { %p7498_p2 = pnand %p7496_p0, %p7493_p13 }
 0x123   : > { %7501 = shalt.err (!%p7498_p2)
}
 0x124   : > { %s7502_s19 = scalar_lea.vmem %s528_s23, 32  ;;  %p7510_p10 = scmp.lt.s32.totalorder %s528_s23, %s528_s23 }
 0x125   : > { %p7503_p5 = scmp.ne.s32.totalorder %s528_s23, %s7502_s19  ;;  %p7511_p11 = scmp.lt.s32.totalorder %s7502_s19, %s7502_s19 }
 0x127   : > { %p7505_p7 = pnand %p7503_p5, %p8029_p8  ;;  %p7512_p12 = por %p7511_p11, %p7510_p10 }
 0x129   : > { %p7506_p9 = pneg %p7505_p7 }
 0x12b   : > { %p7513_p4 = pnand %p7512_p12, %p7506_p9 }
 0x12d   : > { %7516 = shalt.err (!%p7513_p4)
}
 0x12e   : > { %6901 = dma.hbm_to_vmem [thread:$0]  (!%p8015_p6), %s12994_s4, 32, %s528_s23, [#allocation9]  }
 0x12f   : > { %s12995_s6 = sld [smem:[#allocation114_spill]] }
 0x135   : > { %s7517_s27 = scalar_lea.hbm %s12995_s6, 32 }
 0x136   : > { %p7518_p1 = scmp.ne.s32.totalorder %s12995_s6, %s7517_s27  ;;  %p7524_p0 = scmp.lt.u32.totalorder %s7517_s27, %s12995_s6 }
 0x138   : > { %p7520_p3 = pnand %p7518_p1, %p8029_p8 }
 0x13a   : > { %p7521_p13 = pneg %p7520_p3 }
 0x13c   : > { %p7526_p2 = pnand %p7524_p0, %p7521_p13 }
 0x13e   : > { %7529 = shalt.err (!%p7526_p2)
}
 0x13f   : > { %s7530_s23 = scalar_lea.vmem %s8264_s0, 32  ;;  %p7538_p10 = scmp.lt.s32.totalorder %s8264_s0, %s8264_s0 }
 0x140   : > { %p7531_p5 = scmp.ne.s32.totalorder %s8264_s0, %s7530_s23  ;;  %p7539_p11 = scmp.lt.s32.totalorder %s7530_s23, %s7530_s23 }
 0x142   : > { %p7533_p7 = pnand %p7531_p5, %p8029_p8  ;;  %p7540_p12 = por %p7539_p11, %p7538_p10 }
 0x144   : > { %p7534_p9 = pneg %p7533_p7 }
 0x146   : > { %p7541_p4 = pnand %p7540_p12, %p7534_p9 }
 0x148   : > { %7544 = shalt.err (!%p7541_p4)
}
 0x149   : > { %6907 = dma.hbm_to_vmem [thread:$0]  (!%p8015_p6), %s12995_s6, 32, %s8264_s0, [#allocation12]  }
 0x14a   : > { %s7863_s30 = smov [#allocation16]   ;;  %s7864_s22 = smov [#allocation19]  }
 0x14b   : > { %s575_s25 = sshll.u32 %s7863_s30, 4  ;;  %s599_s27 = sshll.u32 %s7864_s22, 4  ;;  %s576_s25 = int_to_ptr.vmem [resolvable:$true] %s575_s25  ;;  %s8307_s27 = int_to_ptr.vmem [resolvable:$true] %s599_s27 }
 0x14c   : > { %s7545_s2 = scalar_lea.hbm %s12778_s8, 16 }
 0x14d   : > { %p7546_p1 = scmp.ne.s32.totalorder %s12778_s8, %s7545_s2  ;;  %p7552_p0 = scmp.lt.u32.totalorder %s7545_s2, %s12778_s8 }
 0x14f   : > { %p7548_p3 = pnand %p7546_p1, %p8029_p8 }
 0x151   : > { %p7549_p13 = pneg %p7548_p3 }
 0x153   : > { %p7554_p2 = pnand %p7552_p0, %p7549_p13 }
 0x155   : > { %7557 = shalt.err (!%p7554_p2)
}
 0x156   : > { %s7558_s20 = scalar_lea.vmem %s576_s25, 16  ;;  %s7565_s30 = scalar_lea.vmem %s576_s25, 32 }
 0x157   : > { %p7559_p5 = scmp.ne.s32.totalorder %s576_s25, %s7558_s20  ;;  %p7566_p10 = scmp.lt.s32.totalorder %s576_s25, %s576_s25 }
 0x158   : > { %p7567_p11 = scmp.lt.s32.totalorder %s7565_s30, %s7558_s20 }
 0x159   : > { %p7561_p7 = pnand %p7559_p5, %p8029_p8 }
 0x15a   : > { %p7568_p12 = por %p7567_p11, %p7566_p10 }
 0x15b   : > { %p7562_p9 = pneg %p7561_p7 }
 0x15d   : > { %p7569_p4 = pnand %p7568_p12, %p7562_p9 }
 0x15f   : > { %7572 = shalt.err (!%p7569_p4)
}
 0x160   : > { %6913 = dma.hbm_to_vmem [thread:$0]  (!%p8015_p6), %s12778_s8, 16, %s576_s25, [#allocation15]  }
 0x161   : > { %s7573_s29 = scalar_lea.hbm %s12780_s10, 16 }
 0x162   : > { %p7574_p1 = scmp.ne.s32.totalorder %s12780_s10, %s7573_s29  ;;  %p7580_p0 = scmp.lt.u32.totalorder %s7573_s29, %s12780_s10 }
 0x164   : > { %p7576_p3 = pnand %p7574_p1, %p8029_p8 }
 0x166   : > { %p7577_p13 = pneg %p7576_p3 }
 0x168   : > { %p7582_p2 = pnand %p7580_p0, %p7577_p13 }
 0x16a   : > { %7585 = shalt.err (!%p7582_p2)
}
 0x16b   : > { %s7586_s25 = scalar_lea.vmem %s8307_s27, 16  ;;  %s7593_s30 = scalar_lea.vmem %s8307_s27, 32 }
 0x16c   : > { %p7587_p5 = scmp.ne.s32.totalorder %s8307_s27, %s7586_s25  ;;  %p7594_p10 = scmp.lt.s32.totalorder %s8307_s27, %s8307_s27 }
 0x16d   : > { %p7595_p11 = scmp.lt.s32.totalorder %s7593_s30, %s7586_s25 }
 0x16e   : > { %p7589_p7 = pnand %p7587_p5, %p8029_p8 }
 0x16f   : > { %p7596_p12 = por %p7595_p11, %p7594_p10 }
 0x170   : > { %p7590_p9 = pneg %p7589_p7 }
 0x172   : > { %p7597_p4 = pnand %p7596_p12, %p7590_p9 }
 0x174   : > { %7600 = shalt.err (!%p7597_p4)
}
 0x175   : > { %6919 = dma.hbm_to_vmem [thread:$0]  (!%p8015_p6), %s12780_s10, 16, %s8307_s27, [#allocation18]  }
 0x176   : > { %s7865_s21 = smov [#allocation22]   ;;  %s7866_s29 = smov [#allocation25]  }
 0x177   : > { %s621_s2 = sshll.u32 %s7865_s21, 4  ;;  %s645_s23 = sshll.u32 %s7866_s29, 4  ;;  %s622_s2 = int_to_ptr.vmem [resolvable:$true] %s621_s2  ;;  %s8351_s23 = int_to_ptr.vmem [resolvable:$true] %s645_s23 }
 0x178   : > { %s7601_s20 = scalar_lea.hbm %s12782_s12, 16 }
 0x179   : > { %p7602_p1 = scmp.ne.s32.totalorder %s12782_s12, %s7601_s20  ;;  %p7608_p0 = scmp.lt.u32.totalorder %s7601_s20, %s12782_s12 }
 0x17b   : > { %p7604_p3 = pnand %p7602_p1, %p8029_p8 }
 0x17d   : > { %p7605_p13 = pneg %p7604_p3 }
 0x17f   : > { %p7610_p2 = pnand %p7608_p0, %p7605_p13 }
 0x181   : > { %7613 = shalt.err (!%p7610_p2)
}
 0x182   : > { %s7614_s26 = scalar_lea.vmem %s622_s2, 16  ;;  %s7621_s21 = scalar_lea.vmem %s622_s2, 32 }
 0x183   : > { %p7615_p5 = scmp.ne.s32.totalorder %s622_s2, %s7614_s26  ;;  %p7622_p10 = scmp.lt.s32.totalorder %s622_s2, %s622_s2 }
 0x184   : > { %p7623_p11 = scmp.lt.s32.totalorder %s7621_s21, %s7614_s26 }
 0x185   : > { %p7617_p7 = pnand %p7615_p5, %p8029_p8 }
 0x186   : > { %p7624_p12 = por %p7623_p11, %p7622_p10 }
 0x187   : > { %p7618_p9 = pneg %p7617_p7 }
 0x189   : > { %p7625_p4 = pnand %p7624_p12, %p7618_p9 }
 0x18b   : > { %7628 = shalt.err (!%p7625_p4)
}
 0x18c   : > { %6925 = dma.hbm_to_vmem [thread:$0]  (!%p8015_p6), %s12782_s12, 16, %s622_s2, [#allocation21]  }
 0x18d   : > { %s7629_s25 = scalar_lea.hbm %s12784_s14, 32 }
 0x18e   : > { %p7630_p1 = scmp.ne.s32.totalorder %s12784_s14, %s7629_s25  ;;  %p7636_p0 = scmp.lt.u32.totalorder %s7629_s25, %s12784_s14 }
 0x190   : > { %p7632_p3 = pnand %p7630_p1, %p8029_p8 }
 0x192   : > { %p7633_p13 = pneg %p7632_p3 }
 0x194   : > { %p7638_p2 = pnand %p7636_p0, %p7633_p13 }
 0x196   : > { %7641 = shalt.err (!%p7638_p2)
}
 0x197   : > { %s7642_s2 = scalar_lea.vmem %s8351_s23, 32  ;;  %p7650_p10 = scmp.lt.s32.totalorder %s8351_s23, %s8351_s23 }
 0x198   : > { %p7643_p5 = scmp.ne.s32.totalorder %s8351_s23, %s7642_s2  ;;  %p7651_p11 = scmp.lt.s32.totalorder %s7642_s2, %s7642_s2 }
 0x19a   : > { %p7645_p7 = pnand %p7643_p5, %p8029_p8  ;;  %p7652_p12 = por %p7651_p11, %p7650_p10 }
 0x19c   : > { %p7646_p9 = pneg %p7645_p7 }
 0x19e   : > { %p7653_p4 = pnand %p7652_p12, %p7646_p9 }
 0x1a0   : > { %7656 = shalt.err (!%p7653_p4)
}
 0x1a1   : > { %6931 = dma.hbm_to_vmem [thread:$0]  (!%p8015_p6), %s12784_s14, 32, %s8351_s23, [#allocation24]  }
 0x1a2   : > { %s7867_s19 = smov [#allocation28]   ;;  %s7868_s20 = smov [#allocation31]  }
 0x1a3   : > { %s669_s0 = sshll.u32 %s7867_s19, 4  ;;  %s691_s25 = sshll.u32 %s7868_s20, 4  ;;  %s670_s0 = int_to_ptr.vmem [resolvable:$true] %s669_s0  ;;  %s8394_s25 = int_to_ptr.vmem [resolvable:$true] %s691_s25 }
 0x1a4   : > { %s7657_s27 = scalar_lea.hbm %s12786_s16, 16 }
 0x1a5   : > { %p7658_p1 = scmp.ne.s32.totalorder %s12786_s16, %s7657_s27  ;;  %p7664_p0 = scmp.lt.u32.totalorder %s7657_s27, %s12786_s16 }
 0x1a7   : > { %p7660_p3 = pnand %p7658_p1, %p8029_p8 }
 0x1a9   : > { %p7661_p13 = pneg %p7660_p3 }
 0x1ab   : > { %p7666_p2 = pnand %p7664_p0, %p7661_p13 }
 0x1ad   : > { %7669 = shalt.err (!%p7666_p2)
}
 0x1ae   : > { %s7670_s29 = scalar_lea.vmem %s670_s0, 16  ;;  %s7677_s19 = scalar_lea.vmem %s670_s0, 32 }
 0x1af   : > { %p7671_p5 = scmp.ne.s32.totalorder %s670_s0, %s7670_s29  ;;  %p7678_p10 = scmp.lt.s32.totalorder %s670_s0, %s670_s0 }
 0x1b0   : > { %p7679_p11 = scmp.lt.s32.totalorder %s7677_s19, %s7670_s29 }
 0x1b1   : > { %p7673_p7 = pnand %p7671_p5, %p8029_p8 }
 0x1b2   : > { %p7680_p12 = por %p7679_p11, %p7678_p10 }
 0x1b3   : > { %p7674_p9 = pneg %p7673_p7 }
 0x1b5   : > { %p7681_p4 = pnand %p7680_p12, %p7674_p9 }
 0x1b7   : > { %7684 = shalt.err (!%p7681_p4)
}
 0x1b8   : > { %6937 = dma.hbm_to_vmem [thread:$0]  (!%p8015_p6), %s12786_s16, 16, %s670_s0, [#allocation27]  }
 0x1b9   : > { %s7685_s26 = scalar_lea.hbm %s12788_s18, 16 }
 0x1ba   : > { %p7686_p1 = scmp.ne.s32.totalorder %s12788_s18, %s7685_s26  ;;  %p7692_p0 = scmp.lt.u32.totalorder %s7685_s26, %s12788_s18 }
 0x1bc   : > { %p7688_p3 = pnand %p7686_p1, %p8029_p8 }
 0x1be   : > { %p7689_p13 = pneg %p7688_p3 }
 0x1c0   : > { %p7694_p2 = pnand %p7692_p0, %p7689_p13 }
 0x1c2   : > { %7697 = shalt.err (!%p7694_p2)
}
 0x1c3   : > { %s7698_s0 = scalar_lea.vmem %s8394_s25, 16  ;;  %s7705_s19 = scalar_lea.vmem %s8394_s25, 32 }
 0x1c4   : > { %p7699_p5 = scmp.ne.s32.totalorder %s8394_s25, %s7698_s0  ;;  %p7706_p10 = scmp.lt.s32.totalorder %s8394_s25, %s8394_s25 }
 0x1c5   : > { %p7707_p11 = scmp.lt.s32.totalorder %s7705_s19, %s7698_s0 }
 0x1c6   : > { %p7701_p7 = pnand %p7699_p5, %p8029_p8 }
 0x1c7   : > { %p7708_p12 = por %p7707_p11, %p7706_p10 }
 0x1c8   : > { %p7702_p9 = pneg %p7701_p7 }
 0x1ca   : > { %p7709_p4 = pnand %p7708_p12, %p7702_p9 }
 0x1cc   : > { %7712 = shalt.err (!%p7709_p4)
}
 0x1cd   : > { %s12996_s22 = sld [smem:[#allocation47_spill]]  ;;  %s12997_s27 = sld [smem:[#allocation46_spill]] }
 0x1ce   : > { %s12998_s24 = sld [smem:[#allocation45_spill]]  ;;  %s12999_s26 = sld [smem:[#allocation44_spill]] }
 0x1cf   : > { %s13000_s2 = sld [smem:[#allocation48_spill]]  ;;  %s13006_s5 = sld [smem:[#allocation108_spill]] }
 0x1d0   : > { %6943 = dma.hbm_to_vmem [thread:$0]  (!%p8015_p6), %s12788_s18, 16, %s8394_s25, [#allocation30]  }
 0x1d3   : > { %s6293_s3 = sadd.s32 4294967294, %s12996_s22   ;;  %s8440_s21 = sadd.s32 1, %s12996_s22  }
 0x1d4   : > { %s48_s23 = ssub.s32 %s12996_s22, %s8440_s21  ;;  %s51_s29 = sadd.s32 1, %s12997_s27 }
 0x1d5   : > { %p49_p8 = scmp.eq.s32.totalorder %s48_s23, 0  ;;  %p58_p1 = scmp.ne.s32.totalorder %s12997_s27, %s12998_s24 }
 0x1d6   : > { %p59_p3 = scmp.eq.s32.totalorder %s12996_s22, 0  ;;  %p64_p13 = scmp.ne.s32.totalorder %s12998_s24, %s12999_s26 }
 0x1d7   : > { %s8451_s0 = scalar_select %p49_p8, %s12997_s27, %s51_s29  }
 0x1d8   : > { %p8453_p0 = por %p59_p3, %p58_p1  ;;  %p13002_p2 = scmp.eq.s32.totalorder %s13000_s2, 0 }
 0x1d9   : > { %p466_p5 = scmp.eq.s32.totalorder %s13000_s2, 1  ;;  %p472_p7 = scmp.eq.s32.totalorder %s6293_s3, 1 }
 0x1da   : > { %p8459_p6 = por %p13002_p2, %p64_p13  ;;  %p6970_p9 = scmp.lt.s32.totalorder %s12996_s22, 2 }
 0x1db   : > { %s702_s20 = sand.u32 1, %s12997_s27   ;;  %p8466_p10 = por %p466_p5, %p58_p1 }
 0x1dc   : > { %p8470_p11 = por %p472_p7, %p64_p13  ;;  %s6314_s26 = sshll.u32 %s702_s20, 8 }
 0x1dd   : > { %s13004_s30 = scalar_select %p8466_p10, 1, 0 }
 0x1de   : > { %s13005_s24 = scalar_select %p8470_p11, 1, 0 }
 0x1df   : > { %s6351_s23 = sshll.u32 %s12996_s22, 12  ;;  %s706_s27 = scalar_lea.vmem [#allocation2], %s6314_s26 }
 0x1e0   : > { %s8478_s6 = scalar_lea.hbm %s13006_s5, %s6351_s23  ;;  %s713_s2 = sshll.u32 %s706_s27, 4  ;;  %s8480_s2 = int_to_ptr.vmem [resolvable:$true] %s713_s2 }
 0x1e1   : > { %p8484_p12 = pnand %p6970_p9, %p8453_p0  ;;  %s8488_s22 = scalar_lea.sflag [#allocation3], %s702_s20 }
 0x1e2   : > { %s7713_s4 = scalar_lea.hbm %s8478_s6, 4096  ;;  %s7718_s19 = scalar_lea.hbm %s13006_s5, 8192 }
 0x1e3   : > { %p7714_p4 = scmp.ne.s32.totalorder %s8478_s6, %s7713_s4  ;;  %p7715_p8 = pneg %p8484_p12 }
 0x1e4   : > { %p7719_p13 = scmp.lt.u32.totalorder %s8478_s6, %s13006_s5  ;;  %p7720_p0 = scmp.lt.u32.totalorder %s7718_s19, %s7713_s4 }
 0x1e5   : > { %p7716_p1 = pnand %p7715_p8, %p7714_p4  ;;  %p7722_p5 = scmp.lt.u32.totalorder %s7713_s4, %s8478_s6 }
 0x1e6   : > { %p7721_p2 = por %p7720_p0, %p7719_p13 }
 0x1e7   : > { %p7717_p3 = pneg %p7716_p1 }
 0x1e8   : > { %p7723_p7 = por %p7722_p5, %p7721_p2 }
 0x1ea   : > { %p7724_p9 = pnand %p7723_p7, %p7717_p3 }
 0x1ec   : > { %7727 = shalt.err (!%p7724_p9)
}
 0x1ed   : > { %s7728_s20 = scalar_lea.vmem %s8480_s2, 4096  ;;  %s7869_s26 = smov [#allocation2]  }
 0x1ee   : > { %p7729_p4 = scmp.ne.s32.totalorder %s8480_s2, %s7728_s20  ;;  %s7733_s23 = sshll.u32 %s7869_s26, 4  ;;  %s7734_s23 = int_to_ptr.vmem [resolvable:$false] %s7733_s23 }
 0x1ef   : > { %s7735_s29 = scalar_lea.vmem %s7734_s23, 8192  ;;  %p7736_p10 = scmp.lt.s32.totalorder %s8480_s2, %s7734_s23 }
 0x1f0   : > { %p7731_p1 = pnand %p7729_p4, %p7715_p8  ;;  %p7737_p13 = scmp.lt.s32.totalorder %s7735_s29, %s7728_s20 }
 0x1f2   : > { %p7732_p11 = pneg %p7731_p1  ;;  %p7738_p0 = por %p7737_p13, %p7736_p10 }
 0x1f4   : > { %p7739_p2 = pnand %p7738_p0, %p7732_p11 }
 0x1f6   : > { %7742 = shalt.err (!%p7739_p2)
}
 0x1f7   : > { %s13008_s4 = smov 8   ;;  %s13009_s19 = sld [smem:[#allocation49_spill]] }
 0x1f8   : > { %6947 = dma.hbm_to_vmem [thread:$0]  (!%p8484_p12), %s8478_s6, 4096, %s8480_s2, %s8488_s22, %s12991_s1, %s12991_s1, %s13008_s4  }
 0x1fd   : > { %p13010_p8 = scmp.ne.s32.totalorder %s13009_s19, 0 }
 0x1ff   : > { %725 = sbr.rel (%p13010_p8) target bundleno = 2904 (0xb58), region = 96 }
 0x206   : > { %s13011_s27 = sld [smem:[#allocation45_spill]] }
 0x20c   : > { %s8522_s26 = sand.u32 1, %s13011_s27  }
 0x20d   : > { %s6318_s20 = sshll.u32 %s8522_s26, 8  ;;  %s728_s23 = scalar_lea.sflag [#allocation3], %s8522_s26 }
 0x20e   : > { %s8528_s3 = scalar_lea.vmem [#allocation2], %s6318_s20 }
 0x20f   : > { %7788 = dma.done.wait (%p8459_p6), %s728_s23, 4096  }
 0x210   : > { %7790 = vsyncadd (%p8459_p6), %s728_s23, 4294963200  ;;  %s13012_s6 = sld [smem:[#allocation48_spill]] }
 0x216   : > { %p13013_p10 = scmp.eq.s32.totalorder %s13012_s6, 0 }
 0x218   : > { %7792 = dma.done.wait (%p13013_p10), [#allocation6], 32   ;;  %p13014_p11 = pmov %p13013_p10 }
 0x219   : > { %p13015_p12 = pmov %p13013_p10 }
 0x21a   : > { %7794 = vsyncadd (%p13014_p11), [#allocation6], 4294967264 }
 0x21b   : > { %7796 = dma.done.wait (%p13015_p12), [#allocation9], 4128   ;;  %p13016_p3 = pmov %p13013_p10 }
 0x21d   : > { %7798 = vsyncadd (%p13016_p3), [#allocation9], 4294963168  ;;  %p13017_p5 = pmov %p13016_p3 }
 0x21e   : > { %p13018_p7 = pmov %p13016_p3 }
 0x21f   : > { %7800 = dma.done.wait (%p13017_p5), [#allocation12], 544  }
 0x220   : > { %7802 = vsyncadd (%p13018_p7), [#allocation12], 4294966752  ;;  %p13019_p6 = pmov %p13016_p3 }
 0x221   : > { %p13020_p9 = pmov %p13016_p3 }
 0x222   : > { %7804 = dma.done.wait (%p13019_p6), [#allocation15], 2064  }
 0x223   : > { %7806 = vsyncadd (%p13020_p9), [#allocation15], 4294965232  ;;  %p13021_p4 = pmov %p13016_p3 }
 0x224   : > { %p13022_p1 = pmov %p13016_p3 }
 0x225   : > { %7808 = dma.done.wait (%p13021_p4), [#allocation18], 2064  }
 0x226   : > { %7810 = vsyncadd (%p13022_p1), [#allocation18], 4294965232  ;;  %p13023_p13 = pmov %p13022_p1 }
 0x227   : > { %p13024_p0 = pmov %p13022_p1 }
 0x228   : > { %7812 = dma.done.wait (%p13023_p13), [#allocation21], 32  }
 0x229   : > { %7814 = vsyncadd (%p13024_p0), [#allocation21], 4294967264  ;;  %p13025_p2 = pmov %p13024_p0 }
 0x22a   : > { %p13026_p8 = pmov %p13024_p0 }
 0x22b   : > { %7816 = dma.done.wait (%p13025_p2), [#allocation24], 4128  }
 0x22c   : > { %7818 = vsyncadd (%p13026_p8), [#allocation24], 4294963168  ;;  %p13027_p10 = pmov %p13024_p0 }
 0x22d   : > { %p13028_p11 = pmov %p13024_p0 }
 0x22e   : > { %7820 = dma.done.wait (%p13027_p10), [#allocation27], 2064  }
 0x22f   : > { %7822 = vsyncadd (%p13028_p11), [#allocation27], 4294965232  ;;  %p13029_p12 = pmov %p13024_p0 }
 0x230   : > { %p13030_p3 = pmov %p13024_p0 }
 0x231   : > { %7824 = dma.done.wait (%p13029_p12), [#allocation30], 32  }
 0x232   : > { %7826 = vsyncadd (%p13030_p3), [#allocation30], 4294967264  ;;  %v8571_v0 = vld [vmem:[%s8528_s3 + $0x10] sm:$0xff]  ;;  %v8574_v1 = vld [vmem:[%s8528_s3] sm:$0xff]  ;;  %s12595_s1 = scalar_lea.vmem [#allocation32], %s6318_s20  ;;  %s6352_s25 = sshll.u32 %s13012_s6, 12 }
 0x233   : > { %929 = vadd.xlane.f32.xlu1 %v8571_v0  ;;  %925 = vadd.xlane.f32.xlu0 %v8574_v1  ;;  %v8579_v2 = vld [vmem:[%s8528_s3 + $0x18] sm:$0xff]  ;;  %v8582_v3 = vld [vmem:[%s8528_s3 + $0x8] sm:$0xff]  ;;  %v8590_v5 = vld [vmem:[%s8528_s3 + $0x20] sm:$0xff]  ;;  %s6049_s2 = sshll.u32 %s12595_s1, 4  ;;  %s13561_s4 = sld [smem:[#allocation115_spill]]  ;;  %s12723_s2 = int_to_ptr.vmem [resolvable:$true] %s6049_s2 }
 0x234   : > { %v8587_v4 = vld [vmem:[%s8528_s3 + $0x28] sm:$0xff]  ;;  %v8595_v6 = vld [vmem:[%s8528_s3 + $0x38] sm:$0xff]  ;;  %v8598_v7 = vld [vmem:[%s8528_s3 + $0x30] sm:$0xff]  ;;  %s6036_s27 = scalar_lea.sflag [#allocation4], %s8522_s26  ;;  %s7743_s20 = scalar_lea.vmem %s12723_s2, 4096 }
 0x235   : > { %v8603_v8 = vld [vmem:[%s8528_s3 + $0x48] sm:$0xff]  ;;  %v8606_v9 = vld [vmem:[%s8528_s3 + $0x40] sm:$0xff]  ;;  %v8611_v10 = vld [vmem:[%s8528_s3 + $0x58] sm:$0xff]  ;;  %p7744_p5 = scmp.ne.s32.totalorder %s12723_s2, %s7743_s20  ;;  %p13563_p7 = scmp.ne.s32.totalorder %s13004_s30, 0 }
 0x236   : > { %v8614_v11 = vld [vmem:[%s8528_s3 + $0x50] sm:$0xff]  ;;  %v8619_v12 = vld [vmem:[%s8528_s3 + $0x68] sm:$0xff]  ;;  %v8622_v13 = vld [vmem:[%s8528_s3 + $0x60] sm:$0xff]  ;;  %s7873_s23 = smov [#allocation32]  }
 0x237   : > { %931 = vadd.xlane.f32.xlu1 %v8579_v2  ;;  %927 = vadd.xlane.f32.xlu0 %v8582_v3  ;;  %v8627_v14 = vld [vmem:[%s8528_s3 + $0x78] sm:$0xff]  ;;  %v8630_v15 = vld [vmem:[%s8528_s3 + $0x70] sm:$0xff]  ;;  %v8635_v16 = vld [vmem:[%s8528_s3 + $0x88] sm:$0xff]  ;;  %p7745_p6 = pnand %p7744_p5, %p13563_p7 }
 0x238   : > { %v8638_v17 = vld [vmem:[%s8528_s3 + $0x80] sm:$0xff]  ;;  %v8643_v18 = vld [vmem:[%s8528_s3 + $0x98] sm:$0xff]  ;;  %v8646_v19 = vld [vmem:[%s8528_s3 + $0x90] sm:$0xff] }
 0x239   : > { %v8651_v20 = vld [vmem:[%s8528_s3 + $0xa0] sm:$0xff]  ;;  %v8655_v21 = vld [vmem:[%s8528_s3 + $0xa8] sm:$0xff]  ;;  %v8659_v22 = vld [vmem:[%s8528_s3 + $0xb0] sm:$0xff]  ;;  %s12721_s19 = scalar_lea.hbm %s13561_s4, %s6352_s25  ;;  %p7746_p9 = pneg %p7745_p6 }
 0x23a   : > { %v8663_v23 = vld [vmem:[%s8528_s3 + $0xb8] sm:$0xff]  ;;  %v8667_v24 = vld [vmem:[%s8528_s3 + $0xc0] sm:$0xff]  ;;  %v8671_v25 = vld [vmem:[%s8528_s3 + $0xc8] sm:$0xff] }
 0x23b   : > { %935 = vadd.xlane.f32.xlu1 %v8587_v4  ;;  %933 = vadd.xlane.f32.xlu0 %v8590_v5  ;;  %v8675_v26 = vld [vmem:[%s8528_s3 + $0xd0] sm:$0xff]  ;;  %v8679_v27 = vld [vmem:[%s8528_s3 + $0xd8] sm:$0xff]  ;;  %v8683_v28 = vld [vmem:[%s8528_s3 + $0xe0] sm:$0xff] }
 0x23c   : > { %v8687_v29 = vld [vmem:[%s8528_s3 + $0xe8] sm:$0xff]  ;;  %v8691_v30 = vld [vmem:[%s8528_s3 + $0xf0] sm:$0xff]  ;;  %v8695_v31 = vld [vmem:[%s8528_s3 + $0xf8] sm:$0xff] }
 0x23d   : > { %v1450_v32 = vld [vmem:[#allocation8 + $0x8] sm:$0xff]  ;;  %v1452_v33 = vld [vmem:[#allocation8 + $0x18] sm:$0xff]  ;;  %v1449_v34 = vld [vmem:[#allocation8] sm:$0xff] }
 0x23e   : > { %v6661_v35 = vpack.c.bf16 %v1452_v33, %v1450_v32  ;;  %v1451_v36 = vld [vmem:[#allocation8 + $0x10] sm:$0xff]  ;;  %v1454_v37 = vld [vmem:[#allocation8 + $0x28] sm:$0xff]  ;;  %v1456_v38 = vld [vmem:[#allocation8 + $0x38] sm:$0xff] }
 0x23f   : > { %939 = vadd.xlane.f32.xlu1 %v8595_v6  ;;  %937 = vadd.xlane.f32.xlu0 %v8598_v7  ;;  %v6663_v39 = vpack.c.bf16 %v1451_v36, %v1449_v34  ;;  %v6665_v40 = vpack.c.bf16 %v1456_v38, %v1454_v37  ;;  %v1453_v41 = vld [vmem:[#allocation8 + $0x20] sm:$0xff]  ;;  %v1455_v42 = vld [vmem:[#allocation8 + $0x30] sm:$0xff]  ;;  %v1458_v43 = vld [vmem:[#allocation8 + $0x48] sm:$0xff] }
 0x240   : > { %6662 = vmatprep.subr.bf16.mxu0 %v6661_v35  ;;  %v1460_v44 = vld [vmem:[#allocation8 + $0x58] sm:$0xff]  ;;  %v6667_v45 = vpack.c.bf16 %v1455_v42, %v1453_v41  ;;  %v1457_v37 = vld [vmem:[#allocation8 + $0x40] sm:$0xff]  ;;  %v1459_v38 = vld [vmem:[#allocation8 + $0x50] sm:$0xff] }
 0x241   : > { %6664 = vmatpush1.bf16.msra.mxu0 %v6663_v39  ;;  %v6669_v46 = vpack.c.bf16 %v1460_v44, %v1458_v43  ;;  %v1464_v42 = vld [vmem:[#allocation8 + $0x78] sm:$0xff] }
 0x242   : > { %6666 = vmatprep.subr.bf16.mxu0 %v6665_v40  ;;  %v6671_v40 = vpack.c.bf16 %v1459_v38, %v1457_v37 }
 0x243   : > { %943 = vadd.xlane.f32.xlu1 %v8603_v8  ;;  %941 = vadd.xlane.f32.xlu0 %v8606_v9 }
 0x245   : > { %6668 = vmatpush1.bf16.msra.mxu0 %v6667_v45  ;;  %v1461_v45 = vld [vmem:[#allocation8 + $0x60] sm:$0xff] }
 0x246   : > { %6670 = vmatprep.subr.bf16.mxu0 %v6669_v46  ;;  %v1463_v46 = vld [vmem:[#allocation8 + $0x70] sm:$0xff] }
 0x247   : > { %947 = vadd.xlane.f32.xlu1 %v8611_v10  ;;  %945 = vadd.xlane.f32.xlu0 %v8614_v11 }
 0x249   : > { %6672 = vmatpush1.bf16.msra.mxu0 %v6671_v40 }
 0x24b   : > { %951 = vadd.xlane.f32.xlu1 %v8619_v12  ;;  %949 = vadd.xlane.f32.xlu0 %v8622_v13 }
 0x24f   : > { %955 = vadd.xlane.f32.xlu1 %v8627_v14  ;;  %953 = vadd.xlane.f32.xlu0 %v8630_v15 }
 0x253   : > { %959 = vadd.xlane.f32.xlu1 %v8635_v16  ;;  %957 = vadd.xlane.f32.xlu0 %v8638_v17 }
 0x257   : > { %963 = vadd.xlane.f32.xlu1 %v8643_v18  ;;  %961 = vadd.xlane.f32.xlu0 %v8646_v19 }
 0x25b   : > { %965 = vadd.xlane.f32.xlu1 %v8651_v20 }
 0x25f   : > { %967 = vadd.xlane.f32.xlu1 %v8655_v21 }
 0x263   : > { %969 = vadd.xlane.f32.xlu1 %v8659_v22 }
 0x267   : > { %971 = vadd.xlane.f32.xlu1 %v8663_v23 }
 0x26b   : > { %973 = vadd.xlane.f32.xlu1 %v8667_v24 }
 0x26f   : > { %975 = vadd.xlane.f32.xlu1 %v8671_v25 }
 0x273   : > { %977 = vadd.xlane.f32.xlu1 %v8675_v26 }
 0x277   : > { %979 = vadd.xlane.f32.xlu1 %v8679_v27 }
 0x27b   : > { %981 = vadd.xlane.f32.xlu1 %v8683_v28 }
 0x27f   : > { %983 = vadd.xlane.f32.xlu1 %v8687_v29 }
 0x283   : > { %985 = vadd.xlane.f32.xlu1 %v8691_v30 }
 0x287   : > { %987 = vadd.xlane.f32.xlu1 %v8695_v31 }
 0x2c0   : > { %v930_v47 = vpop.xlane.xlu1 %929  ;;  %v926_v48 = vpop.xlane.xlu0 %925 }
 0x2c1   : > { %v8698_v49 = vmul.f32 0.25, %v926_v48  ;;  %v8704_v53 = vmul.f32 0.25, %v930_v47 }
 0x2c3   : > { %v8702_v50 = vsub.f32 %v8574_v1, %v8698_v49  ;;  %v8716_v57 = vsub.f32 %v8571_v0, %v8704_v53 }
 0x2c4   : > { %v932_v51 = vpop.xlane.xlu1 %931  ;;  %v928_v52 = vpop.xlane.xlu0 %927 }
 0x2c5   : > { %v8706_v54 = vmul.f32 0.25, %v928_v52  ;;  %v1053_v55 = vmul.f32 %v8702_v50, %v8702_v50  ;;  %v8718_v59 = vmul.f32 0.25, %v932_v51  ;;  %v1055_v62 = vmul.f32 %v8716_v57, %v8716_v57 }
 0x2c6   : > { %v6675_v51 = vpack.c.bf16 %v1463_v46, %v1461_v45  ;;  %v1469_v46 = vld [vmem:[#allocation8 + $0xa0] sm:$0xff] }
 0x2c7   : > { %1085 = vadd.xlane.f32.xlu0 %v1053_v55  ;;  %v8712_v56 = vsub.f32 %v8582_v3, %v8706_v54  ;;  %v8726_v63 = vsub.f32 %v8579_v2, %v8718_v59 }
 0x2c8   : > { %v936_v58 = vpop.xlane.xlu1 %935  ;;  %v934_v61 = vpop.xlane.xlu0 %933 }
 0x2c9   : > { %v1054_v60 = vmul.f32 %v8712_v56, %v8712_v56  ;;  %v8728_v3 = vmul.f32 0.25, %v934_v61  ;;  %v1056_v0 = vmul.f32 %v8726_v63, %v8726_v63  ;;  %v8736_v34 = vmul.f32 0.25, %v936_v58  ;;  %v1468_v61 = vld [vmem:[#allocation8 + $0x98] sm:$0xff] }
 0x2cb   : > { %1087 = vadd.xlane.f32.xlu0 %v1054_v60  ;;  %v8734_v32 = vsub.f32 %v8590_v5, %v8728_v3  ;;  %v8742_v36 = vsub.f32 %v8587_v4, %v8736_v34  ;;  %v1462_v5 = vld [vmem:[#allocation8 + $0x68] sm:$0xff] }
 0x2cc   : > { %v940_v1 = vpop.xlane.xlu1 %939  ;;  %v938_v35 = vpop.xlane.xlu0 %937  ;;  %v6673_v4 = vpack.c.bf16 %v1464_v42, %v1462_v5  ;;  %v1466_v60 = vld [vmem:[#allocation8 + $0x88] sm:$0xff]  ;;  %v1472_v42 = vld [vmem:[#allocation8 + $0xb8] sm:$0xff] }
 0x2cd   : > { %v1057_v2 = vmul.f32 %v8734_v32, %v8734_v32  ;;  %v8746_v41 = vmul.f32 0.25, %v938_v35  ;;  %v1058_v43 = vmul.f32 %v8742_v36, %v8742_v36  ;;  %v8754_v47 = vmul.f32 0.25, %v940_v1  ;;  %v1467_v35 = vld [vmem:[#allocation8 + $0x90] sm:$0xff]  ;;  %v1470_v5 = vld [vmem:[#allocation8 + $0xa8] sm:$0xff] }
 0x2ce   : > { %6674 = vmatprep.subr.bf16.mxu0 %v6673_v4  ;;  %v6677_v1 = vpack.c.bf16 %v1468_v61, %v1466_v60  ;;  %v6681_v45 = vpack.c.bf16 %v1472_v42, %v1470_v5 }
 0x2cf   : > { %1089 = vadd.xlane.f32.xlu0 %v1055_v62  ;;  %v8752_v44 = vsub.f32 %v8598_v7, %v8746_v41  ;;  %v8760_v58 = vsub.f32 %v8595_v6, %v8754_v47  ;;  %6676 = vmatpush1.bf16.msra.mxu0 %v6675_v51 }
 0x2d0   : > { %v944_v33 = vpop.xlane.xlu1 %943  ;;  %v942_v55 = vpop.xlane.xlu0 %941  ;;  %6678 = vmatprep.subr.bf16.mxu0 %v6677_v1 }
 0x2d1   : > { %v1059_v62 = vmul.f32 %v8752_v44, %v8752_v44  ;;  %v8770_v6 = vmul.f32 0.25, %v942_v55  ;;  %v8784_v51 = vmul.f32 0.25, %v944_v33 }
 0x2d3   : > { %1091 = vadd.xlane.f32.xlu0 %v1056_v0  ;;  %v1465_v0 = vld [vmem:[#allocation8 + $0x80] sm:$0xff]  ;;  %v8782_v4 = vsub.f32 %v8606_v9, %v8770_v6  ;;  %v1474_v9 = vld [vmem:[#allocation8 + $0xc8] sm:$0xff] }
 0x2d4   : > { %v8744_v39 = vpop.xlane.xlu1 %947  ;;  %v6679_v37 = vpack.c.bf16 %v1467_v35, %v1465_v0  ;;  %v946_v60 = vpop.xlane.xlu0 %945  ;;  %v1476_v0 = vld [vmem:[#allocation8 + $0xd8] sm:$0xff] }
 0x2d5   : > { %v1061_v35 = vmul.f32 %v8782_v4, %v8782_v4 }
 0x2d6   : > { %6680 = vmatpush1.bf16.msra.mxu0 %v6679_v37  ;;  %v1473_v37 = vld [vmem:[#allocation8 + $0xc0] sm:$0xff] }
 0x2d7   : > { %1093 = vadd.xlane.f32.xlu0 %v1057_v2  ;;  %6682 = vmatprep.subr.bf16.mxu0 %v6681_v45 }
 0x2d8   : > { %v952_v48 = vpop.xlane.xlu1 %951  ;;  %v950_v42 = vpop.xlane.xlu0 %949 }
 0x2d9   : > { %v8756_v52 = vmul.f32 0.25, %v952_v48  ;;  %v1471_v48 = vld [vmem:[#allocation8 + $0xb0] sm:$0xff] }
 0x2da   : > { %v6683_v61 = vpack.c.bf16 %v1471_v48, %v1469_v46  ;;  %v8802_v46 = vmul.f32 0.25, %v946_v60  ;;  %v1478_v48 = vld [vmem:[#allocation8 + $0xe8] sm:$0xff] }
 0x2db   : > { %1095 = vadd.xlane.f32.xlu0 %v1058_v43  ;;  %v8764_v7 = vsub.f32 %v8619_v12, %v8756_v52  ;;  %v1060_v12 = vmul.f32 %v8760_v58, %v8760_v58 }
 0x2dc   : > { %v956_v2 = vpop.xlane.xlu1 %955  ;;  %6684 = vmatpush1.bf16.msra.mxu0 %v6683_v61  ;;  %v8814_v60 = vsub.f32 %v8614_v11, %v8802_v46 }
 0x2dd   : > { %v8768_v38 = vmul.f32 0.25, %v956_v2  ;;  %v1066_v40 = vmul.f32 %v8764_v7, %v8764_v7  ;;  %v6685_v2 = vpack.c.bf16 %v1476_v0, %v1474_v9  ;;  %v1477_v9 = vld [vmem:[#allocation8 + $0xe0] sm:$0xff]  ;;  %v1479_v0 = vld [vmem:[#allocation8 + $0xf0] sm:$0xff] }
 0x2de   : > { %v1063_v11 = vmul.f32 %v8814_v60, %v8814_v60 }
 0x2df   : > { %1111 = vadd.xlane.f32.xlu1 %v1066_v40  ;;  %1097 = vadd.xlane.f32.xlu0 %v1059_v62  ;;  %v8778_v43 = vsub.f32 %v8627_v14, %v8768_v38  ;;  %v8792_v14 = vsub.f32 %v8603_v8, %v8784_v51  ;;  %v1475_v40 = vld [vmem:[#allocation8 + $0xd0] sm:$0xff] }
 0x2e0   : > { %v960_v55 = vpop.xlane.xlu1 %959  ;;  %v6687_v45 = vpack.c.bf16 %v1475_v40, %v1473_v37  ;;  %6686 = vmatprep.subr.bf16.mxu0 %v6685_v2  ;;  %v954_v37 = vpop.xlane.xlu0 %953  ;;  %v6691_v40 = vpack.c.bf16 %v1479_v0, %v1477_v9 }
 0x2e1   : > { %v8786_v1 = vmul.f32 0.25, %v960_v55  ;;  %v1068_v62 = vmul.f32 %v8778_v43, %v8778_v43  ;;  %v1480_v55 = vld [vmem:[#allocation8 + $0xf8] sm:$0xff]  ;;  %v8838_v9 = vmul.f32 0.25, %v954_v37 }
 0x2e2   : > { %6688 = vmatpush1.bf16.msra.mxu0 %v6687_v45 }
 0x2e3   : > { %1115 = vadd.xlane.f32.xlu1 %v1068_v62  ;;  %1099 = vadd.xlane.f32.xlu0 %v1060_v12  ;;  %v8796_v33 = vsub.f32 %v8635_v16, %v8786_v1  ;;  %v1062_v16 = vmul.f32 %v8792_v14, %v8792_v14  ;;  %v6689_v62 = vpack.c.bf16 %v1480_v55, %v1478_v48  ;;  %v8830_v48 = vmul.f32 0.25, %v950_v42 }
 0x2e4   : > { %v964_v5 = vpop.xlane.xlu1 %963  ;;  %v958_v55 = vpop.xlane.xlu0 %957 }
 0x2e5   : > { %v8800_v8 = vmul.f32 0.25, %v964_v5  ;;  %v1070_v12 = vmul.f32 %v8796_v33, %v8796_v33  ;;  %v8817_v5 = vmul.f32 0.25, %v8744_v39  ;;  %6690 = vmatprep.subr.bf16.mxu0 %v6689_v62 }
 0x2e6   : > { %6692 = vmatpush1.bf16.msra.mxu0 %v6691_v40 }
 0x2e7   : > { %1119 = vadd.xlane.f32.xlu1 %v1070_v12  ;;  %1101 = vadd.xlane.f32.xlu0 %v1061_v35  ;;  %v8810_v61 = vsub.f32 %v8643_v18, %v8800_v8  ;;  %v8825_v18 = vsub.f32 %v8611_v10, %v8817_v5  ;;  %v12813_v12 = vmov 0.0   ;;  %v8842_v10 = vsub.f32 %v8622_v13, %v8830_v48 }
 0x2e8   : > { %v966_v2 = vpop.xlane.xlu1 %965  ;;  %1557 = vmatprep.mubr.f32.mxu0 %v12813_v12 }
 0x2e9   : > { %13031 = vst [vmem:[#allocation50_spill] sm:$0xff] %v8810_v61  ;;  %v1072_v35 = vmul.f32 %v8810_v61, %v8810_v61  ;;  %v1064_v62 = vmul.f32 %v8825_v18, %v8825_v18  ;;  %v1065_v40 = vmul.f32 %v8842_v10, %v8842_v10 }
 0x2eb   : > { %1123 = vadd.xlane.f32.xlu1 %v1072_v35  ;;  %1103 = vadd.xlane.f32.xlu0 %v1062_v16  ;;  %v8852_v35 = vsub.f32 %v8630_v15, %v8838_v9 }
 0x2ec   : > { %v968_v45 = vpop.xlane.xlu1 %967 }
 0x2ed   : > { %v8828_v39 = vmul.f32 0.25, %v968_v45 }
 0x2ef   : > { %1105 = vadd.xlane.f32.xlu0 %v1063_v11  ;;  %v8834_v16 = vsub.f32 %v8655_v21, %v8828_v39  ;;  %v8848_v21 = vmul.f32 0.25, %v958_v55  ;;  %v962_v11 = vpop.xlane.xlu0 %961 }
 0x2f0   : > { %v970_v0 = vpop.xlane.xlu1 %969 }
 0x2f1   : > { %13032 = vst [vmem:[#allocation51_spill] sm:$0xff] %v8834_v16  ;;  %v1074_v42 = vmul.f32 %v8834_v16, %v8834_v16  ;;  %v8866_v55 = vsub.f32 %v8638_v17, %v8848_v21  ;;  %v8880_v17 = vmul.f32 0.25, %v970_v0 }
 0x2f3   : > { %1127 = vadd.xlane.f32.xlu1 %v1074_v42  ;;  %1107 = vadd.xlane.f32.xlu0 %v1064_v62  ;;  %v1067_v62 = vmul.f32 %v8852_v35, %v8852_v35  ;;  %v8862_v42 = vmul.f32 0.25, %v962_v11 }
 0x2f4   : > { %v972_v37 = vpop.xlane.xlu1 %971 }
 0x2f5   : > { %v8854_v45 = vmul.f32 0.25, %v972_v37  ;;  %v8870_v37 = vmul.f32 0.25, %v966_v2 }
 0x2f7   : > { %1109 = vadd.xlane.f32.xlu0 %v1065_v40  ;;  %v8858_v13 = vsub.f32 %v8663_v23, %v8854_v45  ;;  %v1069_v23 = vmul.f32 %v8866_v55, %v8866_v55  ;;  %v8876_v40 = vsub.f32 %v8646_v19, %v8862_v42 }
 0x2f8   : > { %v974_v15 = vpop.xlane.xlu1 %973 }
 0x2f9   : > { %13033 = vst [vmem:[#allocation52_spill] sm:$0xff] %v8858_v13  ;;  %v1076_v12 = vmul.f32 %v8858_v13, %v8858_v13  ;;  %v1071_v2 = vmul.f32 %v8876_v40, %v8876_v40 }
 0x2fb   : > { %1131 = vadd.xlane.f32.xlu1 %v1076_v12  ;;  %1113 = vadd.xlane.f32.xlu0 %v1067_v62  ;;  %v8890_v12 = vsub.f32 %v8651_v20, %v8870_v37 }
 0x2fc   : > { %v976_v11 = vpop.xlane.xlu1 %975 }
 0x2fd   : > { %v8878_v16 = vmul.f32 0.25, %v976_v11  ;;  %v8894_v11 = vmul.f32 0.25, %v974_v15  ;;  %v1073_v0 = vmul.f32 %v8890_v12, %v8890_v12 }
 0x2ff   : > { %1117 = vadd.xlane.f32.xlu0 %v1069_v23  ;;  %v8884_v13 = vsub.f32 %v8671_v25, %v8878_v16  ;;  %v8900_v25 = vsub.f32 %v8659_v22, %v8880_v17 }
 0x300   : > { %v978_v62 = vpop.xlane.xlu1 %977 }
 0x301   : > { %13034 = vst [vmem:[#allocation53_spill] sm:$0xff] %v8884_v13  ;;  %v1078_v19 = vmul.f32 %v8884_v13, %v8884_v13  ;;  %13035 = vst [vmem:[#allocation54_spill] sm:$0xff] %v8900_v25  ;;  %v8904_v20 = vmul.f32 0.25, %v978_v62  ;;  %v1075_v15 = vmul.f32 %v8900_v25, %v8900_v25 }
 0x303   : > { %1135 = vadd.xlane.f32.xlu1 %v1078_v19  ;;  %1121 = vadd.xlane.f32.xlu0 %v1071_v2  ;;  %v8914_v2 = vsub.f32 %v8667_v24, %v8894_v11 }
 0x304   : > { %v980_v23 = vpop.xlane.xlu1 %979 }
 0x305   : > { %v8902_v61 = vmul.f32 0.25, %v980_v23  ;;  %13037 = vst [vmem:[#allocation56_spill] sm:$0xff] %v8914_v2  ;;  %v1077_v62 = vmul.f32 %v8914_v2, %v8914_v2  ;;  %v1151_v2 = vmul.f32 124.0, %v8704_v53 }
 0x307   : > { %1125 = vadd.xlane.f32.xlu0 %v1073_v0  ;;  %v8908_v13 = vsub.f32 %v8679_v27, %v8902_v61  ;;  %v8924_v27 = vsub.f32 %v8675_v26, %v8904_v20 }
 0x308   : > { %v982_v19 = vpop.xlane.xlu1 %981 }
 0x309   : > { %13036 = vst [vmem:[#allocation55_spill] sm:$0xff] %v8908_v13  ;;  %v1080_v22 = vmul.f32 %v8908_v13, %v8908_v13  ;;  %v8918_v23 = vmul.f32 0.25, %v982_v19  ;;  %13039 = vst [vmem:[#allocation58_spill] sm:$0xff] %v8924_v27  ;;  %v1079_v19 = vmul.f32 %v8924_v27, %v8924_v27 }
 0x30b   : > { %13038 = vst [vmem:[#allocation57_spill] sm:$0xff] %v8918_v23  ;;  %1139 = vadd.xlane.f32.xlu1 %v1080_v22  ;;  %1129 = vadd.xlane.f32.xlu0 %v1075_v15  ;;  %v8936_v15 = vsub.f32 %v8683_v28, %v8918_v23 }
 0x30c   : > { %v984_v0 = vpop.xlane.xlu1 %983 }
 0x30d   : > { %v8926_v25 = vmul.f32 0.25, %v984_v0  ;;  %13042 = vst [vmem:[#allocation61_spill] sm:$0xff] %v8936_v15 }
 0x30f   : > { %13040 = vst [vmem:[#allocation59_spill] sm:$0xff] %v8926_v25  ;;  %1133 = vadd.xlane.f32.xlu0 %v1077_v62  ;;  %v8930_v24 = vsub.f32 %v8687_v29, %v8926_v25  ;;  %v1081_v62 = vmul.f32 %v8936_v15, %v8936_v15 }
 0x310   : > { %v986_v22 = vpop.xlane.xlu1 %985 }
 0x311   : > { %13041 = vst [vmem:[#allocation60_spill] sm:$0xff] %v8930_v24  ;;  %v8938_v13 = vmul.f32 0.25, %v986_v22  ;;  %v1082_v26 = vmul.f32 %v8930_v24, %v8930_v24 }
 0x313   : > { %13043 = vst [vmem:[#allocation62_spill] sm:$0xff] %v8938_v13  ;;  %1143 = vadd.xlane.f32.xlu1 %v1082_v26  ;;  %1137 = vadd.xlane.f32.xlu0 %v1079_v19  ;;  %v8946_v29 = vsub.f32 %v8691_v30, %v8938_v13  ;;  %v1149_v26 = vmul.f32 124.0, %v8698_v49 }
 0x314   : > { %v988_v0 = vpop.xlane.xlu1 %987 }
 0x315   : > { %13044 = vst [vmem:[#allocation63_spill] sm:$0xff] %v8946_v29  ;;  %v8948_v27 = vmul.f32 0.25, %v988_v0  ;;  %v1083_v22 = vmul.f32 %v8946_v29, %v8946_v29  ;;  %v1181_v30 = vmul.f32 %v1149_v26, %v8698_v49  ;;  %v1150_v0 = vmul.f32 124.0, %v8706_v54 }
 0x317   : > { %13045 = vst [vmem:[#allocation64_spill] sm:$0xff] %v8948_v27  ;;  %1141 = vadd.xlane.f32.xlu0 %v1081_v62  ;;  %v8952_v28 = vsub.f32 %v8695_v31, %v8948_v27  ;;  %v1182_v31 = vmul.f32 %v1150_v0, %v8706_v54  ;;  %v1153_v54 = vmul.f32 124.0, %v8728_v3 }
 0x319   : > { %13046 = vst [vmem:[#allocation65_spill] sm:$0xff] %v8952_v28  ;;  %v1084_v19 = vmul.f32 %v8952_v28, %v8952_v28 }
 0x31b   : > { %1147 = vadd.xlane.f32.xlu1 %v1084_v19  ;;  %1145 = vadd.xlane.f32.xlu0 %v1083_v22  ;;  %v1183_v22 = vmul.f32 %v1151_v2, %v8704_v53  ;;  %v1152_v19 = vmul.f32 124.0, %v8718_v59  ;;  %v1154_v53 = vmul.f32 124.0, %v8736_v34 }
 0x354   : > { %v1086_v24 = vpop.xlane.xlu0 %1085 }
 0x355   : > { %v1213_v62 = vsub.f32 %v1086_v24, %v1181_v30  ;;  %v1184_v24 = vmul.f32 %v1152_v19, %v8718_v59  ;;  %v1155_v19 = vmul.f32 124.0, %v8746_v41 }
 0x357   : > { %v1245_v15 = vmul.f32 0.25, %v1213_v62 }
 0x358   : > { %v1088_v27 = vpop.xlane.xlu0 %1087 }
 0x359   : > { %v1277_v29 = vadd.f32 1e-06, %v1245_v15  ;;  %v1214_v13 = vsub.f32 %v1088_v27, %v1182_v31 }
 0x35b   : > { %7049 = vrsqrt.f32 %v1277_v29  ;;  %v1246_v28 = vmul.f32 0.25, %v1214_v13  ;;  %v1185_v13 = vmul.f32 %v1153_v54, %v8728_v3 }
 0x35c   : > { %v1090_v25 = vpop.xlane.xlu0 %1089 }
 0x35d   : > { %v1278_v49 = vadd.f32 1e-06, %v1246_v28  ;;  %v1215_v26 = vsub.f32 %v1090_v25, %v1183_v22  ;;  %v8969_v25 = vld [vmem:[#allocation5] ss:$0 sm:$0xff]  ;;  %v1186_v22 = vmul.f32 %v1154_v53, %v8736_v34  ;;  %v1156_v34 = vmul.f32 124.0, %v8754_v47 }
 0x35f   : > { %7051 = vrsqrt.f32 %v1278_v49  ;;  %v1247_v23 = vmul.f32 0.25, %v1215_v26 }
 0x360   : > { %v1092_v30 = vpop.xlane.xlu0 %1091 }
 0x361   : > { %v1279_v0 = vadd.f32 1e-06, %v1247_v23  ;;  %v1216_v62 = vsub.f32 %v1092_v30, %v1184_v24  ;;  %v8973_v23 = vld [vmem:[#allocation7] ss:$0 sm:$0xff] }
 0x363   : > { %7053 = vrsqrt.f32 %v1279_v0  ;;  %v1248_v27 = vmul.f32 0.25, %v1216_v62  ;;  %v1187_v62 = vmul.f32 %v1155_v19, %v8746_v41  ;;  %v1157_v41 = vmul.f32 124.0, %v8770_v6 }
 0x364   : > { %v1094_v2 = vpop.xlane.xlu0 %1093 }
 0x365   : > { %v7050_v15 = vpop.eup %7049  ;;  %v1280_v29 = vadd.f32 1e-06, %v1248_v27  ;;  %v1217_v28 = vsub.f32 %v1094_v2, %v1185_v13 }
 0x366   : > { %v1341_v31 = vmul.f32 %v7050_v15, %v8702_v50 }
 0x367   : > { %7055 = vrsqrt.f32 %v1280_v29  ;;  %v1249_v59 = vmul.f32 0.25, %v1217_v28  ;;  %v13047_v29 = vmov 0.0  }
 0x368   : > { %v1096_v49 = vpop.xlane.xlu0 %1095  ;;  %v1379_v3 = vmul.f32 %v8969_v25, %v1341_v31 }
 0x369   : > { %v7052_v26 = vpop.eup %7051  ;;  %v1281_v24 = vadd.f32 1e-06, %v1249_v59  ;;  %v1218_v54 = vsub.f32 %v1096_v49, %v1186_v22  ;;  %v1188_v59 = vmul.f32 %v1156_v34, %v8754_v47  ;;  %v1158_v47 = vmul.f32 124.0, %v8784_v51 }
 0x36a   : > { %v1417_v30 = vadd.f32 %v8973_v23, %v1379_v3  ;;  %v1342_v0 = vmul.f32 %v7052_v26, %v8712_v56 }
 0x36b   : > { %7057 = vrsqrt.f32 %v1281_v24  ;;  %v1250_v50 = vmul.f32 0.25, %v1218_v54 }
 0x36c   : > { %1558 = vmatmul.mubr.f32.vlgmr.msra.gmra.mrb[0].mxu0 %v1417_v30  ;;  %v1098_v27 = vpop.xlane.xlu0 %1097  ;;  %v1380_v13 = vmul.f32 %v8969_v25, %v1342_v0  ;;  %v1189_v30 = vmul.f32 %v1157_v41, %v8770_v6  ;;  %v1159_v6 = vmul.f32 124.0, %v8802_v46 }
 0x36d   : > { %v7054_v53 = vpop.eup %7053  ;;  %v1282_v2 = vadd.f32 1e-06, %v1250_v50  ;;  %v1219_v15 = vsub.f32 %v1098_v27, %v1187_v62  ;;  %1563 = vmatprep.mubr.f32.mxu0 %v13047_v29 }
 0x36e   : > { %v1418_v28 = vadd.f32 %v8973_v23, %v1380_v13  ;;  %v1343_v31 = vmul.f32 %v7054_v53, %v8716_v57 }
 0x36f   : > { %7059 = vrsqrt.f32 %v1282_v2  ;;  %v1251_v56 = vmul.f32 0.25, %v1219_v15  ;;  %v1190_v2 = vmul.f32 %v1158_v47, %v8784_v51  ;;  %v1162_v15 = vmul.f32 124.0, %v8756_v52 }
 0x370   : > { %1564 = vmatmul.mubr.f32.gmra.mrb[2].mxu0 %v1418_v28  ;;  %v1100_v22 = vpop.xlane.xlu0 %1099  ;;  %v1381_v19 = vmul.f32 %v8969_v25, %v1343_v31 }
 0x371   : > { %v7056_v49 = vpop.eup %7055  ;;  %v1283_v3 = vadd.f32 1e-06, %v1251_v56  ;;  %v1220_v26 = vsub.f32 %v1100_v22, %v1188_v59  ;;  %1569 = vmatprep.mubr.f32.mxu0 %v13047_v29 }
 0x372   : > { %v1419_v24 = vadd.f32 %v8973_v23, %v1381_v19  ;;  %v1344_v54 = vmul.f32 %v7056_v49, %v8726_v63  ;;  %v1112_v19 = vpop.xlane.xlu1 %1111  ;;  %v1191_v49 = vmul.f32 %v1159_v6, %v8802_v46 }
 0x373   : > { %v1252_v57 = vmul.f32 0.25, %v1220_v26  ;;  %7061 = vrsqrt.f32 %v1283_v3  ;;  %v1160_v3 = vmul.f32 124.0, %v8817_v5  ;;  %v1194_v26 = vmul.f32 %v1162_v15, %v8756_v52 }
 0x374   : > { %1570 = vmatmul.mubr.f32.gmra.mrb[4].mxu0 %v1419_v24  ;;  %v1102_v0 = vpop.xlane.xlu0 %1101  ;;  %v1382_v50 = vmul.f32 %v8969_v25, %v1344_v54 }
 0x375   : > { %v7058_v62 = vpop.eup %7057  ;;  %v1284_v34 = vadd.f32 1e-06, %v1252_v57  ;;  %v1221_v27 = vsub.f32 %v1102_v0, %v1189_v30  ;;  %1575 = vmatprep.mubr.f32.mxu0 %v13047_v29  ;;  %v1226_v0 = vsub.f32 %v1112_v19, %v1194_v26 }
 0x376   : > { %v1420_v13 = vadd.f32 %v8973_v23, %v1382_v50  ;;  %v1345_v53 = vmul.f32 %v7058_v62, %v8734_v32  ;;  %v1161_v50 = vmul.f32 124.0, %v8830_v48  ;;  %v1192_v62 = vmul.f32 %v1160_v3, %v8817_v5 }
 0x377   : > { %v1253_v63 = vmul.f32 0.25, %v1221_v27  ;;  %7063 = vrsqrt.f32 %v1284_v34  ;;  %v1164_v27 = vmul.f32 124.0, %v8768_v38  ;;  %v1258_v6 = vmul.f32 0.25, %v1226_v0 }
 0x378   : > { %1576 = vmatmul.mubr.f32.gmra.mrb[6].mxu0 %v1420_v13  ;;  %v1104_v28 = vpop.xlane.xlu0 %1103  ;;  %v1383_v31 = vmul.f32 %v8969_v25, %v1345_v53  ;;  %v1193_v15 = vmul.f32 %v1161_v50, %v8830_v48 }
 0x379   : > { %v7060_v56 = vpop.eup %7059  ;;  %v1285_v59 = vadd.f32 1e-06, %v1253_v63  ;;  %v1222_v41 = vsub.f32 %v1104_v28, %v1190_v2  ;;  %1581 = vmatprep.mubr.f32.mxu0 %v13047_v29 }
 0x37a   : > { %v1421_v22 = vadd.f32 %v8973_v23, %v1383_v31  ;;  %v1346_v32 = vmul.f32 %v7060_v56, %v8742_v36  ;;  %v1116_v31 = vpop.xlane.xlu1 %1115 }
 0x37b   : > { %v1254_v51 = vmul.f32 0.25, %v1222_v41  ;;  %7065 = vrsqrt.f32 %v1285_v59  ;;  %v1196_v41 = vmul.f32 %v1164_v27, %v8768_v38 }
 0x37c   : > { %1582 = vmatmul.mubr.f32.gmra.mrb[8].mxu0 %v1421_v22  ;;  %v1106_v24 = vpop.xlane.xlu0 %1105  ;;  %v1384_v54 = vmul.f32 %v8969_v25, %v1346_v32 }
 0x37d   : > { %v1286_v57 = vadd.f32 1e-06, %v1254_v51  ;;  %v1223_v30 = vsub.f32 %v1106_v24, %v1191_v49  ;;  %1587 = vmatprep.mubr.f32.mxu0 %v13047_v29  ;;  %v7062_v47 = vpop.eup %7061  ;;  %v1290_v51 = vadd.f32 1e-06, %v1258_v6  ;;  %v1165_v49 = vmul.f32 124.0, %v8848_v21 }
 0x37e   : > { %v1422_v36 = vadd.f32 %v8973_v23, %v1384_v54  ;;  %v1347_v52 = vmul.f32 %v7062_v47, %v8752_v44  ;;  %v1163_v44 = vmul.f32 124.0, %v8838_v9  ;;  %v1228_v3 = vsub.f32 %v1116_v31, %v1196_v41 }
 0x37f   : > { %v1255_v46 = vmul.f32 0.25, %v1223_v30  ;;  %7067 = vrsqrt.f32 %v1286_v57  ;;  %v1197_v50 = vmul.f32 %v1165_v49, %v8848_v21  ;;  %v1168_v31 = vmul.f32 124.0, %v8800_v8 }
 0x380   : > { %1588 = vmatmul.mubr.f32.gmra.mrb[10].mxu0 %v1422_v36  ;;  %v1108_v34 = vpop.xlane.xlu0 %1107  ;;  %v1385_v63 = vmul.f32 %v8969_v25, %v1347_v52  ;;  %v1195_v24 = vmul.f32 %v1163_v44, %v8838_v9 }
 0x381   : > { %v1287_v13 = vadd.f32 1e-06, %v1255_v46  ;;  %v1224_v53 = vsub.f32 %v1108_v34, %v1192_v62  ;;  %1593 = vmatprep.mubr.f32.mxu0 %v13047_v29  ;;  %v7064_v2 = vpop.eup %7063  ;;  %v1260_v46 = vmul.f32 0.25, %v1228_v3  ;;  %v1120_v62 = vpop.xlane.xlu1 %1119  ;;  %v1200_v3 = vmul.f32 %v1168_v31, %v8800_v8 }
 0x382   : > { %v1423_v5 = vadd.f32 %v8973_v23, %v1385_v63  ;;  %v1348_v59 = vmul.f32 %v7064_v2, %v8760_v58  ;;  %v1166_v58 = vmul.f32 124.0, %v8786_v1  ;;  %v1167_v2 = vmul.f32 124.0, %v8862_v42 }
 0x383   : > { %7069 = vrsqrt.f32 %v1287_v13  ;;  %v1256_v28 = vmul.f32 0.25, %v1224_v53 }
 0x384   : > { %v1110_v56 = vpop.xlane.xlu0 %1109  ;;  %1594 = vmatmul.mubr.f32.gmra.mrb[12].mxu0 %v1423_v5  ;;  %v1386_v48 = vmul.f32 %v8969_v25, %v1348_v59  ;;  %v1198_v52 = vmul.f32 %v1166_v58, %v8786_v1 }
 0x385   : > { %v1288_v22 = vadd.f32 1e-06, %v1256_v28  ;;  %v1225_v32 = vsub.f32 %v1110_v56, %v1193_v15  ;;  %v7066_v19 = vpop.eup %7065  ;;  %1599 = vmatprep.mubr.f32.mxu0 %v13047_v29  ;;  %v1292_v28 = vadd.f32 1e-06, %v1260_v46  ;;  %v1199_v56 = vmul.f32 %v1167_v2, %v8862_v42 }
 0x386   : > { %v1349_v54 = vmul.f32 %v7066_v19, %v8782_v4  ;;  %v1424_v38 = vadd.f32 %v8973_v23, %v1386_v48  ;;  %v1230_v6 = vsub.f32 %v1120_v62, %v1198_v52  ;;  %v1124_v48 = vpop.xlane.xlu1 %1123 }
 0x387   : > { %v1257_v26 = vmul.f32 0.25, %v1225_v32  ;;  %7071 = vrsqrt.f32 %v1288_v22  ;;  %v1232_v58 = vsub.f32 %v1124_v48, %v1200_v3 }
 0x388   : > { %v1114_v57 = vpop.xlane.xlu0 %1113  ;;  %v1387_v0 = vmul.f32 %v8969_v25, %v1349_v54  ;;  %7073 = vrsqrt.f32 %v1290_v51  ;;  %1600 = vmatmul.mubr.f32.gmra.mrb[14].mxu0 %v1424_v38  ;;  %v1262_v41 = vmul.f32 0.25, %v1230_v6 }
 0x389   : > { %v1289_v30 = vadd.f32 1e-06, %v1257_v26  ;;  %v1227_v47 = vsub.f32 %v1114_v57, %v1195_v24  ;;  %v7068_v36 = vpop.eup %7067  ;;  %1605 = vmatprep.mubr.f32.mxu0 %v13047_v29  ;;  %v1169_v26 = vmul.f32 124.0, %v8870_v37 }
 0x38a   : > { %v1425_v4 = vadd.f32 %v8973_v23, %v1387_v0  ;;  %v1350_v27 = vmul.f32 %v7068_v36, %v8792_v14  ;;  %v1294_v24 = vadd.f32 1e-06, %v1262_v41  ;;  %v1173_v41 = vmul.f32 124.0, %v8894_v11 }
 0x38b   : > { %7075 = vrsqrt.f32 %v1289_v30  ;;  %v1259_v9 = vmul.f32 0.25, %v1227_v47  ;;  %v1170_v47 = vmul.f32 124.0, %v8828_v39  ;;  %v1201_v0 = vmul.f32 %v1169_v26, %v8870_v37 }
 0x38c   : > { %v1118_v34 = vpop.xlane.xlu0 %1117  ;;  %1606 = vmatmul.mubr.f32.gmra.mrb[16].mxu0 %v1425_v4  ;;  %v1388_v21 = vmul.f32 %v8969_v25, %v1350_v27  ;;  %v1171_v37 = vmul.f32 124.0, %v8880_v17 }
 0x38d   : > { %v7070_v13 = vpop.eup %7069  ;;  %v1291_v53 = vadd.f32 1e-06, %v1259_v9  ;;  %v1229_v63 = vsub.f32 %v1118_v34, %v1197_v50  ;;  %1611 = vmatprep.mubr.f32.mxu0 %v13047_v29  ;;  %v1264_v50 = vmul.f32 0.25, %v1232_v58  ;;  %v1128_v9 = vpop.xlane.xlu1 %1127  ;;  %v1202_v34 = vmul.f32 %v1170_v47, %v8828_v39 }
 0x38e   : > { %v1351_v15 = vmul.f32 %v7070_v13, %v8814_v60  ;;  %v1426_v1 = vadd.f32 %v8973_v23, %v1388_v21  ;;  %v1203_v39 = vmul.f32 %v1171_v37, %v8880_v17 }
 0x38f   : > { %v1261_v5 = vmul.f32 0.25, %v1229_v63  ;;  %7077 = vrsqrt.f32 %v1291_v53  ;;  %v1296_v27 = vadd.f32 1e-06, %v1264_v50  ;;  %v1234_v13 = vsub.f32 %v1128_v9, %v1202_v34 }
 0x390   : > { %v1122_v44 = vpop.xlane.xlu0 %1121  ;;  %v1389_v14 = vmul.f32 %v8969_v25, %v1351_v15  ;;  %1612 = vmatmul.mubr.f32.gmra.mrb[18].mxu0 %v1426_v1  ;;  %7079 = vrsqrt.f32 %v1292_v28  ;;  %v1172_v15 = vmul.f32 124.0, %v8854_v45 }
 0x391   : > { %v7072_v59 = vpop.eup %7071  ;;  %v1293_v60 = vadd.f32 1e-06, %v1261_v5  ;;  %v1231_v32 = vsub.f32 %v1122_v44, %v1199_v56  ;;  %1617 = vmatprep.mubr.f32.mxu0 %v13047_v29  ;;  %v1266_v28 = vmul.f32 0.25, %v1234_v13  ;;  %v1132_v44 = vpop.xlane.xlu1 %1131 }
 0x392   : > { %v1427_v22 = vadd.f32 %v8973_v23, %v1389_v14  ;;  %v1352_v19 = vmul.f32 %v7072_v59, %v8825_v18  ;;  %v7074_v51 = vpop.eup %7073  ;;  %v1204_v59 = vmul.f32 %v1172_v15, %v8854_v45  ;;  %v1205_v45 = vmul.f32 %v1173_v41, %v8894_v11  ;;  %v13052_v41 = vld [vmem:[#allocation54_spill] sm:$0xff] }
 0x393   : > { %7081 = vrsqrt.f32 %v1293_v60  ;;  %v1263_v38 = vmul.f32 0.25, %v1231_v32  ;;  %v1354_v8 = vmul.f32 %v7074_v51, %v8764_v7  ;;  %v1298_v17 = vadd.f32 1e-06, %v1266_v28 }
 0x394   : > { %v1390_v42 = vmul.f32 %v8969_v25, %v1352_v19  ;;  %1618 = vmatmul.mubr.f32.gmra.mrb[20].mxu0 %v1427_v22  ;;  %v1126_v57 = vpop.xlane.xlu0 %1125  ;;  %7083 = vrsqrt.f32 %v1294_v24  ;;  %v1236_v22 = vsub.f32 %v1132_v44, %v1204_v59 }
 0x395   : > { %v7076_v49 = vpop.eup %7075  ;;  %1623 = vmatprep.mubr.f32.mxu0 %v13047_v29  ;;  %v1295_v46 = vadd.f32 1e-06, %v1263_v38  ;;  %v1233_v62 = vsub.f32 %v1126_v57, %v1201_v0  ;;  %v1392_v4 = vmul.f32 %v8969_v25, %v1354_v8  ;;  %v1136_v24 = vpop.xlane.xlu1 %1135  ;;  %v1175_v57 = vmul.f32 124.0, %v8904_v20 }
 0x396   : > { %v1353_v54 = vmul.f32 %v7076_v49, %v8842_v10  ;;  %v1428_v18 = vadd.f32 %v8973_v23, %v1390_v42  ;;  %v1174_v49 = vmul.f32 124.0, %v8878_v16  ;;  %v1268_v3 = vmul.f32 0.25, %v1236_v22 }
 0x397   : > { %7085 = vrsqrt.f32 %v1295_v46  ;;  %v1265_v53 = vmul.f32 0.25, %v1233_v62  ;;  %v1430_v2 = vadd.f32 %v8973_v23, %v1392_v4  ;;  %v1176_v46 = vmul.f32 124.0, %v8902_v61 }
 0x398   : > { %v1391_v30 = vmul.f32 %v8969_v25, %v1353_v54  ;;  %1624 = vmatmul.mubr.f32.gmra.mrb[22].mxu0 %v1428_v18  ;;  %v1130_v63 = vpop.xlane.xlu0 %1129  ;;  %7087 = vrsqrt.f32 %v1296_v27  ;;  %v1206_v18 = vmul.f32 %v1174_v49, %v8878_v16  ;;  %v1300_v11 = vadd.f32 1e-06, %v1268_v3 }
 0x399   : > { %v7078_v36 = vpop.eup %7077  ;;  %1629 = vmatprep.mubr.f32.mxu0 %v13047_v29  ;;  %v1297_v5 = vadd.f32 1e-06, %v1265_v53  ;;  %v1235_v1 = vsub.f32 %v1130_v63, %v1203_v39  ;;  %v1207_v16 = vmul.f32 %v1175_v57, %v8904_v20  ;;  %v1208_v13 = vmul.f32 %v1176_v46, %v8902_v61  ;;  %v13049_v53 = vld [vmem:[#allocation57_spill] sm:$0xff]  ;;  %v13050_v39 = vld [vmem:[#allocation51_spill] sm:$0xff] }
 0x39a   : > { %v1429_v10 = vadd.f32 %v8973_v23, %v1391_v30  ;;  %v1355_v52 = vmul.f32 %v7078_v36, %v8852_v35  ;;  %v7080_v7 = vpop.eup %7079  ;;  %v1238_v30 = vsub.f32 %v1136_v24, %v1206_v18  ;;  %v1177_v63 = vmul.f32 124.0, %v13049_v53 }
 0x39b   : > { %v1356_v21 = vmul.f32 %v7080_v7, %v8778_v43  ;;  %7089 = vrsqrt.f32 %v1297_v5  ;;  %v1267_v60 = vmul.f32 0.25, %v1235_v1  ;;  %v13051_v5 = vld [vmem:[#allocation59_spill] sm:$0xff] }
 0x39c   : > { %1630 = vmatmul.mubr.f32.gmra.mrb[24].mxu0 %v1429_v10  ;;  %v1393_v6 = vmul.f32 %v8969_v25, %v1355_v52  ;;  %v1134_v32 = vpop.xlane.xlu0 %1133  ;;  %7091 = vrsqrt.f32 %v1298_v17  ;;  %v13048_v10 = vld [vmem:[#allocation50_spill] sm:$0xff]  ;;  %v1270_v62 = vmul.f32 0.25, %v1238_v30  ;;  %v1140_v52 = vpop.xlane.xlu1 %1139  ;;  %v1178_v1 = vmul.f32 124.0, %v13051_v5 }
 0x39d   : > { %1635 = vmatprep.mubr.f32.mxu0 %v13047_v29  ;;  %v7082_v35 = vpop.eup %7081  ;;  %v1394_v31 = vmul.f32 %v8969_v25, %v1356_v21  ;;  %v1299_v26 = vadd.f32 1e-06, %v1267_v60  ;;  %v1237_v42 = vsub.f32 %v1134_v32, %v1205_v45  ;;  %v1209_v61 = vmul.f32 %v1177_v63, %v13049_v53  ;;  %v13053_v32 = vld [vmem:[#allocation62_spill] sm:$0xff] }
 0x39e   : > { %v1431_v14 = vadd.f32 %v8973_v23, %v1393_v6  ;;  %v1357_v56 = vmul.f32 %v7082_v35, %v8866_v55  ;;  %v7084_v43 = vpop.eup %7083  ;;  %v1302_v20 = vadd.f32 1e-06, %v1270_v62  ;;  %v1210_v60 = vmul.f32 %v1178_v1, %v13051_v5 }
 0x39f   : > { %v1432_v19 = vadd.f32 %v8973_v23, %v1394_v31  ;;  %v1358_v48 = vmul.f32 %v7084_v43, %v8796_v33  ;;  %7093 = vrsqrt.f32 %v1299_v26  ;;  %v1269_v8 = vmul.f32 0.25, %v1237_v42  ;;  %v13054_v26 = vld [vmem:[#allocation52_spill] sm:$0xff] }
 0x3a0   : > { %1636 = vmatmul.mubr.f32.gmra.mrb[26].mxu0 %v1430_v2  ;;  %v1395_v51 = vmul.f32 %v8969_v25, %v1357_v56  ;;  %v1138_v47 = vpop.xlane.xlu0 %1137  ;;  %7095 = vrsqrt.f32 %v1300_v11  ;;  %v1240_v2 = vsub.f32 %v1140_v52, %v1208_v13  ;;  %v1144_v56 = vpop.xlane.xlu1 %1143  ;;  %v13058_v13 = vld [vmem:[#allocation58_spill] sm:$0xff] }
 0x3a1   : > { %1641 = vmatprep.mubr.f32.mxu0 %v13047_v29  ;;  %v7086_v55 = vpop.eup %7085  ;;  %v1396_v58 = vmul.f32 %v8969_v25, %v1358_v48  ;;  %v1301_v9 = vadd.f32 1e-06, %v1269_v8  ;;  %v1239_v4 = vsub.f32 %v1138_v47, %v1207_v16  ;;  %v1242_v48 = vsub.f32 %v1144_v56, %v1210_v60  ;;  %v13056_v47 = vld [vmem:[#allocation56_spill] sm:$0xff] }
 0x3a2   : > { %v1433_v54 = vadd.f32 %v8973_v23, %v1395_v51  ;;  %v1359_v38 = vmul.f32 %v7086_v55, %v8876_v40  ;;  %v7088_v33 = vpop.eup %7087  ;;  %v1272_v44 = vmul.f32 0.25, %v1240_v2 }
 0x3a3   : > { %v1434_v0 = vadd.f32 %v8973_v23, %v1396_v58  ;;  %v1360_v50 = vmul.f32 %v7088_v33, %v13048_v10  ;;  %7097 = vrsqrt.f32 %v1301_v9  ;;  %v1271_v6 = vmul.f32 0.25, %v1239_v4  ;;  %v13057_v9 = vld [vmem:[#allocation53_spill] sm:$0xff] }
 0x3a4   : > { %1642 = vmatmul.mubr.f32.gmra.mrb[28].mxu0 %v1431_v14  ;;  %v1397_v36 = vmul.f32 %v8969_v25, %v1359_v38  ;;  %v1142_v21 = vpop.xlane.xlu0 %1141  ;;  %7099 = vrsqrt.f32 %v1302_v20  ;;  %v1304_v51 = vadd.f32 1e-06, %v1272_v44  ;;  %v1274_v33 = vmul.f32 0.25, %v1242_v48 }
 0x3a5   : > { %1647 = vmatprep.mubr.f32.mxu0 %v13047_v29  ;;  %v7090_v40 = vpop.eup %7089  ;;  %v1398_v34 = vmul.f32 %v8969_v25, %v1360_v50  ;;  %v1303_v14 = vadd.f32 1e-06, %v1271_v6  ;;  %v1241_v31 = vsub.f32 %v1142_v21, %v1209_v61  ;;  %v13059_v21 = vld [vmem:[#allocation55_spill] sm:$0xff] }
 0x3a6   : > { %v1435_v7 = vadd.f32 %v8973_v23, %v1397_v36  ;;  %v1361_v37 = vmul.f32 %v7090_v40, %v8890_v12  ;;  %v7092_v27 = vpop.eup %7091  ;;  %v1306_v50 = vadd.f32 1e-06, %v1274_v33 }
 0x3a7   : > { %v1436_v35 = vadd.f32 %v8973_v23, %v1398_v34  ;;  %v1362_v28 = vmul.f32 %v7092_v27, %v13050_v39  ;;  %7101 = vrsqrt.f32 %v1303_v14  ;;  %v1273_v55 = vmul.f32 0.25, %v1241_v31  ;;  %v13061_v14 = vld [vmem:[#allocation60_spill] sm:$0xff] }
 0x3a8   : > { %1648 = vmatmul.mubr.f32.gmra.mrb[30].mxu0 %v1432_v19  ;;  %v1399_v15 = vmul.f32 %v8969_v25, %v1361_v37  ;;  %v1179_v19 = vmul.f32 124.0, %v13053_v32  ;;  %v1146_v49 = vpop.xlane.xlu0 %1145  ;;  %7103 = vrsqrt.f32 %v1304_v51  ;;  %v1148_v11 = vpop.xlane.xlu1 %1147 }
 0x3a9   : > { %1653 = vmatprep.mubr.f32.mxu0 %v13047_v29  ;;  %v7094_v12 = vpop.eup %7093  ;;  %v1400_v59 = vmul.f32 %v8969_v25, %v1362_v28  ;;  %v1305_v18 = vadd.f32 1e-06, %v1273_v55 }
 0x3aa   : > { %v1437_v43 = vadd.f32 %v8973_v23, %v1399_v15  ;;  %v1363_v17 = vmul.f32 %v7094_v12, %v13052_v41  ;;  %v7096_v22 = vpop.eup %7095  ;;  %v1211_v38 = vmul.f32 %v1179_v19, %v13053_v32  ;;  %v13060_v12 = vld [vmem:[#allocation61_spill] sm:$0xff]  ;;  %v13062_v41 = vld [vmem:[#allocation63_spill] sm:$0xff] }
 0x3ab   : > { %v1438_v45 = vadd.f32 %v8973_v23, %v1400_v59  ;;  %v1364_v42 = vmul.f32 %v7096_v22, %v13054_v26  ;;  %7105 = vrsqrt.f32 %v1305_v18  ;;  %v13063_v19 = vld [vmem:[#allocation65_spill] sm:$0xff] }
 0x3ac   : > { %1654 = vmatmul.mubr.f32.gmra.mrb[32].mxu0 %v1433_v54  ;;  %v1401_v3 = vmul.f32 %v8969_v25, %v1363_v17  ;;  %v13055_v54 = vld [vmem:[#allocation64_spill] sm:$0xff]  ;;  %v1243_v57 = vsub.f32 %v1146_v49, %v1211_v38  ;;  %7107 = vrsqrt.f32 %v1306_v50 }
 0x3ad   : > { %1659 = vmatprep.mubr.f32.mxu0 %v13047_v29  ;;  %v7098_v24 = vpop.eup %7097  ;;  %v1180_v58 = vmul.f32 124.0, %v13055_v54  ;;  %v1402_v8 = vmul.f32 %v8969_v25, %v1364_v42  ;;  %v1481_v42 = vld [vmem:[#allocation10] sm:$0x3]  ;;  %v3308_v38 = vld [vmem:[#allocation11 + $0x4] ss:$8 sm:$0x3] }
 0x3ae   : > { %v1439_v30 = vadd.f32 %v8973_v23, %v1401_v3  ;;  %v7100_v36 = vpop.eup %7099  ;;  %v1275_v46 = vmul.f32 0.25, %v1243_v57  ;;  %v2930_v18 = vld [vmem:[#allocation11 + $0x2] ss:$8 sm:$0x3] }
 0x3af   : > { %v1212_v10 = vmul.f32 %v1180_v58, %v13055_v54  ;;  %v1440_v16 = vadd.f32 %v8973_v23, %v1402_v8  ;;  %v1366_v4 = vmul.f32 %v7100_v36, %v13057_v9  ;;  %v2660_v58 = vld [vmem:[#allocation11 + $0x1] ss:$8 sm:$0x3]  ;;  %v3449_v57 = vld [vmem:[#allocation11 + $0x5] ss:$8 sm:$0x3] }
 0x3b0   : > { %1660 = vmatmul.mubr.f32.gmra.mrb[34].mxu0 %v1434_v0  ;;  %v1365_v0 = vmul.f32 %v7098_v24, %v13056_v47  ;;  %v1307_v34 = vadd.f32 1e-06, %v1275_v46  ;;  %v3731_v9 = vld [vmem:[#allocation11 + $0x7] ss:$8 sm:$0x3] }
 0x3b1   : > { %1665 = vmatprep.mubr.f32.mxu0 %v13047_v29  ;;  %v1244_v40 = vsub.f32 %v1148_v11, %v1212_v10  ;;  %v7102_v52 = vpop.eup %7101  ;;  %v1404_v27 = vmul.f32 %v8969_v25, %v1366_v4  ;;  %v3231_v10 = vld [vmem:[#allocation11 + $0x3] ss:$8 sm:$0x3] }
 0x3b2   : > { %v1403_v62 = vmul.f32 %v8969_v25, %v1365_v0  ;;  %v1367_v53 = vmul.f32 %v7102_v52, %v13058_v13  ;;  %v7104_v63 = vpop.eup %7103  ;;  %7109 = vrsqrt.f32 %v1307_v34 }
 0x3b3   : > { %v1442_v2 = vadd.f32 %v8973_v23, %v1404_v27 }
 0x3b4   : > { %1666 = vmatmul.mubr.f32.gmra.mrb[36].mxu0 %v1435_v7  ;;  %v1276_v7 = vmul.f32 0.25, %v1244_v40  ;;  %v1441_v37 = vadd.f32 %v8973_v23, %v1403_v62  ;;  %v1405_v6 = vmul.f32 %v8969_v25, %v1367_v53  ;;  %v3654_v62 = vld [vmem:[#allocation11 + $0x6] ss:$8 sm:$0x3] }
 0x3b5   : > { %1671 = vmatprep.mubr.f32.mxu0 %v13047_v29  ;;  %v7106_v15 = vpop.eup %7105 }
 0x3b6   : > { %v1308_v20 = vadd.f32 1e-06, %v1276_v7  ;;  %v1443_v39 = vadd.f32 %v8973_v23, %v1405_v6  ;;  %v1369_v5 = vmul.f32 %v7106_v15, %v13060_v12  ;;  %v7108_v1 = vpop.eup %7107 }
 0x3b7   : > { %v1370_v31 = vmul.f32 %v7108_v1, %v13061_v14 }
 0x3b8   : > { %1672 = vmatmul.mubr.f32.gmra.mrb[38].mxu0 %v1436_v35  ;;  %v1368_v35 = vmul.f32 %v7104_v63, %v13059_v21  ;;  %7111 = vrsqrt.f32 %v1308_v20  ;;  %v1407_v44 = vmul.f32 %v8969_v25, %v1369_v5  ;;  %v3872_v21 = vld [vmem:[#allocation11 + $0x10] ss:$8 sm:$0x3] }
 0x3b9   : > { %1677 = vmatprep.mubr.f32.mxu0 %v13047_v29  ;;  %v1408_v59 = vmul.f32 %v8969_v25, %v1370_v31 }
 0x3ba   : > { %v1406_v28 = vmul.f32 %v8969_v25, %v1368_v35 }
 0x3bb   : > { %v1446_v60 = vadd.f32 %v8973_v23, %v1408_v59 }
 0x3bc   : > { %1678 = vmatmul.mubr.f32.gmra.mrb[40].mxu0 %v1437_v43  ;;  %v1444_v61 = vadd.f32 %v8973_v23, %v1406_v28  ;;  %v7110_v56 = vpop.eup %7109  ;;  %v1445_v43 = vadd.f32 %v8973_v23, %v1407_v44 }
 0x3bd   : > { %1683 = vmatprep.mubr.f32.mxu0 %v13047_v29  ;;  %v1371_v17 = vmul.f32 %v7110_v56, %v13062_v41 }
 0x3bf   : > { %v1409_v32 = vmul.f32 %v8969_v25, %v1371_v17 }
 0x3c0   : > { %1684 = vmatmul.mubr.f32.gmra.mrb[42].mxu0 %v1438_v45  ;;  %v890_v45 = vlaneseq }
 0x3c1   : > { %1689 = vmatprep.mubr.f32.mxu0 %v13047_v29  ;;  %v1447_v48 = vadd.f32 %v8973_v23, %v1409_v32 }
 0x3c2   : > { %v7112_v22 = vpop.eup %7111  ;;  %v9153_v3 = vshrl.u32 %v890_v45, 7 }
 0x3c3   : > { %v1372_v51 = vmul.f32 %v7112_v22, %v13063_v19 }
 0x3c4   : > { %1690 = vmatmul.mubr.f32.gmra.mrb[44].mxu0 %v1439_v30  ;;  %v892_v26 = vadd.s32 8, %v9153_v3  ;;  %v9157_v24 = vsub.s32 0, %v9153_v3  ;;  %v1754_v54 = vand.u32 15, %v9153_v3  ;;  %v2583_v30 = vld [vmem:[#allocation11] ss:$8 sm:$0x3] }
 0x3c5   : > { %1695 = vmatprep.mubr.f32.mxu0 %v13047_v29  ;;  %v1410_v55 = vmul.f32 %v8969_v25, %v1372_v51  ;;  %v9161_v25 = vsub.s32 1, %v9153_v3  ;;  %vm2864_vm2 = vcmp.lt.s32.totalorder %v9153_v3, 7  ;;  %v9228_v35 = vadd.s32 32, %v9153_v3 }
 0x3c6   : > { %13064 = vst [vmem:[#allocation50_spill] sm:$0xff] %v9157_v24  ;;  %v1761_v33 = vand.u32 15, %v892_v26  ;;  %v9165_v11 = vrot.slane %v1481_v42, %v9157_v24  ;;  %vm9167_vm0 = vcmp.eq.s32.totalorder %v1754_v54, 0  ;;  %v9172_v47 = vrot.slane %v2660_v58, %v9157_v24 }
 0x3c7   : > { %v1448_v49 = vadd.f32 %v8973_v23, %v1410_v55  ;;  %13065 = vst [vmem:[#allocation57_spill] sm:$0xff] %v9161_v25  ;;  %v893_v23 = vadd.s32 16, %v9153_v3  ;;  %v9175_v0 = vrot.slane %v3308_v38, %v9157_v24  ;;  %v9178_v36 = vrot.slane %v1481_v42, %v9161_v25 }
 0x3c8   : > { %1696 = vmatmul.mubr.f32.gmra.mrb[46].mxu0 %v1440_v16  ;;  %v9181_v50 = vrot.slane %v2660_v58, %v9161_v25  ;;  %v9184_v40 = vrot.slane %v3308_v38, %v9161_v25  ;;  %v9187_v46 = vrot.slane %v2930_v18, %v9157_v24  ;;  %v9190_v16 = vrot.slane %v3449_v57, %v9157_v24 }
 0x3c9   : > { %1701 = vmatprep.mubr.f32.mxu0 %v13047_v29  ;;  %13068 = vst [vmem:[#allocation51_spill] sm:$0xff] %v9175_v0  ;;  %vm9192_vm1 = vcmp.eq.s32.totalorder %v1761_v33, 15  ;;  %v9197_v52 = vrot.slane %v2583_v30, %v9157_v24  ;;  %v9200_v7 = vrot.slane %v2930_v18, %v9161_v25  ;;  %v1768_v34 = vand.u32 15, %v893_v23 }
 0x3ca   : > { %v9206_v27 = vrot.slane %v3231_v10, %v9157_v24  ;;  %v9209_v13 = vrot.slane %v2583_v30, %v9161_v25  ;;  %v9212_v53 = vrot.slane %v3231_v10, %v9161_v25  ;;  %v9215_v63 = vrot.slane %v3449_v57, %v9161_v25 }
 0x3cb   : > { %v9219_v20 = vrot.slane %v3654_v62, %v9157_v24  ;;  %v9225_v6 = vrot.slane %v3731_v9, %v9161_v25  ;;  %vm2518_vm3 = vcmp.lt.s32.totalorder %v9153_v3, 1  ;;  %v9232_v15 = vrot.slane %v3654_v62, %v9161_v25 }
 0x3cc   : > { %1702 = vmatmul.mubr.f32.gmra.mrb[48].mxu0 %v1441_v37  ;;  %v9203_v37 = vadd.s32 24, %v9153_v3  ;;  %13071 = vst [vmem:[#allocation59_spill] sm:$0xff] %v9209_v13  ;;  %v9235_v28 = vadd.s32 40, %v9153_v3  ;;  %v9238_v12 = vadd.s32 48, %v9153_v3  ;;  %v9241_v5 = vadd.s32 56, %v9153_v3 }
 0x3cd   : > { %1707 = vmatprep.mubr.f32.mxu0 %v13047_v29  ;;  %v9245_v44 = vadd.s32 64, %v9153_v3  ;;  %v9248_v14 = vadd.s32 72, %v9153_v3  ;;  %v9251_v31 = vadd.s32 80, %v9153_v3  ;;  %vm9256_vm4 = vcmp.eq.s32.totalorder %v1768_v34, 0 }
 0x3ce   : > { %13072 = vst [vmem:[#allocation54_spill] sm:$0xff] %v9241_v5  ;;  %v9261_v41 = vrot.slane %v3872_v21, %v9157_v24  ;;  %v9264_v17 = vadd.s32 88, %v9153_v3  ;;  %v9267_v22 = vadd.s32 96, %v9153_v3  ;;  %v9273_v32 = vrot.slane %v3872_v21, %v9161_v25 }
 0x3cf   : > { %13073 = vst [vmem:[#allocation62_spill] sm:$0xff] %v9245_v44  ;;  %13074 = vst [vmem:[#allocation52_spill] sm:$0xff] %v9248_v14  ;;  %v13093_v59 = vand.u32 15, %v9228_v35 }
 0x3d0   : > { %1708 = vmatmul.mubr.f32.gmra.mrb[50].mxu0 %v1442_v2  ;;  %v9222_v2 = vrot.slane %v3731_v9, %v9157_v24  ;;  %13075 = vst [vmem:[#allocation64_spill] sm:$0xff] %v9251_v31  ;;  %13079 = vst [vmem:[#allocation53_spill] sm:$0xff] %v9264_v17 }
 0x3d1   : > { %1713 = vmatprep.mubr.f32.mxu0 %v13047_v29  ;;  %13080 = vst [vmem:[#allocation58_spill] sm:$0xff] %v9267_v22  ;;  %vm9398_vm6 = vcmp.eq.s32.totalorder %v13093_v59, 0 }
 0x3d4   : > { %1714 = vmatmul.mubr.f32.gmra.mrb[52].mxu0 %v1443_v39  ;;  %v4236_v39 = vld [vmem:[#allocation13] sm:$0x3] }
 0x3d5   : > { %1719 = vmatprep.mubr.f32.mxu0 %v13047_v29  ;;  %v9277_v51 = vrot.slane %v4236_v39, %v9157_v24 }
 0x3d7   : > { %13082 = vst [vmem:[#allocation61_spill] sm:$0xff] %v9277_v51 }
 0x3d8   : > { %1720 = vmatmul.mubr.f32.gmra.mrb[54].mxu0 %v1444_v61  ;;  %v1775_v61 = vand.u32 15, %v9203_v37 }
 0x3d9   : > { %1725 = vmatprep.mubr.f32.mxu0 %v13047_v29 }
 0x3da   : > { %vm9343_vm5 = vcmp.eq.s32.totalorder %v1775_v61, 15 }
 0x3dc   : > { %1726 = vmatmul.mubr.f32.gmra.mrb[56].mxu0 %v1445_v43 }
 0x3dd   : > { %1731 = vmatprep.mubr.f32.mxu0 %v13047_v29 }
 0x3e0   : > { %1732 = vmatmul.mubr.f32.gmra.mrb[58].mxu0 %v1446_v60 }
 0x3e1   : > { %1737 = vmatprep.mubr.f32.mxu0 %v13047_v29 }
 0x3e4   : > { %1738 = vmatmul.mubr.f32.gmra.mrb[60].mxu0 %v1447_v48  ;;  %v9280_v48 = vrot.slane %v4236_v39, %v9161_v25 }
 0x3e5   : > { %1743 = vmatprep.mubr.f32.mxu0 %v13047_v29 }
 0x3e6   : > { %13083 = vst [vmem:[#allocation60_spill] sm:$0xff] %v9280_v48 }
 0x3e8   : > { %1744 = vmatmul.mubr.f32.gmra.mrb[62].mxu0 %v1448_v49 }
 0x43f   : > { %v1559_v1 = vpop.f32.mrb[0].mxu0 }
 0x440   : > { %v9254_v56 = vadd.f32 %v1559_v1, %v9165_v11  ;;  %v1561_v43 = vpop.f32.mrb[1].mxu0 }
 0x441   : > { %v9270_v60 = vadd.f32 %v1561_v43, %v9178_v36 }
 0x442   : > { %13076 = vst [vmem:[#allocation56_spill] sm:$0xff] %v9254_v56  ;;  %v2230_v26 = vsel %vm9167_vm0, 0.0, %v9254_v56  ;;  %v12835_v10 = vrot.slane %v9254_v56, 7  ;;  %v9300_v62 = vmul.f32 %v9172_v47, %v9254_v56  ;;  %v9304_v9 = vmul.f32 %v9175_v0, %v9254_v56 }
 0x443   : > { %13081 = vst [vmem:[#allocation55_spill] sm:$0xff] %v9270_v60  ;;  %v1565_v42 = vpop.f32.mrb[2].mxu0  ;;  %v2231_v33 = vsel %vm9167_vm0, 0.0, %v9270_v60  ;;  %v9309_v34 = vrot.slane %v2230_v26, 1  ;;  %v12840_v37 = vrot.slane %v9270_v60, 7  ;;  %v9322_v26 = vmul.f32 %v9181_v50, %v9270_v60 }
 0x444   : > { %v1566_v23 = vadd.f32 %v1565_v42, %v9165_v11  ;;  %v1567_v18 = vpop.f32.mrb[3].mxu0  ;;  %13084 = vst [vmem:[#allocation63_spill] sm:$0xff] %v9300_v62  ;;  %13085 = vst [vmem:[#allocation65_spill] sm:$0xff] %v9304_v9  ;;  %v9314_v1 = vrot.slane %v2231_v33, 1 }
 0x445   : > { %v9307_v8 = vadd.f32 %v1567_v18, %v9178_v36  ;;  %13086 = vst [vmem:[#allocation66_spill] sm:$0xff] %v9309_v34  ;;  %13088 = vst [vmem:[#allocation68_spill] sm:$0xff] %v9322_v26 }
 0x446   : > { %v2392_v21 = vsel %vm9192_vm1, 0.0, %v1566_v23  ;;  %v2802_v39 = vrot.slane %v1566_v23, 1  ;;  %13087 = vst [vmem:[#allocation67_spill] sm:$0xff] %v9314_v1  ;;  %v2678_v58 = vmul.f32 %v9172_v47, %v1566_v23  ;;  %v3322_v54 = vmul.f32 %v9175_v0, %v1566_v23 }
 0x447   : > { %v2456_v43 = vrot.slane %v2392_v21, 7  ;;  %v2393_v42 = vsel %vm9192_vm1, 0.0, %v9307_v8  ;;  %v2803_v30 = vrot.slane %v9307_v8, 1  ;;  %v1571_v57 = vpop.f32.mrb[4].mxu0  ;;  %v2679_v23 = vmul.f32 %v9181_v50, %v9307_v8 }
 0x448   : > { %v9327_v18 = vsel %vm2864_vm2, %v9309_v34, %v2802_v39  ;;  %v2457_v38 = vrot.slane %v2393_v42, 7  ;;  %v9330_v33 = vadd.f32 %v1571_v57, %v9165_v11  ;;  %v1573_v21 = vpop.f32.mrb[5].mxu0  ;;  %v3323_v61 = vmul.f32 %v9184_v40, %v9307_v8 }
 0x449   : > { %13089 = vst [vmem:[#allocation69_spill] sm:$0xff] %v9327_v18  ;;  %v2579_v4 = vsel %vm2518_vm3, %v12835_v10, %v2456_v43  ;;  %v9341_v45 = vsel %vm2864_vm2, %v9314_v1, %v2803_v30 }
 0x44a   : > { %13090 = vst [vmem:[#allocation70_spill] sm:$0xff] %v9341_v45  ;;  %v2601_v57 = vmul.f32 %v9197_v52, %v2579_v4  ;;  %v3245_v49 = vmul.f32 %v9206_v27, %v2579_v4  ;;  %v2580_v10 = vsel %vm2518_vm3, %v12840_v37, %v2457_v38  ;;  %v2234_v25 = vsel %vm9256_vm4, 0.0, %v9330_v33 }
 0x44b   : > { %v2602_v55 = vmul.f32 %v9209_v13, %v2580_v10  ;;  %v3246_v19 = vmul.f32 %v9212_v53, %v2580_v10  ;;  %v1577_v4 = vpop.f32.mrb[6].mxu0  ;;  %v2458_v26 = vrot.slane %v9330_v33, 7  ;;  %v2680_v37 = vmul.f32 %v9172_v47, %v9330_v33 }
 0x44c   : > { %v2742_v24 = vadd.f32 %v2678_v58, %v2601_v57  ;;  %v3386_v29 = vadd.f32 %v3322_v54, %v3245_v49  ;;  %v1579_v1 = vpop.f32.mrb[7].mxu0  ;;  %v2804_v56 = vrot.slane %v2234_v25, 1  ;;  %v3324_v10 = vmul.f32 %v9175_v0, %v9330_v33 }
 0x44d   : > { %v2743_v9 = vadd.f32 %v2679_v23, %v2602_v55  ;;  %v3387_v62 = vadd.f32 %v3323_v61, %v3246_v19  ;;  %v2577_v8 = vsel %vm2518_vm3, %v2456_v43, %v2458_v26  ;;  %v3743_v34 = vmul.f32 %v9222_v2, %v9330_v33 }
 0x44e   : > { %v9372_v49 = vadd.f32 %v1573_v21, %v9178_v36  ;;  %v9375_v54 = vadd.f32 %v1577_v4, %v9165_v11  ;;  %v2603_v58 = vmul.f32 %v9197_v52, %v2577_v8  ;;  %v2923_v25 = vsel %vm2864_vm2, %v2802_v39, %v2804_v56 }
 0x44f   : > { %v3247_v19 = vmul.f32 %v9206_v27, %v2577_v8  ;;  %v3666_v55 = vmul.f32 %v9219_v20, %v2577_v8  ;;  %v1583_v57 = vpop.f32.mrb[8].mxu0  ;;  %v2948_v43 = vmul.f32 %v9187_v46, %v2923_v25  ;;  %v3463_v33 = vmul.f32 %v9190_v16, %v2923_v25 }
 0x450   : > { %v2235_v21 = vsel %vm9256_vm4, 0.0, %v9372_v49  ;;  %v2459_v23 = vrot.slane %v9372_v49, 7  ;;  %v1585_v61 = vpop.f32.mrb[9].mxu0  ;;  %v2744_v4 = vadd.f32 %v2680_v37, %v2603_v58  ;;  %v2681_v39 = vmul.f32 %v9181_v50, %v9372_v49 }
 0x451   : > { %v3388_v45 = vadd.f32 %v3324_v10, %v3247_v19  ;;  %v3807_v18 = vadd.f32 %v3743_v34, %v3666_v55  ;;  %v9390_v60 = vadd.f32 %v2948_v43, %v2742_v24  ;;  %v9392_v8 = vadd.f32 %v3463_v33, %v3386_v29 }
 0x452   : > { %v2578_v25 = vsel %vm2518_vm3, %v2457_v38, %v2459_v23  ;;  %v2805_v22 = vrot.slane %v2235_v21, 1  ;;  %v3325_v24 = vmul.f32 %v9184_v40, %v9372_v49  ;;  %v3744_v35 = vmul.f32 %v9225_v6, %v9372_v49 }
 0x453   : > { %v2604_v37 = vmul.f32 %v9209_v13, %v2578_v25  ;;  %v3248_v34 = vmul.f32 %v9212_v53, %v2578_v25  ;;  %v3667_v29 = vmul.f32 %v9232_v15, %v2578_v25  ;;  %v9407_v10 = vpop.f32.mrb[10].mxu0  ;;  %v2396_v58 = vsel %vm9343_vm5, 0.0, %v9375_v54 }
 0x454   : > { %v2924_v38 = vsel %vm2864_vm2, %v2803_v30, %v2805_v22  ;;  %v2682_v19 = vmul.f32 %v9172_v47, %v9375_v54  ;;  %v9418_v55 = vpop.f32.mrb[11].mxu0  ;;  %v2460_v30 = vrot.slane %v2396_v58, 7  ;;  %v2806_v31 = vrot.slane %v9375_v54, 1 }
 0x455   : > { %13096 = vst [vmem:[#allocation71_spill] sm:$0xff] %v9418_v55  ;;  %v2745_v43 = vadd.f32 %v2681_v39, %v2604_v37  ;;  %v2949_v33 = vmul.f32 %v9200_v7, %v2924_v38  ;;  %v3389_v21 = vadd.f32 %v3325_v24, %v3248_v34  ;;  %v3464_v25 = vmul.f32 %v9215_v63, %v2924_v38 }
 0x456   : > { %v3808_v59 = vadd.f32 %v3744_v35, %v3667_v29  ;;  %v3326_v49 = vmul.f32 %v9175_v0, %v9375_v54  ;;  %v3745_v5 = vmul.f32 %v9222_v2, %v9375_v54  ;;  %v9432_v39 = vadd.f32 %v1579_v1, %v9178_v36 }
 0x457   : > { %v9425_v14 = vadd.f32 %v2949_v33, %v2743_v9  ;;  %v9427_v44 = vadd.f32 %v3464_v25, %v3387_v62  ;;  %v2575_v37 = vsel %vm2518_vm3, %v2458_v26, %v2460_v30  ;;  %v2921_v34 = vsel %vm2864_vm2, %v2804_v56, %v2806_v31  ;;  %v9444_v62 = vpop.f32.mrb[12].mxu0 }
 0x458   : > { %v9439_v24 = vadd.f32 %v1583_v57, %v9165_v11  ;;  %v9442_v9 = vadd.f32 %v1585_v61, %v9178_v36  ;;  %13097 = vst [vmem:[#allocation72_spill] sm:$0xff] %v9444_v62  ;;  %v2605_v29 = vmul.f32 %v9197_v52, %v2575_v37  ;;  %v2950_v54 = vmul.f32 %v9187_v46, %v2921_v34  ;;  %v9450_v26 = vpop.f32.mrb[13].mxu0 }
 0x459   : > { %v3249_v1 = vmul.f32 %v9206_v27, %v2575_v37  ;;  %v3465_v38 = vmul.f32 %v9190_v16, %v2921_v34  ;;  %13098 = vst [vmem:[#allocation73_spill] sm:$0xff] %v9450_v26  ;;  %v3668_v56 = vmul.f32 %v9219_v20, %v2575_v37  ;;  %v3884_v57 = vmul.f32 %v9261_v41, %v2921_v34 }
 0x45a   : > { %v2397_v61 = vsel %vm9343_vm5, 0.0, %v9432_v39  ;;  %v2683_v35 = vmul.f32 %v9181_v50, %v9432_v39  ;;  %v2746_v58 = vadd.f32 %v2682_v19, %v2605_v29  ;;  %v9459_v33 = vadd.f32 %v2950_v54, %v2744_v4 }
 0x45b   : > { %v3390_v25 = vadd.f32 %v3326_v49, %v3249_v1  ;;  %v9461_v48 = vadd.f32 %v3465_v38, %v3388_v45  ;;  %v3809_v62 = vadd.f32 %v3745_v5, %v3668_v56  ;;  %v9463_v55 = vadd.f32 %v3884_v57, %v3807_v18  ;;  %v9474_v45 = vpop.f32.mrb[14].mxu0 }
 0x45c   : > { %13099 = vst [vmem:[#allocation74_spill] sm:$0xff] %v9459_v33  ;;  %v2461_v26 = vrot.slane %v2397_v61, 7  ;;  %v2807_v37 = vrot.slane %v9432_v39, 1  ;;  %v3327_v34 = vmul.f32 %v9184_v40, %v9432_v39  ;;  %v3746_v42 = vmul.f32 %v9225_v6, %v9432_v39  ;;  %13102 = vst [vmem:[#allocation77_spill] sm:$0xff] %v9474_v45  ;;  %v9484_v39 = vpop.f32.mrb[15].mxu0 }
 0x45d   : > { %13100 = vst [vmem:[#allocation75_spill] sm:$0xff] %v9461_v48  ;;  %13101 = vst [vmem:[#allocation76_spill] sm:$0xff] %v9463_v55  ;;  %v2238_v4 = vsel %vm9398_vm6, 0.0, %v9439_v24  ;;  %v12855_v19 = vrot.slane %v9439_v24, 7  ;;  %v2684_v49 = vmul.f32 %v9172_v47, %v9439_v24  ;;  %v13105_v45 = vand.u32 15, %v9235_v28 }
 0x45e   : > { %v2576_v5 = vsel %vm2518_vm3, %v2459_v23, %v2461_v26  ;;  %v2922_v18 = vsel %vm2864_vm2, %v2805_v22, %v2807_v37  ;;  %v9482_v29 = vrot.slane %v2238_v4, 1  ;;  %13103 = vst [vmem:[#allocation78_spill] sm:$0xff] %v9484_v39  ;;  %v3328_v28 = vmul.f32 %v9175_v0, %v9439_v24 }
 0x45f   : > { %v2606_v54 = vmul.f32 %v9209_v13, %v2576_v5  ;;  %v2951_v1 = vmul.f32 %v9200_v7, %v2922_v18  ;;  %v3250_v38 = vmul.f32 %v9212_v53, %v2576_v5  ;;  %v3466_v56 = vmul.f32 %v9215_v63, %v2922_v18 }
 0x460   : > { %v3669_v23 = vmul.f32 %v9232_v15, %v2576_v5  ;;  %v3885_v57 = vmul.f32 %v9273_v32, %v2922_v18  ;;  %v2573_v22 = vsel %vm2518_vm3, %v2460_v30, %v12855_v19  ;;  %v2919_v61 = vsel %vm2864_vm2, %v2806_v31, %v9482_v29  ;;  %v9509_v18 = vpop.f32.mrb[16].mxu0 }
 0x461   : > { %v2747_v4 = vadd.f32 %v2683_v35, %v2606_v54  ;;  %v9499_v55 = vadd.f32 %v2951_v1, %v2745_v43  ;;  %v3391_v48 = vadd.f32 %v3327_v34, %v3250_v38  ;;  %v9501_v39 = vadd.f32 %v3466_v56, %v3389_v21  ;;  %13108 = vst [vmem:[#allocation80_spill] sm:$0xff] %v9509_v18  ;;  %v9515_v43 = vpop.f32.mrb[17].mxu0 }
 0x462   : > { %vm9505_vm7 = vcmp.eq.s32.totalorder %v13105_v45, 15  ;;  %v3810_v33 = vadd.f32 %v3746_v42, %v3669_v23  ;;  %v9511_v30 = vadd.f32 %v3885_v57, %v3808_v59  ;;  %v2607_v19 = vmul.f32 %v9197_v52, %v2573_v22  ;;  %13110 = vst [vmem:[#allocation82_spill] sm:$0xff] %v9515_v43 }
 0x463   : > { %13104 = vst [vmem:[#allocation79_spill] sm:$0xff] %v9501_v39  ;;  %v2952_v31 = vmul.f32 %v9187_v46, %v2919_v61  ;;  %v3251_v21 = vmul.f32 %v9206_v27, %v2573_v22  ;;  %v3467_v35 = vmul.f32 %v9190_v16, %v2919_v61  ;;  %v3670_v34 = vmul.f32 %v9219_v20, %v2573_v22  ;;  %v9531_v57 = vpop.f32.mrb[18].mxu0 }
 0x464   : > { %13109 = vst [vmem:[#allocation81_spill] sm:$0xff] %v9511_v30  ;;  %v2748_v45 = vadd.f32 %v2684_v49, %v2607_v19  ;;  %v3747_v59 = vmul.f32 %v9222_v2, %v9439_v24  ;;  %v3886_v42 = vmul.f32 %v9261_v41, %v2919_v61  ;;  %v2239_v56 = vsel %vm9398_vm6, 0.0, %v9442_v9  ;;  %13111 = vst [vmem:[#allocation83_spill] sm:$0xff] %v9531_v57  ;;  %v9537_v49 = vpop.f32.mrb[19].mxu0 }
 0x465   : > { %v9522_v54 = vadd.f32 %v2952_v31, %v2746_v58  ;;  %v3392_v1 = vadd.f32 %v3328_v28, %v3251_v21  ;;  %v3531_v38 = vadd.f32 %v3467_v35, %v3390_v25  ;;  %v12856_v23 = vrot.slane %v9442_v9, 7  ;;  %13112 = vst [vmem:[#allocation84_spill] sm:$0xff] %v9537_v49 }
 0x466   : > { %v3811_v30 = vadd.f32 %v3747_v59, %v3670_v34  ;;  %v3950_v22 = vadd.f32 %v3886_v42, %v3809_v62  ;;  %v2685_v58 = vmul.f32 %v9181_v50, %v9442_v9  ;;  %v9535_v19 = vrot.slane %v2239_v56, 1 }
 0x467   : > { %v9540_v61 = vadd.f32 %v3531_v38, %v9390_v60  ;;  %v2574_v17 = vsel %vm2518_vm3, %v2461_v26, %v12856_v23  ;;  %v3329_v25 = vmul.f32 %v9184_v40, %v9442_v9  ;;  %v3748_v62 = vmul.f32 %v9225_v6, %v9442_v9  ;;  %v9566_v38 = vpop.f32.mrb[20].mxu0 }
 0x468   : > { %v4174_v31 = vadd.f32 %v3950_v22, %v9392_v8  ;;  %v2608_v21 = vmul.f32 %v9209_v13, %v2574_v17  ;;  %v2920_v60 = vsel %vm2864_vm2, %v2807_v37, %v9535_v19  ;;  %v3252_v28 = vmul.f32 %v9212_v53, %v2574_v17  ;;  %13116 = vst [vmem:[#allocation85_spill] sm:$0xff] %v9566_v38 }
 0x469   : > { %v2953_v35 = vmul.f32 %v9200_v7, %v2920_v60  ;;  %v3468_v26 = vmul.f32 %v9215_v63, %v2920_v60  ;;  %v3671_v34 = vmul.f32 %v9232_v15, %v2574_v17  ;;  %v3887_v59 = vmul.f32 %v9273_v32, %v2920_v60  ;;  %v9575_v17 = vpop.f32.mrb[21].mxu0 }
 0x46a   : > { %v13113_v42 = vand.u32 15, %v9238_v12  ;;  %v4250_v37 = vadd.f32 %v9277_v51, %v4174_v31  ;;  %v9569_v56 = vadd.f32 %v2685_v58, %v2608_v21  ;;  %v9571_v22 = vadd.f32 %v3329_v25, %v3252_v28  ;;  %13117 = vst [vmem:[#allocation86_spill] sm:$0xff] %v9575_v17 }
 0x46b   : > { %v1590_v23 = vadd.f32 %v9407_v10, %v9165_v11  ;;  %v9577_v60 = vadd.f32 %v2953_v35, %v2747_v4  ;;  %v3532_v12 = vadd.f32 %v3468_v26, %v3391_v48  ;;  %v3951_v39 = vadd.f32 %v3887_v59, %v3810_v33  ;;  %v9588_v28 = vpop.f32.mrb[22].mxu0  ;;  %v13120_v33 = vld [vmem:[#allocation71_spill] sm:$0xff]  ;;  %v13121_v35 = vld [vmem:[#allocation72_spill] sm:$0xff] }
 0x46c   : > { %vm9562_vm8 = vcmp.eq.s32.totalorder %v13113_v42, 0  ;;  %v3812_v42 = vadd.f32 %v3748_v62, %v3671_v34  ;;  %13119 = vst [vmem:[#allocation88_spill] sm:$0xff] %v9588_v28  ;;  %v9595_v62 = vadd.f32 %v13120_v33, %v9178_v36  ;;  %v9599_v26 = vadd.f32 %v13121_v35, %v9165_v11 }
 0x46d   : > { %v2400_v49 = vsel %vm9505_vm7, 0.0, %v1590_v23  ;;  %v2686_v38 = vmul.f32 %v9172_v47, %v1590_v23  ;;  %v2810_v31 = vrot.slane %v1590_v23, 1  ;;  %v3330_v58 = vmul.f32 %v9175_v0, %v1590_v23 }
 0x46e   : > { %v9584_v25 = vadd.f32 %v3532_v12, %v9425_v14  ;;  %v4175_v10 = vadd.f32 %v3951_v39, %v9427_v44  ;;  %v2464_v21 = vrot.slane %v2400_v49, 7  ;;  %v3749_v4 = vmul.f32 %v9222_v2, %v1590_v23  ;;  %v13122_v14 = vld [vmem:[#allocation73_spill] sm:$0xff]  ;;  %v9605_v39 = vpop.f32.mrb[23].mxu0  ;;  %v13124_v23 = vld [vmem:[#allocation60_spill] sm:$0xff] }
 0x46f   : > { %v2917_v48 = vsel %vm2864_vm2, %v9482_v29, %v2810_v31  ;;  %v9603_v44 = vadd.f32 %v13122_v14, %v9178_v36  ;;  %13123 = vst [vmem:[#allocation71_spill] sm:$0xff] %v9605_v39  ;;  %v13125_v34 = vrot.slane %v9439_v24, 7  ;;  %v9625_v17 = vpop.f32.mrb[24].mxu0  ;;  %v3331_v5 = vmul.f32 %v9184_v40, %v9595_v62 }
 0x470   : > { %13118 = vst [vmem:[#allocation87_spill] sm:$0xff] %v9584_v25  ;;  %v4251_v49 = vadd.f32 %v13124_v23, %v4175_v10  ;;  %v2954_v59 = vmul.f32 %v9187_v46, %v2917_v48  ;;  %v3469_v12 = vmul.f32 %v9190_v16, %v2917_v48  ;;  %v3888_v28 = vmul.f32 %v9261_v41, %v2917_v48  ;;  %v9629_v25 = vpop.f32.mrb[25].mxu0 }
 0x471   : > { %v2571_v29 = vsel %vm2518_vm3, %v13125_v34, %v2464_v21  ;;  %v2401_v34 = vsel %vm9505_vm7, 0.0, %v9595_v62  ;;  %13127 = vst [vmem:[#allocation73_spill] sm:$0xff] %v9625_v17  ;;  %13129 = vst [vmem:[#allocation90_spill] sm:$0xff] %v9629_v25  ;;  %v3752_v8 = vmul.f32 %v9225_v6, %v9603_v44 }
 0x472   : > { %v2609_v33 = vmul.f32 %v9197_v52, %v2571_v29  ;;  %v3253_v35 = vmul.f32 %v9206_v27, %v2571_v29  ;;  %v3672_v14 = vmul.f32 %v9219_v20, %v2571_v29  ;;  %v9618_v39 = vmul.f32 %v4251_v49, %v4250_v37  ;;  %v13130_v29 = vld [vmem:[#allocation74_spill] sm:$0xff] }
 0x473   : > { %v9620_v10 = vadd.f32 %v2954_v59, %v2748_v45  ;;  %v3533_v24 = vadd.f32 %v3469_v12, %v3392_v1  ;;  %v9627_v23 = vadd.f32 %v3888_v28, %v3811_v30  ;;  %v2465_v37 = vrot.slane %v2401_v34, 7 }
 0x474   : > { %13126 = vst [vmem:[#allocation72_spill] sm:$0xff] %v9618_v39  ;;  %v2750_v57 = vadd.f32 %v2686_v38, %v2609_v33  ;;  %v3394_v43 = vadd.f32 %v3330_v58, %v3253_v35  ;;  %v3813_v18 = vadd.f32 %v3749_v4, %v3672_v14  ;;  %v2687_v45 = vmul.f32 %v9181_v50, %v9595_v62 }
 0x475   : > { %13128 = vst [vmem:[#allocation89_spill] sm:$0xff] %v9627_v23  ;;  %v9632_v48 = vadd.f32 %v3533_v24, %v13130_v29  ;;  %v2811_v1 = vrot.slane %v9595_v62, 1  ;;  %v3750_v38 = vmul.f32 %v9225_v6, %v9595_v62  ;;  %v2242_v30 = vsel %vm9562_vm8, 0.0, %v9599_v26  ;;  %v9656_v62 = vpop.f32.mrb[26].mxu0  ;;  %v13134_v24 = vld [vmem:[#allocation54_spill] sm:$0xff] }
 0x476   : > { %v12858_v58 = vrot.slane %v9599_v26, 7  ;;  %v13132_v4 = vrot.slane %v9442_v9, 7  ;;  %v2688_v59 = vmul.f32 %v9172_v47, %v9599_v26  ;;  %v9654_v12 = vrot.slane %v2242_v30, 1  ;;  %13133 = vst [vmem:[#allocation91_spill] sm:$0xff] %v9656_v62 }
 0x477   : > { %13131 = vst [vmem:[#allocation74_spill] sm:$0xff] %v9632_v48  ;;  %v2918_v49 = vsel %vm2864_vm2, %v9535_v19, %v2811_v1  ;;  %v13135_v34 = vand.u32 15, %v13134_v24  ;;  %v9668_v19 = vpop.f32.mrb[27].mxu0 }
 0x478   : > { %v2572_v28 = vsel %vm2518_vm3, %v13132_v4, %v2465_v37  ;;  %v2955_v35 = vmul.f32 %v9200_v7, %v2918_v49  ;;  %v3470_v14 = vmul.f32 %v9215_v63, %v2918_v49  ;;  %13138 = vst [vmem:[#allocation54_spill] sm:$0xff] %v9668_v19  ;;  %v3889_v4 = vmul.f32 %v9273_v32, %v2918_v49  ;;  %v9687_v48 = vpop.f32.mrb[28].mxu0 }
 0x479   : > { %v2610_v33 = vmul.f32 %v9209_v13, %v2572_v28  ;;  %v3254_v9 = vmul.f32 %v9212_v53, %v2572_v28  ;;  %vm9664_vm9 = vcmp.eq.s32.totalorder %v13135_v34, 15  ;;  %v3673_v30 = vmul.f32 %v9232_v15, %v2572_v28  ;;  %13140 = vst [vmem:[#allocation93_spill] sm:$0xff] %v9687_v48  ;;  %v13149_v48 = vld [vmem:[#allocation62_spill] sm:$0xff] }
 0x47a   : > { %v2569_v39 = vsel %vm2518_vm3, %v2464_v21, %v12858_v58  ;;  %v2915_v23 = vsel %vm2864_vm2, %v2810_v31, %v9654_v12  ;;  %v9680_v34 = vadd.f32 %v2955_v35, %v9569_v56  ;;  %v3534_v19 = vadd.f32 %v3470_v14, %v9571_v22  ;;  %v9696_v22 = vpop.f32.mrb[29].mxu0 }
 0x47b   : > { %v2751_v24 = vadd.f32 %v2687_v45, %v2610_v33  ;;  %v3395_v62 = vadd.f32 %v3331_v5, %v3254_v9  ;;  %v3814_v25 = vadd.f32 %v3750_v38, %v3673_v30  ;;  %v9683_v28 = vadd.f32 %v3889_v4, %v3812_v42  ;;  %13141 = vst [vmem:[#allocation94_spill] sm:$0xff] %v9696_v22 }
 0x47c   : > { %v2611_v49 = vmul.f32 %v9197_v52, %v2569_v39  ;;  %v2956_v17 = vmul.f32 %v9187_v46, %v2915_v23  ;;  %v9690_v21 = vadd.f32 %v3534_v19, %v9499_v55  ;;  %v3255_v31 = vmul.f32 %v9206_v27, %v2569_v39 }
 0x47d   : > { %13139 = vst [vmem:[#allocation92_spill] sm:$0xff] %v9683_v28  ;;  %v3332_v56 = vmul.f32 %v9175_v0, %v9599_v26  ;;  %v3471_v45 = vmul.f32 %v9190_v16, %v2915_v23  ;;  %v3674_v38 = vmul.f32 %v9219_v20, %v2569_v39  ;;  %v3751_v33 = vmul.f32 %v9222_v2, %v9599_v26  ;;  %v9714_v39 = vpop.f32.mrb[30].mxu0 }
 0x47e   : > { %v9698_v42 = vadd.f32 %v2688_v59, %v2611_v49  ;;  %v9700_v5 = vadd.f32 %v2956_v17, %v2750_v57  ;;  %v3890_v9 = vmul.f32 %v9261_v41, %v2915_v23  ;;  %v2243_v14 = vsel %vm9562_vm8, 0.0, %v9603_v44  ;;  %13142 = vst [vmem:[#allocation95_spill] sm:$0xff] %v9714_v39  ;;  %v9723_v4 = vpop.f32.mrb[31].mxu0 }
 0x47f   : > { %v3396_v55 = vadd.f32 %v3332_v56, %v3255_v31  ;;  %v3535_v35 = vadd.f32 %v3471_v45, %v3394_v43  ;;  %v3815_v19 = vadd.f32 %v3751_v33, %v3674_v38  ;;  %v2467_v30 = vrot.slane %v9603_v44, 7  ;;  %13144 = vst [vmem:[#allocation97_spill] sm:$0xff] %v9723_v4  ;;  %v13145_v56 = vld [vmem:[#allocation77_spill] sm:$0xff] }
 0x480   : > { %v2689_v57 = vmul.f32 %v9181_v50, %v9603_v44  ;;  %v9712_v17 = vrot.slane %v2243_v14, 1  ;;  %v3954_v43 = vadd.f32 %v3890_v9, %v3813_v18  ;;  %v3333_v23 = vmul.f32 %v9184_v40, %v9603_v44  ;;  %v13146_v18 = vld [vmem:[#allocation78_spill] sm:$0xff] }
 0x481   : > { %v9717_v59 = vadd.f32 %v3535_v35, %v9522_v54  ;;  %v2570_v49 = vsel %vm2518_vm3, %v2465_v37, %v2467_v30  ;;  %v9732_v54 = vadd.f32 %v13145_v56, %v9165_v11  ;;  %v9736_v45 = vadd.f32 %v13146_v18, %v9178_v36  ;;  %v9748_v56 = vpop.f32.mrb[32].mxu0 }
 0x482   : > { %v2916_v31 = vsel %vm2864_vm2, %v2811_v1, %v9712_v17  ;;  %v4178_v38 = vadd.f32 %v3954_v43, %v9540_v61  ;;  %v2612_v44 = vmul.f32 %v9209_v13, %v2570_v49  ;;  %v3256_v37 = vmul.f32 %v9212_v53, %v2570_v49  ;;  %13147 = vst [vmem:[#allocation77_spill] sm:$0xff] %v9748_v56  ;;  %v9753_v28 = vpop.f32.mrb[33].mxu0 }
 0x483   : > { %13143 = vst [vmem:[#allocation96_spill] sm:$0xff] %v9717_v59  ;;  %v2957_v33 = vmul.f32 %v9200_v7, %v2916_v31  ;;  %v3472_v35 = vmul.f32 %v9215_v63, %v2916_v31  ;;  %v3675_v1 = vmul.f32 %v9232_v15, %v2570_v49  ;;  %v3891_v9 = vmul.f32 %v9273_v32, %v2916_v31 }
 0x484   : > { %v2404_v14 = vsel %vm9664_vm9, 0.0, %v9732_v54  ;;  %v4254_v61 = vadd.f32 %v9277_v51, %v4178_v38  ;;  %v2753_v43 = vadd.f32 %v2689_v57, %v2612_v44  ;;  %v3397_v58 = vadd.f32 %v3333_v23, %v3256_v37  ;;  %13148 = vst [vmem:[#allocation78_spill] sm:$0xff] %v9753_v28  ;;  %v13153_v23 = vld [vmem:[#allocation87_spill] sm:$0xff] }
 0x485   : > { %v9751_v18 = vadd.f32 %v2957_v33, %v2751_v24  ;;  %v3536_v4 = vadd.f32 %v3472_v35, %v3395_v62  ;;  %v3816_v39 = vadd.f32 %v3752_v8, %v3675_v1  ;;  %v3955_v22 = vadd.f32 %v3891_v9, %v3814_v25  ;;  %v9779_v33 = vpop.f32.mrb[34].mxu0 }
 0x486   : > { %v2468_v49 = vrot.slane %v2404_v14, 7  ;;  %v13150_v31 = vand.u32 15, %v13149_v48  ;;  %v2690_v56 = vmul.f32 %v9172_v47, %v9732_v54  ;;  %v2814_v57 = vrot.slane %v9732_v54, 1  ;;  %13155 = vst [vmem:[#allocation62_spill] sm:$0xff] %v9779_v33 }
 0x487   : > { %v3334_v24 = vmul.f32 %v9175_v0, %v9732_v54  ;;  %v3753_v62 = vmul.f32 %v9222_v2, %v9732_v54  ;;  %v9769_v25 = vadd.f32 %v3536_v4, %v9577_v60  ;;  %v4179_v48 = vadd.f32 %v3955_v22, %v13153_v23  ;;  %v13157_v54 = vld [vmem:[#allocation60_spill] sm:$0xff] }
 0x488   : > { %vm9757_vm10 = vcmp.eq.s32.totalorder %v13150_v31, 0  ;;  %v13154_v8 = vrot.slane %v9599_v26, 7  ;;  %v2405_v44 = vsel %vm9664_vm9, 0.0, %v9736_v45  ;;  %v2913_v60 = vsel %vm2864_vm2, %v9654_v12, %v2814_v57  ;;  %v9787_v26 = vpop.f32.mrb[35].mxu0 }
 0x489   : > { %13156 = vst [vmem:[#allocation87_spill] sm:$0xff] %v9787_v26  ;;  %v4255_v35 = vadd.f32 %v13157_v54, %v4179_v48  ;;  %v2958_v1 = vmul.f32 %v9187_v46, %v2913_v60  ;;  %v3473_v29 = vmul.f32 %v9190_v16, %v2913_v60  ;;  %v3892_v9 = vmul.f32 %v9261_v41, %v2913_v60  ;;  %v13161_v60 = vld [vmem:[#allocation80_spill] sm:$0xff] }
 0x48a   : > { %v2567_v38 = vsel %vm2518_vm3, %v13154_v8, %v2468_v49  ;;  %v9793_v8 = vrot.slane %v2405_v44, 7  ;;  %v2691_v28 = vmul.f32 %v9181_v50, %v9736_v45 }
 0x48b   : > { %v2613_v37 = vmul.f32 %v9197_v52, %v2567_v38  ;;  %v3257_v4 = vmul.f32 %v9206_v27, %v2567_v38  ;;  %v3676_v22 = vmul.f32 %v9219_v20, %v2567_v38  ;;  %v9795_v12 = vmul.f32 %v4255_v35, %v4254_v61 }
 0x48c   : > { %v9798_v33 = vadd.f32 %v2958_v1, %v9698_v42  ;;  %v3537_v38 = vadd.f32 %v3473_v29, %v3396_v55  ;;  %v3956_v26 = vadd.f32 %v3892_v9, %v3815_v19  ;;  %v2568_v48 = vsel %vm2518_vm3, %v2467_v30, %v9793_v8  ;;  %v13163_v29 = vld [vmem:[#allocation52_spill] sm:$0xff] }
 0x48d   : > { %v2754_v14 = vadd.f32 %v2690_v56, %v2613_v37  ;;  %v3398_v31 = vadd.f32 %v3334_v24, %v3257_v4  ;;  %v3817_v23 = vadd.f32 %v3753_v62, %v3676_v22  ;;  %13158 = vst [vmem:[#allocation98_spill] sm:$0xff] %v9795_v12  ;;  %v2815_v56 = vrot.slane %v9736_v45, 1  ;;  %v13160_v62 = vld [vmem:[#allocation74_spill] sm:$0xff] }
 0x48e   : > { %v3335_v24 = vmul.f32 %v9184_v40, %v9736_v45  ;;  %v9809_v61 = vadd.f32 %v3537_v38, %v9620_v10  ;;  %v4180_v42 = vadd.f32 %v3956_v26, %v13160_v62  ;;  %v2614_v55 = vmul.f32 %v9209_v13, %v2568_v48  ;;  %v9824_v10 = vpop.f32.mrb[36].mxu0 }
 0x48f   : > { %v3258_v19 = vmul.f32 %v9212_v53, %v2568_v48  ;;  %v2914_v30 = vsel %vm2864_vm2, %v9712_v17, %v2815_v56  ;;  %v3677_v44 = vmul.f32 %v9232_v15, %v2568_v48  ;;  %v3754_v37 = vmul.f32 %v9225_v6, %v9736_v45  ;;  %13162 = vst [vmem:[#allocation74_spill] sm:$0xff] %v9824_v10 }
 0x490   : > { %13159 = vst [vmem:[#allocation99_spill] sm:$0xff] %v9809_v61  ;;  %v9822_v4 = vadd.f32 %v13161_v60, %v9165_v11  ;;  %v4256_v22 = vadd.f32 %v9277_v51, %v4180_v42  ;;  %v2755_v26 = vadd.f32 %v2691_v28, %v2614_v55  ;;  %v2959_v35 = vmul.f32 %v9200_v7, %v2914_v30  ;;  %v9839_v42 = vpop.f32.mrb[37].mxu0 }
 0x491   : > { %v3399_v1 = vadd.f32 %v3335_v24, %v3258_v19  ;;  %v13164_v9 = vand.u32 15, %v13163_v29  ;;  %v3474_v45 = vmul.f32 %v9215_v63, %v2914_v30  ;;  %v3818_v38 = vadd.f32 %v3754_v37, %v3677_v44  ;;  %13167 = vst [vmem:[#allocation80_spill] sm:$0xff] %v9839_v42 }
 0x492   : > { %v3893_v48 = vmul.f32 %v9273_v32, %v2914_v30  ;;  %v2246_v62 = vsel %vm9757_vm10, 0.0, %v9822_v4  ;;  %v9841_v28 = vadd.f32 %v2959_v35, %v2753_v43  ;;  %v2470_v24 = vrot.slane %v9822_v4, 7  ;;  %v13169_v35 = vld [vmem:[#allocation82_spill] sm:$0xff] }
 0x493   : > { %vm9830_vm11 = vcmp.eq.s32.totalorder %v13164_v9, 15  ;;  %v2692_v55 = vmul.f32 %v9172_v47, %v9822_v4  ;;  %v2816_v19 = vrot.slane %v2246_v62, 1  ;;  %v3538_v60 = vadd.f32 %v3474_v45, %v3397_v58  ;;  %v13170_v62 = vld [vmem:[#allocation83_spill] sm:$0xff] }
 0x494   : > { %13168 = vst [vmem:[#allocation52_spill] sm:$0xff] %v9841_v28  ;;  %v3957_v29 = vadd.f32 %v3893_v48, %v3816_v39  ;;  %v3336_v44 = vmul.f32 %v9175_v0, %v9822_v4  ;;  %v3755_v30 = vmul.f32 %v9222_v2, %v9822_v4  ;;  %v2565_v37 = vsel %vm2518_vm3, %v2468_v49, %v2470_v24 }
 0x495   : > { %v2911_v43 = vsel %vm2864_vm2, %v2814_v57, %v2816_v19  ;;  %v9856_v9 = vadd.f32 %v13169_v35, %v9178_v36  ;;  %v9860_v58 = vadd.f32 %v13170_v62, %v9165_v11  ;;  %v9863_v39 = vadd.f32 %v3538_v60, %v9680_v34 }
 0x496   : > { %v4181_v45 = vadd.f32 %v3957_v29, %v9690_v21  ;;  %v2615_v4 = vmul.f32 %v9197_v52, %v2565_v37  ;;  %v2960_v49 = vmul.f32 %v9187_v46, %v2911_v43  ;;  %v3259_v48 = vmul.f32 %v9206_v27, %v2565_v37 }
 0x497   : > { %13171 = vst [vmem:[#allocation82_spill] sm:$0xff] %v9863_v39  ;;  %v3475_v57 = vmul.f32 %v9190_v16, %v2911_v43  ;;  %v3678_v35 = vmul.f32 %v9219_v20, %v2565_v37  ;;  %v3894_v12 = vmul.f32 %v9261_v41, %v2911_v43  ;;  %v2247_v34 = vsel %vm9757_vm10, 0.0, %v9856_v9 }
 0x498   : > { %v4257_v62 = vadd.f32 %v13157_v54, %v4181_v45  ;;  %v2756_v42 = vadd.f32 %v2692_v55, %v2615_v4  ;;  %v9873_v10 = vadd.f32 %v2960_v49, %v2754_v14  ;;  %v3400_v21 = vadd.f32 %v3336_v44, %v3259_v48  ;;  %v13175_v14 = vld [vmem:[#allocation96_spill] sm:$0xff] }
 0x499   : > { %v3539_v60 = vadd.f32 %v3475_v57, %v3398_v31  ;;  %v3819_v29 = vadd.f32 %v3755_v30, %v3678_v35  ;;  %v3958_v39 = vadd.f32 %v3894_v12, %v3817_v23  ;;  %v12860_v61 = vrot.slane %v9856_v9, 7  ;;  %v13176_v49 = vld [vmem:[#allocation64_spill] sm:$0xff] }
 0x49a   : > { %13172 = vst [vmem:[#allocation83_spill] sm:$0xff] %v9873_v10  ;;  %v9878_v28 = vmul.f32 %v4257_v62, %v4256_v22  ;;  %v2693_v37 = vmul.f32 %v9181_v50, %v9856_v9  ;;  %v2817_v43 = vrot.slane %v2247_v34, 1  ;;  %v3337_v59 = vmul.f32 %v9184_v40, %v9856_v9 }
 0x49b   : > { %v9884_v55 = vadd.f32 %v3539_v60, %v9700_v5  ;;  %v4182_v45 = vadd.f32 %v3958_v39, %v13175_v14  ;;  %v3756_v31 = vmul.f32 %v9225_v6, %v9856_v9  ;;  %v2566_v23 = vsel %vm2518_vm3, %v9793_v8, %v12860_v61 }
 0x49c   : > { %13173 = vst [vmem:[#allocation100_spill] sm:$0xff] %v9878_v28  ;;  %v2912_v12 = vsel %vm2864_vm2, %v2815_v56, %v2817_v43  ;;  %v2408_v5 = vsel %vm9830_vm11, 0.0, %v9860_v58  ;;  %v2694_v22 = vmul.f32 %v9172_v47, %v9860_v58  ;;  %v2616_v30 = vmul.f32 %v9209_v13, %v2566_v23 }
 0x49d   : > { %13174 = vst [vmem:[#allocation101_spill] sm:$0xff] %v9884_v55  ;;  %v4258_v44 = vadd.f32 %v9277_v51, %v4182_v45  ;;  %v2961_v39 = vmul.f32 %v9200_v7, %v2912_v12  ;;  %v3260_v4 = vmul.f32 %v9212_v53, %v2566_v23  ;;  %v13177_v8 = vand.u32 15, %v13176_v49  ;;  %v9921_v55 = vpop.f32.mrb[38].mxu0 }
 0x49e   : > { %v3476_v56 = vmul.f32 %v9215_v63, %v2912_v12  ;;  %v3679_v57 = vmul.f32 %v9232_v15, %v2566_v23  ;;  %v3895_v35 = vmul.f32 %v9273_v32, %v2912_v12  ;;  %v2472_v62 = vrot.slane %v2408_v5, 7  ;;  %13180 = vst [vmem:[#allocation96_spill] sm:$0xff] %v9921_v55 }
 0x49f   : > { %vm9909_vm12 = vcmp.eq.s32.totalorder %v13177_v8, 0  ;;  %v2757_v34 = vadd.f32 %v2693_v37, %v2616_v30  ;;  %v9916_v60 = vadd.f32 %v2961_v39, %v2755_v26  ;;  %v3401_v14 = vadd.f32 %v3337_v59, %v3260_v4  ;;  %v9929_v59 = vpop.f32.mrb[39].mxu0 }
 0x4a0   : > { %v2818_v45 = vrot.slane %v9860_v58, 1  ;;  %v3540_v61 = vadd.f32 %v3476_v56, %v3399_v1  ;;  %v3820_v28 = vadd.f32 %v3756_v31, %v3679_v57  ;;  %v3959_v49 = vadd.f32 %v3895_v35, %v3818_v38  ;;  %13181 = vst [vmem:[#allocation64_spill] sm:$0xff] %v9929_v59  ;;  %v13185_v35 = vld [vmem:[#allocation86_spill] sm:$0xff]  ;;  %v9979_v17 = vpop.f32.mrb[40].mxu0 }
 0x4a1   : > { %v2563_v8 = vsel %vm2518_vm3, %v2470_v24, %v2472_v62  ;;  %v3338_v26 = vmul.f32 %v9175_v0, %v9860_v58  ;;  %v3757_v30 = vmul.f32 %v9222_v2, %v9860_v58  ;;  %13190 = vst [vmem:[#allocation86_spill] sm:$0xff] %v9979_v17  ;;  %v10014_v17 = vpop.f32.mrb[41].mxu0 }
 0x4a2   : > { %v2617_v10 = vmul.f32 %v9197_v52, %v2563_v8  ;;  %v2909_v23 = vsel %vm2864_vm2, %v2816_v19, %v2818_v45  ;;  %v3261_v37 = vmul.f32 %v9206_v27, %v2563_v8  ;;  %v9932_v1 = vadd.f32 %v3540_v61, %v9751_v18 }
 0x4a3   : > { %v4183_v38 = vadd.f32 %v3959_v49, %v9769_v25  ;;  %v2962_v24 = vmul.f32 %v9187_v46, %v2909_v23  ;;  %v3477_v31 = vmul.f32 %v9190_v16, %v2909_v23  ;;  %v3680_v19 = vmul.f32 %v9219_v20, %v2563_v8  ;;  %v13183_v25 = vld [vmem:[#allocation84_spill] sm:$0xff] }
 0x4a4   : > { %v2758_v12 = vadd.f32 %v2694_v22, %v2617_v10  ;;  %v3402_v5 = vadd.f32 %v3338_v26, %v3261_v37  ;;  %v3896_v18 = vmul.f32 %v9261_v41, %v2909_v23  ;;  %v9946_v57 = vadd.f32 %v13183_v25, %v9178_v36  ;;  %v13184_v10 = vld [vmem:[#allocation85_spill] sm:$0xff]  ;;  %v13188_v8 = vld [vmem:[#allocation88_spill] sm:$0xff] }
 0x4a5   : > { %v4259_v39 = vadd.f32 %v13157_v54, %v4183_v38  ;;  %v9941_v4 = vadd.f32 %v2962_v24, %v2756_v42  ;;  %v3541_v56 = vadd.f32 %v3477_v31, %v3400_v21  ;;  %v3821_v61 = vadd.f32 %v3757_v30, %v3680_v19  ;;  %v13189_v24 = vld [vmem:[#allocation99_spill] sm:$0xff]  ;;  %v13191_v25 = vld [vmem:[#allocation53_spill] sm:$0xff]  ;;  %13197 = vst [vmem:[#allocation88_spill] sm:$0xff] %v10014_v17 }
 0x4a6   : > { %v9950_v22 = vadd.f32 %v13184_v10, %v9165_v11  ;;  %v9954_v49 = vadd.f32 %v13185_v35, %v9178_v36  ;;  %v3960_v21 = vadd.f32 %v3896_v18, %v3819_v29  ;;  %v9963_v23 = vadd.f32 %v13188_v8, %v9165_v11 }
 0x4a7   : > { %13182 = vst [vmem:[#allocation102_spill] sm:$0xff] %v9941_v4  ;;  %v9956_v58 = vmul.f32 %v4259_v39, %v4258_v44  ;;  %v9959_v42 = vadd.f32 %v3541_v56, %v9798_v33  ;;  %v2409_v37 = vsel %vm9830_vm11, 0.0, %v9946_v57  ;;  %v2695_v26 = vmul.f32 %v9181_v50, %v9946_v57  ;;  %v13198_v4 = vld [vmem:[#allocation52_spill] sm:$0xff] }
 0x4a8   : > { %v2819_v38 = vrot.slane %v9946_v57, 1  ;;  %v3339_v44 = vmul.f32 %v9184_v40, %v9946_v57  ;;  %v4184_v33 = vadd.f32 %v3960_v21, %v13189_v24  ;;  %v2473_v31 = vrot.slane %v2409_v37, 7 }
 0x4a9   : > { %13186 = vst [vmem:[#allocation84_spill] sm:$0xff] %v9956_v58  ;;  %13187 = vst [vmem:[#allocation85_spill] sm:$0xff] %v9959_v42  ;;  %v3758_v29 = vmul.f32 %v9225_v6, %v9946_v57  ;;  %v2250_v19 = vsel %vm9909_vm12, 0.0, %v9950_v22  ;;  %v2696_v56 = vmul.f32 %v9172_v47, %v9950_v22  ;;  %v13192_v10 = vand.u32 15, %v13191_v25 }
 0x4aa   : > { %v2910_v30 = vsel %vm2864_vm2, %v2817_v43, %v2819_v38  ;;  %v9986_v18 = vrot.slane %v2250_v19, 1  ;;  %v4260_v35 = vadd.f32 %v9277_v51, %v4184_v33  ;;  %v13195_v21 = vrot.slane %v9856_v9, 7 }
 0x4ab   : > { %vm9990_vm13 = vcmp.eq.s32.totalorder %v13192_v10, 15  ;;  %v2963_v8 = vmul.f32 %v9200_v7, %v2910_v30  ;;  %v3478_v37 = vmul.f32 %v9215_v63, %v2910_v30  ;;  %v3897_v10 = vmul.f32 %v9273_v32, %v2910_v30 }
 0x4ac   : > { %v2564_v43 = vsel %vm2518_vm3, %v13195_v21, %v2473_v31  ;;  %v13196_v9 = vrot.slane %v9950_v22, 7  ;;  %v2907_v58 = vsel %vm2864_vm2, %v2818_v45, %v9986_v18  ;;  %v3340_v45 = vmul.f32 %v9175_v0, %v9950_v22 }
 0x4ad   : > { %v2618_v24 = vmul.f32 %v9209_v13, %v2564_v43  ;;  %v3262_v19 = vmul.f32 %v9212_v53, %v2564_v43  ;;  %v3681_v25 = vmul.f32 %v9232_v15, %v2564_v43  ;;  %v10005_v39 = vadd.f32 %v2963_v8, %v2757_v34 }
 0x4ae   : > { %v3542_v33 = vadd.f32 %v3478_v37, %v3401_v14  ;;  %v2561_v21 = vsel %vm2518_vm3, %v2472_v62, %v13196_v9  ;;  %v3961_v43 = vadd.f32 %v3897_v10, %v3820_v28  ;;  %v2964_v14 = vmul.f32 %v9187_v46, %v2907_v58  ;;  %v13199_v62 = vld [vmem:[#allocation82_spill] sm:$0xff] }
 0x4af   : > { %v2759_v59 = vadd.f32 %v2695_v26, %v2618_v24  ;;  %v3403_v55 = vadd.f32 %v3339_v44, %v3262_v19  ;;  %v3822_v42 = vadd.f32 %v3758_v29, %v3681_v25  ;;  %v2619_v34 = vmul.f32 %v9197_v52, %v2561_v21 }
 0x4b0   : > { %v10017_v30 = vadd.f32 %v3542_v33, %v13198_v4  ;;  %v3263_v8 = vmul.f32 %v9206_v27, %v2561_v21  ;;  %v4185_v37 = vadd.f32 %v3961_v43, %v13199_v62  ;;  %v3479_v9 = vmul.f32 %v9190_v16, %v2907_v58 }
 0x4b1   : > { %v3682_v26 = vmul.f32 %v9219_v20, %v2561_v21  ;;  %v2760_v44 = vadd.f32 %v2696_v56, %v2619_v34  ;;  %v10027_v28 = vadd.f32 %v2964_v14, %v2758_v12  ;;  %v3759_v4 = vmul.f32 %v9222_v2, %v9950_v22  ;;  %v13201_v34 = vld [vmem:[#allocation83_spill] sm:$0xff] }
 0x4b2   : > { %v3898_v29 = vmul.f32 %v9261_v41, %v2907_v58  ;;  %v4261_v24 = vadd.f32 %v13157_v54, %v4185_v37  ;;  %v3404_v19 = vadd.f32 %v3340_v45, %v3263_v8  ;;  %v3543_v25 = vadd.f32 %v3479_v9, %v3402_v5  ;;  %v13203_v8 = vld [vmem:[#allocation101_spill] sm:$0xff] }
 0x4b3   : > { %v2251_v10 = vsel %vm9909_vm12, 0.0, %v9954_v49  ;;  %v3823_v33 = vadd.f32 %v3759_v4, %v3682_v26  ;;  %v2475_v21 = vrot.slane %v9954_v49, 7  ;;  %v2697_v12 = vmul.f32 %v9181_v50, %v9954_v49  ;;  %v13204_v4 = vld [vmem:[#allocation58_spill] sm:$0xff] }
 0x4b4   : > { %v3962_v43 = vadd.f32 %v3898_v29, %v3821_v61  ;;  %v10039_v56 = vmul.f32 %v4261_v24, %v4260_v35  ;;  %v10042_v14 = vadd.f32 %v3543_v25, %v13201_v34  ;;  %v2821_v58 = vrot.slane %v2251_v10, 1 }
 0x4b5   : > { %v3341_v5 = vmul.f32 %v9184_v40, %v9954_v49  ;;  %v2562_v48 = vsel %vm2518_vm3, %v2473_v31, %v2475_v21  ;;  %v3760_v61 = vmul.f32 %v9225_v6, %v9954_v49  ;;  %v2412_v35 = vsel %vm9990_vm13, 0.0, %v9963_v23  ;;  %v10065_v49 = vpop.f32.mrb[42].mxu0 }
 0x4b6   : > { %13200 = vst [vmem:[#allocation99_spill] sm:$0xff] %v10039_v56  ;;  %13202 = vst [vmem:[#allocation53_spill] sm:$0xff] %v10042_v14  ;;  %v4186_v62 = vadd.f32 %v3962_v43, %v13203_v8  ;;  %v2620_v37 = vmul.f32 %v9209_v13, %v2562_v48  ;;  %v2908_v45 = vsel %vm2864_vm2, %v2819_v38, %v2821_v58  ;;  %v13205_v29 = vand.u32 15, %v13204_v4 }
 0x4b7   : > { %v3264_v9 = vmul.f32 %v9212_v53, %v2562_v48  ;;  %v3683_v26 = vmul.f32 %v9232_v15, %v2562_v48  ;;  %13208 = vst [vmem:[#allocation52_spill] sm:$0xff] %v10065_v49  ;;  %v2965_v25 = vmul.f32 %v9200_v7, %v2908_v45  ;;  %v3480_v10 = vmul.f32 %v9215_v63, %v2908_v45 }
 0x4b8   : > { %vm10061_vm14 = vcmp.eq.s32.totalorder %v13205_v29, 0  ;;  %v4262_v24 = vadd.f32 %v9277_v51, %v4186_v62  ;;  %v3899_v38 = vmul.f32 %v9273_v32, %v2908_v45  ;;  %v2761_v43 = vadd.f32 %v2697_v12, %v2620_v37  ;;  %v13211_v45 = vld [vmem:[#allocation71_spill] sm:$0xff] }
 0x4b9   : > { %v3405_v34 = vadd.f32 %v3341_v5, %v3264_v9  ;;  %v3824_v8 = vadd.f32 %v3760_v61, %v3683_v26  ;;  %v2476_v48 = vrot.slane %v2412_v35, 7  ;;  %v10071_v56 = vadd.f32 %v2965_v25, %v2759_v59  ;;  %v10084_v59 = vpop.f32.mrb[43].mxu0  ;;  %v13212_v9 = vld [vmem:[#allocation73_spill] sm:$0xff] }
 0x4ba   : > { %v3544_v4 = vadd.f32 %v3480_v10, %v3403_v55  ;;  %v3963_v29 = vadd.f32 %v3899_v38, %v3822_v42  ;;  %v2698_v17 = vmul.f32 %v9172_v47, %v9963_v23  ;;  %v13209_v49 = vrot.slane %v9950_v22, 7  ;;  %13210 = vst [vmem:[#allocation82_spill] sm:$0xff] %v10084_v59  ;;  %v10149_v59 = vpop.f32.mrb[44].mxu0 }
 0x4bb   : > { %v2822_v14 = vrot.slane %v9963_v23, 1  ;;  %v3342_v12 = vmul.f32 %v9175_v0, %v9963_v23  ;;  %v3761_v5 = vmul.f32 %v9222_v2, %v9963_v23  ;;  %v10098_v23 = vadd.f32 %v13211_v45, %v9178_v36  ;;  %13217 = vst [vmem:[#allocation58_spill] sm:$0xff] %v10149_v59 }
 0x4bc   : > { %v2559_v62 = vsel %vm2518_vm3, %v13209_v49, %v2476_v48  ;;  %v10087_v55 = vadd.f32 %v3544_v4, %v9916_v60  ;;  %v4187_v42 = vadd.f32 %v3963_v29, %v9932_v1  ;;  %v10102_v60 = vadd.f32 %v13212_v9, %v9165_v11 }
 0x4bd   : > { %v2621_v22 = vmul.f32 %v9197_v52, %v2559_v62  ;;  %v3265_v61 = vmul.f32 %v9206_v27, %v2559_v62  ;;  %v2905_v35 = vsel %vm2864_vm2, %v9986_v18, %v2822_v14  ;;  %v3684_v37 = vmul.f32 %v9219_v20, %v2559_v62 }
 0x4be   : > { %v4263_v1 = vadd.f32 %v13157_v54, %v4187_v42  ;;  %v2966_v49 = vmul.f32 %v9187_v46, %v2905_v35  ;;  %v3481_v10 = vmul.f32 %v9190_v16, %v2905_v35  ;;  %v3900_v18 = vmul.f32 %v9261_v41, %v2905_v35  ;;  %v13214_v35 = vld [vmem:[#allocation102_spill] sm:$0xff] }
 0x4bf   : > { %v2762_v26 = vadd.f32 %v2698_v17, %v2621_v22  ;;  %v3406_v25 = vadd.f32 %v3342_v12, %v3265_v61  ;;  %v3825_v38 = vadd.f32 %v3761_v5, %v3684_v37  ;;  %v2413_v4 = vsel %vm9990_vm13, 0.0, %v10098_v23 }
 0x4c0   : > { %v10111_v29 = vmul.f32 %v4263_v1, %v4262_v24  ;;  %v10113_v62 = vadd.f32 %v2966_v49, %v2760_v44  ;;  %v2477_v45 = vrot.slane %v2413_v4, 7  ;;  %v2699_v17 = vmul.f32 %v9181_v50, %v10098_v23 }
 0x4c1   : > { %v3545_v42 = vadd.f32 %v3481_v10, %v3404_v19  ;;  %v3964_v22 = vadd.f32 %v3900_v18, %v3823_v33  ;;  %v12864_v12 = vrot.slane %v10098_v23, 1  ;;  %v3343_v5 = vmul.f32 %v9184_v40, %v10098_v23  ;;  %v13216_v33 = vld [vmem:[#allocation85_spill] sm:$0xff] }
 0x4c2   : > { %13213 = vst [vmem:[#allocation83_spill] sm:$0xff] %v10111_v29  ;;  %v2560_v61 = vsel %vm2518_vm3, %v2475_v21, %v2477_v45  ;;  %v3762_v57 = vmul.f32 %v9225_v6, %v10098_v23  ;;  %v2254_v44 = vsel %vm10061_vm14, 0.0, %v10102_v60  ;;  %v12867_v24 = vrot.slane %v10102_v60, 7 }
 0x4c3   : > { %v10129_v19 = vadd.f32 %v3545_v42, %v13214_v35  ;;  %v4188_v37 = vadd.f32 %v3964_v22, %v13216_v33  ;;  %v2622_v9 = vmul.f32 %v9209_v13, %v2560_v61  ;;  %v2906_v21 = vsel %vm2864_vm2, %v2821_v58, %v12864_v12 }
 0x4c4   : > { %v2967_v1 = vmul.f32 %v9200_v7, %v2906_v21  ;;  %v3266_v49 = vmul.f32 %v9212_v53, %v2560_v61  ;;  %v3482_v10 = vmul.f32 %v9215_v63, %v2906_v21  ;;  %v3685_v18 = vmul.f32 %v9232_v15, %v2560_v61 }
 0x4c5   : > { %13215 = vst [vmem:[#allocation101_spill] sm:$0xff] %v10129_v19  ;;  %v4264_v4 = vadd.f32 %v9277_v51, %v4188_v37  ;;  %v2763_v42 = vadd.f32 %v2699_v17, %v2622_v9  ;;  %v3901_v22 = vmul.f32 %v9273_v32, %v2906_v21  ;;  %v2557_v35 = vsel %vm2518_vm3, %v2476_v48, %v12867_v24  ;;  %v10161_v48 = vpop.f32.mrb[45].mxu0 }
 0x4c6   : > { %v10147_v33 = vadd.f32 %v2967_v1, %v2761_v43  ;;  %v3407_v58 = vadd.f32 %v3343_v5, %v3266_v49  ;;  %v3546_v12 = vadd.f32 %v3482_v10, %v3405_v34  ;;  %v3826_v29 = vadd.f32 %v3762_v57, %v3685_v18  ;;  %13218 = vst [vmem:[#allocation71_spill] sm:$0xff] %v10161_v48 }
 0x4c7   : > { %v3965_v19 = vadd.f32 %v3901_v22, %v3824_v8  ;;  %v2623_v61 = vmul.f32 %v9197_v52, %v2557_v35  ;;  %v2700_v17 = vmul.f32 %v9172_v47, %v10102_v60  ;;  %v2824_v37 = vrot.slane %v2254_v44, 1  ;;  %v13219_v22 = vld [vmem:[#allocation90_spill] sm:$0xff] }
 0x4c8   : > { %v10155_v9 = vadd.f32 %v3546_v12, %v10005_v39  ;;  %v3267_v21 = vmul.f32 %v9206_v27, %v2557_v35  ;;  %v3344_v43 = vmul.f32 %v9175_v0, %v10102_v60  ;;  %v3686_v34 = vmul.f32 %v9219_v20, %v2557_v35 }
 0x4c9   : > { %v4189_v8 = vadd.f32 %v3965_v19, %v10017_v30  ;;  %v2764_v5 = vadd.f32 %v2700_v17, %v2623_v61  ;;  %v2903_v57 = vsel %vm2864_vm2, %v2822_v14, %v2824_v37  ;;  %v3763_v44 = vmul.f32 %v9222_v2, %v10102_v60  ;;  %v13220_v17 = vld [vmem:[#allocation91_spill] sm:$0xff] }
 0x4ca   : > { %v2968_v39 = vmul.f32 %v9187_v46, %v2903_v57  ;;  %v3408_v12 = vadd.f32 %v3344_v43, %v3267_v21  ;;  %v3483_v1 = vmul.f32 %v9190_v16, %v2903_v57  ;;  %v3902_v49 = vmul.f32 %v9261_v41, %v2903_v57 }
 0x4cb   : > { %v4265_v10 = vadd.f32 %v13157_v54, %v4189_v8  ;;  %v3827_v18 = vadd.f32 %v3763_v44, %v3686_v34  ;;  %v10174_v30 = vadd.f32 %v13219_v22, %v9178_v36  ;;  %v904_v19 = vadd.s32 104, %v9153_v3 }
 0x4cc   : > { %v10177_v14 = vadd.f32 %v2968_v39, %v2762_v26  ;;  %v3547_v35 = vadd.f32 %v3483_v1, %v3406_v25  ;;  %v3966_v61 = vadd.f32 %v3902_v49, %v3825_v38  ;;  %v10181_v21 = vadd.f32 %v13220_v17, %v9165_v11  ;;  %v13222_v25 = vld [vmem:[#allocation53_spill] sm:$0xff] }
 0x4cd   : > { %v10183_v43 = vmul.f32 %v4265_v10, %v4264_v4  ;;  %v2255_v34 = vsel %vm10061_vm14, 0.0, %v10174_v30  ;;  %v12866_v8 = vrot.slane %v10174_v30, 7  ;;  %v2701_v57 = vmul.f32 %v9181_v50, %v10174_v30 }
 0x4ce   : > { %v10192_v26 = vadd.f32 %v3547_v35, %v10027_v28  ;;  %v4190_v38 = vadd.f32 %v3966_v61, %v13222_v25  ;;  %v10195_v44 = vrot.slane %v2255_v34, 1  ;;  %v3345_v4 = vmul.f32 %v9184_v40, %v10174_v30 }
 0x4cf   : > { %13221 = vst [vmem:[#allocation73_spill] sm:$0xff] %v10183_v43  ;;  %v2558_v31 = vsel %vm2518_vm3, %v2477_v45, %v12866_v8  ;;  %v3764_v39 = vmul.f32 %v9225_v6, %v10174_v30  ;;  %v1845_v1 = vand.u32 15, %v904_v19  ;;  %v2702_v28 = vmul.f32 %v9172_v47, %v10181_v21 }
 0x4d0   : > { %v4266_v49 = vadd.f32 %v9277_v51, %v4190_v38  ;;  %v2624_v10 = vmul.f32 %v9209_v13, %v2558_v31  ;;  %v13223_v22 = vrot.slane %v10098_v23, 1  ;;  %v3268_v61 = vmul.f32 %v9212_v53, %v2558_v31 }
 0x4d1   : > { %v3687_v19 = vmul.f32 %v9232_v15, %v2558_v31  ;;  %vm10219_vm15 = vcmp.eq.s32.totalorder %v1845_v1, 15  ;;  %v12869_v23 = vrot.slane %v10181_v21, 1  ;;  %v3765_v31 = vmul.f32 %v9222_v2, %v10181_v21 }
 0x4d2   : > { %v2904_v35 = vsel %vm2864_vm2, %v13223_v22, %v10195_v44  ;;  %v2765_v25 = vadd.f32 %v2701_v57, %v2624_v10  ;;  %v3409_v38 = vadd.f32 %v3345_v4, %v3268_v61  ;;  %v2416_v59 = vsel %vm10219_vm15, 0.0, %v10181_v21 }
 0x4d3   : > { %v2969_v45 = vmul.f32 %v9200_v7, %v2904_v35  ;;  %v3484_v17 = vmul.f32 %v9215_v63, %v2904_v35  ;;  %v3903_v34 = vmul.f32 %v9273_v32, %v2904_v35  ;;  %v3828_v43 = vadd.f32 %v3764_v39, %v3687_v19 }
 0x4d4   : > { %v2901_v57 = vsel %vm2864_vm2, %v2824_v37, %v12869_v23  ;;  %v3346_v4 = vmul.f32 %v9175_v0, %v10181_v21  ;;  %v13227_v37 = vld [vmem:[#allocation54_spill] sm:$0xff]  ;;  %v905_v61 = vadd.s32 112, %v9153_v3 }
 0x4d5   : > { %v10224_v24 = vadd.f32 %v2969_v45, %v2763_v42  ;;  %v3548_v22 = vadd.f32 %v3484_v17, %v3407_v58  ;;  %v3967_v48 = vadd.f32 %v3903_v34, %v3826_v29  ;;  %v2480_v58 = vrot.slane %v2416_v59, 7  ;;  %v10249_v45 = vpop.f32.mrb[46].mxu0 }
 0x4d6   : > { %v2970_v39 = vmul.f32 %v9187_v46, %v2901_v57  ;;  %v3485_v1 = vmul.f32 %v9190_v16, %v2901_v57  ;;  %v3904_v10 = vmul.f32 %v9261_v41, %v2901_v57  ;;  %v10246_v35 = vadd.f32 %v13227_v37, %v9178_v36  ;;  %13228 = vst [vmem:[#allocation85_spill] sm:$0xff] %v10249_v45  ;;  %v10262_v34 = vpop.f32.mrb[47].mxu0 }
 0x4d7   : > { %v10238_v42 = vadd.f32 %v3548_v22, %v10071_v56  ;;  %v4191_v29 = vadd.f32 %v3967_v48, %v10087_v55  ;;  %v13229_v17 = vrot.slane %v10102_v60, 7  ;;  %v13231_v48 = vld [vmem:[#allocation93_spill] sm:$0xff]  ;;  %13232 = vst [vmem:[#allocation91_spill] sm:$0xff] %v10262_v34 }
 0x4d8   : > { %v10256_v55 = vadd.f32 %v2970_v39, %v2764_v5  ;;  %v10260_v19 = vadd.f32 %v13231_v48, %v9165_v11  ;;  %v3549_v37 = vadd.f32 %v3485_v1, %v3408_v12  ;;  %v3968_v60 = vadd.f32 %v3904_v10, %v3827_v18 }
 0x4d9   : > { %13226 = vst [vmem:[#allocation102_spill] sm:$0xff] %v10238_v42  ;;  %v4267_v56 = vadd.f32 %v13157_v54, %v4191_v29  ;;  %v2555_v59 = vsel %vm2518_vm3, %v13229_v17, %v2480_v58  ;;  %v2417_v5 = vsel %vm10219_vm15, 0.0, %v10246_v35  ;;  %v2703_v39 = vmul.f32 %v9181_v50, %v10246_v35 }
 0x4da   : > { %13230 = vst [vmem:[#allocation90_spill] sm:$0xff] %v10256_v55  ;;  %v2625_v22 = vmul.f32 %v9197_v52, %v2555_v59  ;;  %v3269_v57 = vmul.f32 %v9206_v27, %v2555_v59  ;;  %v3688_v29 = vmul.f32 %v9219_v20, %v2555_v59  ;;  %v10275_v34 = vadd.f32 %v3549_v37, %v10113_v62  ;;  %v13235_v55 = vld [vmem:[#allocation101_spill] sm:$0xff]  ;;  %v10300_v37 = vpop.f32.mrb[48].mxu0 }
 0x4db   : > { %v10267_v23 = vmul.f32 %v4267_v56, %v4266_v49  ;;  %v4192_v12 = vadd.f32 %v3968_v60, %v13235_v55  ;;  %v2481_v1 = vrot.slane %v2417_v5, 7  ;;  %v2827_v49 = vrot.slane %v10246_v35, 1  ;;  %13237 = vst [vmem:[#allocation93_spill] sm:$0xff] %v10300_v37 }
 0x4dc   : > { %v2766_v17 = vadd.f32 %v2702_v28, %v2625_v22  ;;  %v3410_v48 = vadd.f32 %v3346_v4, %v3269_v57  ;;  %13234 = vst [vmem:[#allocation54_spill] sm:$0xff] %v10275_v34  ;;  %v3829_v45 = vadd.f32 %v3765_v31, %v3688_v29  ;;  %v3347_v18 = vmul.f32 %v9184_v40, %v10246_v35 }
 0x4dd   : > { %13233 = vst [vmem:[#allocation53_spill] sm:$0xff] %v10267_v23  ;;  %v3766_v8 = vmul.f32 %v9225_v6, %v10246_v35  ;;  %v1852_v10 = vand.u32 15, %v905_v61  ;;  %v2482_v56 = vrot.slane %v10260_v19, 7  ;;  %v2704_v28 = vmul.f32 %v9172_v47, %v10260_v19 }
 0x4de   : > { %v4268_v62 = vadd.f32 %v9277_v51, %v4192_v12  ;;  %v13236_v4 = vrot.slane %v10174_v30, 7  ;;  %v2902_v59 = vsel %vm2864_vm2, %v10195_v44, %v2827_v49  ;;  %v3348_v35 = vmul.f32 %v9175_v0, %v10260_v19 }
 0x4df   : > { %v2971_v55 = vmul.f32 %v9200_v7, %v2902_v59  ;;  %v3486_v57 = vmul.f32 %v9215_v63, %v2902_v59  ;;  %v3905_v29 = vmul.f32 %v9273_v32, %v2902_v59  ;;  %vm10304_vm0 = vcmp.eq.s32.totalorder %v1852_v10, 0 }
 0x4e0   : > { %v2556_v31 = vsel %vm2518_vm3, %v13236_v4, %v2481_v1  ;;  %v2553_v44 = vsel %vm2518_vm3, %v2480_v58, %v2482_v56 }
 0x4e1   : > { %v2626_v61 = vmul.f32 %v9209_v13, %v2556_v31  ;;  %v3270_v22 = vmul.f32 %v9212_v53, %v2556_v31  ;;  %v3689_v30 = vmul.f32 %v9232_v15, %v2556_v31  ;;  %v10312_v12 = vadd.f32 %v2971_v55, %v2765_v25  ;;  %v10323_v25 = vpop.f32.mrb[49].mxu0 }
 0x4e2   : > { %v3550_v23 = vadd.f32 %v3486_v57, %v3409_v38  ;;  %v3969_v37 = vadd.f32 %v3905_v29, %v3828_v43  ;;  %v2258_v31 = vsel %vm10304_vm0, 0.0, %v10260_v19  ;;  %v2627_v10 = vmul.f32 %v9197_v52, %v2553_v44  ;;  %13240 = vst [vmem:[#allocation101_spill] sm:$0xff] %v10323_v25 }
 0x4e3   : > { %v2767_v5 = vadd.f32 %v2703_v39, %v2626_v61  ;;  %v3411_v4 = vadd.f32 %v3347_v18, %v3270_v22  ;;  %v3830_v34 = vadd.f32 %v3766_v8, %v3689_v30  ;;  %v2828_v42 = vrot.slane %v2258_v31, 1  ;;  %v13241_v18 = vld [vmem:[#allocation94_spill] sm:$0xff]  ;;  %v13243_v22 = vld [vmem:[#allocation95_spill] sm:$0xff] }
 0x4e4   : > { %v10319_v59 = vadd.f32 %v3550_v23, %v10147_v33  ;;  %v3271_v0 = vmul.f32 %v9206_v27, %v2553_v44  ;;  %v3690_v58 = vmul.f32 %v9219_v20, %v2553_v44  ;;  %v4193_v38 = vadd.f32 %v3969_v37, %v10155_v9 }
 0x4e5   : > { %v2768_v39 = vadd.f32 %v2704_v28, %v2627_v10  ;;  %v3767_v43 = vmul.f32 %v9222_v2, %v10260_v19  ;;  %v10330_v8 = vadd.f32 %v13241_v18, %v9178_v36  ;;  %v13242_v33 = vrot.slane %v10181_v21, 1 }
 0x4e6   : > { %v3412_v61 = vadd.f32 %v3348_v35, %v3271_v0  ;;  %v906_v55 = vadd.s32 120, %v9153_v3  ;;  %v10339_v57 = vadd.f32 %v13243_v22, %v9165_v11  ;;  %v4269_v9 = vadd.f32 %v13157_v54, %v4193_v38 }
 0x4e7   : > { %v2899_v23 = vsel %vm2864_vm2, %v13242_v33, %v2828_v42  ;;  %v3831_v30 = vadd.f32 %v3767_v43, %v3690_v58  ;;  %v2259_v21 = vsel %vm10304_vm0, 0.0, %v10330_v8  ;;  %v12873_v0 = vrot.slane %v10330_v8, 7 }
 0x4e8   : > { %v2972_v28 = vmul.f32 %v9187_v46, %v2899_v23  ;;  %v3487_v37 = vmul.f32 %v9190_v16, %v2899_v23  ;;  %v3906_v29 = vmul.f32 %v9261_v41, %v2899_v23  ;;  %v2705_v35 = vmul.f32 %v9181_v50, %v10330_v8 }
 0x4e9   : > { %v10351_v44 = vmul.f32 %v4269_v9, %v4268_v62  ;;  %v2829_v38 = vrot.slane %v2259_v21, 1  ;;  %v2554_v58 = vsel %vm2518_vm3, %v2481_v1, %v12873_v0  ;;  %v3349_v60 = vmul.f32 %v9184_v40, %v10330_v8 }
 0x4ea   : > { %v10353_v31 = vadd.f32 %v2972_v28, %v2766_v17  ;;  %v3551_v10 = vadd.f32 %v3487_v37, %v3410_v48  ;;  %v3970_v18 = vadd.f32 %v3906_v29, %v3829_v45  ;;  %v3768_v43 = vmul.f32 %v9225_v6, %v10330_v8  ;;  %v10375_v29 = vpop.f32.mrb[50].mxu0 }
 0x4eb   : > { %13244 = vst [vmem:[#allocation94_spill] sm:$0xff] %v10351_v44  ;;  %v2628_v17 = vmul.f32 %v9209_v13, %v2554_v58  ;;  %v2900_v48 = vsel %vm2864_vm2, %v2827_v49, %v2829_v38  ;;  %v3272_v45 = vmul.f32 %v9212_v53, %v2554_v58  ;;  %v3691_v22 = vmul.f32 %v9232_v15, %v2554_v58 }
 0x4ec   : > { %v10364_v33 = vadd.f32 %v3551_v10, %v10177_v14  ;;  %v4194_v62 = vadd.f32 %v3970_v18, %v10192_v26  ;;  %v2973_v1 = vmul.f32 %v9200_v7, %v2900_v48  ;;  %v3488_v23 = vmul.f32 %v9215_v63, %v2900_v48  ;;  %13246 = vst [vmem:[#allocation103_spill] sm:$0xff] %v10375_v29  ;;  %v13256_v18 = vld [vmem:[#allocation90_spill] sm:$0xff] }
 0x4ed   : > { %v2769_v9 = vadd.f32 %v2705_v35, %v2628_v17  ;;  %v3413_v28 = vadd.f32 %v3349_v60, %v3272_v45  ;;  %v3907_v14 = vmul.f32 %v9273_v32, %v2900_v48  ;;  %v1859_v37 = vand.u32 15, %v906_v55 }
 0x4ee   : > { %13245 = vst [vmem:[#allocation95_spill] sm:$0xff] %v10364_v33  ;;  %v4270_v21 = vadd.f32 %v9277_v51, %v4194_v62  ;;  %v10378_v49 = vadd.f32 %v2973_v1, %v2767_v5  ;;  %v3552_v10 = vadd.f32 %v3488_v23, %v3411_v4  ;;  %v3832_v0 = vadd.f32 %v3768_v43, %v3691_v22  ;;  %v13251_v4 = vld [vmem:[#allocation51_spill] sm:$0xff]  ;;  %v13252_v43 = vld [vmem:[#allocation102_spill] sm:$0xff]  ;;  %v10406_v1 = vpop.f32.mrb[51].mxu0 }
 0x4ef   : > { %v3971_v26 = vadd.f32 %v3907_v14, %v3830_v34  ;;  %vm10380_vm1 = vcmp.eq.s32.totalorder %v1859_v37, 15  ;;  %v2706_v35 = vmul.f32 %v9172_v47, %v10339_v57  ;;  %v12874_v58 = vrot.slane %v10339_v57, 1  ;;  %13254 = vst [vmem:[#allocation51_spill] sm:$0xff] %v10406_v1  ;;  %v13257_v33 = vld [vmem:[#allocation54_spill] sm:$0xff] }
 0x4f0   : > { %13247 = vst [vmem:[#allocation104_spill] sm:$0xff] %v10378_v49  ;;  %v10388_v55 = vadd.f32 %v3552_v10, %v10224_v24  ;;  %v2420_v5 = vsel %vm10380_vm1, 0.0, %v10339_v57  ;;  %v3350_v60 = vmul.f32 %v13251_v4, %v10339_v57  ;;  %v3769_v34 = vmul.f32 %v9222_v2, %v10339_v57  ;;  %v13253_v24 = vld [vmem:[#allocation97_spill] sm:$0xff] }
 0x4f1   : > { %v4195_v17 = vadd.f32 %v3971_v26, %v13252_v43  ;;  %v2484_v48 = vrot.slane %v2420_v5, 7  ;;  %v2897_v45 = vsel %vm2864_vm2, %v2828_v42, %v12874_v58  ;;  %v10404_v62 = vadd.f32 %v13253_v24, %v9178_v36 }
 0x4f2   : > { %13250 = vst [vmem:[#allocation105_spill] sm:$0xff] %v10388_v55  ;;  %v2974_v23 = vmul.f32 %v9187_v46, %v2897_v45  ;;  %v3489_v22 = vmul.f32 %v9190_v16, %v2897_v45  ;;  %v3908_v14 = vmul.f32 %v9261_v41, %v2897_v45  ;;  %v907_v37 = vadd.s32 128, %v9153_v3 }
 0x4f3   : > { %v4271_v10 = vadd.f32 %v13157_v54, %v4195_v17  ;;  %v2551_v42 = vsel %vm2518_vm3, %v2482_v56, %v2484_v48  ;;  %v2421_v26 = vsel %vm10380_vm1, 0.0, %v10404_v62  ;;  %v2707_v5 = vmul.f32 %v9181_v50, %v10404_v62 }
 0x4f4   : > { %v2629_v43 = vmul.f32 %v9197_v52, %v2551_v42  ;;  %v10423_v24 = vadd.f32 %v2974_v23, %v2768_v39  ;;  %v3273_v45 = vmul.f32 %v9206_v27, %v2551_v42  ;;  %v3553_v58 = vadd.f32 %v3489_v22, %v3412_v61 }
 0x4f5   : > { %v10426_v17 = vmul.f32 %v4271_v10, %v4270_v21  ;;  %v3692_v19 = vmul.f32 %v9219_v20, %v2551_v42  ;;  %v3972_v44 = vadd.f32 %v3908_v14, %v3831_v30  ;;  %v2485_v56 = vrot.slane %v2421_v26, 7  ;;  %v13259_v42 = vld [vmem:[#allocation77_spill] sm:$0xff] }
 0x4f6   : > { %v2770_v1 = vadd.f32 %v2706_v35, %v2629_v43  ;;  %v3414_v29 = vadd.f32 %v3350_v60, %v3273_v45  ;;  %v10430_v25 = vadd.f32 %v3553_v58, %v13256_v18  ;;  %v2831_v55 = vrot.slane %v10404_v62, 1 }
 0x4f7   : > { %13255 = vst [vmem:[#allocation102_spill] sm:$0xff] %v10426_v17  ;;  %v3833_v49 = vadd.f32 %v3769_v34, %v3692_v19  ;;  %v4196_v39 = vadd.f32 %v3972_v44, %v13257_v33  ;;  %v13258_v23 = vrot.slane %v10330_v8, 7  ;;  %v3351_v21 = vmul.f32 %v9184_v40, %v10404_v62 }
 0x4f8   : > { %v2898_v35 = vsel %vm2864_vm2, %v2829_v38, %v2831_v55  ;;  %v3770_v33 = vmul.f32 %v9225_v6, %v10404_v62  ;;  %v10453_v38 = vadd.f32 %v13259_v42, %v9165_v11  ;;  %v1866_v19 = vand.u32 15, %v907_v37 }
 0x4f9   : > { %v2552_v61 = vsel %vm2518_vm3, %v13258_v23, %v2485_v56  ;;  %v4272_v34 = vadd.f32 %v9277_v51, %v4196_v39  ;;  %v2975_v44 = vmul.f32 %v9200_v7, %v2898_v35  ;;  %v3490_v8 = vmul.f32 %v9215_v63, %v2898_v35 }
 0x4fa   : > { %v2630_v30 = vmul.f32 %v9209_v13, %v2552_v61  ;;  %v3274_v58 = vmul.f32 %v9212_v53, %v2552_v61  ;;  %v3693_v60 = vmul.f32 %v9232_v15, %v2552_v61  ;;  %v3909_v10 = vmul.f32 %v9273_v32, %v2898_v35 }
 0x4fb   : > { %v10455_v26 = vadd.f32 %v2975_v44, %v2769_v9  ;;  %v3554_v43 = vadd.f32 %v3490_v8, %v3413_v28  ;;  %v12876_v39 = vrot.slane %v10453_v38, 7  ;;  %v2708_v23 = vmul.f32 %v9172_v47, %v10453_v38  ;;  %v13263_v28 = vld [vmem:[#allocation78_spill] sm:$0xff] }
 0x4fc   : > { %v2771_v22 = vadd.f32 %v2707_v5, %v2630_v30  ;;  %v3415_v14 = vadd.f32 %v3351_v21, %v3274_v58  ;;  %v3834_v45 = vadd.f32 %v3770_v33, %v3693_v60  ;;  %v3973_v18 = vadd.f32 %v3909_v10, %v3832_v0  ;;  %v10462_v5 = vpop.f32.mrb[52].mxu0 }
 0x4fd   : > { %v3352_v62 = vmul.f32 %v13251_v4, %v10453_v38  ;;  %13260 = vst [vmem:[#allocation97_spill] sm:$0xff] %v10462_v5  ;;  %v10465_v61 = vadd.f32 %v3554_v43, %v10312_v12  ;;  %vm10467_vm4 = vcmp.eq.s32.totalorder %v1866_v19, 0  ;;  %v3771_v0 = vmul.f32 %v9222_v2, %v10453_v38  ;;  %v10486_v58 = vpop.f32.mrb[53].mxu0 }
 0x4fe   : > { %v10475_v37 = vadd.f32 %v13263_v28, %v9178_v36  ;;  %v4197_v21 = vadd.f32 %v3973_v18, %v10319_v59  ;;  %v2262_v30 = vsel %vm10467_vm4, 0.0, %v10453_v38  ;;  %v2549_v12 = vsel %vm2518_vm3, %v2484_v48, %v12876_v39  ;;  %13264 = vst [vmem:[#allocation90_spill] sm:$0xff] %v10486_v58 }
 0x4ff   : > { %v908_v35 = vadd.s32 136, %v9153_v3  ;;  %v2631_v60 = vmul.f32 %v9197_v52, %v2549_v12  ;;  %v2832_v44 = vrot.slane %v2262_v30, 1  ;;  %v3275_v8 = vmul.f32 %v9206_v27, %v2549_v12 }
 0x500   : > { %v3694_v59 = vmul.f32 %v9219_v20, %v2549_v12  ;;  %v4273_v33 = vadd.f32 %v13157_v54, %v4197_v21  ;;  %v2263_v10 = vsel %vm10467_vm4, 0.0, %v10475_v37  ;;  %v12877_v42 = vrot.slane %v10475_v37, 7 }
 0x501   : > { %v2709_v48 = vmul.f32 %v9181_v50, %v10475_v37  ;;  %v2772_v43 = vadd.f32 %v2708_v23, %v2631_v60  ;;  %v13265_v19 = vrot.slane %v10339_v57, 1  ;;  %v3416_v28 = vadd.f32 %v3352_v62, %v3275_v8 }
 0x502   : > { %v3835_v30 = vadd.f32 %v3771_v0, %v3694_v59  ;;  %v10502_v12 = vmul.f32 %v4273_v33, %v4272_v34  ;;  %v2550_v23 = vsel %vm2518_vm3, %v2485_v56, %v12877_v42  ;;  %v2833_v60 = vrot.slane %v2263_v10, 1  ;;  %v13267_v10 = vld [vmem:[#allocation62_spill] sm:$0xff] }
 0x503   : > { %v2895_v18 = vsel %vm2864_vm2, %v13265_v19, %v2832_v44  ;;  %v3353_v57 = vmul.f32 %v9184_v40, %v10475_v37  ;;  %v3772_v62 = vmul.f32 %v9225_v6, %v10475_v37  ;;  %v2632_v59 = vmul.f32 %v9209_v13, %v2550_v23 }
 0x504   : > { %13266 = vst [vmem:[#allocation54_spill] sm:$0xff] %v10502_v12  ;;  %v2976_v21 = vmul.f32 %v9187_v46, %v2895_v18  ;;  %v3491_v9 = vmul.f32 %v9190_v16, %v2895_v18  ;;  %v3910_v39 = vmul.f32 %v9261_v41, %v2895_v18  ;;  %v2896_v33 = vsel %vm2864_vm2, %v2831_v55, %v2833_v60 }
 0x505   : > { %v3276_v19 = vmul.f32 %v9212_v53, %v2550_v23  ;;  %v3695_v56 = vmul.f32 %v9232_v15, %v2550_v23  ;;  %v10524_v18 = vadd.f32 %v13267_v10, %v9165_v11  ;;  %v3911_v12 = vmul.f32 %v9273_v32, %v2896_v33 }
 0x506   : > { %v10515_v34 = vadd.f32 %v2976_v21, %v2770_v1  ;;  %v3555_v0 = vadd.f32 %v3491_v9, %v3414_v29  ;;  %v3974_v8 = vadd.f32 %v3910_v39, %v3833_v49  ;;  %v13268_v1 = vld [vmem:[#allocation95_spill] sm:$0xff]  ;;  %v2773_v29 = vadd.f32 %v2709_v48, %v2632_v59 }
 0x507   : > { %v2977_v49 = vmul.f32 %v9200_v7, %v2896_v33  ;;  %v3417_v39 = vadd.f32 %v3353_v57, %v3276_v19  ;;  %v3492_v9 = vmul.f32 %v9215_v63, %v2896_v33  ;;  %v10532_v55 = vadd.f32 %v3772_v62, %v3695_v56 }
 0x508   : > { %v10527_v42 = vadd.f32 %v3555_v0, %v10353_v31  ;;  %v4198_v21 = vadd.f32 %v3974_v8, %v13268_v1  ;;  %v1873_v10 = vand.u32 15, %v908_v35  ;;  %v2710_v31 = vmul.f32 %v9172_v47, %v10524_v18 }
 0x509   : > { %v10536_v17 = vadd.f32 %v2977_v49, %v2771_v22  ;;  %v3556_v0 = vadd.f32 %v3492_v9, %v3415_v14  ;;  %v3975_v8 = vadd.f32 %v3911_v12, %v3834_v45  ;;  %v12880_v48 = vrot.slane %v10524_v18, 1  ;;  %v13271_v22 = vld [vmem:[#allocation87_spill] sm:$0xff]  ;;  %v13272_v14 = vld [vmem:[#allocation104_spill] sm:$0xff]  ;;  %v13274_v12 = vld [vmem:[#allocation105_spill] sm:$0xff] }
 0x50a   : > { %v4274_v23 = vadd.f32 %v9277_v51, %v4198_v21  ;;  %v3354_v57 = vmul.f32 %v13251_v4, %v10524_v18  ;;  %vm10543_vm5 = vcmp.eq.s32.totalorder %v1873_v10, 15  ;;  %v3773_v59 = vmul.f32 %v9222_v2, %v10524_v18 }
 0x50b   : > { %v10551_v35 = vadd.f32 %v13271_v22, %v9178_v36  ;;  %v909_v33 = vadd.s32 144, %v9153_v3  ;;  %v10555_v45 = vadd.f32 %v3556_v0, %v13272_v14  ;;  %v4199_v19 = vadd.f32 %v3975_v8, %v13274_v12  ;;  %v10568_v0 = vpop.f32.mrb[54].mxu0 }
 0x50c   : > { %v2424_v56 = vsel %vm10543_vm5, 0.0, %v10524_v18  ;;  %v2893_v1 = vsel %vm2864_vm2, %v2832_v44, %v12880_v48  ;;  %13275 = vst [vmem:[#allocation78_spill] sm:$0xff] %v10568_v0  ;;  %v10577_v12 = vpop.f32.mrb[55].mxu0 }
 0x50d   : > { %13273 = vst [vmem:[#allocation77_spill] sm:$0xff] %v10555_v45  ;;  %v2488_v21 = vrot.slane %v2424_v56, 7  ;;  %v2978_v49 = vmul.f32 %v9187_v46, %v2893_v1  ;;  %v3493_v9 = vmul.f32 %v9190_v16, %v2893_v1  ;;  %v3912_v10 = vmul.f32 %v9261_v41, %v2893_v1  ;;  %13276 = vst [vmem:[#allocation62_spill] sm:$0xff] %v10577_v12 }
 0x50e   : > { %v4275_v8 = vadd.f32 %v13157_v54, %v4199_v19  ;;  %v2425_v22 = vsel %vm10543_vm5, 0.0, %v10551_v35  ;;  %v2711_v14 = vmul.f32 %v9181_v50, %v10551_v35  ;;  %v13277_v56 = vrot.slane %v10453_v38, 7 }
 0x50f   : > { %v10583_v48 = vadd.f32 %v2978_v49, %v2772_v43  ;;  %v3557_v0 = vadd.f32 %v3493_v9, %v3416_v28  ;;  %v3976_v19 = vadd.f32 %v3912_v10, %v3835_v30  ;;  %v2489_v12 = vrot.slane %v2425_v22, 7 }
 0x510   : > { %v2547_v1 = vsel %vm2518_vm3, %v13277_v56, %v2488_v21  ;;  %v10585_v58 = vmul.f32 %v4275_v8, %v4274_v23  ;;  %v13279_v56 = vrot.slane %v10551_v35, 1  ;;  %v13280_v10 = vrot.slane %v10475_v37, 7 }
 0x511   : > { %v2633_v62 = vmul.f32 %v9197_v52, %v2547_v1  ;;  %v3277_v5 = vmul.f32 %v9206_v27, %v2547_v1  ;;  %v3696_v45 = vmul.f32 %v9219_v20, %v2547_v1  ;;  %v10591_v44 = vadd.f32 %v3557_v0, %v10423_v24  ;;  %v10619_v1 = vpop.f32.mrb[56].mxu0 }
 0x512   : > { %13278 = vst [vmem:[#allocation95_spill] sm:$0xff] %v10585_v58  ;;  %v4200_v38 = vadd.f32 %v3976_v19, %v10430_v25  ;;  %v2894_v43 = vsel %vm2864_vm2, %v2833_v60, %v13279_v56  ;;  %v2548_v24 = vsel %vm2518_vm3, %v13280_v10, %v2489_v12  ;;  %v3355_v25 = vmul.f32 %v9184_v40, %v10551_v35 }
 0x513   : > { %v2774_v28 = vadd.f32 %v2710_v31, %v2633_v62  ;;  %v3418_v30 = vadd.f32 %v3354_v57, %v3277_v5  ;;  %v3837_v23 = vadd.f32 %v3773_v59, %v3696_v45  ;;  %v2979_v49 = vmul.f32 %v9200_v7, %v2894_v43  ;;  %v13281_v45 = vld [vmem:[#allocation74_spill] sm:$0xff]  ;;  %13282 = vst [vmem:[#allocation87_spill] sm:$0xff] %v10619_v1 }
 0x514   : > { %v4276_v9 = vadd.f32 %v9277_v51, %v4200_v38  ;;  %v3494_v0 = vmul.f32 %v9215_v63, %v2894_v43  ;;  %v2634_v8 = vmul.f32 %v9209_v13, %v2548_v24  ;;  %v3278_v5 = vmul.f32 %v9212_v53, %v2548_v24  ;;  %v13283_v38 = vld [vmem:[#allocation80_spill] sm:$0xff] }
 0x515   : > { %v10608_v60 = vadd.f32 %v2979_v49, %v2773_v29  ;;  %v3697_v31 = vmul.f32 %v9232_v15, %v2548_v24  ;;  %v3774_v37 = vmul.f32 %v9225_v6, %v10551_v35  ;;  %v3913_v59 = vmul.f32 %v9273_v32, %v2894_v43 }
 0x516   : > { %v3558_v57 = vadd.f32 %v3494_v0, %v3417_v39  ;;  %v10617_v22 = vadd.f32 %v13281_v45, %v9165_v11  ;;  %v2775_v19 = vadd.f32 %v2711_v14, %v2634_v8  ;;  %v3419_v62 = vadd.f32 %v3355_v25, %v3278_v5  ;;  %v10651_v5 = vpop.f32.mrb[57].mxu0 }
 0x517   : > { %v1880_v29 = vand.u32 15, %v909_v33  ;;  %v10623_v56 = vadd.f32 %v13283_v38, %v9178_v36  ;;  %v3838_v49 = vadd.f32 %v3774_v37, %v3697_v31  ;;  %v3977_v10 = vadd.f32 %v3913_v59, %v10532_v55  ;;  %13286 = vst [vmem:[#allocation104_spill] sm:$0xff] %v10651_v5 }
 0x518   : > { %v10626_v39 = vadd.f32 %v3558_v57, %v10455_v26  ;;  %v12881_v43 = vrot.slane %v10617_v22, 7  ;;  %v2712_v14 = vmul.f32 %v9172_v47, %v10617_v22  ;;  %v3356_v33 = vmul.f32 %v13251_v4, %v10617_v22 }
 0x519   : > { %vm10630_vm6 = vcmp.eq.s32.totalorder %v1880_v29, 0  ;;  %v3775_v25 = vmul.f32 %v9222_v2, %v10617_v22  ;;  %v4201_v26 = vadd.f32 %v3977_v10, %v10465_v61  ;;  %v13287_v10 = vrot.slane %v10524_v18, 1 }
 0x51a   : > { %v2266_v55 = vsel %vm10630_vm6, 0.0, %v10617_v22  ;;  %v2545_v0 = vsel %vm2518_vm3, %v2488_v21, %v12881_v43  ;;  %v2267_v8 = vsel %vm10630_vm6, 0.0, %v10623_v56  ;;  %v2713_v21 = vmul.f32 %v9181_v50, %v10623_v56 }
 0x51b   : > { %v2635_v31 = vmul.f32 %v9197_v52, %v2545_v0  ;;  %v2836_v57 = vrot.slane %v2266_v55, 1  ;;  %v3279_v61 = vmul.f32 %v9206_v27, %v2545_v0  ;;  %v3698_v37 = vmul.f32 %v9219_v20, %v2545_v0 }
 0x51c   : > { %v4277_v59 = vadd.f32 %v13157_v54, %v4201_v26  ;;  %v2837_v29 = vrot.slane %v2267_v8, 1  ;;  %v13289_v5 = vrot.slane %v10623_v56, 7  ;;  %v13290_v18 = vrot.slane %v10551_v35, 1 }
 0x51d   : > { %v2776_v38 = vadd.f32 %v2712_v14, %v2635_v31  ;;  %v2891_v24 = vsel %vm2864_vm2, %v13287_v10, %v2836_v57  ;;  %v3420_v43 = vadd.f32 %v3356_v33, %v3279_v61  ;;  %v3839_v55 = vadd.f32 %v3775_v25, %v3698_v37  ;;  %v10688_v10 = vpop.f32.mrb[58].mxu0 }
 0x51e   : > { %v10664_v58 = vmul.f32 %v4277_v59, %v4276_v9  ;;  %v2980_v0 = vmul.f32 %v9187_v46, %v2891_v24  ;;  %v3495_v26 = vmul.f32 %v9190_v16, %v2891_v24  ;;  %v3914_v45 = vmul.f32 %v9261_v41, %v2891_v24  ;;  %13291 = vst [vmem:[#allocation74_spill] sm:$0xff] %v10688_v10  ;;  %v13293_v10 = vld [vmem:[#allocation96_spill] sm:$0xff] }
 0x51f   : > { %v2546_v14 = vsel %vm2518_vm3, %v2489_v12, %v13289_v5  ;;  %v2892_v8 = vsel %vm2864_vm2, %v13290_v18, %v2837_v29  ;;  %v3357_v9 = vmul.f32 %v9184_v40, %v10623_v56  ;;  %v3776_v33 = vmul.f32 %v9225_v6, %v10623_v56 }
 0x520   : > { %13288 = vst [vmem:[#allocation105_spill] sm:$0xff] %v10664_v58  ;;  %v10681_v25 = vadd.f32 %v2980_v0, %v2774_v28  ;;  %v3559_v31 = vadd.f32 %v3495_v26, %v3418_v30  ;;  %v3978_v61 = vadd.f32 %v3914_v45, %v3837_v23  ;;  %v2636_v37 = vmul.f32 %v9209_v13, %v2546_v14 }
 0x521   : > { %v2981_v59 = vmul.f32 %v9200_v7, %v2892_v8  ;;  %v3280_v12 = vmul.f32 %v9212_v53, %v2546_v14  ;;  %v3496_v35 = vmul.f32 %v9215_v63, %v2892_v8  ;;  %v3699_v5 = vmul.f32 %v9232_v15, %v2546_v14 }
 0x522   : > { %v10691_v24 = vadd.f32 %v3559_v31, %v10515_v34  ;;  %v4202_v28 = vadd.f32 %v3978_v61, %v10527_v42  ;;  %v2777_v0 = vadd.f32 %v2713_v21, %v2636_v37  ;;  %v3915_v30 = vmul.f32 %v9273_v32, %v2892_v8  ;;  %v13295_v21 = vld [vmem:[#allocation64_spill] sm:$0xff]  ;;  %v13296_v8 = vld [vmem:[#allocation86_spill] sm:$0xff] }
 0x523   : > { %v10695_v23 = vadd.f32 %v2981_v59, %v2775_v19  ;;  %v3421_v45 = vadd.f32 %v3357_v9, %v3280_v12  ;;  %v3560_v26 = vadd.f32 %v3496_v35, %v3419_v62  ;;  %v10697_v18 = vadd.f32 %v3776_v33, %v3699_v5  ;;  %v13298_v33 = vld [vmem:[#allocation77_spill] sm:$0xff] }
 0x524   : > { %v4278_v58 = vadd.f32 %v9277_v51, %v4202_v28  ;;  %v3979_v1 = vadd.f32 %v3915_v30, %v3838_v49  ;;  %v910_v14 = vadd.s32 152, %v9153_v3  ;;  %v10703_v34 = vadd.f32 %v13293_v10, %v9165_v11  ;;  %v10717_v49 = vpop.f32.mrb[59].mxu0 }
 0x525   : > { %13292 = vst [vmem:[#allocation80_spill] sm:$0xff] %v10695_v23  ;;  %v10706_v42 = vadd.f32 %v3560_v26, %v10536_v17  ;;  %v10710_v19 = vadd.f32 %v13295_v21, %v9178_v36  ;;  %v911_v62 = vadd.s32 160, %v9153_v3  ;;  %v10715_v9 = vadd.f32 %v13296_v8, %v9165_v11  ;;  %13297 = vst [vmem:[#allocation64_spill] sm:$0xff] %v10717_v49 }
 0x526   : > { %v4203_v31 = vadd.f32 %v3979_v1, %v13298_v33  ;;  %v1887_v61 = vand.u32 15, %v910_v14  ;;  %v2714_v37 = vmul.f32 %v9172_v47, %v10703_v34  ;;  %v12884_v17 = vrot.slane %v10703_v34, 1 }
 0x527   : > { %13294 = vst [vmem:[#allocation96_spill] sm:$0xff] %v10706_v42  ;;  %v3358_v59 = vmul.f32 %v13251_v4, %v10703_v34  ;;  %v3777_v12 = vmul.f32 %v9222_v2, %v10703_v34  ;;  %v2715_v35 = vmul.f32 %v9181_v50, %v10710_v19  ;;  %v12886_v5 = vrot.slane %v10710_v19, 1 }
 0x528   : > { %v4279_v10 = vadd.f32 %v13157_v54, %v4203_v31  ;;  %vm2313_vm7 = vcmp.eq.s32.totalorder %v1887_v61, 15  ;;  %v2889_v1 = vsel %vm2864_vm2, %v2836_v57, %v12884_v17  ;;  %v3359_v28 = vmul.f32 %v9184_v40, %v10710_v19 }
 0x529   : > { %v2428_v30 = vsel %vm2313_vm7, 0.0, %v10703_v34  ;;  %v2982_v26 = vmul.f32 %v9187_v46, %v2889_v1  ;;  %v3497_v14 = vmul.f32 %v9190_v16, %v2889_v1  ;;  %v3916_v21 = vmul.f32 %v9261_v41, %v2889_v1 }
 0x52a   : > { %v10741_v8 = vmul.f32 %v4279_v10, %v4278_v58  ;;  %v2492_v33 = vrot.slane %v2428_v30, 7  ;;  %v2429_v31 = vsel %vm2313_vm7, 0.0, %v10710_v19  ;;  %v2890_v57 = vsel %vm2864_vm2, %v2837_v29, %v12886_v5 }
 0x52b   : > { %v10748_v61 = vadd.f32 %v2982_v26, %v2776_v38  ;;  %v3561_v17 = vadd.f32 %v3497_v14, %v3420_v43  ;;  %v3980_v49 = vadd.f32 %v3916_v21, %v3839_v55  ;;  %v2493_v42 = vrot.slane %v2429_v31, 7  ;;  %v10771_v21 = vpop.f32.mrb[60].mxu0 }
 0x52c   : > { %13299 = vst [vmem:[#allocation86_spill] sm:$0xff] %v10741_v8  ;;  %v13301_v23 = vrot.slane %v10617_v22, 7  ;;  %v2983_v58 = vmul.f32 %v9200_v7, %v2890_v57  ;;  %v3498_v10 = vmul.f32 %v9215_v63, %v2890_v57  ;;  %v3778_v30 = vmul.f32 %v9225_v6, %v10710_v19  ;;  %13303 = vst [vmem:[#allocation106_spill] sm:$0xff] %v10771_v21 }
 0x52d   : > { %13300 = vst [vmem:[#allocation77_spill] sm:$0xff] %v10748_v61  ;;  %v10761_v43 = vadd.f32 %v3561_v17, %v10583_v48  ;;  %v4204_v22 = vadd.f32 %v3980_v49, %v10591_v44  ;;  %v13302_v55 = vrot.slane %v10623_v56, 7  ;;  %v10780_v49 = vpop.f32.mrb[61].mxu0 }
 0x52e   : > { %v2543_v1 = vsel %vm2518_vm3, %v13301_v23, %v2492_v33  ;;  %v10769_v26 = vadd.f32 %v2983_v58, %v2777_v0  ;;  %v3562_v14 = vadd.f32 %v3498_v10, %v3421_v45  ;;  %13304 = vst [vmem:[#allocation107_spill] sm:$0xff] %v10780_v49  ;;  %v3917_v45 = vmul.f32 %v9273_v32, %v2890_v57 }
 0x52f   : > { %v2637_v8 = vmul.f32 %v9197_v52, %v2543_v1  ;;  %v3281_v29 = vmul.f32 %v9206_v27, %v2543_v1  ;;  %v3700_v38 = vmul.f32 %v9219_v20, %v2543_v1  ;;  %v2544_v23 = vsel %vm2518_vm3, %v13302_v55, %v2493_v42  ;;  %v13307_v55 = vld [vmem:[#allocation88_spill] sm:$0xff] }
 0x530   : > { %v2638_v48 = vmul.f32 %v9209_v13, %v2544_v23  ;;  %v4280_v17 = vadd.f32 %v9277_v51, %v4204_v22  ;;  %v3282_v1 = vmul.f32 %v9212_v53, %v2544_v23  ;;  %v10777_v44 = vadd.f32 %v3562_v14, %v10608_v60 }
 0x531   : > { %v2778_v31 = vadd.f32 %v2714_v37, %v2637_v8  ;;  %v3422_v5 = vadd.f32 %v3358_v59, %v3281_v29  ;;  %v3841_v61 = vadd.f32 %v3777_v12, %v3700_v38  ;;  %v3701_v56 = vmul.f32 %v9232_v15, %v2544_v23 }
 0x532   : > { %v2779_v0 = vadd.f32 %v2715_v35, %v2638_v48  ;;  %v1894_v58 = vand.u32 15, %v911_v62  ;;  %v12887_v37 = vrot.slane %v10715_v9, 7  ;;  %v3423_v59 = vadd.f32 %v3359_v28, %v3282_v1 }
 0x533   : > { %v3842_v12 = vadd.f32 %v3778_v30, %v3701_v56  ;;  %v2716_v8 = vmul.f32 %v9172_v47, %v10715_v9  ;;  %v3360_v10 = vmul.f32 %v13251_v4, %v10715_v9  ;;  %v3981_v60 = vadd.f32 %v3917_v45, %v10697_v18  ;;  %v13308_v56 = vld [vmem:[#allocation52_spill] sm:$0xff] }
 0x534   : > { %vm10789_vm8 = vcmp.eq.s32.totalorder %v1894_v58, 0  ;;  %v2541_v62 = vsel %vm2518_vm3, %v2492_v33, %v12887_v37  ;;  %v3779_v35 = vmul.f32 %v9222_v2, %v10715_v9  ;;  %v10808_v23 = vadd.f32 %v13307_v55, %v9178_v36  ;;  %v13322_v21 = vld [vmem:[#allocation77_spill] sm:$0xff] }
 0x535   : > { %v2270_v28 = vsel %vm10789_vm8, 0.0, %v10715_v9  ;;  %v2639_v57 = vmul.f32 %v9197_v52, %v2541_v62  ;;  %v3283_v18 = vmul.f32 %v9206_v27, %v2541_v62  ;;  %v3702_v30 = vmul.f32 %v9219_v20, %v2541_v62 }
 0x536   : > { %v4205_v38 = vadd.f32 %v3981_v60, %v10626_v39  ;;  %v2840_v22 = vrot.slane %v2270_v28, 1  ;;  %v912_v33 = vadd.s32 168, %v9153_v3  ;;  %v10813_v45 = vadd.f32 %v13308_v56, %v9165_v11 }
 0x537   : > { %v2780_v14 = vadd.f32 %v2716_v8, %v2639_v57  ;;  %v3424_v48 = vadd.f32 %v3360_v10, %v3283_v18  ;;  %v3843_v1 = vadd.f32 %v3779_v35, %v3702_v30  ;;  %v13309_v62 = vrot.slane %v10703_v34, 1  ;;  %v10824_v8 = vpop.f32.mrb[62].mxu0 }
 0x538   : > { %v4281_v58 = vadd.f32 %v13157_v54, %v4205_v38  ;;  %v2271_v60 = vsel %vm10789_vm8, 0.0, %v10808_v23  ;;  %v12889_v28 = vrot.slane %v10808_v23, 7  ;;  %13310 = vst [vmem:[#allocation88_spill] sm:$0xff] %v10824_v8  ;;  %v2717_v34 = vmul.f32 %v9181_v50, %v10808_v23 }
 0x539   : > { %v2887_v39 = vsel %vm2864_vm2, %v13309_v62, %v2840_v22  ;;  %v2841_v30 = vrot.slane %v2271_v60, 1  ;;  %v3361_v38 = vmul.f32 %v9184_v40, %v10808_v23  ;;  %v13312_v37 = vrot.slane %v10710_v19, 1 }
 0x53a   : > { %v2984_v10 = vmul.f32 %v9187_v46, %v2887_v39  ;;  %v3499_v35 = vmul.f32 %v9190_v16, %v2887_v39  ;;  %v3918_v57 = vmul.f32 %v9261_v41, %v2887_v39  ;;  %v10831_v18 = vmul.f32 %v4281_v58, %v4280_v17 }
 0x53b   : > { %v2542_v29 = vsel %vm2518_vm3, %v2493_v42, %v12889_v28  ;;  %v2888_v17 = vsel %vm2864_vm2, %v13312_v37, %v2841_v30  ;;  %v3780_v42 = vmul.f32 %v9225_v6, %v10808_v23  ;;  %v1901_v28 = vand.u32 15, %v912_v33 }
 0x53c   : > { %13311 = vst [vmem:[#allocation52_spill] sm:$0xff] %v10831_v18  ;;  %v10839_v55 = vadd.f32 %v2984_v10, %v2778_v31  ;;  %v3563_v56 = vadd.f32 %v3499_v35, %v3422_v5  ;;  %v3982_v62 = vadd.f32 %v3918_v57, %v3841_v61  ;;  %v2640_v39 = vmul.f32 %v9209_v13, %v2542_v29 }
 0x53d   : > { %v3284_v58 = vmul.f32 %v9212_v53, %v2542_v29  ;;  %v3703_v18 = vmul.f32 %v9232_v15, %v2542_v29  ;;  %v2985_v31 = vmul.f32 %v9200_v7, %v2888_v17  ;;  %v3500_v19 = vmul.f32 %v9215_v63, %v2888_v17 }
 0x53e   : > { %v10851_v60 = vadd.f32 %v3563_v56, %v10681_v25  ;;  %v4206_v5 = vadd.f32 %v3982_v62, %v10691_v24  ;;  %v2781_v61 = vadd.f32 %v2717_v34, %v2640_v39  ;;  %v3919_v37 = vmul.f32 %v9273_v32, %v2888_v17  ;;  %v13318_v39 = vld [vmem:[#allocation96_spill] sm:$0xff] }
 0x53f   : > { %v3425_v10 = vadd.f32 %v3361_v38, %v3284_v58  ;;  %v3844_v35 = vadd.f32 %v3780_v42, %v3703_v18  ;;  %v10858_v29 = vadd.f32 %v2985_v31, %v2779_v0  ;;  %v2718_v25 = vmul.f32 %v9172_v47, %v10813_v45  ;;  %v13315_v0 = vld [vmem:[#allocation82_spill] sm:$0xff]  ;;  %v10887_v42 = vpop.f32.mrb[63].mxu0 }
 0x540   : > { %v4282_v57 = vadd.f32 %v9277_v51, %v4206_v5  ;;  %v3564_v56 = vadd.f32 %v3500_v19, %v3423_v59  ;;  %v3983_v8 = vadd.f32 %v3919_v37, %v3842_v12  ;;  %v12890_v24 = vrot.slane %v10813_v45, 1  ;;  %v13316_v59 = vld [vmem:[#allocation80_spill] sm:$0xff] }
 0x541   : > { %v3362_v34 = vmul.f32 %v13251_v4, %v10813_v45  ;;  %vm10865_vm9 = vcmp.eq.s32.totalorder %v1901_v28, 15  ;;  %v3781_v18 = vmul.f32 %v9222_v2, %v10813_v45  ;;  %v10873_v33 = vadd.f32 %v13315_v0, %v9178_v36  ;;  %13319 = vst [vmem:[#allocation80_spill] sm:$0xff] %v10887_v42 }
 0x542   : > { %v913_v62 = vadd.s32 176, %v9153_v3  ;;  %v10877_v12 = vadd.f32 %v3564_v56, %v13316_v59  ;;  %v4207_v17 = vadd.f32 %v3983_v8, %v13318_v39  ;;  %v2432_v28 = vsel %vm10865_vm9, 0.0, %v10813_v45 }
 0x543   : > { %v2885_v58 = vsel %vm2864_vm2, %v2840_v22, %v12890_v24  ;;  %v2496_v5 = vrot.slane %v2432_v28, 7  ;;  %v2433_v56 = vsel %vm10865_vm9, 0.0, %v10873_v33  ;;  %v2719_v0 = vmul.f32 %v9181_v50, %v10873_v33 }
 0x544   : > { %13317 = vst [vmem:[#allocation82_spill] sm:$0xff] %v10877_v12  ;;  %v2986_v31 = vmul.f32 %v9187_v46, %v2885_v58  ;;  %v3501_v19 = vmul.f32 %v9190_v16, %v2885_v58  ;;  %v3920_v37 = vmul.f32 %v9261_v41, %v2885_v58  ;;  %v4283_v8 = vadd.f32 %v13157_v54, %v4207_v17 }
 0x545   : > { %v13320_v59 = vrot.slane %v10715_v9, 7  ;;  %v2497_v22 = vrot.slane %v2433_v56, 7  ;;  %v13325_v56 = vld [vmem:[#allocation58_spill] sm:$0xff] }
 0x546   : > { %v10903_v28 = vadd.f32 %v2986_v31, %v2780_v14  ;;  %v3565_v24 = vadd.f32 %v3501_v19, %v3424_v48  ;;  %v3984_v58 = vadd.f32 %v3920_v37, %v3843_v1  ;;  %v10905_v42 = vmul.f32 %v4283_v8, %v4282_v57 }
 0x547   : > { %v2539_v39 = vsel %vm2518_vm3, %v13320_v59, %v2496_v5  ;;  %v13323_v59 = vrot.slane %v10873_v33, 1  ;;  %v13324_v37 = vrot.slane %v10808_v23, 7  ;;  %v3782_v23 = vmul.f32 %v9225_v6, %v10873_v33 }
 0x548   : > { %13321 = vst [vmem:[#allocation96_spill] sm:$0xff] %v10905_v42  ;;  %v2641_v17 = vmul.f32 %v9197_v52, %v2539_v39  ;;  %v3285_v38 = vmul.f32 %v9206_v27, %v2539_v39  ;;  %v3704_v49 = vmul.f32 %v9219_v20, %v2539_v39  ;;  %v10911_v12 = vadd.f32 %v3565_v24, %v13322_v21 }
 0x549   : > { %v4208_v9 = vadd.f32 %v3984_v58, %v10761_v43  ;;  %v2886_v14 = vsel %vm2864_vm2, %v2841_v30, %v13323_v59  ;;  %v2540_v21 = vsel %vm2518_vm3, %v13324_v37, %v2497_v22  ;;  %v3363_v43 = vmul.f32 %v9184_v40, %v10873_v33 }
 0x54a   : > { %v2782_v48 = vadd.f32 %v2718_v25, %v2641_v17  ;;  %v3426_v1 = vadd.f32 %v3362_v34, %v3285_v38  ;;  %v3845_v57 = vadd.f32 %v3781_v18, %v3704_v49  ;;  %v2987_v31 = vmul.f32 %v9200_v7, %v2886_v14 }
 0x54b   : > { %v4284_v19 = vadd.f32 %v9277_v51, %v4208_v9  ;;  %v3502_v24 = vmul.f32 %v9215_v63, %v2886_v14  ;;  %v2642_v8 = vmul.f32 %v9209_v13, %v2540_v21  ;;  %v3286_v49 = vmul.f32 %v9212_v53, %v2540_v21 }
 0x54c   : > { %v10928_v30 = vadd.f32 %v2987_v31, %v2781_v61  ;;  %v3705_v25 = vmul.f32 %v9232_v15, %v2540_v21  ;;  %v3921_v18 = vmul.f32 %v9273_v32, %v2886_v14  ;;  %v10937_v39 = vadd.f32 %v13325_v56, %v9165_v11  ;;  %v13326_v61 = vld [vmem:[#allocation71_spill] sm:$0xff] }
 0x54d   : > { %v3566_v34 = vadd.f32 %v3502_v24, %v3425_v10  ;;  %v2783_v58 = vadd.f32 %v2719_v0, %v2642_v8  ;;  %v3427_v17 = vadd.f32 %v3363_v43, %v3286_v49  ;;  %v1908_v38 = vand.u32 15, %v913_v62 }
 0x54e   : > { %v10941_v9 = vadd.f32 %v13326_v61, %v9178_v36  ;;  %v3846_v10 = vadd.f32 %v3782_v23, %v3705_v25  ;;  %v3985_v31 = vadd.f32 %v3921_v18, %v3844_v35  ;;  %v12891_v37 = vrot.slane %v10937_v39, 7 }
 0x54f   : > { %v10944_v59 = vadd.f32 %v3566_v34, %v10769_v26  ;;  %vm2156_vm10 = vcmp.eq.s32.totalorder %v1908_v38, 0  ;;  %v2720_v14 = vmul.f32 %v9172_v47, %v10937_v39  ;;  %v3364_v0 = vmul.f32 %v13251_v4, %v10937_v39 }
 0x550   : > { %v3783_v62 = vmul.f32 %v9222_v2, %v10937_v39  ;;  %v4209_v21 = vadd.f32 %v3985_v31, %v10777_v44  ;;  %v2274_v43 = vsel %vm2156_vm10, 0.0, %v10937_v39  ;;  %v2537_v26 = vsel %vm2518_vm3, %v2496_v5, %v12891_v37 }
 0x551   : > { %v2275_v35 = vsel %vm2156_vm10, 0.0, %v10941_v9  ;;  %v2643_v24 = vmul.f32 %v9197_v52, %v2537_v26  ;;  %v2844_v8 = vrot.slane %v2274_v43, 1  ;;  %v3287_v49 = vmul.f32 %v9206_v27, %v2537_v26 }
 0x552   : > { %v3706_v25 = vmul.f32 %v9219_v20, %v2537_v26  ;;  %v4285_v34 = vadd.f32 %v13157_v54, %v4209_v21  ;;  %v12892_v44 = vrot.slane %v10941_v9, 7  ;;  %v2721_v23 = vmul.f32 %v9181_v50, %v10941_v9 }
 0x553   : > { %v2845_v18 = vrot.slane %v2275_v35, 1  ;;  %v2784_v56 = vadd.f32 %v2720_v14, %v2643_v24  ;;  %v13327_v5 = vrot.slane %v10813_v45, 1  ;;  %v3428_v61 = vadd.f32 %v3364_v0, %v3287_v49 }
 0x554   : > { %v3847_v31 = vadd.f32 %v3783_v62, %v3706_v25  ;;  %v10971_v43 = vmul.f32 %v4285_v34, %v4284_v19  ;;  %v2538_v14 = vsel %vm2518_vm3, %v2497_v22, %v12892_v44  ;;  %v13329_v45 = vrot.slane %v10873_v33, 1 }
 0x555   : > { %v2883_v38 = vsel %vm2864_vm2, %v13327_v5, %v2844_v8  ;;  %v3365_v19 = vmul.f32 %v9184_v40, %v10941_v9  ;;  %v3784_v0 = vmul.f32 %v9225_v6, %v10941_v9  ;;  %v2644_v25 = vmul.f32 %v9209_v13, %v2538_v14 }
 0x556   : > { %13328 = vst [vmem:[#allocation77_spill] sm:$0xff] %v10971_v43  ;;  %v2988_v26 = vmul.f32 %v9187_v46, %v2883_v38  ;;  %v3503_v21 = vmul.f32 %v9190_v16, %v2883_v38  ;;  %v3922_v37 = vmul.f32 %v9261_v41, %v2883_v38  ;;  %v2884_v35 = vsel %vm2864_vm2, %v13329_v45, %v2845_v18 }
 0x557   : > { %v2989_v34 = vmul.f32 %v9200_v7, %v2884_v35  ;;  %v3288_v22 = vmul.f32 %v9212_v53, %v2538_v14  ;;  %v3504_v33 = vmul.f32 %v9215_v63, %v2884_v35  ;;  %v3707_v5 = vmul.f32 %v9232_v15, %v2538_v14  ;;  %v13331_v14 = vld [vmem:[#allocation85_spill] sm:$0xff] }
 0x558   : > { %v10988_v62 = vadd.f32 %v2988_v26, %v2782_v48  ;;  %v3567_v24 = vadd.f32 %v3503_v21, %v3426_v1  ;;  %v3986_v49 = vadd.f32 %v3922_v37, %v3845_v57  ;;  %v2785_v44 = vadd.f32 %v2721_v23, %v2644_v25 }
 0x559   : > { %v3923_v48 = vmul.f32 %v9273_v32, %v2884_v35  ;;  %v11000_v1 = vadd.f32 %v2989_v34, %v2783_v58  ;;  %v3429_v57 = vadd.f32 %v3365_v19, %v3288_v22  ;;  %v3568_v37 = vadd.f32 %v3504_v33, %v3427_v17  ;;  %v13334_v17 = vld [vmem:[#allocation93_spill] sm:$0xff] }
 0x55a   : > { %13330 = vst [vmem:[#allocation58_spill] sm:$0xff] %v10988_v62  ;;  %v10996_v38 = vadd.f32 %v3567_v24, %v10839_v55  ;;  %v4210_v45 = vadd.f32 %v3986_v49, %v10851_v60  ;;  %v3848_v26 = vadd.f32 %v3784_v0, %v3707_v5  ;;  %v914_v42 = vadd.s32 184, %v9153_v3  ;;  %v13333_v60 = vld [vmem:[#allocation91_spill] sm:$0xff] }
 0x55b   : > { %v3987_v43 = vadd.f32 %v3923_v48, %v3846_v10  ;;  %v11006_v62 = vadd.f32 %v13331_v14, %v9165_v11  ;;  %v11009_v55 = vadd.f32 %v3568_v37, %v10858_v29  ;;  %v11013_v23 = vadd.f32 %v13333_v60, %v9178_v36  ;;  %v13335_v10 = vld [vmem:[#allocation82_spill] sm:$0xff] }
 0x55c   : > { %v4286_v21 = vadd.f32 %v9277_v51, %v4210_v45  ;;  %v915_v58 = vadd.s32 192, %v9153_v3  ;;  %v11018_v35 = vadd.f32 %v13334_v17, %v9165_v11  ;;  %v1915_v0 = vand.u32 15, %v914_v42 }
 0x55d   : > { %13332 = vst [vmem:[#allocation71_spill] sm:$0xff] %v11009_v55  ;;  %v4211_v19 = vadd.f32 %v3987_v43, %v13335_v10  ;;  %v2722_v24 = vmul.f32 %v9172_v47, %v11006_v62  ;;  %v12895_v49 = vrot.slane %v11006_v62, 1  ;;  %v3366_v29 = vmul.f32 %v13251_v4, %v11006_v62 }
 0x55e   : > { %v3785_v25 = vmul.f32 %v9222_v2, %v11006_v62  ;;  %v2723_v34 = vmul.f32 %v9181_v50, %v11013_v23  ;;  %v12897_v22 = vrot.slane %v11013_v23, 1  ;;  %vm2317_vm11 = vcmp.eq.s32.totalorder %v1915_v0, 15 }
 0x55f   : > { %v4287_v33 = vadd.f32 %v13157_v54, %v4211_v19  ;;  %v2881_v42 = vsel %vm2864_vm2, %v2844_v8, %v12895_v49  ;;  %v3367_v43 = vmul.f32 %v9184_v40, %v11013_v23  ;;  %v2436_v5 = vsel %vm2317_vm11, 0.0, %v11006_v62 }
 0x560   : > { %v2990_v45 = vmul.f32 %v9187_v46, %v2881_v42  ;;  %v3505_v48 = vmul.f32 %v9190_v16, %v2881_v42  ;;  %v3924_v37 = vmul.f32 %v9261_v41, %v2881_v42  ;;  %v2500_v60 = vrot.slane %v2436_v5, 7 }
 0x561   : > { %v11042_v14 = vmul.f32 %v4287_v33, %v4286_v21  ;;  %v2437_v17 = vsel %vm2317_vm11, 0.0, %v11013_v23  ;;  %v2882_v8 = vsel %vm2864_vm2, %v2845_v18, %v12897_v22  ;;  %v13338_v55 = vrot.slane %v10937_v39, 7 }
 0x562   : > { %v11049_v10 = vadd.f32 %v2990_v45, %v2784_v56  ;;  %v3569_v19 = vadd.f32 %v3505_v48, %v3428_v61  ;;  %v3988_v0 = vadd.f32 %v3924_v37, %v3847_v31  ;;  %v2501_v49 = vrot.slane %v2437_v17, 7 }
 0x563   : > { %13336 = vst [vmem:[#allocation85_spill] sm:$0xff] %v11042_v14  ;;  %v2535_v42 = vsel %vm2518_vm3, %v13338_v55, %v2500_v60  ;;  %v2991_v21 = vmul.f32 %v9200_v7, %v2882_v8  ;;  %v3506_v33 = vmul.f32 %v9215_v63, %v2882_v8  ;;  %v3786_v5 = vmul.f32 %v9225_v6, %v11013_v23 }
 0x564   : > { %13337 = vst [vmem:[#allocation91_spill] sm:$0xff] %v11049_v10  ;;  %v2645_v14 = vmul.f32 %v9197_v52, %v2535_v42  ;;  %v3289_v18 = vmul.f32 %v9206_v27, %v2535_v42  ;;  %v11062_v56 = vadd.f32 %v3569_v19, %v10903_v28  ;;  %v3708_v61 = vmul.f32 %v9219_v20, %v2535_v42 }
 0x565   : > { %v4212_v39 = vadd.f32 %v3988_v0, %v10911_v12  ;;  %v13339_v31 = vrot.slane %v10941_v9, 7  ;;  %v11070_v45 = vadd.f32 %v2991_v21, %v2785_v44  ;;  %v3570_v48 = vadd.f32 %v3506_v33, %v3429_v57 }
 0x566   : > { %v2786_v37 = vadd.f32 %v2722_v24, %v2645_v14  ;;  %v3430_v17 = vadd.f32 %v3366_v29, %v3289_v18  ;;  %v3849_v22 = vadd.f32 %v3785_v25, %v3708_v61  ;;  %v3925_v0 = vmul.f32 %v9273_v32, %v2882_v8  ;;  %v13342_v18 = vld [vmem:[#allocation101_spill] sm:$0xff] }
 0x567   : > { %v2536_v55 = vsel %vm2518_vm3, %v13339_v31, %v2501_v49  ;;  %v4288_v28 = vadd.f32 %v9277_v51, %v4212_v39  ;;  %v11076_v42 = vadd.f32 %v3570_v48, %v10928_v30  ;;  %v1922_v44 = vand.u32 15, %v915_v58  ;;  %v13343_v48 = vld [vmem:[#allocation103_spill] sm:$0xff] }
 0x568   : > { %v2646_v10 = vmul.f32 %v9209_v13, %v2536_v55  ;;  %v3290_v19 = vmul.f32 %v9212_v53, %v2536_v55  ;;  %v3709_v12 = vmul.f32 %v9232_v15, %v2536_v55  ;;  %v12899_v57 = vrot.slane %v11018_v35, 7 }
 0x569   : > { %v2724_v25 = vmul.f32 %v9172_v47, %v11018_v35  ;;  %v3368_v14 = vmul.f32 %v13251_v4, %v11018_v35  ;;  %v3989_v21 = vadd.f32 %v3925_v0, %v3848_v26  ;;  %vm11085_vm12 = vcmp.eq.s32.totalorder %v1922_v44, 0 }
 0x56a   : > { %v2787_v9 = vadd.f32 %v2723_v34, %v2646_v10  ;;  %v3431_v24 = vadd.f32 %v3367_v43, %v3290_v19  ;;  %v3850_v29 = vadd.f32 %v3786_v5, %v3709_v12  ;;  %v2533_v58 = vsel %vm2518_vm3, %v2500_v60, %v12899_v57 }
 0x56b   : > { %v3787_v34 = vmul.f32 %v9222_v2, %v11018_v35  ;;  %v2278_v43 = vsel %vm11085_vm12, 0.0, %v11018_v35  ;;  %v2647_v8 = vmul.f32 %v9197_v52, %v2533_v58  ;;  %v3291_v26 = vmul.f32 %v9206_v27, %v2533_v58 }
 0x56c   : > { %v3710_v10 = vmul.f32 %v9219_v20, %v2533_v58  ;;  %v4213_v33 = vadd.f32 %v3989_v21, %v10944_v59  ;;  %v2848_v5 = vrot.slane %v2278_v43, 1  ;;  %v11104_v61 = vadd.f32 %v13342_v18, %v9178_v36 }
 0x56d   : > { %v916_v60 = vadd.s32 200, %v9153_v3  ;;  %v2788_v39 = vadd.f32 %v2724_v25, %v2647_v8  ;;  %v3432_v31 = vadd.f32 %v3368_v14, %v3291_v26  ;;  %v11109_v19 = vadd.f32 %v13343_v48, %v9165_v11 }
 0x56e   : > { %v3851_v55 = vadd.f32 %v3787_v34, %v3710_v10  ;;  %v4289_v12 = vadd.f32 %v13157_v54, %v4213_v33  ;;  %v13344_v0 = vrot.slane %v11006_v62, 1  ;;  %v2279_v44 = vsel %vm11085_vm12, 0.0, %v11104_v61 }
 0x56f   : > { %v12898_v21 = vrot.slane %v11104_v61, 7  ;;  %v2725_v34 = vmul.f32 %v9181_v50, %v11104_v61  ;;  %v2849_v30 = vrot.slane %v2279_v44, 1  ;;  %v3369_v8 = vmul.f32 %v9184_v40, %v11104_v61 }
 0x570   : > { %v2879_v59 = vsel %vm2864_vm2, %v13344_v0, %v2848_v5  ;;  %v11125_v43 = vmul.f32 %v4289_v12, %v4288_v28  ;;  %v13346_v48 = vrot.slane %v11013_v23, 1 }
 0x571   : > { %v2992_v25 = vmul.f32 %v9187_v46, %v2879_v59  ;;  %v3507_v14 = vmul.f32 %v9190_v16, %v2879_v59  ;;  %v3926_v58 = vmul.f32 %v9261_v41, %v2879_v59  ;;  %v2534_v62 = vsel %vm2518_vm3, %v2501_v49, %v12898_v21  ;;  %v13347_v59 = vld [vmem:[#allocation58_spill] sm:$0xff] }
 0x572   : > { %13345 = vst [vmem:[#allocation93_spill] sm:$0xff] %v11125_v43  ;;  %v2648_v18 = vmul.f32 %v9209_v13, %v2534_v62  ;;  %v2880_v28 = vsel %vm2864_vm2, %v13346_v48, %v2849_v30  ;;  %v3292_v12 = vmul.f32 %v9212_v53, %v2534_v62  ;;  %v3711_v0 = vmul.f32 %v9232_v15, %v2534_v62  ;;  %v13355_v43 = vld [vmem:[#allocation91_spill] sm:$0xff] }
 0x573   : > { %v11133_v26 = vadd.f32 %v2992_v25, %v2786_v37  ;;  %v3571_v10 = vadd.f32 %v3507_v14, %v3430_v17  ;;  %v3990_v33 = vadd.f32 %v3926_v58, %v3849_v22  ;;  %v3788_v49 = vmul.f32 %v9225_v6, %v11104_v61 }
 0x574   : > { %v2789_v22 = vadd.f32 %v2725_v34, %v2648_v18  ;;  %v2993_v17 = vmul.f32 %v9200_v7, %v2880_v28  ;;  %v3433_v25 = vadd.f32 %v3369_v8, %v3292_v12  ;;  %v3508_v23 = vmul.f32 %v9215_v63, %v2880_v28 }
 0x575   : > { %v11145_v44 = vadd.f32 %v3571_v10, %v13347_v59  ;;  %v4214_v37 = vadd.f32 %v3990_v33, %v10996_v38  ;;  %v3852_v14 = vadd.f32 %v3788_v49, %v3711_v0  ;;  %v3927_v58 = vmul.f32 %v9273_v32, %v2880_v28 }
 0x576   : > { %v11152_v62 = vadd.f32 %v2993_v17, %v2787_v9  ;;  %v1929_v21 = vand.u32 15, %v916_v60  ;;  %v2726_v10 = vmul.f32 %v9172_v47, %v11109_v19  ;;  %v3572_v59 = vadd.f32 %v3508_v23, %v3431_v24  ;;  %v13350_v9 = vld [vmem:[#allocation51_spill] sm:$0xff] }
 0x577   : > { %v4290_v48 = vadd.f32 %v9277_v51, %v4214_v37  ;;  %v3991_v57 = vadd.f32 %v3927_v58, %v3850_v29  ;;  %v12900_v38 = vrot.slane %v11109_v19, 1  ;;  %v3370_v34 = vmul.f32 %v13251_v4, %v11109_v19  ;;  %v13352_v29 = vld [vmem:[#allocation71_spill] sm:$0xff] }
 0x578   : > { %vm11159_vm13 = vcmp.eq.s32.totalorder %v1929_v21, 15  ;;  %v3789_v33 = vmul.f32 %v9222_v2, %v11109_v19  ;;  %v11167_v60 = vadd.f32 %v13350_v9, %v9178_v36  ;;  %v917_v18 = vadd.s32 208, %v9153_v3 }
 0x579   : > { %v11171_v24 = vadd.f32 %v3572_v59, %v11000_v1  ;;  %v4215_v28 = vadd.f32 %v3991_v57, %v13352_v29  ;;  %v2440_v21 = vsel %vm11159_vm13, 0.0, %v11109_v19  ;;  %v2877_v12 = vsel %vm2864_vm2, %v2848_v5, %v12900_v38 }
 0x57a   : > { %v2504_v0 = vrot.slane %v2440_v21, 7  ;;  %v2994_v49 = vmul.f32 %v9187_v46, %v2877_v12  ;;  %v3509_v37 = vmul.f32 %v9190_v16, %v2877_v12  ;;  %v3928_v17 = vmul.f32 %v9261_v41, %v2877_v12 }
 0x57b   : > { %13351 = vst [vmem:[#allocation82_spill] sm:$0xff] %v11171_v24  ;;  %v4291_v1 = vadd.f32 %v13157_v54, %v4215_v28  ;;  %v2441_v57 = vsel %vm11159_vm13, 0.0, %v11167_v60  ;;  %v2727_v23 = vmul.f32 %v9181_v50, %v11167_v60  ;;  %v13353_v5 = vrot.slane %v11018_v35, 7 }
 0x57c   : > { %v11195_v9 = vadd.f32 %v2994_v49, %v2788_v39  ;;  %v3573_v29 = vadd.f32 %v3509_v37, %v3432_v31  ;;  %v3992_v21 = vadd.f32 %v3928_v17, %v3851_v55  ;;  %v2505_v58 = vrot.slane %v2441_v57, 7 }
 0x57d   : > { %v2531_v59 = vsel %vm2518_vm3, %v13353_v5, %v2504_v0  ;;  %v11197_v12 = vmul.f32 %v4291_v1, %v4290_v48  ;;  %v13356_v5 = vrot.slane %v11167_v60, 1  ;;  %v13357_v17 = vrot.slane %v11104_v61, 7 }
 0x57e   : > { %v2649_v28 = vmul.f32 %v9197_v52, %v2531_v59  ;;  %v3293_v8 = vmul.f32 %v9206_v27, %v2531_v59  ;;  %v3712_v38 = vmul.f32 %v9219_v20, %v2531_v59  ;;  %v11203_v24 = vadd.f32 %v3573_v29, %v13355_v43  ;;  %v13358_v59 = vld [vmem:[#allocation97_spill] sm:$0xff] }
 0x57f   : > { %13354 = vst [vmem:[#allocation101_spill] sm:$0xff] %v11197_v12  ;;  %v4216_v35 = vadd.f32 %v3992_v21, %v11062_v56  ;;  %v2878_v39 = vsel %vm2864_vm2, %v2849_v30, %v13356_v5  ;;  %v2532_v43 = vsel %vm2518_vm3, %v13357_v17, %v2505_v58  ;;  %v3371_v56 = vmul.f32 %v9184_v40, %v11167_v60 }
 0x580   : > { %v2790_v31 = vadd.f32 %v2726_v10, %v2649_v28  ;;  %v3434_v55 = vadd.f32 %v3370_v34, %v3293_v8  ;;  %v3853_v48 = vadd.f32 %v3789_v33, %v3712_v38  ;;  %v2995_v49 = vmul.f32 %v9200_v7, %v2878_v39 }
 0x581   : > { %v4292_v37 = vadd.f32 %v9277_v51, %v4216_v35  ;;  %v3510_v1 = vmul.f32 %v9215_v63, %v2878_v39  ;;  %v2650_v57 = vmul.f32 %v9209_v13, %v2532_v43  ;;  %v3294_v10 = vmul.f32 %v9212_v53, %v2532_v43 }
 0x582   : > { %v11220_v30 = vadd.f32 %v2995_v49, %v2789_v22  ;;  %v3713_v38 = vmul.f32 %v9232_v15, %v2532_v43  ;;  %v3790_v61 = vmul.f32 %v9225_v6, %v11167_v60  ;;  %v3929_v33 = vmul.f32 %v9273_v32, %v2878_v39  ;;  %v13359_v22 = vld [vmem:[#allocation90_spill] sm:$0xff] }
 0x583   : > { %v3574_v34 = vadd.f32 %v3510_v1, %v3433_v25  ;;  %v11229_v29 = vadd.f32 %v13358_v59, %v9165_v11  ;;  %v2791_v21 = vadd.f32 %v2727_v23, %v2650_v57  ;;  %v3435_v28 = vadd.f32 %v3371_v56, %v3294_v10 }
 0x584   : > { %v1936_v8 = vand.u32 15, %v917_v18  ;;  %v11233_v35 = vadd.f32 %v13359_v22, %v9178_v36  ;;  %v3854_v25 = vadd.f32 %v3790_v61, %v3713_v38  ;;  %v3993_v49 = vadd.f32 %v3929_v33, %v3852_v14 }
 0x585   : > { %v11236_v5 = vadd.f32 %v3574_v34, %v11070_v45  ;;  %v12902_v17 = vrot.slane %v11229_v29, 7  ;;  %v2728_v39 = vmul.f32 %v9172_v47, %v11229_v29  ;;  %v3372_v23 = vmul.f32 %v13251_v4, %v11229_v29 }
 0x586   : > { %vm2160_vm14 = vcmp.eq.s32.totalorder %v1936_v8, 0  ;;  %v3791_v18 = vmul.f32 %v9222_v2, %v11229_v29  ;;  %v4217_v43 = vadd.f32 %v3993_v49, %v11076_v42  ;;  %v12903_v42 = vrot.slane %v11233_v35, 7 }
 0x587   : > { %v2282_v56 = vsel %vm2160_vm14, 0.0, %v11229_v29  ;;  %v2529_v45 = vsel %vm2518_vm3, %v2504_v0, %v12902_v17  ;;  %v2283_v14 = vsel %vm2160_vm14, 0.0, %v11233_v35  ;;  %v2729_v61 = vmul.f32 %v9181_v50, %v11233_v35 }
 0x588   : > { %v2651_v1 = vmul.f32 %v9197_v52, %v2529_v45  ;;  %v2852_v57 = vrot.slane %v2282_v56, 1  ;;  %v3295_v10 = vmul.f32 %v9206_v27, %v2529_v45  ;;  %v3714_v38 = vmul.f32 %v9219_v20, %v2529_v45 }
 0x589   : > { %v4293_v34 = vadd.f32 %v13157_v54, %v4217_v43  ;;  %v2853_v33 = vrot.slane %v2283_v14, 1  ;;  %v13360_v0 = vrot.slane %v11109_v19, 1  ;;  %v13362_v19 = vrot.slane %v11167_v60, 1 }
 0x58a   : > { %v2792_v59 = vadd.f32 %v2728_v39, %v2651_v1  ;;  %v3436_v22 = vadd.f32 %v3372_v23, %v3295_v10  ;;  %v3855_v49 = vadd.f32 %v3791_v18, %v3714_v38  ;;  %v2530_v39 = vsel %vm2518_vm3, %v2505_v58, %v12903_v42 }
 0x58b   : > { %v2875_v8 = vsel %vm2864_vm2, %v13360_v0, %v2852_v57  ;;  %v11263_v56 = vmul.f32 %v4293_v34, %v4292_v37  ;;  %v2876_v14 = vsel %vm2864_vm2, %v13362_v19, %v2853_v33  ;;  %v3373_v37 = vmul.f32 %v9184_v40, %v11233_v35 }
 0x58c   : > { %v2996_v45 = vmul.f32 %v9187_v46, %v2875_v8  ;;  %v3511_v43 = vmul.f32 %v9190_v16, %v2875_v8  ;;  %v3930_v17 = vmul.f32 %v9261_v41, %v2875_v8  ;;  %v3792_v23 = vmul.f32 %v9225_v6, %v11233_v35 }
 0x58d   : > { %13361 = vst [vmem:[#allocation103_spill] sm:$0xff] %v11263_v56  ;;  %v2652_v38 = vmul.f32 %v9209_v13, %v2530_v39  ;;  %v2997_v34 = vmul.f32 %v9200_v7, %v2876_v14  ;;  %v3296_v58 = vmul.f32 %v9212_v53, %v2530_v39  ;;  %v3512_v60 = vmul.f32 %v9215_v63, %v2876_v14 }
 0x58e   : > { %v11280_v18 = vadd.f32 %v2996_v45, %v2790_v31  ;;  %v3575_v1 = vadd.f32 %v3511_v43, %v3434_v55  ;;  %v3994_v10 = vadd.f32 %v3930_v17, %v3853_v48  ;;  %v3715_v0 = vmul.f32 %v9232_v15, %v2530_v39  ;;  %v13363_v43 = vld [vmem:[#allocation55_spill] sm:$0xff] }
 0x58f   : > { %v2793_v42 = vadd.f32 %v2729_v61, %v2652_v38  ;;  %v3931_v31 = vmul.f32 %v9273_v32, %v2876_v14  ;;  %v11292_v55 = vadd.f32 %v2997_v34, %v2791_v21  ;;  %v3437_v48 = vadd.f32 %v3373_v37, %v3296_v58  ;;  %v13366_v21 = vld [vmem:[#allocation62_spill] sm:$0xff]  ;;  %v13368_v38 = vld [vmem:[#allocation87_spill] sm:$0xff] }
 0x590   : > { %v11288_v8 = vadd.f32 %v3575_v1, %v11133_v26  ;;  %v4218_v19 = vadd.f32 %v3994_v10, %v11145_v44  ;;  %v3576_v17 = vadd.f32 %v3512_v60, %v3435_v28  ;;  %v3856_v45 = vadd.f32 %v3792_v23, %v3715_v0  ;;  %v13365_v26 = vld [vmem:[#allocation78_spill] sm:$0xff] }
 0x591   : > { %v11296_v56 = vmul.f32 %v9184_v40, %v13363_v43  ;;  %v3995_v12 = vadd.f32 %v3931_v31, %v3854_v25  ;;  %v918_v39 = vadd.s32 216, %v9153_v3  ;;  %v11301_v1 = vadd.f32 %v13365_v26, %v9165_v11  ;;  %v13367_v37 = vld [vmem:[#allocation82_spill] sm:$0xff] }
 0x592   : > { %v4294_v44 = vadd.f32 %v9277_v51, %v4218_v19  ;;  %v11305_v61 = vadd.f32 %v3576_v17, %v11152_v62  ;;  %v11309_v28 = vadd.f32 %v13366_v21, %v9178_v36  ;;  %v919_v14 = vadd.s32 224, %v9153_v3 }
 0x593   : > { %13364 = vst [vmem:[#allocation58_spill] sm:$0xff] %v11296_v56  ;;  %v4219_v23 = vadd.f32 %v3995_v12, %v13367_v37  ;;  %v1943_v25 = vand.u32 15, %v918_v39  ;;  %v12906_v10 = vrot.slane %v11301_v1, 1  ;;  %v11316_v34 = vadd.f32 %v13368_v38, %v9165_v11 }
 0x594   : > { %v2730_v58 = vmul.f32 %v9172_v47, %v11301_v1  ;;  %v3374_v62 = vmul.f32 %v13251_v4, %v11301_v1  ;;  %v3793_v60 = vmul.f32 %v9222_v2, %v11301_v1  ;;  %v12909_v0 = vrot.slane %v11309_v28, 1 }
 0x595   : > { %v4295_v12 = vadd.f32 %v13157_v54, %v4219_v23  ;;  %vm2321_vm15 = vcmp.eq.s32.totalorder %v1943_v25, 15  ;;  %v2873_v19 = vsel %vm2864_vm2, %v2852_v57, %v12906_v10  ;;  %v2731_v31 = vmul.f32 %v9181_v50, %v11309_v28 }
 0x596   : > { %v2444_v17 = vsel %vm2321_vm15, 0.0, %v11301_v1  ;;  %v2998_v39 = vmul.f32 %v9187_v46, %v2873_v19  ;;  %v3513_v26 = vmul.f32 %v9190_v16, %v2873_v19  ;;  %v3932_v21 = vmul.f32 %v9261_v41, %v2873_v19 }
 0x597   : > { %v11336_v37 = vmul.f32 %v4295_v12, %v4294_v44  ;;  %v2508_v23 = vrot.slane %v2444_v17, 7  ;;  %v2445_v25 = vsel %vm2321_vm15, 0.0, %v11309_v28  ;;  %v2874_v57 = vsel %vm2864_vm2, %v2853_v33, %v12909_v0 }
 0x598   : > { %v11343_v38 = vadd.f32 %v2998_v39, %v2792_v59  ;;  %v3577_v10 = vadd.f32 %v3513_v26, %v3436_v22  ;;  %v3996_v56 = vadd.f32 %v3932_v21, %v3855_v49  ;;  %v2509_v43 = vrot.slane %v2445_v25, 7 }
 0x599   : > { %13369 = vst [vmem:[#allocation51_spill] sm:$0xff] %v11336_v37  ;;  %v13370_v54 = vrot.slane %v11229_v29, 7  ;;  %v2999_v44 = vmul.f32 %v9200_v7, %v2874_v57  ;;  %v3375_v12 = vmul.f32 %v9184_v40, %v11309_v28  ;;  %v3514_v17 = vmul.f32 %v9215_v63, %v2874_v57 }
 0x59a   : > { %v11356_v59 = vadd.f32 %v3577_v10, %v11195_v9  ;;  %v11360_v29 = vadd.f32 %v3996_v56, %v11203_v24 }
 0x59b   : > { %v2527_v19 = vsel %vm2518_vm3, %v13370_v54, %v2508_v23  ;;  %v13371_v54 = vrot.slane %v11233_v35, 7  ;;  %v11366_v39 = vadd.f32 %v2999_v44, %v2793_v42  ;;  %v3578_v26 = vadd.f32 %v3514_v17, %v3437_v48 }
 0x59c   : > { %v2653_v37 = vmul.f32 %v9197_v52, %v2527_v19  ;;  %v3297_v33 = vmul.f32 %v9206_v27, %v2527_v19  ;;  %v3716_v22 = vmul.f32 %v9219_v20, %v2527_v19  ;;  %v3794_v35 = vmul.f32 %v9225_v6, %v11309_v28 }
 0x59d   : > { %v2528_v49 = vsel %vm2518_vm3, %v13371_v54, %v2509_v43  ;;  %13372 = vst [vmem:[#allocation71_spill] sm:$0xff] %v11366_v39  ;;  %v11373_v19 = vadd.f32 %v3578_v26, %v11220_v30  ;;  %v3933_v42 = vmul.f32 %v9273_v32, %v2874_v57  ;;  %v1950_v48 = vand.u32 15, %v919_v14  ;;  %v13379_v26 = vld [vmem:[#allocation104_spill] sm:$0xff] }
 0x59e   : > { %v11368_v21 = vadd.f32 %v2730_v58, %v2653_v37  ;;  %v3438_v25 = vadd.f32 %v3374_v62, %v3297_v33  ;;  %v3857_v0 = vadd.f32 %v3793_v60, %v3716_v22  ;;  %v2654_v9 = vmul.f32 %v9209_v13, %v2528_v49  ;;  %v13376_v22 = vld [vmem:[#allocation69_spill] sm:$0xff] }
 0x59f   : > { %v3298_v10 = vmul.f32 %v9212_v53, %v2528_v49  ;;  %v3717_v24 = vmul.f32 %v9232_v15, %v2528_v49  ;;  %v12910_v58 = vrot.slane %v11316_v34, 7  ;;  %v2732_v37 = vmul.f32 %v9172_v47, %v11316_v34 }
 0x5a0   : > { %v11378_v56 = vadd.f32 %v2731_v31, %v2654_v9  ;;  %v3376_v30 = vmul.f32 %v13251_v4, %v11316_v34  ;;  %v3997_v44 = vadd.f32 %v3933_v42, %v3856_v45  ;;  %vm11386_vm0 = vcmp.eq.s32.totalorder %v1950_v48, 0 }
 0x5a1   : > { %v3439_v62 = vadd.f32 %v3375_v12, %v3298_v10  ;;  %v3858_v60 = vadd.f32 %v3794_v35, %v3717_v24  ;;  %v2525_v14 = vsel %vm2518_vm3, %v2508_v23, %v12910_v58  ;;  %v3795_v31 = vmul.f32 %v9222_v2, %v11316_v34 }
 0x5a2   : > { %13373 = vst [vmem:[#allocation91_spill] sm:$0xff] %v11378_v56  ;;  %v2286_v57 = vsel %vm11386_vm0, 0.0, %v11316_v34  ;;  %v2655_v12 = vmul.f32 %v9197_v52, %v2525_v14  ;;  %v3299_v45 = vmul.f32 %v9206_v27, %v2525_v14  ;;  %v3718_v33 = vmul.f32 %v9219_v20, %v2525_v14 }
 0x5a3   : > { %v11404_v54 = vmul.f32 %v9187_v46, %v13376_v22  ;;  %v11407_v49 = vadd.f32 %v3997_v44, %v11236_v5  ;;  %v2856_v23 = vrot.slane %v2286_v57, 1  ;;  %v11411_v9 = vadd.f32 %v13379_v26, %v9178_v36  ;;  %v13382_v26 = vld [vmem:[#allocation70_spill] sm:$0xff] }
 0x5a4   : > { %v11415_v10 = vmul.f32 %v9190_v16, %v13376_v22  ;;  %v11417_v24 = vadd.f32 %v2732_v37, %v2655_v12  ;;  %v3440_v35 = vadd.f32 %v3376_v30, %v3299_v45  ;;  %v3859_v42 = vadd.f32 %v3795_v31, %v3718_v33 }
 0x5a5   : > { %13377 = vst [vmem:[#allocation97_spill] sm:$0xff] %v11404_v54  ;;  %13378 = vst [vmem:[#allocation90_spill] sm:$0xff] %v11407_v49  ;;  %v13381_v48 = vrot.slane %v11301_v1, 1  ;;  %v2287_v5 = vsel %vm11386_vm0, 0.0, %v11411_v9  ;;  %v12911_v44 = vrot.slane %v11411_v9, 7  ;;  %v920_v57 = vadd.s32 232, %v9153_v3 }
 0x5a6   : > { %13380 = vst [vmem:[#allocation78_spill] sm:$0xff] %v11415_v10  ;;  %v11430_v22 = vmul.f32 %v9200_v7, %v13382_v26  ;;  %v13384_v1 = vld [vmem:[#allocation74_spill] sm:$0xff]  ;;  %v2733_v12 = vmul.f32 %v9181_v50, %v11411_v9  ;;  %v2857_v45 = vrot.slane %v2287_v5, 1  ;;  %v3377_v33 = vmul.f32 %v9184_v40, %v11411_v9 }
 0x5a7   : > { %v2871_v14 = vsel %vm2864_vm2, %v13381_v48, %v2856_v23  ;;  %v11436_v31 = vadd.f32 %v13384_v1, %v9165_v11  ;;  %v2526_v17 = vsel %vm2518_vm3, %v2509_v43, %v12911_v44  ;;  %v13385_v1 = vrot.slane %v11309_v28, 1 }
 0x5a8   : > { %13383 = vst [vmem:[#allocation62_spill] sm:$0xff] %v11430_v22  ;;  %v3515_v37 = vmul.f32 %v9190_v16, %v2871_v14  ;;  %v3934_v30 = vmul.f32 %v9261_v41, %v2871_v14  ;;  %v2656_v22 = vmul.f32 %v9209_v13, %v2526_v17  ;;  %v3300_v39 = vmul.f32 %v9212_v53, %v2526_v17 }
 0x5a9   : > { %v11452_v49 = vsel %vm2864_vm2, %v13385_v1, %v2857_v45  ;;  %v3719_v43 = vmul.f32 %v9232_v15, %v2526_v17  ;;  %v3796_v5 = vmul.f32 %v9225_v6, %v11411_v9  ;;  %v1957_v44 = vand.u32 15, %v920_v57 }
 0x5aa   : > { %v3579_v48 = vadd.f32 %v3515_v37, %v3438_v25  ;;  %v3998_v58 = vadd.f32 %v3934_v30, %v3857_v0  ;;  %v11459_v25 = vmul.f32 %v9215_v63, %v13382_v26  ;;  %v11464_v37 = vadd.f32 %v2733_v12, %v2656_v22 }
 0x5ab   : > { %v3441_v28 = vadd.f32 %v3377_v33, %v3300_v39  ;;  %v3516_v30 = vmul.f32 %v9215_v63, %v11452_v49  ;;  %v3860_v1 = vadd.f32 %v3796_v5, %v3719_v43  ;;  %v3935_v17 = vmul.f32 %v9273_v32, %v11452_v49  ;;  %v13392_v43 = vld [vmem:[#allocation64_spill] sm:$0xff] }
 0x5ac   : > { %13386 = vst [vmem:[#allocation82_spill] sm:$0xff] %v11459_v25  ;;  %v11462_v0 = vadd.f32 %v3998_v58, %v11288_v8  ;;  %13388 = vst [vmem:[#allocation69_spill] sm:$0xff] %v11464_v37  ;;  %vm11470_vm1 = vcmp.eq.s32.totalorder %v1957_v44, 15  ;;  %v11476_v57 = vadd.f32 %v9277_v51, %v11360_v29  ;;  %v2734_v39 = vmul.f32 %v9172_v47, %v11436_v31 }
 0x5ad   : > { %v2448_v8 = vsel %vm11470_vm1, 0.0, %v11436_v31  ;;  %v2858_v58 = vrot.slane %v11436_v31, 1  ;;  %v3580_v26 = vadd.f32 %v3516_v30, %v3439_v62  ;;  %v3999_v22 = vadd.f32 %v3935_v17, %v3858_v60 }
 0x5ae   : > { %13387 = vst [vmem:[#allocation87_spill] sm:$0xff] %v11462_v0  ;;  %13391 = vst [vmem:[#allocation104_spill] sm:$0xff] %v11476_v57  ;;  %v2512_v12 = vrot.slane %v2448_v8, 7  ;;  %v3378_v44 = vmul.f32 %v13251_v4, %v11436_v31  ;;  %v3797_v29 = vmul.f32 %v9222_v2, %v11436_v31  ;;  %v11492_v5 = vadd.f32 %v13392_v43, %v9178_v36 }
 0x5af   : > { %v2869_v33 = vsel %vm2864_vm2, %v2856_v23, %v2858_v58  ;;  %v921_v47 = vadd.s32 240, %v9153_v3  ;;  %v11496_v57 = vadd.f32 %v3999_v22, %v11305_v61  ;;  %v13394_v62 = vrot.slane %v11316_v34, 7  ;;  %v13395_v23 = vld [vmem:[#allocation106_spill] sm:$0xff] }
 0x5b0   : > { %v3517_v30 = vmul.f32 %v9190_v16, %v2869_v33  ;;  %v11505_v17 = vadd.f32 %v13395_v23, %v9165_v11  ;;  %v3936_v61 = vmul.f32 %v9261_v41, %v2869_v33  ;;  %v3000_v22 = vmul.f32 %v9187_v46, %v2871_v14 }
 0x5b1   : > { %13393 = vst [vmem:[#allocation70_spill] sm:$0xff] %v11496_v57  ;;  %v2523_v60 = vsel %vm2518_vm3, %v13394_v62, %v2512_v12  ;;  %v3002_v34 = vmul.f32 %v9187_v46, %v2869_v33  ;;  %v2449_v62 = vsel %vm11470_vm1, 0.0, %v11492_v5  ;;  %v2859_v10 = vrot.slane %v11492_v5, 1 }
 0x5b2   : > { %v2657_v31 = vmul.f32 %v9197_v52, %v2523_v60  ;;  %v3301_v8 = vmul.f32 %v9206_v27, %v2523_v60  ;;  %v3720_v43 = vmul.f32 %v9219_v20, %v2523_v60  ;;  %v11513_v25 = vadd.f32 %v3517_v30, %v3440_v35 }
 0x5b3   : > { %v4000_v51 = vadd.f32 %v3936_v61, %v3859_v42  ;;  %v2513_v0 = vrot.slane %v2449_v62, 7  ;;  %v2735_v60 = vmul.f32 %v9181_v50, %v11492_v5  ;;  %v3379_v14 = vmul.f32 %v9184_v40, %v11492_v5 }
 0x5b4   : > { %v11518_v23 = vadd.f32 %v2734_v39, %v2657_v31  ;;  %v3442_v57 = vadd.f32 %v3378_v44, %v3301_v8  ;;  %v3861_v37 = vadd.f32 %v3797_v29, %v3720_v43  ;;  %v3798_v56 = vmul.f32 %v9225_v6, %v11492_v5 }
 0x5b5   : > { %v11526_v35 = vadd.f32 %v4000_v51, %v11356_v59  ;;  %v1964_v39 = vand.u32 15, %v921_v47  ;;  %v2514_v44 = vrot.slane %v11505_v17, 7  ;;  %v13397_v42 = vrot.slane %v11411_v9, 7 }
 0x5b6   : > { %v2870_v50 = vsel %vm2864_vm2, %v2857_v45, %v2859_v10  ;;  %v3380_v29 = vmul.f32 %v13251_v4, %v11505_v17  ;;  %v3643_v51 = vadd.f32 %v3579_v48, %v11280_v18  ;;  %v3799_v9 = vmul.f32 %v9222_v2, %v11505_v17 }
 0x5b7   : > { %13396 = vst [vmem:[#allocation74_spill] sm:$0xff] %v11526_v35  ;;  %v2524_v33 = vsel %vm2518_vm3, %v13397_v42, %v2513_v0  ;;  %v3518_v47 = vmul.f32 %v9215_v63, %v2870_v50  ;;  %v3937_v31 = vmul.f32 %v9273_v32, %v2870_v50  ;;  %vm11547_vm4 = vcmp.eq.s32.totalorder %v1964_v39, 0 }
 0x5b8   : > { %v2658_v59 = vmul.f32 %v9209_v13, %v2524_v33  ;;  %v3302_v5 = vmul.f32 %v9212_v53, %v2524_v33  ;;  %v3721_v30 = vmul.f32 %v9232_v15, %v2524_v33  ;;  %v2521_v18 = vsel %vm2518_vm3, %v2512_v12, %v2514_v44  ;;  %v13400_v13 = vld [vmem:[#allocation107_spill] sm:$0xff] }
 0x5b9   : > { %v11557_v43 = vadd.f32 %v3518_v47, %v3441_v28  ;;  %v2290_v61 = vsel %vm11547_vm4, 0.0, %v11505_v17  ;;  %v4001_v42 = vadd.f32 %v3937_v31, %v3860_v1  ;;  %v3303_v33 = vmul.f32 %v9206_v27, %v2521_v18 }
 0x5ba   : > { %v11555_v48 = vadd.f32 %v2735_v60, %v2658_v59  ;;  %v3443_v8 = vadd.f32 %v3379_v14, %v3302_v5  ;;  %v3862_v62 = vadd.f32 %v3798_v56, %v3721_v30  ;;  %v2860_v39 = vrot.slane %v2290_v61, 1  ;;  %v13401_v56 = vld [vmem:[#allocation88_spill] sm:$0xff] }
 0x5bb   : > { %v3722_v35 = vmul.f32 %v9219_v20, %v2521_v18  ;;  %v11566_v54 = vadd.f32 %v13400_v13, %v9178_v36  ;;  %v3644_v12 = vadd.f32 %v3580_v26, %v11292_v55  ;;  %v922_v28 = vadd.s32 248, %v9153_v3 }
 0x5bc   : > { %v11571_v60 = vadd.f32 %v4001_v42, %v11373_v19  ;;  %v2867_v14 = vsel %vm2864_vm2, %v2858_v58, %v2860_v39  ;;  %v3444_v1 = vadd.f32 %v3380_v29, %v3303_v33  ;;  %v1746_v59 = vadd.f32 %v13401_v56, %v9165_v11 }
 0x5bd   : > { %v3004_v5 = vmul.f32 %v9187_v46, %v2867_v14  ;;  %v3519_v47 = vmul.f32 %v9190_v16, %v2867_v14  ;;  %v3863_v13 = vadd.f32 %v3799_v9, %v3722_v35  ;;  %v3938_v30 = vmul.f32 %v9261_v41, %v2867_v14 }
 0x5be   : > { %v2291_v55 = vsel %vm11547_vm4, 0.0, %v11566_v54  ;;  %v2515_v19 = vrot.slane %v11566_v54, 7  ;;  %v3381_v58 = vmul.f32 %v9184_v40, %v11566_v54  ;;  %v3800_v26 = vmul.f32 %v9225_v6, %v11566_v54 }
 0x5bf   : > { %v3583_v11 = vadd.f32 %v3519_v47, %v3442_v57  ;;  %v4002_v29 = vadd.f32 %v3938_v30, %v3861_v37  ;;  %v2861_v46 = vrot.slane %v2291_v55, 1  ;;  %v1971_v31 = vand.u32 15, %v922_v28  ;;  %v13404_v30 = vld [vmem:[#allocation66_spill] sm:$0xff] }
 0x5c0   : > { %v2522_v35 = vsel %vm2518_vm3, %v2513_v0, %v2515_v19  ;;  %v2862_v9 = vrot.slane %v1746_v59, 1  ;;  %v3064_v45 = vadd.f32 %v3000_v22, %v11368_v21  ;;  %v3066_v18 = vadd.f32 %v3002_v34, %v11417_v24  ;;  %v13417_v21 = vld [vmem:[#allocation60_spill] sm:$0xff] }
 0x5c1   : > { %v11594_v61 = vadd.f32 %v4002_v29, %v3643_v51  ;;  %v2868_v42 = vsel %vm2864_vm2, %v2859_v10, %v2861_v46  ;;  %v3304_v57 = vmul.f32 %v9212_v53, %v2522_v35  ;;  %v3723_v37 = vmul.f32 %v9232_v15, %v2522_v35 }
 0x5c2   : > { %v3001_v33 = vmul.f32 %v9200_v7, %v11452_v49  ;;  %v3520_v28 = vmul.f32 %v9215_v63, %v2868_v42  ;;  %v3939_v0 = vmul.f32 %v9273_v32, %v2868_v42  ;;  %vm11604_vm5 = vcmp.eq.s32.totalorder %v1971_v31, 15 }
 0x5c3   : > { %v3003_v24 = vmul.f32 %v9200_v7, %v2870_v50  ;;  %v11609_v22 = vadd.f32 %v3381_v58, %v3304_v57  ;;  %v11611_v10 = vadd.f32 %v3800_v26, %v3723_v37  ;;  %v2452_v34 = vsel %vm11604_vm5, 0.0, %v1746_v59  ;;  %v13408_v37 = vld [vmem:[#allocation65_spill] sm:$0xff] }
 0x5c4   : > { %v11615_v51 = vadd.f32 %v3520_v28, %v3443_v8  ;;  %v4003_v49 = vadd.f32 %v3939_v0, %v3862_v62  ;;  %v2516_v14 = vrot.slane %v2452_v34, 7  ;;  %v2865_v56 = vsel %vm2864_vm2, %v2860_v39, %v2862_v9  ;;  %v13405_v62 = vld [vmem:[#allocation56_spill] sm:$0xff] }
 0x5c5   : > { %v3005_v47 = vmul.f32 %v9200_v7, %v2868_v42  ;;  %v2927_v50 = vsel %vm2864_vm2, %v2862_v9, %v13404_v30  ;;  %v3068_v55 = vadd.f32 %v3004_v5, %v11518_v23  ;;  %v3521_v58 = vmul.f32 %v9190_v16, %v2865_v56  ;;  %v13407_v42 = vld [vmem:[#allocation63_spill] sm:$0xff] }
 0x5c6   : > { %v11625_v26 = vadd.f32 %v4003_v49, %v3644_v12  ;;  %v2519_v8 = vsel %vm2518_vm3, %v2514_v44, %v2516_v14  ;;  %v13406_v29 = vrot.slane %v13405_v62, 7  ;;  %v3382_v39 = vmul.f32 %v13251_v4, %v1746_v59  ;;  %v13412_v49 = vld [vmem:[#allocation91_spill] sm:$0xff] }
 0x5c7   : > { %v3305_v5 = vmul.f32 %v9206_v27, %v2519_v8  ;;  %v3585_v12 = vadd.f32 %v3521_v58, %v3444_v1  ;;  %v3523_v35 = vmul.f32 %v9190_v16, %v2927_v50  ;;  %v3645_v17 = vadd.f32 %v11513_v25, %v11343_v38  ;;  %v13409_v16 = vld [vmem:[#allocation80_spill] sm:$0xff]  ;;  %v13410_v38 = vld [vmem:[#allocation97_spill] sm:$0xff] }
 0x5c8   : > { %v2581_v7 = vsel %vm2518_vm3, %v2516_v14, %v13406_v29  ;;  %v3647_v44 = vadd.f32 %v3583_v11, %v3064_v45  ;;  %v3724_v9 = vmul.f32 %v9219_v20, %v2519_v8  ;;  %v3942_v1 = vmul.f32 %v9261_v41, %v2927_v50  ;;  %v13411_v11 = vld [vmem:[#allocation78_spill] sm:$0xff] }
 0x5c9   : > { %v2599_v31 = vmul.f32 %v9197_v52, %v2581_v7  ;;  %v3243_v23 = vmul.f32 %v9206_v27, %v2581_v7  ;;  %v3446_v4 = vadd.f32 %v3382_v39, %v3305_v5  ;;  %v11645_v0 = vadd.f32 %v3585_v12, %v3066_v18  ;;  %v13415_v39 = vld [vmem:[#allocation67_spill] sm:$0xff] }
 0x5ca   : > { %v3801_v52 = vmul.f32 %v9222_v2, %v1746_v59  ;;  %v3940_v27 = vmul.f32 %v9261_v41, %v2865_v56  ;;  %v1748_v34 = vadd.f32 %v13409_v16, %v9178_v36  ;;  %v3065_v14 = vadd.f32 %v3001_v33, %v13412_v49  ;;  %v13413_v59 = vld [vmem:[#allocation75_spill] sm:$0xff]  ;;  %v13414_v41 = vld [vmem:[#allocation76_spill] sm:$0xff]  ;;  %v13416_v33 = vld [vmem:[#allocation90_spill] sm:$0xff] }
 0x5cb   : > { %v2740_v57 = vadd.f32 %v13407_v42, %v2599_v31  ;;  %v3384_v28 = vadd.f32 %v13408_v37, %v3243_v23  ;;  %v3587_v45 = vadd.f32 %v3523_v35, %v3446_v4  ;;  %v11668_v31 = vadd.f32 %v13417_v21, %v13416_v33  ;;  %v13418_v23 = vld [vmem:[#allocation89_spill] sm:$0xff]  ;;  %v13419_v12 = vld [vmem:[#allocation55_spill] sm:$0xff] }
 0x5cc   : > { %v3865_v30 = vadd.f32 %v3801_v52, %v3724_v9  ;;  %v4004_v58 = vadd.f32 %v3940_v27, %v3863_v13  ;;  %v2453_v18 = vsel %vm11604_vm5, 0.0, %v1748_v34  ;;  %v2863_v2 = vrot.slane %v1748_v34, 1  ;;  %v13422_v9 = vld [vmem:[#allocation61_spill] sm:$0xff]  ;;  %v13423_v37 = vld [vmem:[#allocation59_spill] sm:$0xff]  ;;  %v13425_v27 = vld [vmem:[#allocation70_spill] sm:$0xff] }
 0x5cd   : > { %v3010_v25 = vadd.f32 %v13410_v38, %v2740_v57  ;;  %v3525_v20 = vadd.f32 %v13411_v11, %v3384_v28  ;;  %v11658_v8 = vadd.f32 %v3587_v45, %v3068_v55  ;;  %v2517_v36 = vrot.slane %v2453_v18, 7  ;;  %v13424_v4 = vld [vmem:[#allocation69_spill] sm:$0xff]  ;;  %v13426_v38 = vld [vmem:[#allocation68_spill] sm:$0xff]  ;;  %v13428_v49 = vld [vmem:[#allocation71_spill] sm:$0xff] }
 0x5ce   : > { %v4006_v62 = vadd.f32 %v3942_v1, %v3865_v30  ;;  %v4228_v29 = vadd.f32 %v4004_v58, %v3645_v17  ;;  %v2866_v7 = vsel %vm2864_vm2, %v2861_v46, %v2863_v2  ;;  %v2928_v13 = vsel %vm2864_vm2, %v2863_v2, %v13415_v39  ;;  %v13421_v17 = vld [vmem:[#allocation87_spill] sm:$0xff]  ;;  %v4385_v39 = vld [vmem:[#allocation14 + $0x10] sm:$0xff] }
 0x5cf   : > { %v3593_v56 = vadd.f32 %v13413_v59, %v3010_v25  ;;  %v4172_v50 = vadd.f32 %v13414_v41, %v3525_v20  ;;  %v2520_v55 = vsel %vm2518_vm3, %v2515_v19, %v2517_v36  ;;  %v13420_v35 = vrot.slane %v13419_v12, 7  ;;  %v13427_v20 = vld [vmem:[#allocation58_spill] sm:$0xff]  ;;  %v4383_v59 = vld [vmem:[#allocation14] sm:$0xff]  ;;  %v4386_v33 = vld [vmem:[#allocation14 + $0x18] sm:$0xff] }
 0x5d0   : > { %v11681_v42 = vadd.f32 %v13422_v9, %v13421_v17  ;;  %v4230_v57 = vadd.f32 %v4006_v62, %v3647_v44  ;;  %v3067_v52 = vadd.f32 %v3003_v24, %v13424_v4  ;;  %v11687_v54 = vadd.f32 %v13417_v21, %v13425_v27  ;;  %v13431_v62 = vld [vmem:[#allocation79_spill] sm:$0xff]  ;;  %v4388_v17 = vld [vmem:[#allocation14 + $0x28] sm:$0xff] }
 0x5d1   : > { %v4176_v5 = vadd.f32 %v13418_v23, %v3593_v56  ;;  %v2582_v46 = vsel %vm2518_vm3, %v2517_v36, %v13420_v35  ;;  %v3069_v19 = vadd.f32 %v3005_v47, %v11555_v48  ;;  %v3306_v3 = vmul.f32 %v9212_v53, %v2520_v55  ;;  %v13429_v47 = vld [vmem:[#allocation62_spill] sm:$0xff] }
 0x5d2   : > { %v2600_v28 = vmul.f32 %v13423_v37, %v2582_v46  ;;  %v3244_v1 = vmul.f32 %v9212_v53, %v2582_v46  ;;  %v4248_v16 = vadd.f32 %v13422_v9, %v4172_v50  ;;  %v3383_v44 = vmul.f32 %v9184_v40, %v1748_v34  ;;  %v4384_v40 = vld [vmem:[#allocation14 + $0x8] sm:$0xff]  ;;  %v13430_v56 = vld [vmem:[#allocation82_spill] sm:$0xff]  ;;  %v4387_v46 = vld [vmem:[#allocation14 + $0x20] sm:$0xff] }
 0x5d3   : > { %v3522_v11 = vmul.f32 %v9215_v63, %v2866_v7  ;;  %v3524_v45 = vmul.f32 %v9215_v63, %v2928_v13  ;;  %v3646_v30 = vadd.f32 %v11557_v43, %v13428_v49  ;;  %v3648_v48 = vadd.f32 %v11615_v51, %v3065_v14  ;;  %v4390_v49 = vld [vmem:[#allocation14 + $0x38] sm:$0xff] }
 0x5d4   : > { %v2741_v25 = vadd.f32 %v13426_v38, %v2600_v28  ;;  %v3385_v24 = vadd.f32 %v13427_v20, %v3244_v1  ;;  %v3447_v53 = vadd.f32 %v3383_v44, %v3306_v3  ;;  %v3725_v2 = vmul.f32 %v9232_v15, %v2520_v55  ;;  %v13432_v15 = vld [vmem:[#allocation81_spill] sm:$0xff]  ;;  %v13434_v44 = vld [vmem:[#allocation74_spill] sm:$0xff] }
 0x5d5   : > { %v3586_v18 = vadd.f32 %v3522_v11, %v11609_v22  ;;  %v3802_v50 = vmul.f32 %v9225_v6, %v1748_v34  ;;  %v3941_v63 = vmul.f32 %v9273_v32, %v2866_v7  ;;  %v3943_v36 = vmul.f32 %v9273_v32, %v2928_v13  ;;  %v13433_v7 = vld [vmem:[#allocation92_spill] sm:$0xff] }
 0x5d6   : > { %v3011_v58 = vadd.f32 %v13429_v47, %v2741_v25  ;;  %v3526_v41 = vadd.f32 %v13430_v56, %v3385_v24  ;;  %v3588_v43 = vadd.f32 %v3524_v45, %v3447_v53  ;;  %v7871_v12 = vmov 0.0|0.0   ;;  %v4389_v45 = vld [vmem:[#allocation14 + $0x30] sm:$0xff]  ;;  %v13437_v47 = vld [vmem:[#allocation104_spill] sm:$0xff] }
 0x5d7   : > { %v3650_v14 = vadd.f32 %v3586_v18, %v3067_v52  ;;  %v3866_v23 = vadd.f32 %v3802_v50, %v3725_v2  ;;  %v4005_v22 = vadd.f32 %v3941_v63, %v11611_v10  ;;  %6693 = vmatprep.subr.bf16.mxu1 %v7871_v12  ;;  %v6694_v35 = vpack.c.bf16 %v4384_v40, %v4383_v59  ;;  %v13440_v63 = vld [vmem:[#allocation84_spill] sm:$0xff] }
 0x5d8   : > { %v3594_v51 = vadd.f32 %v13431_v62, %v3011_v58  ;;  %v4173_v55 = vadd.f32 %v13432_v15, %v3526_v41  ;;  %v4302_v6 = vadd.f32 %v13422_v9, %v11594_v61  ;;  %v4252_v32 = vadd.f32 %v13422_v9, %v4176_v5  ;;  %v13439_v41 = vld [vmem:[#allocation100_spill] sm:$0xff]  ;;  %v4393_v62 = vld [vmem:[#allocation14 + $0x50] sm:$0xff] }
 0x5d9   : > { %v3652_v34 = vadd.f32 %v3588_v43, %v3069_v19  ;;  %v4007_v37 = vadd.f32 %v3943_v36, %v3866_v23  ;;  %v4229_v28 = vadd.f32 %v4005_v22, %v3646_v30  ;;  %6695 = vmatpush3.bf16.msra.mxu1 %v6694_v35  ;;  %v6697_v4 = vpack.c.bf16 %v4386_v33, %v4385_v39  ;;  %v13442_v33 = vld [vmem:[#allocation83_spill] sm:$0xff]  ;;  %v4395_v15 = vld [vmem:[#allocation14 + $0x60] sm:$0xff]  ;;  %v13443_v35 = vld [vmem:[#allocation73_spill] sm:$0xff] }
 0x5da   : > { %v4177_v13 = vadd.f32 %v13433_v7, %v3594_v51  ;;  %v4249_v10 = vadd.f32 %v13417_v21, %v4173_v55  ;;  %v4303_v52 = vadd.f32 %v13417_v21, %v11625_v26  ;;  %v4304_v27 = vadd.f32 %v13422_v9, %v4228_v29  ;;  %6696 = vmatprep.subr.bf16.mxu1 %v7871_v12  ;;  %v4394_v51 = vld [vmem:[#allocation14 + $0x58] sm:$0xff]  ;;  %v4396_v55 = vld [vmem:[#allocation14 + $0x68] sm:$0xff] }
 0x5db   : > { %v4306_v61 = vadd.f32 %v13422_v9, %v4230_v57  ;;  %v4231_v19 = vadd.f32 %v4007_v37, %v3648_v48  ;;  %v4305_v1 = vadd.f32 %v13417_v21, %v4229_v28  ;;  %v6700_v38 = vpack.c.bf16 %v4388_v17, %v4387_v46  ;;  %v13435_v57 = vld [vmem:[#allocation72_spill] sm:$0xff]  ;;  %v4398_v46 = vld [vmem:[#allocation14 + $0x78] sm:$0xff]  ;;  %v13445_v17 = vld [vmem:[#allocation94_spill] sm:$0xff] }
 0x5dc   : > { %v4253_v5 = vadd.f32 %v13417_v21, %v4177_v13  ;;  %v11724_v3 = vmul.f32 %v4249_v10, %v4248_v16  ;;  %v4300_v11 = vadd.f32 %v13422_v9, %v13434_v44  ;;  %v4301_v26 = vadd.f32 %v13417_v21, %v11571_v60  ;;  %v4397_v13 = vld [vmem:[#allocation14 + $0x70] sm:$0xff]  ;;  %v4506_v28 = vld [vmem:[#allocation17] sm:$0xff] }
 0x5dd   : > { %v4307_v29 = vadd.f32 %v13417_v21, %v4231_v19  ;;  %6698 = vmatpush3.bf16.msra.mxu1 %v6697_v4  ;;  %vm7872_vm2 = vmmov 0   ;;  %v13436_v24 = vmov 0.0   ;;  %v4308_v16 = vadd.f32 %v13422_v9, %v11645_v0  ;;  %v4507_v10 = vld [vmem:[#allocation17 + $0x8] sm:$0xff] }
 0x5de   : > { %v11726_v25 = vmul.f32 %v4253_v5, %v4252_v32  ;;  %v4344_v20 = vadd.f32 %v13435_v57, %v11724_v3  ;;  %6498 = vmatprep.mubr.msk.f32.mxu1 %vm7872_vm2, %v13436_v24  ;;  %6699 = vmatprep.subr.bf16.mxu1 %v7871_v12  ;;  %v4309_v30 = vadd.f32 %v13417_v21, %v3650_v14  ;;  %v13441_v14 = vld [vmem:[#allocation99_spill] sm:$0xff]  ;;  %v13444_v32 = vld [vmem:[#allocation53_spill] sm:$0xff]  ;;  %v13446_v4 = vld [vmem:[#allocation102_spill] sm:$0xff] }
 0x5df   : > { %v4310_v60 = vadd.f32 %v13422_v9, %v11658_v8  ;;  %v4311_v48 = vadd.f32 %v13417_v21, %v3652_v34  ;;  %v11745_v58 = vmul.f32 %v11668_v31, %v13437_v47  ;;  %v11750_v0 = vmul.f32 %v11687_v54, %v11681_v42  ;;  %v13438_v31 = vld [vmem:[#allocation98_spill] sm:$0xff]  ;;  %v4391_v42 = vld [vmem:[#allocation14 + $0x40] sm:$0xff]  ;;  %v4392_v54 = vld [vmem:[#allocation14 + $0x48] sm:$0xff] }
 0x5e0   : > { %v4345_v53 = vadd.f32 %v4344_v20, %v11726_v25  ;;  %v11752_v18 = vmul.f32 %v4301_v26, %v4300_v11  ;;  %v11754_v2 = vmul.f32 %v4303_v52, %v4302_v6  ;;  %v11756_v59 = vmul.f32 %v4305_v1, %v4304_v27  ;;  %v13447_v5 = vld [vmem:[#allocation54_spill] sm:$0xff]  ;;  %v13448_v1 = vld [vmem:[#allocation95_spill] sm:$0xff]  ;;  %v13449_v44 = vld [vmem:[#allocation105_spill] sm:$0xff] }
 0x5e1   : > { %v11758_v40 = vmul.f32 %v4307_v29, %v4306_v61  ;;  %v11760_v8 = vmul.f32 %v4309_v30, %v4308_v16  ;;  %v11762_v21 = vmul.f32 %v4311_v48, %v4310_v60  ;;  %6701 = vmatpush3.bf16.msra.mxu1 %v6700_v38  ;;  %v6703_v56 = vpack.c.bf16 %v4390_v49, %v4389_v45  ;;  %v13450_v26 = vld [vmem:[#allocation86_spill] sm:$0xff]  ;;  %v13451_v20 = vld [vmem:[#allocation52_spill] sm:$0xff]  ;;  %v13453_v30 = vld [vmem:[#allocation77_spill] sm:$0xff] }
 0x5e2   : > { %v4346_v9 = vadd.f32 %v4345_v53, %v13438_v31  ;;  %6702 = vmatprep.subr.bf16.mxu1 %v7871_v12  ;;  %v6706_v43 = vpack.c.bf16 %v4392_v54, %v4391_v42  ;;  %v6709_v22 = vpack.c.bf16 %v4394_v51, %v4393_v62  ;;  %v6712_v7 = vpack.c.bf16 %v4396_v55, %v4395_v15  ;;  %v13452_v45 = vld [vmem:[#allocation96_spill] sm:$0xff]  ;;  %v13454_v48 = vld [vmem:[#allocation85_spill] sm:$0xff]  ;;  %v13457_v42 = vld [vmem:[#allocation103_spill] sm:$0xff] }
 0x5e3   : > { %v6715_v27 = vpack.c.bf16 %v4398_v46, %v4397_v13  ;;  %v6717_v61 = vpack.c.bf16 %v4507_v10, %v4506_v28  ;;  %v4509_v28 = vld [vmem:[#allocation17 + $0x18] sm:$0xff] }
 0x5e4   : > { %v4347_v50 = vadd.f32 %v4346_v9, %v13439_v41  ;;  %v13456_v9 = vld [vmem:[#allocation101_spill] sm:$0xff] }
 0x5e5   : > { %6704 = vmatpush3.bf16.msra.mxu1 %v6703_v56 }
 0x5e6   : > { %v4348_v36 = vadd.f32 %v4347_v50, %v13440_v63  ;;  %6705 = vmatprep.subr.bf16.mxu1 %v7871_v12  ;;  %v13458_v50 = vld [vmem:[#allocation51_spill] sm:$0xff] }
 0x5e8   : > { %v4349_v39 = vadd.f32 %v4348_v36, %v13441_v14 }
 0x5e9   : > { %6707 = vmatpush3.bf16.msra.mxu1 %v6706_v43 }
 0x5ea   : > { %v4350_v23 = vadd.f32 %v4349_v39, %v13442_v33  ;;  %6708 = vmatprep.subr.bf16.mxu1 %v7871_v12 }
 0x5ec   : > { %v4351_v6 = vadd.f32 %v4350_v23, %v13443_v35 }
 0x5ed   : > { %6710 = vmatpush3.bf16.msra.mxu1 %v6709_v22 }
 0x5ee   : > { %v4352_v34 = vadd.f32 %v4351_v6, %v13444_v32  ;;  %6711 = vmatprep.subr.bf16.mxu1 %v7871_v12 }
 0x5f0   : > { %v4353_v37 = vadd.f32 %v4352_v34, %v13445_v17 }
 0x5f1   : > { %6713 = vmatpush3.bf16.msra.mxu1 %v6712_v7 }
 0x5f2   : > { %v4354_v52 = vadd.f32 %v4353_v37, %v13446_v4  ;;  %6714 = vmatprep.subr.bf16.mxu1 %v7871_v12  ;;  %v13455_v12 = vld [vmem:[#allocation93_spill] sm:$0xff]  ;;  %v4508_v37 = vld [vmem:[#allocation17 + $0x10] sm:$0xff] }
 0x5f4   : > { %v4355_v19 = vadd.f32 %v4354_v52, %v13447_v5 }
 0x5f5   : > { %6716 = vmatpush3.bf16.msra.mxu1 %v6715_v27  ;;  %v6721_v27 = vpack.c.bf16 %v4509_v28, %v4508_v37 }
 0x5f6   : > { %v4356_v38 = vadd.f32 %v4355_v19, %v13448_v1  ;;  %6718 = vmatprep.subr.bf16.mxu1 %v6717_v61  ;;  %v4510_v19 = vld [vmem:[#allocation17 + $0x20] sm:$0xff] }
 0x5f8   : > { %v4357_v11 = vadd.f32 %v4356_v38, %v13449_v44  ;;  %v4511_v38 = vld [vmem:[#allocation17 + $0x28] sm:$0xff] }
 0x5fa   : > { %v4358_v29 = vadd.f32 %v4357_v11, %v13450_v26  ;;  %v6725_v11 = vpack.c.bf16 %v4511_v38, %v4510_v19 }
 0x5fc   : > { %v4359_v16 = vadd.f32 %v4358_v29, %v13451_v20  ;;  %v4512_v29 = vld [vmem:[#allocation17 + $0x30] sm:$0xff] }
 0x5fe   : > { %v4360_v49 = vadd.f32 %v4359_v16, %v13452_v45  ;;  %v4513_v16 = vld [vmem:[#allocation17 + $0x38] sm:$0xff] }
 0x600   : > { %v4361_v60 = vadd.f32 %v4360_v49, %v13453_v30  ;;  %v6729_v49 = vpack.c.bf16 %v4513_v16, %v4512_v29  ;;  %v7177_v16 = vld [vmem:[%s8528_s3 + $0x8] sm:$0xff] }
 0x602   : > { %v4362_v47 = vadd.f32 %v4361_v60, %v13454_v48  ;;  %v4514_v60 = vld [vmem:[#allocation17 + $0x40] sm:$0xff] }
 0x604   : > { %v4363_v53 = vadd.f32 %v4362_v47, %v13455_v12  ;;  %v4515_v47 = vld [vmem:[#allocation17 + $0x48] sm:$0xff] }
 0x606   : > { %v4364_v56 = vadd.f32 %v4363_v53, %v13456_v9  ;;  %v6733_v53 = vpack.c.bf16 %v4515_v47, %v4514_v60  ;;  %v7178_v47 = vld [vmem:[%s8528_s3] sm:$0xff] }
 0x608   : > { %v4365_v54 = vadd.f32 %v4364_v56, %v13457_v42  ;;  %v4516_v56 = vld [vmem:[#allocation17 + $0x50] sm:$0xff] }
 0x60a   : > { %v4366_v36 = vadd.f32 %v4365_v54, %v13458_v50  ;;  %v4517_v54 = vld [vmem:[#allocation17 + $0x58] sm:$0xff] }
 0x60c   : > { %v4367_v43 = vadd.f32 %v4366_v36, %v11745_v58  ;;  %v6737_v36 = vpack.c.bf16 %v4517_v54, %v4516_v56 }
 0x60e   : > { %v4368_v62 = vadd.f32 %v4367_v43, %v11750_v0  ;;  %v4519_v43 = vld [vmem:[#allocation17 + $0x68] sm:$0xff] }
 0x610   : > { %v4369_v51 = vadd.f32 %v4368_v62, %v11752_v18  ;;  %v4520_v62 = vld [vmem:[#allocation17 + $0x70] sm:$0xff] }
 0x612   : > { %v4370_v39 = vadd.f32 %v4369_v51, %v11754_v2 }
 0x614   : > { %v4371_v23 = vadd.f32 %v4370_v39, %v11756_v59  ;;  %v4521_v39 = vld [vmem:[#allocation17 + $0x78] sm:$0xff] }
 0x616   : > { %v4372_v22 = vadd.f32 %v4371_v23, %v11758_v40  ;;  %v6745_v23 = vpack.c.bf16 %v4521_v39, %v4520_v62  ;;  %v7179_v62 = vld [vmem:[%s8528_s3 + $0x18] sm:$0xff] }
 0x618   : > { %v4373_v15 = vadd.f32 %v4372_v22, %v11760_v8  ;;  %v4399_v22 = vld [vmem:[#allocation16] sm:$0x1] }
 0x61a   : > { %v4374_v55 = vadd.f32 %v4373_v15, %v11762_v21 }
 0x61c   : > { %v4375_v6 = vrot.slane %v4374_v55, 4 }
 0x61e   : > { %v4376_v34 = vadd.f32 %v4375_v6, %v4374_v55 }
 0x620   : > { %v4377_v7 = vrot.slane %v4376_v34, 2 }
 0x622   : > { %v4378_v13 = vadd.f32 %v4377_v7, %v4376_v34  ;;  %v13459_v34 = vld [vmem:[#allocation50_spill] sm:$0xff] }
 0x624   : > { %v4379_v46 = vrot.slane %v4378_v13, 1 }
 0x626   : > { %v4380_v10 = vadd.f32 %v4379_v46, %v4378_v13 }
 0x628   : > { %v4382_v52 = vmul.f32 0.00390625, %v4380_v10 }
 0x62a   : > { %6499 = vmatmul.mubr.f32.vlgmr.msra.gmra.mrb[0].mxu1 %v4382_v52 }
 0x62b   : > { %6720 = vmatpush3.bf16.msra.mxu1 %v6717_v61  ;;  %v4518_v61 = vld [vmem:[#allocation17 + $0x60] sm:$0xff] }
 0x62c   : > { %6722 = vmatprep.subr.bf16.mxu1 %v6721_v27  ;;  %v6741_v51 = vpack.c.bf16 %v4519_v43, %v4518_v61 }
 0x62f   : > { %6724 = vmatpush3.bf16.msra.mxu1 %v6721_v27 }
 0x630   : > { %6726 = vmatprep.subr.bf16.mxu1 %v6725_v11 }
 0x633   : > { %6728 = vmatpush3.bf16.msra.mxu1 %v6725_v11 }
 0x634   : > { %6730 = vmatprep.subr.bf16.mxu1 %v6729_v49 }
 0x637   : > { %6732 = vmatpush3.bf16.msra.mxu1 %v6729_v49 }
 0x638   : > { %6734 = vmatprep.subr.bf16.mxu1 %v6733_v53 }
 0x63b   : > { %6736 = vmatpush3.bf16.msra.mxu1 %v6733_v53 }
 0x63c   : > { %6738 = vmatprep.subr.bf16.mxu1 %v6737_v36 }
 0x63f   : > { %6740 = vmatpush3.bf16.msra.mxu1 %v6737_v36 }
 0x640   : > { %6742 = vmatprep.subr.bf16.mxu1 %v6741_v51 }
 0x643   : > { %6744 = vmatpush3.bf16.msra.mxu1 %v6741_v51 }
 0x644   : > { %6746 = vmatprep.subr.bf16.mxu1 %v6745_v23 }
 0x647   : > { %6748 = vmatpush3.bf16.msra.mxu1 %v6745_v23  ;;  %v7180_v23 = vld [vmem:[%s8528_s3 + $0x10] sm:$0xff] }
 0x6fd   : > { %v4466_v15 = vpop.f32.mrb[0].mxu1 }
 0x6fe   : > { %v4467_v55 = vadd.f32 %v4466_v15, %v4399_v22  ;;  %v6500_v6 = vpop.f32.mrb[1].mxu1 }
 0x700   : > { %v11799_v7 = vrot.slane %v4467_v55, %v13459_v34 }
 0x702   : > { %v4474_v13 = vmul.f32 %v11799_v7, %v11724_v3  ;;  %v4475_v46 = vmul.f32 %v11799_v7, %v13435_v57  ;;  %v4476_v37 = vmul.f32 %v11799_v7, %v11726_v25  ;;  %v4477_v28 = vmul.f32 %v11799_v7, %v13438_v31 }
 0x703   : > { %v4478_v10 = vmul.f32 %v11799_v7, %v13439_v41  ;;  %v4479_v3 = vmul.f32 %v11799_v7, %v13440_v63  ;;  %v4480_v57 = vmul.f32 %v11799_v7, %v13441_v14  ;;  %v4481_v25 = vmul.f32 %v11799_v7, %v13442_v33 }
 0x704   : > { %6533 = vmatprep.mubr.f32.mxu1 %v4474_v13  ;;  %v4482_v52 = vmul.f32 %v11799_v7, %v13443_v35  ;;  %v4483_v31 = vmul.f32 %v11799_v7, %v13444_v32  ;;  %v4484_v41 = vmul.f32 %v11799_v7, %v13445_v17  ;;  %v4485_v63 = vmul.f32 %v11799_v7, %v13446_v4 }
 0x705   : > { %6534 = vmatmul.mubr.f32.vlgmr.msra.gmra.mrb[2].mxu1 %v4475_v46  ;;  %v4486_v14 = vmul.f32 %v11799_v7, %v13447_v5  ;;  %v4487_v33 = vmul.f32 %v11799_v7, %v13448_v1  ;;  %v4488_v35 = vmul.f32 %v11799_v7, %v13449_v44  ;;  %v4489_v32 = vmul.f32 %v11799_v7, %v13450_v26  ;;  %v7181_v46 = vld [vmem:[%s8528_s3 + $0x28] sm:$0xff] }
 0x706   : > { %6536 = vmatprep.mubr.f32.mxu1 %v4476_v37  ;;  %v4490_v17 = vmul.f32 %v11799_v7, %v13451_v20  ;;  %v4491_v4 = vmul.f32 %v11799_v7, %v13452_v45  ;;  %v4492_v5 = vmul.f32 %v11799_v7, %v13453_v30  ;;  %v4493_v1 = vmul.f32 %v11799_v7, %v13454_v48 }
 0x707   : > { %v4494_v44 = vmul.f32 %v11799_v7, %v13455_v12  ;;  %v4495_v26 = vmul.f32 %v11799_v7, %v13456_v9  ;;  %v4496_v20 = vmul.f32 %v11799_v7, %v13457_v42  ;;  %v4497_v45 = vmul.f32 %v11799_v7, %v13458_v50 }
 0x708   : > { %v4498_v30 = vmul.f32 %v11799_v7, %v11745_v58  ;;  %v4499_v48 = vmul.f32 %v11799_v7, %v11750_v0  ;;  %v4500_v12 = vmul.f32 %v11799_v7, %v11752_v18  ;;  %v4501_v9 = vmul.f32 %v11799_v7, %v11754_v2  ;;  %v11866_v18 = vld [vmem:[#allocation19] ss:$0 sm:$0xff] }
 0x709   : > { %6537 = vmatmul.mubr.f32.gmra.mrb[4].mxu1 %v4477_v28  ;;  %v4502_v42 = vmul.f32 %v11799_v7, %v11756_v59  ;;  %v4503_v58 = vmul.f32 %v11799_v7, %v11758_v40  ;;  %v4504_v50 = vmul.f32 %v11799_v7, %v11760_v8  ;;  %v4505_v0 = vmul.f32 %v11799_v7, %v11762_v21  ;;  %v11868_v59 = vld [vmem:[#allocation29] ss:$0 sm:$0xff] }
 0x70a   : > { %6539 = vmatprep.mubr.f32.mxu1 %v4478_v10  ;;  %v7182_v10 = vld [vmem:[%s8528_s3 + $0x20] sm:$0xff] }
 0x70d   : > { %6540 = vmatmul.mubr.f32.gmra.mrb[6].mxu1 %v4479_v3 }
 0x70e   : > { %6542 = vmatprep.mubr.f32.mxu1 %v4480_v57 }
 0x711   : > { %6543 = vmatmul.mubr.f32.gmra.mrb[8].mxu1 %v4481_v25 }
 0x712   : > { %6545 = vmatprep.mubr.f32.mxu1 %v4482_v52 }
 0x715   : > { %6546 = vmatmul.mubr.f32.gmra.mrb[10].mxu1 %v4483_v31 }
 0x716   : > { %6548 = vmatprep.mubr.f32.mxu1 %v4484_v41 }
 0x719   : > { %6549 = vmatmul.mubr.f32.gmra.mrb[12].mxu1 %v4485_v63  ;;  %v7183_v63 = vld [vmem:[%s8528_s3 + $0x38] sm:$0xff] }
 0x71a   : > { %6551 = vmatprep.mubr.f32.mxu1 %v4486_v14 }
 0x71d   : > { %6552 = vmatmul.mubr.f32.gmra.mrb[14].mxu1 %v4487_v33 }
 0x71e   : > { %6554 = vmatprep.mubr.f32.mxu1 %v4488_v35  ;;  %v7184_v35 = vld [vmem:[%s8528_s3 + $0x30] sm:$0xff] }
 0x721   : > { %6555 = vmatmul.mubr.f32.gmra.mrb[16].mxu1 %v4489_v32 }
 0x722   : > { %6557 = vmatprep.mubr.f32.mxu1 %v4490_v17 }
 0x725   : > { %6558 = vmatmul.mubr.f32.gmra.mrb[18].mxu1 %v4491_v4 }
 0x726   : > { %6560 = vmatprep.mubr.f32.mxu1 %v4492_v5 }
 0x729   : > { %6561 = vmatmul.mubr.f32.gmra.mrb[20].mxu1 %v4493_v1 }
 0x72a   : > { %6563 = vmatprep.mubr.f32.mxu1 %v4494_v44 }
 0x72d   : > { %6564 = vmatmul.mubr.f32.gmra.mrb[22].mxu1 %v4495_v26  ;;  %v7185_v26 = vld [vmem:[%s8528_s3 + $0x48] sm:$0xff] }
 0x72e   : > { %6566 = vmatprep.mubr.f32.mxu1 %v4496_v20 }
 0x731   : > { %6567 = vmatmul.mubr.f32.gmra.mrb[24].mxu1 %v4497_v45 }
 0x732   : > { %6569 = vmatprep.mubr.f32.mxu1 %v4498_v30  ;;  %v7186_v30 = vld [vmem:[%s8528_s3 + $0x40] sm:$0xff] }
 0x735   : > { %6570 = vmatmul.mubr.f32.gmra.mrb[26].mxu1 %v4499_v48 }
 0x736   : > { %6572 = vmatprep.mubr.f32.mxu1 %v4500_v12 }
 0x739   : > { %6573 = vmatmul.mubr.f32.gmra.mrb[28].mxu1 %v4501_v9 }
 0x73a   : > { %6575 = vmatprep.mubr.f32.mxu1 %v4502_v42 }
 0x73d   : > { %6576 = vmatmul.mubr.f32.gmra.mrb[30].mxu1 %v4503_v58 }
 0x73e   : > { %6578 = vmatprep.mubr.f32.mxu1 %v4504_v50 }
 0x741   : > { %6579 = vmatmul.mubr.f32.gmra.mrb[32].mxu1 %v4505_v0  ;;  %v7187_v0 = vld [vmem:[%s8528_s3 + $0x58] sm:$0xff] }
 0x742   : > { %5459 = vmatprep.mubr.f32.mxu1 %v13436_v24 }
 0x7d8   : > { %v6535_v2 = vpop.f32.mrb[2].mxu1 }
 0x7d9   : > { %v4601_v40 = vadd.f32 %v6535_v2, %v11866_v18  ;;  %v4595_v27 = vpop.f32.mrb[3].mxu1 }
 0x7da   : > { %v4596_v8 = vadd.f32 %v11866_v18, %v4595_v27  ;;  %v7188_v27 = vld [vmem:[%s8528_s3 + $0x50] sm:$0xff] }
 0x7db   : > { %v4762_v19 = vmul.f32 %v11868_v59, %v4601_v40 }
 0x7dc   : > { %v4761_v38 = vmul.f32 %v11868_v59, %v4596_v8  ;;  %v6538_v21 = vpop.f32.mrb[4].mxu1 }
 0x7dd   : > { %v4611_v11 = vadd.f32 %v6538_v21, %v11866_v18  ;;  %v4605_v29 = vpop.f32.mrb[5].mxu1  ;;  %v11876_v49 = vadd.f32 %v7177_v16, %v4762_v19  ;;  %v7189_v16 = vld [vmem:[%s8528_s3 + $0x68] sm:$0xff] }
 0x7de   : > { %v4606_v60 = vadd.f32 %v11866_v18, %v4605_v29  ;;  %v11880_v53 = vadd.f32 %v7178_v47, %v4761_v38 }
 0x7df   : > { %13460 = vst [vmem:[#allocation64_spill] sm:$0xff] %v11876_v49  ;;  %v4764_v56 = vmul.f32 %v11868_v59, %v4611_v11  ;;  %4829 = vadd.xlane.f32.xlu1 %v11876_v49 }
 0x7e0   : > { %13461 = vst [vmem:[#allocation106_spill] sm:$0xff] %v11880_v53  ;;  %v4763_v54 = vmul.f32 %v11868_v59, %v4606_v60  ;;  %v6541_v36 = vpop.f32.mrb[6].mxu1  ;;  %4827 = vadd.xlane.f32.xlu0 %v11880_v53 }
 0x7e1   : > { %v4621_v61 = vadd.f32 %v6541_v36, %v11866_v18  ;;  %v4615_v43 = vpop.f32.mrb[7].mxu1  ;;  %v11888_v51 = vadd.f32 %v7179_v62, %v4764_v56  ;;  %v7190_v56 = vld [vmem:[%s8528_s3 + $0x60] sm:$0xff] }
 0x7e2   : > { %v4616_v39 = vadd.f32 %v11866_v18, %v4615_v43  ;;  %v11892_v22 = vadd.f32 %v7180_v23, %v4763_v54  ;;  %v7191_v23 = vld [vmem:[%s8528_s3 + $0x78] sm:$0xff] }
 0x7e3   : > { %13462 = vst [vmem:[#allocation107_spill] sm:$0xff] %v11888_v51  ;;  %v4766_v15 = vmul.f32 %v11868_v59, %v4621_v61  ;;  %4833 = vadd.xlane.f32.xlu1 %v11888_v51 }
 0x7e4   : > { %13463 = vst [vmem:[#allocation88_spill] sm:$0xff] %v11892_v22  ;;  %v4765_v55 = vmul.f32 %v11868_v59, %v4616_v39  ;;  %v6544_v6 = vpop.f32.mrb[8].mxu1  ;;  %4831 = vadd.xlane.f32.xlu0 %v11892_v22 }
 0x7e5   : > { %v4631_v7 = vadd.f32 %v6544_v6, %v11866_v18  ;;  %v4625_v13 = vpop.f32.mrb[9].mxu1  ;;  %v11900_v37 = vadd.f32 %v7181_v46, %v4766_v15  ;;  %v7192_v6 = vld [vmem:[%s8528_s3 + $0x70] sm:$0xff] }
 0x7e6   : > { %v4626_v28 = vadd.f32 %v11866_v18, %v4625_v13  ;;  %v11904_v3 = vadd.f32 %v7182_v10, %v4765_v55 }
 0x7e7   : > { %13464 = vst [vmem:[#allocation66_spill] sm:$0xff] %v11900_v37  ;;  %v4768_v57 = vmul.f32 %v11868_v59, %v4631_v7  ;;  %4837 = vadd.xlane.f32.xlu1 %v11900_v37 }
 0x7e8   : > { %13465 = vst [vmem:[#allocation56_spill] sm:$0xff] %v11904_v3  ;;  %v4767_v25 = vmul.f32 %v11868_v59, %v4626_v28  ;;  %v6547_v52 = vpop.f32.mrb[10].mxu1  ;;  %4835 = vadd.xlane.f32.xlu0 %v11904_v3 }
 0x7e9   : > { %v4641_v31 = vadd.f32 %v6547_v52, %v11866_v18  ;;  %v4635_v41 = vpop.f32.mrb[11].mxu1  ;;  %v11912_v14 = vadd.f32 %v7183_v63, %v4768_v57 }
 0x7ea   : > { %v4636_v33 = vadd.f32 %v11866_v18, %v4635_v41  ;;  %v11916_v32 = vadd.f32 %v7184_v35, %v4767_v25  ;;  %v7193_v25 = vld [vmem:[%s8528_s3 + $0x88] sm:$0xff]  ;;  %v7194_v41 = vld [vmem:[%s8528_s3 + $0x80] sm:$0xff] }
 0x7eb   : > { %13466 = vst [vmem:[#allocation63_spill] sm:$0xff] %v11912_v14  ;;  %v4770_v17 = vmul.f32 %v11868_v59, %v4641_v31  ;;  %4841 = vadd.xlane.f32.xlu1 %v11912_v14 }
 0x7ec   : > { %13467 = vst [vmem:[#allocation65_spill] sm:$0xff] %v11916_v32  ;;  %v4769_v4 = vmul.f32 %v11868_v59, %v4636_v33  ;;  %v6550_v5 = vpop.f32.mrb[12].mxu1  ;;  %4839 = vadd.xlane.f32.xlu0 %v11916_v32 }
 0x7ed   : > { %v4651_v1 = vadd.f32 %v6550_v5, %v11866_v18  ;;  %v4645_v44 = vpop.f32.mrb[13].mxu1  ;;  %v11924_v20 = vadd.f32 %v7185_v26, %v4770_v17  ;;  %v7195_v5 = vld [vmem:[%s8528_s3 + $0x98] sm:$0xff] }
 0x7ee   : > { %v4646_v45 = vadd.f32 %v11866_v18, %v4645_v44  ;;  %v11928_v48 = vadd.f32 %v7186_v30, %v4769_v4 }
 0x7ef   : > { %13468 = vst [vmem:[#allocation80_spill] sm:$0xff] %v11924_v20  ;;  %v4772_v12 = vmul.f32 %v11868_v59, %v4651_v1  ;;  %4845 = vadd.xlane.f32.xlu1 %v11924_v20 }
 0x7f0   : > { %13469 = vst [vmem:[#allocation97_spill] sm:$0xff] %v11928_v48  ;;  %v4771_v9 = vmul.f32 %v11868_v59, %v4646_v45  ;;  %v6553_v42 = vpop.f32.mrb[14].mxu1  ;;  %4843 = vadd.xlane.f32.xlu0 %v11928_v48  ;;  %v7196_v45 = vld [vmem:[%s8528_s3 + $0x90] sm:$0xff] }
 0x7f1   : > { %v4661_v58 = vadd.f32 %v6553_v42, %v11866_v18  ;;  %v4655_v50 = vpop.f32.mrb[15].mxu1  ;;  %v11936_v2 = vadd.f32 %v7187_v0, %v4772_v12  ;;  %v7197_v0 = vld [vmem:[%s8528_s3 + $0xa0] sm:$0xff] }
 0x7f2   : > { %v4656_v40 = vadd.f32 %v11866_v18, %v4655_v50  ;;  %v11940_v8 = vadd.f32 %v7188_v27, %v4771_v9 }
 0x7f3   : > { %13470 = vst [vmem:[#allocation78_spill] sm:$0xff] %v11936_v2  ;;  %v4774_v19 = vmul.f32 %v11868_v59, %v4661_v58  ;;  %4849 = vadd.xlane.f32.xlu1 %v11936_v2 }
 0x7f4   : > { %13471 = vst [vmem:[#allocation91_spill] sm:$0xff] %v11940_v8  ;;  %v4773_v38 = vmul.f32 %v11868_v59, %v4656_v40  ;;  %v6556_v21 = vpop.f32.mrb[16].mxu1  ;;  %4847 = vadd.xlane.f32.xlu0 %v11940_v8 }
 0x7f5   : > { %v4671_v11 = vadd.f32 %v6556_v21, %v11866_v18  ;;  %v4665_v29 = vpop.f32.mrb[17].mxu1  ;;  %v11948_v60 = vadd.f32 %v7189_v16, %v4774_v19 }
 0x7f6   : > { %v4666_v47 = vadd.f32 %v11866_v18, %v4665_v29  ;;  %v11952_v54 = vadd.f32 %v7190_v56, %v4773_v38 }
 0x7f7   : > { %13472 = vst [vmem:[#allocation75_spill] sm:$0xff] %v11948_v60  ;;  %v4776_v36 = vmul.f32 %v11868_v59, %v4671_v11  ;;  %4853 = vadd.xlane.f32.xlu1 %v11948_v60  ;;  %v7198_v11 = vld [vmem:[%s8528_s3 + $0xa8] sm:$0xff] }
 0x7f8   : > { %13473 = vst [vmem:[#allocation76_spill] sm:$0xff] %v11952_v54  ;;  %v4775_v61 = vmul.f32 %v11868_v59, %v4666_v47  ;;  %v6559_v43 = vpop.f32.mrb[18].mxu1  ;;  %4851 = vadd.xlane.f32.xlu0 %v11952_v54 }
 0x7f9   : > { %v4681_v62 = vadd.f32 %v6559_v43, %v11866_v18  ;;  %v4675_v39 = vpop.f32.mrb[19].mxu1  ;;  %v11960_v15 = vadd.f32 %v7191_v23, %v4776_v36 }
 0x7fa   : > { %v4676_v55 = vadd.f32 %v11866_v18, %v4675_v39  ;;  %v11964_v7 = vadd.f32 %v7192_v6, %v4775_v61 }
 0x7fb   : > { %13474 = vst [vmem:[#allocation67_spill] sm:$0xff] %v11960_v15  ;;  %v4778_v13 = vmul.f32 %v11868_v59, %v4681_v62  ;;  %4857 = vadd.xlane.f32.xlu1 %v11960_v15  ;;  %v7199_v62 = vld [vmem:[%s8528_s3 + $0xb0] sm:$0xff] }
 0x7fc   : > { %13475 = vst [vmem:[#allocation90_spill] sm:$0xff] %v11964_v7  ;;  %v4777_v46 = vmul.f32 %v11868_v59, %v4676_v55  ;;  %v6562_v28 = vpop.f32.mrb[20].mxu1  ;;  %4855 = vadd.xlane.f32.xlu0 %v11964_v7 }
 0x7fd   : > { %v4691_v10 = vadd.f32 %v6562_v28, %v11866_v18  ;;  %v4685_v57 = vpop.f32.mrb[21].mxu1  ;;  %v11972_v52 = vadd.f32 %v7193_v25, %v4778_v13  ;;  %v7200_v25 = vld [vmem:[%s8528_s3 + $0xb8] sm:$0xff] }
 0x7fe   : > { %v4686_v31 = vadd.f32 %v11866_v18, %v4685_v57  ;;  %v11976_v63 = vadd.f32 %v7194_v41, %v4777_v46 }
 0x7ff   : > { %13476 = vst [vmem:[#allocation60_spill] sm:$0xff] %v11972_v52  ;;  %v4780_v33 = vmul.f32 %v11868_v59, %v4691_v10  ;;  %4861 = vadd.xlane.f32.xlu1 %v11972_v52 }
 0x800   : > { %13477 = vst [vmem:[#allocation89_spill] sm:$0xff] %v11976_v63  ;;  %v4779_v35 = vmul.f32 %v11868_v59, %v4686_v31  ;;  %v6565_v17 = vpop.f32.mrb[22].mxu1  ;;  %4859 = vadd.xlane.f32.xlu0 %v11976_v63 }
 0x801   : > { %v4695_v4 = vpop.f32.mrb[23].mxu1  ;;  %v11983_v1 = vadd.f32 %v7195_v5, %v4780_v33  ;;  %v4701_v44 = vadd.f32 %v6565_v17, %v11866_v18 }
 0x802   : > { %v4696_v26 = vadd.f32 %v11866_v18, %v4695_v4  ;;  %v11988_v30 = vadd.f32 %v7196_v45, %v4779_v35 }
 0x803   : > { %13478 = vst [vmem:[#allocation55_spill] sm:$0xff] %v11983_v1  ;;  %4865 = vadd.xlane.f32.xlu1 %v11983_v1  ;;  %v4782_v58 = vmul.f32 %v11868_v59, %v4701_v44 }
 0x804   : > { %13479 = vst [vmem:[#allocation87_spill] sm:$0xff] %v11988_v30  ;;  %v4781_v12 = vmul.f32 %v11868_v59, %v4696_v26  ;;  %v6568_v9 = vpop.f32.mrb[24].mxu1  ;;  %4863 = vadd.xlane.f32.xlu0 %v11988_v30  ;;  %v7201_v26 = vld [vmem:[%s8528_s3 + $0xc0] sm:$0xff] }
 0x805   : > { %v4705_v42 = vpop.f32.mrb[25].mxu1  ;;  %v4711_v38 = vadd.f32 %v6568_v9, %v11866_v18  ;;  %v12002_v29 = vadd.f32 %v7198_v11, %v4782_v58  ;;  %v7207_v11 = vld [vmem:[%s8528_s3 + $0xf0] sm:$0xff] }
 0x806   : > { %v4706_v50 = vadd.f32 %v11866_v18, %v4705_v42  ;;  %v11996_v40 = vadd.f32 %v7197_v0, %v4781_v12  ;;  %v7202_v42 = vld [vmem:[%s8528_s3 + $0xc8] sm:$0xff] }
 0x807   : > { %13481 = vst [vmem:[#allocation59_spill] sm:$0xff] %v12002_v29  ;;  %v4784_v36 = vmul.f32 %v11868_v59, %v4711_v38  ;;  %v7206_v38 = vld [vmem:[%s8528_s3 + $0xe8] sm:$0xff] }
 0x808   : > { %13480 = vst [vmem:[#allocation61_spill] sm:$0xff] %v11996_v40  ;;  %v6571_v27 = vpop.f32.mrb[26].mxu1  ;;  %4867 = vadd.xlane.f32.xlu1 %v11996_v40  ;;  %v4783_v21 = vmul.f32 %v11868_v59, %v4706_v50  ;;  %v7203_v50 = vld [vmem:[%s8528_s3 + $0xd0] sm:$0xff] }
 0x809   : > { %v4715_v19 = vpop.f32.mrb[27].mxu1  ;;  %v4721_v28 = vadd.f32 %v6571_v27, %v11866_v18  ;;  %v12020_v31 = vadd.f32 %v7200_v25, %v4784_v36  ;;  %v5352_v36 = vld [vmem:[#allocation23 + $0x8] sm:$0xff]  ;;  %v5362_v25 = vld [vmem:[#allocation23 + $0x58] sm:$0xff] }
 0x80a   : > { %v4716_v61 = vadd.f32 %v11866_v18, %v4715_v19  ;;  %v12010_v39 = vadd.f32 %v7199_v62, %v4783_v21 }
 0x80b   : > { %13483 = vst [vmem:[#allocation70_spill] sm:$0xff] %v12020_v31  ;;  %v4786_v5 = vmul.f32 %v11868_v59, %v4721_v28  ;;  %v5355_v28 = vld [vmem:[#allocation23 + $0x20] sm:$0xff] }
 0x80c   : > { %v6574_v16 = vpop.f32.mrb[28].mxu1  ;;  %4869 = vadd.xlane.f32.xlu1 %v12002_v29  ;;  %13482 = vst [vmem:[#allocation69_spill] sm:$0xff] %v12010_v39  ;;  %v4785_v10 = vmul.f32 %v11868_v59, %v4716_v61  ;;  %v5354_v61 = vld [vmem:[#allocation23 + $0x18] sm:$0xff] }
 0x80d   : > { %v4731_v47 = vadd.f32 %v6574_v16, %v11866_v18  ;;  %v4725_v56 = vpop.f32.mrb[29].mxu1  ;;  %v12035_v58 = vadd.f32 %v7202_v42, %v4786_v5  ;;  %v6749_v62 = vpack.c.bf16 %v5354_v61, %v5352_v36  ;;  %v5366_v5 = vld [vmem:[#allocation23 + $0x78] sm:$0xff]  ;;  %v5368_v42 = vld [vmem:[#allocation23 + $0x88] sm:$0xff] }
 0x80e   : > { %v4726_v43 = vadd.f32 %v11866_v18, %v4725_v56  ;;  %v12029_v45 = vadd.f32 %v7201_v26, %v4785_v10  ;;  %v5357_v10 = vld [vmem:[#allocation23 + $0x30] sm:$0xff]  ;;  %v5374_v36 = vld [vmem:[#allocation23 + $0xb8] sm:$0xff] }
 0x80f   : > { %v4788_v23 = vmul.f32 %v11868_v59, %v4731_v47  ;;  %13485 = vst [vmem:[#allocation58_spill] sm:$0xff] %v12035_v58  ;;  %v7208_v47 = vld [vmem:[%s8528_s3 + $0xf8] sm:$0xff]  ;;  %6750 = vmatprep.subr.bf16.mxu1 %v6749_v62  ;;  %v5371_v62 = vld [vmem:[#allocation23 + $0xa0] sm:$0xff] }
 0x810   : > { %v4787_v55 = vmul.f32 %v11868_v59, %v4726_v43  ;;  %v6577_v6 = vpop.f32.mrb[30].mxu1  ;;  %4871 = vadd.xlane.f32.xlu1 %v12010_v39  ;;  %13484 = vst [vmem:[#allocation68_spill] sm:$0xff] %v12029_v45  ;;  %v5351_v43 = vld [vmem:[#allocation23] sm:$0xff] }
 0x811   : > { %v4741_v13 = vadd.f32 %v6577_v6, %v11866_v18  ;;  %v4735_v46 = vpop.f32.mrb[31].mxu1  ;;  %v5358_v6 = vld [vmem:[#allocation23 + $0x38] sm:$0xff] }
 0x812   : > { %v4736_v57 = vadd.f32 %v11866_v18, %v4735_v46  ;;  %v12039_v0 = vadd.f32 %v7203_v50, %v4787_v55  ;;  %v5356_v55 = vld [vmem:[#allocation23 + $0x28] sm:$0xff]  ;;  %v5370_v50 = vld [vmem:[#allocation23 + $0x98] sm:$0xff] }
 0x813   : > { %v4790_v41 = vmul.f32 %v11868_v59, %v4741_v13  ;;  %v6753_v46 = vpack.c.bf16 %v5358_v6, %v5356_v55 }
 0x814   : > { %v4789_v33 = vmul.f32 %v11868_v59, %v4736_v57  ;;  %v6580_v35 = vpop.f32.mrb[32].mxu1  ;;  %4873 = vadd.xlane.f32.xlu1 %v12020_v31  ;;  %13486 = vst [vmem:[#allocation71_spill] sm:$0xff] %v12039_v0  ;;  %v5360_v57 = vld [vmem:[#allocation23 + $0x48] sm:$0xff] }
 0x815   : > { %v4751_v17 = vadd.f32 %v6580_v35, %v11866_v18  ;;  %v4745_v4 = vpop.f32.mrb[33].mxu1  ;;  %v12051_v21 = vadd.f32 %v7206_v38, %v4790_v41  ;;  %v6755_v41 = vpack.c.bf16 %v5357_v10, %v5355_v28  ;;  %v5359_v35 = vld [vmem:[#allocation23 + $0x40] sm:$0xff] }
 0x816   : > { %v4746_v44 = vadd.f32 %v11866_v18, %v4745_v4  ;;  %v7204_v18 = vld [vmem:[%s8528_s3 + $0xd8] sm:$0xff]  ;;  %v5367_v38 = vld [vmem:[#allocation23 + $0x80] sm:$0xff] }
 0x817   : > { %v4792_v12 = vmul.f32 %v11868_v59, %v4751_v17  ;;  %v12043_v27 = vadd.f32 %v7204_v18, %v4788_v23  ;;  %13489 = vst [vmem:[#allocation79_spill] sm:$0xff] %v12051_v21  ;;  %v5353_v23 = vld [vmem:[#allocation23 + $0x10] sm:$0xff]  ;;  %v5364_v4 = vld [vmem:[#allocation23 + $0x68] sm:$0xff] }
 0x818   : > { %v4791_v9 = vmul.f32 %v11868_v59, %v4746_v44  ;;  %4875 = vadd.xlane.f32.xlu1 %v12029_v45  ;;  %v7205_v59 = vld [vmem:[%s8528_s3 + $0xe0] sm:$0xff]  ;;  %v6751_v13 = vpack.c.bf16 %v5353_v23, %v5351_v43  ;;  %v6761_v26 = vpack.c.bf16 %v5366_v5, %v5364_v4  ;;  %s7747_s3 = sshll.u32 %s7873_s23, 4  ;;  %s7748_s3 = int_to_ptr.vmem [resolvable:$false] %s7747_s3 }
 0x819   : > { %13487 = vst [vmem:[#allocation62_spill] sm:$0xff] %v12043_v27  ;;  %v12047_v19 = vadd.f32 %v7205_v59, %v4789_v33  ;;  %v12059_v56 = vadd.f32 %v7208_v47, %v4792_v12  ;;  %v6757_v33 = vpack.c.bf16 %v5362_v25, %v5360_v57  ;;  %v5361_v17 = vld [vmem:[#allocation23 + $0x50] sm:$0xff]  ;;  %v5363_v12 = vld [vmem:[#allocation23 + $0x60] sm:$0xff]  ;;  %v6765_v59 = vpack.c.bf16 %v5370_v50, %v5368_v42  ;;  %v5372_v47 = vld [vmem:[#allocation23 + $0xa8] sm:$0xff]  ;;  %s7749_s6 = scalar_lea.vmem %s7748_s3, 8192  ;;  %p7750_p4 = scmp.lt.s32.totalorder %s12723_s2, %s7748_s3 }
 0x81a   : > { %v12055_v16 = vadd.f32 %v7207_v11, %v4791_v9  ;;  %6752 = vmatpush1.bf16.msra.mxu1 %v6751_v13  ;;  %v6759_v44 = vpack.c.bf16 %v5361_v17, %v5359_v35  ;;  %v5365_v9 = vld [vmem:[#allocation23 + $0x70] sm:$0xff]  ;;  %v6769_v43 = vpack.c.bf16 %v5374_v36, %v5372_v47  ;;  %p7751_p1 = scmp.lt.s32.totalorder %s7749_s6, %s7743_s20 }
 0x81b   : > { %13488 = vst [vmem:[#allocation82_spill] sm:$0xff] %v12047_v19  ;;  %13491 = vst [vmem:[#allocation92_spill] sm:$0xff] %v12059_v56  ;;  %6754 = vmatprep.subr.bf16.mxu1 %v6753_v46  ;;  %v6763_v18 = vpack.c.bf16 %v5365_v9, %v5363_v12  ;;  %v5369_v11 = vld [vmem:[#allocation23 + $0x90] sm:$0xff] }
 0x81c   : > { %4877 = vadd.xlane.f32.xlu1 %v12035_v58  ;;  %13490 = vst [vmem:[#allocation81_spill] sm:$0xff] %v12055_v16  ;;  %v6767_v61 = vpack.c.bf16 %v5369_v11, %v5367_v38  ;;  %v5373_v23 = vld [vmem:[#allocation23 + $0xb0] sm:$0xff]  ;;  %p7752_p13 = por %p7751_p1, %p7750_p4 }
 0x81d   : > { %v6771_v55 = vpack.c.bf16 %v5373_v23, %v5371_v62 }
 0x81e   : > { %6756 = vmatpush1.bf16.msra.mxu1 %v6755_v41  ;;  %p7753_p0 = pnand %p7752_p13, %p7746_p9 }
 0x81f   : > { %6758 = vmatprep.subr.bf16.mxu1 %v6757_v33 }
 0x820   : > { %4879 = vadd.xlane.f32.xlu1 %v12039_v0 }
 0x822   : > { %6760 = vmatpush1.bf16.msra.mxu1 %v6759_v44 }
 0x823   : > { %6762 = vmatprep.subr.bf16.mxu1 %v6761_v26 }
 0x824   : > { %4881 = vadd.xlane.f32.xlu1 %v12043_v27 }
 0x826   : > { %6764 = vmatpush1.bf16.msra.mxu1 %v6763_v18 }
 0x827   : > { %6766 = vmatprep.subr.bf16.mxu1 %v6765_v59 }
 0x828   : > { %4883 = vadd.xlane.f32.xlu1 %v12047_v19 }
 0x82a   : > { %6768 = vmatpush1.bf16.msra.mxu1 %v6767_v61 }
 0x82b   : > { %6770 = vmatprep.subr.bf16.mxu1 %v6769_v43 }
 0x82c   : > { %4885 = vadd.xlane.f32.xlu1 %v12051_v21 }
 0x82e   : > { %6772 = vmatpush1.bf16.msra.mxu1 %v6771_v55 }
 0x830   : > { %4887 = vadd.xlane.f32.xlu1 %v12055_v16 }
 0x834   : > { %4889 = vadd.xlane.f32.xlu1 %v12059_v56 }
 0x86c   : > { %v4830_v6 = vpop.xlane.xlu1 %4829 }
 0x86d   : > { %v4828_v13 = vpop.xlane.xlu0 %4827  ;;  %v12062_v46 = vmul.f32 0.25, %v4830_v6 }
 0x86e   : > { %v12064_v28 = vmul.f32 0.25, %v4828_v13 }
 0x86f   : > { %v12076_v35 = vsub.f32 %v11876_v49, %v12062_v46 }
 0x870   : > { %v4834_v10 = vpop.xlane.xlu1 %4833  ;;  %v12068_v57 = vsub.f32 %v11880_v53, %v12064_v28  ;;  %v5382_v53 = vld [vmem:[#allocation23 + $0xf8] sm:$0xff] }
 0x871   : > { %v4832_v25 = vpop.xlane.xlu0 %4831  ;;  %v12078_v4 = vmul.f32 0.25, %v4834_v10  ;;  %v4956_v5 = vmul.f32 %v12076_v35, %v12076_v35 }
 0x872   : > { %v12070_v41 = vmul.f32 0.25, %v4832_v25  ;;  %v4955_v33 = vmul.f32 %v12068_v57, %v12068_v57 }
 0x873   : > { %v12092_v50 = vsub.f32 %v11888_v51, %v12078_v4  ;;  %v5380_v51 = vld [vmem:[#allocation23 + $0xe8] sm:$0xff] }
 0x874   : > { %v4838_v17 = vpop.xlane.xlu1 %4837  ;;  %4987 = vadd.xlane.f32.xlu0 %v4955_v33  ;;  %v12084_v44 = vsub.f32 %v11892_v22, %v12070_v41  ;;  %v5377_v22 = vld [vmem:[#allocation23 + $0xd0] sm:$0xff]  ;;  %v6777_v34 = vpack.c.bf16 %v5382_v53, %v5380_v51 }
 0x875   : > { %v4836_v26 = vpop.xlane.xlu0 %4835  ;;  %v12094_v59 = vmul.f32 0.25, %v4838_v17  ;;  %v4958_v38 = vmul.f32 %v12092_v50, %v12092_v50 }
 0x876   : > { %v12086_v9 = vmul.f32 0.25, %v4836_v26  ;;  %v4957_v42 = vmul.f32 %v12084_v44, %v12084_v44 }
 0x877   : > { %v12108_v62 = vsub.f32 %v11900_v37, %v12094_v59 }
 0x878   : > { %v4842_v12 = vpop.xlane.xlu1 %4841  ;;  %4989 = vadd.xlane.f32.xlu0 %v4956_v5  ;;  %v12100_v11 = vsub.f32 %v11904_v3, %v12086_v9 }
 0x879   : > { %v4840_v47 = vpop.xlane.xlu0 %4839  ;;  %v12112_v13 = vmul.f32 0.25, %v4842_v12  ;;  %v4960_v10 = vmul.f32 %v12108_v62, %v12108_v62 }
 0x87a   : > { %v12102_v61 = vmul.f32 0.25, %v4840_v47  ;;  %v4959_v43 = vmul.f32 %v12100_v11, %v12100_v11 }
 0x87b   : > { %v12130_v12 = vsub.f32 %v11912_v14, %v12112_v13 }
 0x87c   : > { %v4846_v18 = vpop.xlane.xlu1 %4845  ;;  %4991 = vadd.xlane.f32.xlu0 %v4957_v42  ;;  %v12118_v25 = vsub.f32 %v11916_v32, %v12102_v61 }
 0x87d   : > { %v4844_v55 = vpop.xlane.xlu0 %4843  ;;  %v4962_v32 = vmul.f32 %v12130_v12, %v12130_v12 }
 0x87e   : > { %v12132_v42 = vmul.f32 0.25, %v4844_v55 }
 0x880   : > { %v4850_v36 = vpop.xlane.xlu1 %4849  ;;  %4993 = vadd.xlane.f32.xlu0 %v4958_v38  ;;  %v4961_v38 = vmul.f32 %v12118_v25, %v12118_v25  ;;  %v12148_v55 = vsub.f32 %v11928_v48, %v12132_v42 }
 0x881   : > { %v4848_v47 = vpop.xlane.xlu0 %4847 }
 0x882   : > { %v12164_v14 = vmul.f32 0.25, %v4848_v47  ;;  %v4963_v3 = vmul.f32 %v12148_v55, %v12148_v55 }
 0x884   : > { %v4854_v23 = vpop.xlane.xlu1 %4853  ;;  %4995 = vadd.xlane.f32.xlu0 %v4959_v43 }
 0x885   : > { %v12110_v6 = vmul.f32 0.25, %v4854_v23 }
 0x887   : > { %v12122_v33 = vsub.f32 %v11948_v60, %v12110_v6  ;;  %v12144_v60 = vmul.f32 0.25, %v4846_v18 }
 0x888   : > { %v4858_v17 = vpop.xlane.xlu1 %4857  ;;  %4997 = vadd.xlane.f32.xlu0 %v4960_v10 }
 0x889   : > { %13492 = vst [vmem:[#allocation74_spill] sm:$0xff] %v12122_v33  ;;  %v12124_v5 = vmul.f32 0.25, %v4858_v17  ;;  %v4968_v26 = vmul.f32 %v12122_v33, %v12122_v33  ;;  %v12162_v48 = vsub.f32 %v11924_v20, %v12144_v60  ;;  %v12174_v33 = vmul.f32 0.25, %v4850_v36 }
 0x88b   : > { %v12138_v43 = vsub.f32 %v11960_v15, %v12124_v5  ;;  %5013 = vadd.xlane.f32.xlu1 %v4968_v26  ;;  %v12184_v53 = vsub.f32 %v11936_v2, %v12174_v33 }
 0x88c   : > { %v4862_v23 = vpop.xlane.xlu1 %4861  ;;  %4999 = vadd.xlane.f32.xlu0 %v4961_v38  ;;  %v4852_v38 = vpop.xlane.xlu0 %4851 }
 0x88d   : > { %13493 = vst [vmem:[#allocation72_spill] sm:$0xff] %v12138_v43  ;;  %v12140_v10 = vmul.f32 0.25, %v4862_v23  ;;  %v4970_v17 = vmul.f32 %v12138_v43, %v12138_v43  ;;  %v5381_v43 = vld [vmem:[#allocation23 + $0xf0] sm:$0xff]  ;;  %v12186_v51 = vmul.f32 0.25, %v4852_v38 }
 0x88f   : > { %v12154_v15 = vsub.f32 %v11972_v52, %v12140_v10  ;;  %5017 = vadd.xlane.f32.xlu1 %v4970_v17  ;;  %v5375_v52 = vld [vmem:[#allocation23 + $0xc0] sm:$0xff] }
 0x890   : > { %v4866_v26 = vpop.xlane.xlu1 %4865  ;;  %5001 = vadd.xlane.f32.xlu0 %v4962_v32  ;;  %v5376_v32 = vld [vmem:[#allocation23 + $0xc8] sm:$0xff]  ;;  %v6775_v49 = vpack.c.bf16 %v5377_v22, %v5375_v52 }
 0x891   : > { %13494 = vst [vmem:[#allocation104_spill] sm:$0xff] %v12154_v15  ;;  %v12156_v23 = vmul.f32 0.25, %v4866_v26  ;;  %v4972_v18 = vmul.f32 %v12154_v15, %v12154_v15  ;;  %v5378_v26 = vld [vmem:[#allocation23 + $0xd8] sm:$0xff]  ;;  %v5379_v15 = vld [vmem:[#allocation23 + $0xe0] sm:$0xff] }
 0x892   : > { %v6773_v37 = vpack.c.bf16 %v5378_v26, %v5376_v32  ;;  %v4856_v32 = vpop.xlane.xlu0 %4855  ;;  %v6779_v26 = vpack.c.bf16 %v5381_v43, %v5379_v15  ;;  %v12198_v15 = vsub.f32 %v11952_v54, %v12186_v51 }
 0x893   : > { %v12170_v17 = vsub.f32 %v11983_v1, %v12156_v23  ;;  %5021 = vadd.xlane.f32.xlu1 %v4972_v18  ;;  %v12178_v18 = vsub.f32 %v11940_v8, %v12164_v14  ;;  %v12200_v43 = vmul.f32 0.25, %v4856_v32 }
 0x894   : > { %5003 = vadd.xlane.f32.xlu0 %v4963_v3  ;;  %v4964_v3 = vmul.f32 %v12162_v48, %v12162_v48  ;;  %6774 = vmatprep.subr.bf16.mxu1 %v6773_v37  ;;  %v4967_v32 = vmul.f32 %v12198_v15, %v12198_v15 }
 0x895   : > { %v4868_v20 = vpop.xlane.xlu1 %4867  ;;  %v4974_v47 = vmul.f32 %v12170_v17, %v12170_v17  ;;  %6776 = vmatpush1.bf16.msra.mxu1 %v6775_v49  ;;  %v4965_v36 = vmul.f32 %v12178_v18, %v12178_v18 }
 0x896   : > { %6778 = vmatprep.subr.bf16.mxu1 %v6777_v34  ;;  %v4860_v49 = vpop.xlane.xlu0 %4859 }
 0x897   : > { %5025 = vadd.xlane.f32.xlu1 %v4974_v47  ;;  %v4966_v47 = vmul.f32 %v12184_v53, %v12184_v53 }
 0x898   : > { %5005 = vadd.xlane.f32.xlu0 %v4964_v3 }
 0x899   : > { %v4870_v22 = vpop.xlane.xlu1 %4869  ;;  %6780 = vmatpush1.bf16.msra.mxu1 %v6779_v26  ;;  %v12208_v26 = vsub.f32 %v11964_v7, %v12200_v43 }
 0x89a   : > { %v12188_v52 = vmul.f32 0.25, %v4870_v22  ;;  %v12210_v22 = vmul.f32 0.25, %v4860_v49 }
 0x89c   : > { %v12194_v37 = vsub.f32 %v12002_v29, %v12188_v52  ;;  %5007 = vadd.xlane.f32.xlu0 %v4965_v36  ;;  %v4864_v29 = vpop.xlane.xlu0 %4863 }
 0x89d   : > { %v4872_v34 = vpop.xlane.xlu1 %4871  ;;  %v12224_v7 = vmul.f32 0.25, %v4864_v29 }
 0x89e   : > { %13495 = vst [vmem:[#allocation98_spill] sm:$0xff] %v12194_v37  ;;  %v4976_v38 = vmul.f32 %v12194_v37, %v12194_v37 }
 0x8a0   : > { %5029 = vadd.xlane.f32.xlu1 %v4976_v38  ;;  %5009 = vadd.xlane.f32.xlu0 %v4966_v47  ;;  %v12222_v47 = vsub.f32 %v11976_v63, %v12210_v22 }
 0x8a1   : > { %v4874_v3 = vpop.xlane.xlu1 %4873 }
 0x8a2   : > { %v12212_v36 = vmul.f32 0.25, %v4874_v3  ;;  %v4969_v3 = vmul.f32 %v12208_v26, %v12208_v26  ;;  %v4971_v29 = vmul.f32 %v12222_v47, %v12222_v47 }
 0x8a4   : > { %v12218_v1 = vsub.f32 %v12020_v31, %v12212_v36  ;;  %5011 = vadd.xlane.f32.xlu0 %v4967_v32  ;;  %v12232_v31 = vsub.f32 %v11988_v30, %v12224_v7  ;;  %v12234_v32 = vmul.f32 0.25, %v4868_v20 }
 0x8a5   : > { %v4876_v38 = vpop.xlane.xlu1 %4875 }
 0x8a6   : > { %13496 = vst [vmem:[#allocation100_spill] sm:$0xff] %v12218_v1  ;;  %v4978_v49 = vmul.f32 %v12218_v1, %v12218_v1 }
 0x8a8   : > { %5033 = vadd.xlane.f32.xlu1 %v4978_v49  ;;  %5015 = vadd.xlane.f32.xlu0 %v4969_v3  ;;  %v12246_v49 = vsub.f32 %v11996_v40, %v12234_v32  ;;  %v12248_v3 = vmul.f32 0.25, %v4872_v34 }
 0x8a9   : > { %v4878_v54 = vpop.xlane.xlu1 %4877 }
 0x8aa   : > { %v12236_v8 = vmul.f32 0.25, %v4878_v54  ;;  %v4973_v54 = vmul.f32 %v12232_v31, %v12232_v31  ;;  %v4975_v34 = vmul.f32 %v12246_v49, %v12246_v49 }
 0x8ac   : > { %v12242_v63 = vsub.f32 %v12035_v58, %v12236_v8  ;;  %5019 = vadd.xlane.f32.xlu0 %v4971_v29  ;;  %v12256_v58 = vsub.f32 %v12010_v39, %v12248_v3  ;;  %v12258_v29 = vmul.f32 0.25, %v4876_v38 }
 0x8ad   : > { %v4880_v2 = vpop.xlane.xlu1 %4879 }
 0x8ae   : > { %13497 = vst [vmem:[#allocation84_spill] sm:$0xff] %v12242_v63  ;;  %v4980_v20 = vmul.f32 %v12242_v63, %v12242_v63  ;;  %13498 = vst [vmem:[#allocation99_spill] sm:$0xff] %v12256_v58 }
 0x8b0   : > { %5037 = vadd.xlane.f32.xlu1 %v4980_v20  ;;  %5023 = vadd.xlane.f32.xlu0 %v4973_v54  ;;  %v12270_v20 = vsub.f32 %v12029_v45, %v12258_v29  ;;  %v12272_v54 = vmul.f32 0.25, %v4880_v2 }
 0x8b1   : > { %v4882_v30 = vpop.xlane.xlu1 %4881 }
 0x8b2   : > { %v12260_v1 = vmul.f32 0.25, %v4882_v30  ;;  %13500 = vst [vmem:[#allocation73_spill] sm:$0xff] %v12270_v20  ;;  %v4977_v30 = vmul.f32 %v12256_v58, %v12256_v58  ;;  %v4979_v2 = vmul.f32 %v12270_v20, %v12270_v20 }
 0x8b4   : > { %v12266_v40 = vsub.f32 %v12043_v27, %v12260_v1  ;;  %5027 = vadd.xlane.f32.xlu0 %v4975_v34  ;;  %v12280_v27 = vsub.f32 %v12039_v0, %v12272_v54 }
 0x8b5   : > { %v4884_v63 = vpop.xlane.xlu1 %4883 }
 0x8b6   : > { %13499 = vst [vmem:[#allocation83_spill] sm:$0xff] %v12266_v40  ;;  %v4982_v38 = vmul.f32 %v12266_v40, %v12266_v40  ;;  %13501 = vst [vmem:[#allocation53_spill] sm:$0xff] %v12280_v27  ;;  %v12282_v34 = vmul.f32 0.25, %v4884_v63 }
 0x8b8   : > { %5041 = vadd.xlane.f32.xlu1 %v4982_v38  ;;  %5031 = vadd.xlane.f32.xlu0 %v4977_v30  ;;  %13502 = vst [vmem:[#allocation94_spill] sm:$0xff] %v12282_v34  ;;  %v12294_v38 = vsub.f32 %v12047_v19, %v12282_v34 }
 0x8b9   : > { %v4886_v39 = vpop.xlane.xlu1 %4885 }
 0x8ba   : > { %v12284_v37 = vmul.f32 0.25, %v4886_v39  ;;  %13505 = vst [vmem:[#allocation95_spill] sm:$0xff] %v12294_v38  ;;  %v4981_v39 = vmul.f32 %v12280_v27, %v12280_v27  ;;  %v4983_v19 = vmul.f32 %v12294_v38, %v12294_v38 }
 0x8bc   : > { %13503 = vst [vmem:[#allocation102_spill] sm:$0xff] %v12284_v37  ;;  %v12290_v45 = vsub.f32 %v12051_v21, %v12284_v37  ;;  %5035 = vadd.xlane.f32.xlu0 %v4979_v2 }
 0x8bd   : > { %v4888_v40 = vpop.xlane.xlu1 %4887 }
 0x8be   : > { %13504 = vst [vmem:[#allocation54_spill] sm:$0xff] %v12290_v45  ;;  %v12296_v30 = vmul.f32 0.25, %v4888_v40  ;;  %v4984_v63 = vmul.f32 %v12290_v45, %v12290_v45 }
 0x8c0   : > { %13506 = vst [vmem:[#allocation105_spill] sm:$0xff] %v12296_v30  ;;  %5045 = vadd.xlane.f32.xlu1 %v4984_v63  ;;  %5039 = vadd.xlane.f32.xlu0 %v4981_v39  ;;  %v12304_v21 = vsub.f32 %v12055_v16, %v12296_v30  ;;  %v5051_v39 = vmul.f32 124.0, %v12064_v28  ;;  %v5052_v16 = vmul.f32 124.0, %v12062_v46 }
 0x8c1   : > { %v4890_v0 = vpop.xlane.xlu1 %4889 }
 0x8c2   : > { %13507 = vst [vmem:[#allocation86_spill] sm:$0xff] %v12304_v21  ;;  %v12306_v2 = vmul.f32 0.25, %v4890_v0  ;;  %v4985_v63 = vmul.f32 %v12304_v21, %v12304_v21  ;;  %v5083_v0 = vmul.f32 %v5051_v39, %v12064_v28 }
 0x8c4   : > { %13508 = vst [vmem:[#allocation52_spill] sm:$0xff] %v12306_v2  ;;  %v12312_v40 = vsub.f32 %v12059_v56, %v12306_v2  ;;  %5043 = vadd.xlane.f32.xlu0 %v4983_v19  ;;  %v5084_v56 = vmul.f32 %v5052_v16, %v12062_v46  ;;  %v5053_v19 = vmul.f32 124.0, %v12070_v41  ;;  %v5055_v16 = vmul.f32 124.0, %v12086_v9 }
 0x8c6   : > { %13509 = vst [vmem:[#allocation96_spill] sm:$0xff] %v12312_v40  ;;  %v4986_v45 = vmul.f32 %v12312_v40, %v12312_v40 }
 0x8c8   : > { %5049 = vadd.xlane.f32.xlu1 %v4986_v45  ;;  %5047 = vadd.xlane.f32.xlu0 %v4985_v63  ;;  %v5085_v45 = vmul.f32 %v5053_v19, %v12070_v41  ;;  %v5054_v63 = vmul.f32 124.0, %v12078_v4  ;;  %v5056_v41 = vmul.f32 124.0, %v12094_v59 }
 0x901   : > { %v4988_v38 = vpop.xlane.xlu0 %4987 }
 0x902   : > { %v5115_v27 = vsub.f32 %v4988_v38, %v5083_v0 }
 0x904   : > { %v5147_v20 = vmul.f32 0.25, %v5115_v27  ;;  %v5086_v27 = vmul.f32 %v5054_v63, %v12078_v4  ;;  %v5057_v63 = vmul.f32 124.0, %v12102_v61 }
 0x905   : > { %v4990_v2 = vpop.xlane.xlu0 %4989 }
 0x906   : > { %v5179_v40 = vadd.f32 1e-06, %v5147_v20  ;;  %v5116_v30 = vsub.f32 %v4990_v2, %v5084_v56  ;;  %v5087_v20 = vmul.f32 %v5055_v16, %v12086_v9 }
 0x908   : > { %7113 = vrsqrt.f32 %v5179_v40  ;;  %v5148_v21 = vmul.f32 0.25, %v5116_v30 }
 0x909   : > { %v4992_v58 = vpop.xlane.xlu0 %4991 }
 0x90a   : > { %v5180_v28 = vadd.f32 1e-06, %v5148_v21  ;;  %v5117_v39 = vsub.f32 %v4992_v58, %v5085_v45  ;;  %v12329_v58 = vld [vmem:[#allocation20] ss:$0 sm:$0xff]  ;;  %v5088_v45 = vmul.f32 %v5056_v41, %v12094_v59 }
 0x90b   : > { %v5687_v41 = vld [vmem:[#allocation26 + $0x18] sm:$0xff] }
 0x90c   : > { %7115 = vrsqrt.f32 %v5180_v28  ;;  %v5149_v37 = vmul.f32 0.25, %v5117_v39 }
 0x90d   : > { %v4994_v46 = vpop.xlane.xlu0 %4993 }
 0x90e   : > { %v5181_v38 = vadd.f32 1e-06, %v5149_v37  ;;  %v5118_v0 = vsub.f32 %v4994_v46, %v5086_v27  ;;  %v12333_v37 = vld [vmem:[#allocation22] ss:$0 sm:$0xff]  ;;  %v5684_v46 = vld [vmem:[#allocation26] sm:$0xff] }
 0x910   : > { %7117 = vrsqrt.f32 %v5181_v38  ;;  %v5150_v56 = vmul.f32 0.25, %v5118_v0  ;;  %v5685_v38 = vld [vmem:[#allocation26 + $0x8] sm:$0xff]  ;;  %v5686_v0 = vld [vmem:[#allocation26 + $0x10] sm:$0xff] }
 0x911   : > { %v4996_v30 = vpop.xlane.xlu0 %4995  ;;  %v6781_v59 = vpack.c.bf16 %v5685_v38, %v5684_v46  ;;  %v5690_v46 = vld [vmem:[#allocation26 + $0x30] sm:$0xff]  ;;  %v5691_v38 = vld [vmem:[#allocation26 + $0x38] sm:$0xff] }
 0x912   : > { %v7114_v2 = vpop.eup %7113  ;;  %v5182_v40 = vadd.f32 1e-06, %v5150_v56  ;;  %v5119_v21 = vsub.f32 %v4996_v30, %v5087_v20  ;;  %v5058_v20 = vmul.f32 124.0, %v12112_v13 }
 0x913   : > { %v5243_v19 = vmul.f32 %v7114_v2, %v12068_v57  ;;  %v5089_v2 = vmul.f32 %v5057_v63, %v12102_v61  ;;  %6782 = vmatprep.subr.bf16.mxu0 %v6781_v59 }
 0x914   : > { %7119 = vrsqrt.f32 %v5182_v40  ;;  %v5151_v4 = vmul.f32 0.25, %v5119_v21  ;;  %v6785_v40 = vpack.c.bf16 %v5687_v41, %v5686_v0  ;;  %v5688_v21 = vld [vmem:[#allocation26 + $0x20] sm:$0xff]  ;;  %6784 = vmatpush3.bf16.msra.mxu0 %v6781_v59 }
 0x915   : > { %v4998_v28 = vpop.xlane.xlu0 %4997  ;;  %v5281_v9 = vmul.f32 %v12329_v58, %v5243_v19  ;;  %v5689_v19 = vld [vmem:[#allocation26 + $0x28] sm:$0xff] }
 0x916   : > { %v7116_v39 = vpop.eup %7115  ;;  %v5183_v27 = vadd.f32 1e-06, %v5151_v4  ;;  %v5120_v16 = vsub.f32 %v4998_v28, %v5088_v45  ;;  %6786 = vmatprep.subr.bf16.mxu0 %v6785_v40  ;;  %v6789_v61 = vpack.c.bf16 %v5689_v19, %v5688_v21  ;;  %v5692_v21 = vld [vmem:[#allocation26 + $0x40] sm:$0xff]  ;;  %v5693_v19 = vld [vmem:[#allocation26 + $0x48] sm:$0xff] }
 0x917   : > { %v5319_v56 = vadd.f32 %v12333_v37, %v5281_v9  ;;  %v5244_v57 = vmul.f32 %v7116_v39, %v12076_v35 }
 0x918   : > { %7121 = vrsqrt.f32 %v5183_v27  ;;  %v5152_v30 = vmul.f32 0.25, %v5120_v16  ;;  %v5090_v27 = vmul.f32 %v5058_v20, %v12112_v13  ;;  %v5059_v16 = vmul.f32 124.0, %v12132_v42  ;;  %6788 = vmatpush3.bf16.msra.mxu0 %v6785_v40 }
 0x919   : > { %5460 = vmatmul.mubr.f32.vlgmr.msra.gmra.mrb[34].mxu1 %v5319_v56  ;;  %v5000_v4 = vpop.xlane.xlu0 %4999  ;;  %v5282_v45 = vmul.f32 %v12329_v58, %v5244_v57  ;;  %6790 = vmatprep.subr.bf16.mxu0 %v6789_v61  ;;  %v6793_v13 = vpack.c.bf16 %v5691_v38, %v5690_v46  ;;  %v5695_v46 = vld [vmem:[#allocation26 + $0x58] sm:$0xff]  ;;  %v5064_v38 = vmul.f32 124.0, %v12110_v6 }
 0x91a   : > { %v7118_v28 = vpop.eup %7117  ;;  %v5184_v9 = vadd.f32 1e-06, %v5152_v30  ;;  %v5121_v34 = vsub.f32 %v5000_v4, %v5089_v2  ;;  %5465 = vmatprep.mubr.f32.mxu1 %v13436_v24  ;;  %v5091_v30 = vmul.f32 %v5059_v16, %v12132_v42  ;;  %v5060_v2 = vmul.f32 124.0, %v12144_v60  ;;  %v5694_v16 = vld [vmem:[#allocation26 + $0x50] sm:$0xff] }
 0x91b   : > { %v5320_v35 = vadd.f32 %v12333_v37, %v5282_v45  ;;  %v5245_v39 = vmul.f32 %v7118_v28, %v12084_v44  ;;  %v6797_v42 = vpack.c.bf16 %v5693_v19, %v5692_v21 }
 0x91c   : > { %7123 = vrsqrt.f32 %v5184_v9  ;;  %v5153_v63 = vmul.f32 0.25, %v5121_v34  ;;  %6792 = vmatpush3.bf16.msra.mxu0 %v6789_v61 }
 0x91d   : > { %5466 = vmatmul.mubr.f32.gmra.mrb[36].mxu1 %v5320_v35  ;;  %v5002_v0 = vpop.xlane.xlu0 %5001  ;;  %v5283_v56 = vmul.f32 %v12329_v58, %v5245_v39  ;;  %6794 = vmatprep.subr.bf16.mxu0 %v6793_v13 }
 0x91e   : > { %v7120_v57 = vpop.eup %7119  ;;  %v5185_v59 = vadd.f32 1e-06, %v5153_v63  ;;  %v5122_v41 = vsub.f32 %v5002_v0, %v5090_v27  ;;  %5471 = vmatprep.mubr.f32.mxu1 %v13436_v24  ;;  %v5092_v63 = vmul.f32 %v5060_v2, %v12144_v60  ;;  %v5061_v27 = vmul.f32 124.0, %v12164_v14 }
 0x91f   : > { %v5321_v44 = vadd.f32 %v12333_v37, %v5283_v56  ;;  %v5246_v34 = vmul.f32 %v7120_v57, %v12092_v50  ;;  %v5096_v2 = vmul.f32 %v5064_v38, %v12110_v6 }
 0x920   : > { %7125 = vrsqrt.f32 %v5185_v59  ;;  %v5154_v20 = vmul.f32 0.25, %v5122_v41  ;;  %6796 = vmatpush3.bf16.msra.mxu0 %v6793_v13  ;;  %v6801_v41 = vpack.c.bf16 %v5695_v46, %v5694_v16 }
 0x921   : > { %5472 = vmatmul.mubr.f32.gmra.mrb[38].mxu1 %v5321_v44  ;;  %v5004_v4 = vpop.xlane.xlu0 %5003  ;;  %v5284_v45 = vmul.f32 %v12329_v58, %v5246_v34  ;;  %6798 = vmatprep.subr.bf16.mxu0 %v6797_v42  ;;  %v5014_v44 = vpop.xlane.xlu1 %5013 }
 0x922   : > { %v7122_v28 = vpop.eup %7121  ;;  %v5186_v40 = vadd.f32 1e-06, %v5154_v20  ;;  %v5123_v9 = vsub.f32 %v5004_v4, %v5091_v30  ;;  %5477 = vmatprep.mubr.f32.mxu1 %v13436_v24  ;;  %v5093_v20 = vmul.f32 %v5061_v27, %v12164_v14  ;;  %v5062_v30 = vmul.f32 124.0, %v12174_v33 }
 0x923   : > { %v5322_v50 = vadd.f32 %v12333_v37, %v5284_v45  ;;  %v5247_v35 = vmul.f32 %v7122_v28, %v12100_v11 }
 0x924   : > { %7127 = vrsqrt.f32 %v5186_v40  ;;  %v5155_v39 = vmul.f32 0.25, %v5123_v9  ;;  %6800 = vmatpush3.bf16.msra.mxu0 %v6797_v42  ;;  %v5094_v6 = vmul.f32 %v5062_v30, %v12174_v33  ;;  %v5063_v9 = vmul.f32 124.0, %v12186_v51 }
 0x925   : > { %5478 = vmatmul.mubr.f32.gmra.mrb[40].mxu1 %v5322_v50  ;;  %v5006_v0 = vpop.xlane.xlu0 %5005  ;;  %v5285_v61 = vmul.f32 %v12329_v58, %v5247_v35  ;;  %6802 = vmatprep.subr.bf16.mxu0 %v6801_v41  ;;  %v5066_v50 = vmul.f32 124.0, %v12124_v5  ;;  %v5018_v33 = vpop.xlane.xlu1 %5017 }
 0x926   : > { %v7124_v56 = vpop.eup %7123  ;;  %v5187_v57 = vadd.f32 1e-06, %v5155_v39  ;;  %v5124_v59 = vsub.f32 %v5006_v0, %v5092_v63  ;;  %5483 = vmatprep.mubr.f32.mxu1 %v13436_v24  ;;  %v5095_v0 = vmul.f32 %v5063_v9, %v12186_v51  ;;  %v5068_v51 = vmul.f32 124.0, %v12140_v10 }
 0x927   : > { %v5323_v11 = vadd.f32 %v12333_v37, %v5285_v61  ;;  %v5248_v60 = vmul.f32 %v7124_v56, %v12108_v62  ;;  %v5128_v62 = vsub.f32 %v5014_v44, %v5096_v2  ;;  %v5065_v61 = vmul.f32 124.0, %v12200_v43 }
 0x928   : > { %7129 = vrsqrt.f32 %v5187_v57  ;;  %v5156_v34 = vmul.f32 0.25, %v5124_v59  ;;  %6804 = vmatpush3.bf16.msra.mxu0 %v6801_v41  ;;  %v5098_v56 = vmul.f32 %v5066_v50, %v12124_v5  ;;  %v5067_v2 = vmul.f32 124.0, %v12210_v22 }
 0x929   : > { %5484 = vmatmul.mubr.f32.gmra.mrb[42].mxu1 %v5323_v11  ;;  %v5008_v21 = vpop.xlane.xlu0 %5007  ;;  %v5286_v19 = vmul.f32 %v12329_v58, %v5248_v60  ;;  %v5097_v5 = vmul.f32 %v5065_v61, %v12200_v43  ;;  %v5100_v43 = vmul.f32 %v5068_v51, %v12140_v10 }
 0x92a   : > { %v7126_v13 = vpop.eup %7125  ;;  %v5188_v4 = vadd.f32 1e-06, %v5156_v34  ;;  %v5125_v45 = vsub.f32 %v5008_v21, %v5093_v20  ;;  %5489 = vmatprep.mubr.f32.mxu1 %v13436_v24 }
 0x92b   : > { %v5324_v28 = vadd.f32 %v12333_v37, %v5286_v19  ;;  %v5249_v40 = vmul.f32 %v7126_v13, %v12118_v25  ;;  %v5160_v25 = vmul.f32 0.25, %v5128_v62 }
 0x92c   : > { %7131 = vrsqrt.f32 %v5188_v4  ;;  %v5157_v14 = vmul.f32 0.25, %v5125_v45 }
 0x92d   : > { %5490 = vmatmul.mubr.f32.gmra.mrb[44].mxu1 %v5324_v28  ;;  %v5010_v35 = vpop.xlane.xlu0 %5009  ;;  %v5287_v39 = vmul.f32 %v12329_v58, %v5249_v40  ;;  %v5192_v44 = vadd.f32 1e-06, %v5160_v25 }
 0x92e   : > { %v7128_v63 = vpop.eup %7127  ;;  %v5189_v42 = vadd.f32 1e-06, %v5157_v14  ;;  %v5126_v27 = vsub.f32 %v5010_v35, %v5094_v6  ;;  %5495 = vmatprep.mubr.f32.mxu1 %v13436_v24  ;;  %v5099_v6 = vmul.f32 %v5067_v2, %v12210_v22  ;;  %v5069_v35 = vmul.f32 124.0, %v12224_v7  ;;  %v13510_v2 = vld [vmem:[#allocation74_spill] sm:$0xff] }
 0x92f   : > { %v5325_v16 = vadd.f32 %v12333_v37, %v5287_v39  ;;  %v5250_v46 = vmul.f32 %v7128_v63, %v12130_v12  ;;  %v5130_v12 = vsub.f32 %v5018_v33, %v5098_v56  ;;  %v5070_v22 = vmul.f32 124.0, %v12156_v23 }
 0x930   : > { %7133 = vrsqrt.f32 %v5189_v42  ;;  %v5158_v38 = vmul.f32 0.25, %v5126_v27 }
 0x931   : > { %5496 = vmatmul.mubr.f32.gmra.mrb[46].mxu1 %v5325_v16  ;;  %v5012_v57 = vpop.xlane.xlu0 %5011  ;;  %v5288_v59 = vmul.f32 %v12329_v58, %v5250_v46  ;;  %v5162_v62 = vmul.f32 0.25, %v5130_v12  ;;  %v5101_v46 = vmul.f32 %v5069_v35, %v12224_v7  ;;  %v5071_v7 = vmul.f32 124.0, %v12234_v32 }
 0x932   : > { %v7130_v11 = vpop.eup %7129  ;;  %v5190_v60 = vadd.f32 1e-06, %v5158_v38  ;;  %v5127_v41 = vsub.f32 %v5012_v57, %v5095_v0  ;;  %5501 = vmatprep.mubr.f32.mxu1 %v13436_v24 }
 0x933   : > { %v5326_v34 = vadd.f32 %v12333_v37, %v5288_v59  ;;  %v5251_v20 = vmul.f32 %v7130_v11, %v12148_v55  ;;  %v5022_v55 = vpop.xlane.xlu1 %5021  ;;  %v5194_v25 = vadd.f32 1e-06, %v5162_v62 }
 0x934   : > { %v5159_v30 = vmul.f32 0.25, %v5127_v41  ;;  %7135 = vrsqrt.f32 %v5190_v60  ;;  %v5132_v63 = vsub.f32 %v5022_v55, %v5100_v43  ;;  %v5102_v41 = vmul.f32 %v5070_v22, %v12156_v23 }
 0x935   : > { %5502 = vmatmul.mubr.f32.gmra.mrb[48].mxu1 %v5326_v34  ;;  %v5016_v21 = vpop.xlane.xlu0 %5015  ;;  %v5289_v19 = vmul.f32 %v12329_v58, %v5251_v20  ;;  %7137 = vrsqrt.f32 %v5192_v44  ;;  %v5072_v23 = vmul.f32 124.0, %v12188_v52 }
 0x936   : > { %v7132_v13 = vpop.eup %7131  ;;  %v5191_v4 = vadd.f32 1e-06, %v5159_v30  ;;  %v5129_v45 = vsub.f32 %v5016_v21, %v5097_v5  ;;  %5507 = vmatprep.mubr.f32.mxu1 %v13436_v24  ;;  %v5164_v0 = vmul.f32 0.25, %v5132_v63 }
 0x937   : > { %v5327_v28 = vadd.f32 %v12333_v37, %v5289_v19  ;;  %v5252_v40 = vmul.f32 %v7132_v13, %v12162_v48  ;;  %v5103_v19 = vmul.f32 %v5071_v7, %v12234_v32  ;;  %v5104_v32 = vmul.f32 %v5072_v23, %v12188_v52  ;;  %v13512_v7 = vld [vmem:[#allocation104_spill] sm:$0xff] }
 0x938   : > { %7139 = vrsqrt.f32 %v5191_v4  ;;  %v5161_v14 = vmul.f32 0.25, %v5129_v45  ;;  %v5196_v12 = vadd.f32 1e-06, %v5164_v0 }
 0x939   : > { %5508 = vmatmul.mubr.f32.gmra.mrb[50].mxu1 %v5327_v28  ;;  %v5020_v9 = vpop.xlane.xlu0 %5019  ;;  %v5290_v50 = vmul.f32 %v12329_v58, %v5252_v40 }
 0x93a   : > { %v7134_v39 = vpop.eup %7133  ;;  %v5193_v42 = vadd.f32 1e-06, %v5161_v14  ;;  %v5131_v27 = vsub.f32 %v5020_v9, %v5099_v6  ;;  %5513 = vmatprep.mubr.f32.mxu1 %v13436_v24  ;;  %v5073_v6 = vmul.f32 124.0, %v12248_v3 }
 0x93b   : > { %v5328_v48 = vadd.f32 %v12333_v37, %v5290_v50  ;;  %v5253_v10 = vmul.f32 %v7134_v39, %v12178_v18  ;;  %v5026_v18 = vpop.xlane.xlu1 %5025 }
 0x93c   : > { %v5163_v16 = vmul.f32 0.25, %v5131_v27  ;;  %7141 = vrsqrt.f32 %v5193_v42  ;;  %v5134_v20 = vsub.f32 %v5026_v18, %v5102_v41  ;;  %v13511_v27 = vld [vmem:[#allocation72_spill] sm:$0xff]  ;;  %v5105_v52 = vmul.f32 %v5073_v6, %v12248_v3 }
 0x93d   : > { %5514 = vmatmul.mubr.f32.gmra.mrb[52].mxu1 %v5328_v48  ;;  %v5024_v33 = vpop.xlane.xlu0 %5023  ;;  %v5291_v38 = vmul.f32 %v12329_v58, %v5253_v10  ;;  %7143 = vrsqrt.f32 %v5194_v25  ;;  %v5074_v48 = vmul.f32 124.0, %v12212_v36 }
 0x93e   : > { %5519 = vmatprep.mubr.f32.mxu1 %v13436_v24  ;;  %v7136_v61 = vpop.eup %7135  ;;  %v5195_v56 = vadd.f32 1e-06, %v5163_v16  ;;  %v5133_v57 = vsub.f32 %v5024_v33, %v5101_v46  ;;  %v5166_v45 = vmul.f32 0.25, %v5134_v20 }
 0x93f   : > { %v5329_v59 = vadd.f32 %v12333_v37, %v5291_v38  ;;  %v5254_v11 = vmul.f32 %v7136_v61, %v12184_v53  ;;  %v7138_v60 = vpop.eup %7137  ;;  %v5030_v28 = vpop.xlane.xlu1 %5029 }
 0x940   : > { %7145 = vrsqrt.f32 %v5195_v56  ;;  %v5165_v51 = vmul.f32 0.25, %v5133_v57  ;;  %v5256_v21 = vmul.f32 %v7138_v60, %v13510_v2  ;;  %v5198_v9 = vadd.f32 1e-06, %v5166_v45 }
 0x941   : > { %5520 = vmatmul.mubr.f32.gmra.mrb[54].mxu1 %v5329_v59  ;;  %v5292_v34 = vmul.f32 %v12329_v58, %v5254_v11  ;;  %v5028_v5 = vpop.xlane.xlu0 %5027  ;;  %7147 = vrsqrt.f32 %v5196_v12  ;;  %v5136_v50 = vsub.f32 %v5030_v28, %v5104_v32  ;;  %v5106_v56 = vmul.f32 %v5074_v48, %v12212_v36 }
 0x942   : > { %v7140_v44 = vpop.eup %7139  ;;  %5525 = vmatprep.mubr.f32.mxu1 %v13436_v24  ;;  %v5197_v62 = vadd.f32 1e-06, %v5165_v51  ;;  %v5135_v55 = vsub.f32 %v5028_v5, %v5103_v19  ;;  %v5294_v40 = vmul.f32 %v12329_v58, %v5256_v21  ;;  %v5075_v57 = vmul.f32 124.0, %v12258_v29 }
 0x943   : > { %v5255_v30 = vmul.f32 %v7140_v44, %v12198_v15  ;;  %v5330_v53 = vadd.f32 %v12333_v37, %v5292_v34  ;;  %v5168_v10 = vmul.f32 0.25, %v5136_v50  ;;  %v5034_v33 = vpop.xlane.xlu1 %5033  ;;  %v5077_v19 = vmul.f32 124.0, %v12272_v54 }
 0x944   : > { %7149 = vrsqrt.f32 %v5197_v62  ;;  %v5167_v35 = vmul.f32 0.25, %v5135_v55  ;;  %v5332_v63 = vadd.f32 %v12333_v37, %v5294_v40  ;;  %v5138_v59 = vsub.f32 %v5034_v33, %v5106_v56 }
 0x945   : > { %v5293_v13 = vmul.f32 %v12329_v58, %v5255_v30  ;;  %5526 = vmatmul.mubr.f32.gmra.mrb[56].mxu1 %v5330_v53  ;;  %v5032_v39 = vpop.xlane.xlu0 %5031  ;;  %7151 = vrsqrt.f32 %v5198_v9  ;;  %v5200_v3 = vadd.f32 1e-06, %v5168_v10  ;;  %v5107_v36 = vmul.f32 %v5075_v57, %v12258_v29  ;;  %v13516_v57 = vld [vmem:[#allocation99_spill] sm:$0xff] }
 0x946   : > { %v7142_v4 = vpop.eup %7141  ;;  %5531 = vmatprep.mubr.f32.mxu1 %v13436_v24  ;;  %v5199_v16 = vadd.f32 1e-06, %v5167_v35  ;;  %v5137_v22 = vsub.f32 %v5032_v39, %v5105_v52  ;;  %v5170_v34 = vmul.f32 0.25, %v5138_v59  ;;  %v5078_v28 = vmul.f32 124.0, %v12260_v1  ;;  %v13513_v39 = vld [vmem:[#allocation94_spill] sm:$0xff] }
 0x947   : > { %v5331_v15 = vadd.f32 %v12333_v37, %v5293_v13  ;;  %v5257_v43 = vmul.f32 %v7142_v4, %v12208_v26  ;;  %v7144_v14 = vpop.eup %7143  ;;  %v5038_v30 = vpop.xlane.xlu1 %5037  ;;  %v13514_v52 = vld [vmem:[#allocation98_spill] sm:$0xff] }
 0x948   : > { %v5258_v25 = vmul.f32 %v7144_v14, %v13511_v27  ;;  %7153 = vrsqrt.f32 %v5199_v16  ;;  %v5169_v18 = vmul.f32 0.25, %v5137_v22  ;;  %v5202_v29 = vadd.f32 1e-06, %v5170_v34  ;;  %v13515_v16 = vld [vmem:[#allocation102_spill] sm:$0xff]  ;;  %v13518_v34 = vld [vmem:[#allocation100_spill] sm:$0xff] }
 0x949   : > { %5532 = vmatmul.mubr.f32.gmra.mrb[58].mxu1 %v5331_v15  ;;  %v5295_v42 = vmul.f32 %v12329_v58, %v5257_v43  ;;  %v5036_v11 = vpop.xlane.xlu0 %5035  ;;  %7155 = vrsqrt.f32 %v5200_v3  ;;  %v5110_v35 = vmul.f32 %v5078_v28, %v12260_v1  ;;  %v5080_v22 = vmul.f32 124.0, %v13515_v16 }
 0x94a   : > { %5537 = vmatprep.mubr.f32.mxu1 %v13436_v24  ;;  %v7146_v26 = vpop.eup %7145  ;;  %v5296_v0 = vmul.f32 %v12329_v58, %v5258_v25  ;;  %v5201_v20 = vadd.f32 1e-06, %v5169_v18  ;;  %v5139_v51 = vsub.f32 %v5036_v11, %v5107_v36  ;;  %v13517_v11 = vld [vmem:[#allocation105_spill] sm:$0xff] }
 0x94b   : > { %v7148_v46 = vpop.eup %7147  ;;  %v5333_v38 = vadd.f32 %v12333_v37, %v5295_v42  ;;  %v5259_v61 = vmul.f32 %v7146_v26, %v12222_v47  ;;  %v5076_v47 = vmul.f32 124.0, %v12236_v8  ;;  %v5042_v32 = vpop.xlane.xlu1 %5041  ;;  %v5112_v18 = vmul.f32 %v5080_v22, %v13515_v16  ;;  %v13523_v16 = vld [vmem:[#allocation83_spill] sm:$0xff] }
 0x94c   : > { %v5334_v60 = vadd.f32 %v12333_v37, %v5296_v0  ;;  %v5260_v44 = vmul.f32 %v7148_v46, %v13512_v7  ;;  %7157 = vrsqrt.f32 %v5201_v20  ;;  %v5171_v4 = vmul.f32 0.25, %v5139_v51 }
 0x94d   : > { %5538 = vmatmul.mubr.f32.gmra.mrb[60].mxu1 %v5332_v63  ;;  %v5297_v41 = vmul.f32 %v12329_v58, %v5259_v61  ;;  %v5108_v23 = vmul.f32 %v5076_v47, %v12236_v8  ;;  %v5040_v45 = vpop.xlane.xlu0 %5039  ;;  %v5109_v8 = vmul.f32 %v5077_v19, %v12272_v54  ;;  %7159 = vrsqrt.f32 %v5202_v29 }
 0x94e   : > { %5543 = vmatprep.mubr.f32.mxu1 %v13436_v24  ;;  %v7150_v12 = vpop.eup %7149  ;;  %v5298_v53 = vmul.f32 %v12329_v58, %v5260_v44  ;;  %v5203_v43 = vadd.f32 1e-06, %v5171_v4  ;;  %v5079_v63 = vmul.f32 124.0, %v13513_v39  ;;  %v5142_v42 = vsub.f32 %v5042_v32, %v5110_v35  ;;  %v13520_v4 = vld [vmem:[#allocation73_spill] sm:$0xff] }
 0x94f   : > { %v5335_v5 = vadd.f32 %v12333_v37, %v5297_v41  ;;  %v5261_v2 = vmul.f32 %v7150_v12, %v12232_v31  ;;  %v7152_v21 = vpop.eup %7151  ;;  %v5140_v13 = vsub.f32 %v5038_v30, %v5108_v23  ;;  %v5141_v14 = vsub.f32 %v5040_v45, %v5109_v8  ;;  %v5046_v0 = vpop.xlane.xlu1 %5045  ;;  %v13519_v30 = vld [vmem:[#allocation52_spill] sm:$0xff] }
 0x950   : > { %v5336_v62 = vadd.f32 %v12333_v37, %v5298_v53  ;;  %v5262_v15 = vmul.f32 %v7152_v21, %v12170_v17  ;;  %7161 = vrsqrt.f32 %v5203_v43  ;;  %v5111_v1 = vmul.f32 %v5079_v63, %v13513_v39 }
 0x951   : > { %5544 = vmatmul.mubr.f32.gmra.mrb[62].mxu1 %v5333_v38  ;;  %v5299_v55 = vmul.f32 %v12329_v58, %v5261_v2  ;;  %v5172_v40 = vmul.f32 0.25, %v5140_v13  ;;  %v5173_v27 = vmul.f32 0.25, %v5141_v14  ;;  %v5044_v25 = vpop.xlane.xlu0 %5043  ;;  %v5174_v46 = vmul.f32 0.25, %v5142_v42 }
 0x952   : > { %5549 = vmatprep.mubr.f32.mxu1 %v13436_v24  ;;  %v7154_v31 = vpop.eup %7153  ;;  %v5300_v9 = vmul.f32 %v12329_v58, %v5262_v15  ;;  %v5143_v38 = vsub.f32 %v5044_v25, %v5111_v1  ;;  %v5144_v7 = vsub.f32 %v5046_v0, %v5112_v18  ;;  %v13522_v25 = vld [vmem:[#allocation53_spill] sm:$0xff] }
 0x953   : > { %v5337_v6 = vadd.f32 %v12333_v37, %v5299_v55  ;;  %v5263_v50 = vmul.f32 %v7154_v31, %v12246_v49  ;;  %v7156_v17 = vpop.eup %7155  ;;  %v5204_v54 = vadd.f32 1e-06, %v5172_v40  ;;  %v5205_v33 = vadd.f32 1e-06, %v5173_v27  ;;  %v5697_v55 = vld [vmem:[#allocation26 + $0x68] sm:$0xff] }
 0x954   : > { %v5338_v26 = vadd.f32 %v12333_v37, %v5300_v9  ;;  %v5264_v10 = vmul.f32 %v7156_v17, %v13514_v52  ;;  %v5206_v41 = vadd.f32 1e-06, %v5174_v46  ;;  %v5175_v44 = vmul.f32 0.25, %v5143_v38  ;;  %v5699_v17 = vld [vmem:[#allocation26 + $0x78] sm:$0xff]  ;;  %v13524_v38 = vld [vmem:[#allocation95_spill] sm:$0xff] }
 0x955   : > { %5550 = vmatmul.mubr.f32.gmra.mrb[64].mxu1 %v5334_v60  ;;  %v5301_v48 = vmul.f32 %v12329_v58, %v5263_v50  ;;  %7163 = vrsqrt.f32 %v5204_v54  ;;  %v5081_v60 = vmul.f32 124.0, %v13517_v11  ;;  %v5048_v12 = vpop.xlane.xlu0 %5047  ;;  %v5176_v2 = vmul.f32 0.25, %v5144_v7  ;;  %v5050_v19 = vpop.xlane.xlu1 %5049  ;;  %v5698_v50 = vld [vmem:[#allocation26 + $0x70] sm:$0xff] }
 0x956   : > { %5555 = vmatprep.mubr.f32.mxu1 %v13436_v24  ;;  %v7158_v49 = vpop.eup %7157  ;;  %v5302_v56 = vmul.f32 %v12329_v58, %v5264_v10  ;;  %7165 = vrsqrt.f32 %v5205_v33  ;;  %v5207_v21 = vadd.f32 1e-06, %v5175_v44  ;;  %v6809_v39 = vpack.c.bf16 %v5699_v17, %v5698_v50 }
 0x957   : > { %v5339_v61 = vadd.f32 %v12333_v37, %v5301_v48  ;;  %v5265_v3 = vmul.f32 %v7158_v49, %v13516_v57  ;;  %v7160_v59 = vpop.eup %7159  ;;  %v5113_v53 = vmul.f32 %v5081_v60, %v13517_v11  ;;  %7167 = vrsqrt.f32 %v5206_v41  ;;  %v13526_v41 = vld [vmem:[#allocation86_spill] sm:$0xff] }
 0x958   : > { %v5340_v47 = vadd.f32 %v12333_v37, %v5302_v56  ;;  %v5266_v20 = vmul.f32 %v7160_v59, %v13518_v34  ;;  %v5208_v8 = vadd.f32 1e-06, %v5176_v2  ;;  %7169 = vrsqrt.f32 %v5207_v21  ;;  %v13529_v21 = vld [vmem:[#allocation57_spill] sm:$0xff] }
 0x959   : > { %5556 = vmatmul.mubr.f32.gmra.mrb[66].mxu1 %v5335_v5  ;;  %v5303_v36 = vmul.f32 %v12329_v58, %v5265_v3  ;;  %v5082_v5 = vmul.f32 124.0, %v13519_v30  ;;  %v5145_v23 = vsub.f32 %v5048_v12, %v5113_v53  ;;  %v13525_v3 = vld [vmem:[#allocation54_spill] sm:$0xff] }
 0x95a   : > { %5561 = vmatprep.mubr.f32.mxu1 %v13436_v24  ;;  %v7162_v51 = vpop.eup %7161  ;;  %v5304_v13 = vmul.f32 %v12329_v58, %v5266_v20  ;;  %7171 = vrsqrt.f32 %v5208_v8  ;;  %v13528_v53 = vld [vmem:[#allocation50_spill] sm:$0xff] }
 0x95b   : > { %v5341_v29 = vadd.f32 %v12333_v37, %v5303_v36  ;;  %v5267_v45 = vmul.f32 %v7162_v51, %v13520_v4  ;;  %v5114_v31 = vmul.f32 %v5082_v5, %v13519_v30  ;;  %v5177_v43 = vmul.f32 0.25, %v5145_v23  ;;  %v13527_v36 = vld [vmem:[#allocation96_spill] sm:$0xff]  ;;  %v5383_v5 = vld [vmem:[#allocation25] sm:$0x3] }
 0x95c   : > { %v5342_v14 = vadd.f32 %v12333_v37, %v5304_v13  ;;  %v12514_v2 = vrot.slane %v5383_v5, %v13528_v53  ;;  %v12517_v23 = vrot.slane %v5383_v5, %v13529_v21 }
 0x95d   : > { %5562 = vmatmul.mubr.f32.gmra.mrb[68].mxu1 %v5336_v62  ;;  %v5696_v62 = vld [vmem:[#allocation26 + $0x60] sm:$0xff]  ;;  %v5146_v40 = vsub.f32 %v5050_v19, %v5114_v31  ;;  %v5305_v32 = vmul.f32 %v12329_v58, %v5267_v45  ;;  %v5209_v54 = vadd.f32 1e-06, %v5177_v43 }
 0x95e   : > { %5567 = vmatprep.mubr.f32.mxu1 %v13436_v24  ;;  %v6805_v28 = vpack.c.bf16 %v5697_v55, %v5696_v62 }
 0x95f   : > { %v7164_v15 = vpop.eup %7163  ;;  %v5178_v63 = vmul.f32 0.25, %v5146_v40  ;;  %v5343_v42 = vadd.f32 %v12333_v37, %v5305_v32  ;;  %7173 = vrsqrt.f32 %v5209_v54 }
 0x960   : > { %6806 = vmatprep.subr.bf16.mxu0 %v6805_v28  ;;  %v7166_v35 = vpop.eup %7165 }
 0x961   : > { %5568 = vmatmul.mubr.f32.gmra.mrb[70].mxu1 %v5337_v6  ;;  %v13521_v6 = vld [vmem:[#allocation84_spill] sm:$0xff]  ;;  %6808 = vmatpush3.bf16.msra.mxu0 %v6805_v28  ;;  %v7168_v48 = vpop.eup %7167  ;;  %v5210_v52 = vadd.f32 1e-06, %v5178_v63 }
 0x962   : > { %5573 = vmatprep.mubr.f32.mxu1 %v13436_v24  ;;  %v5268_v9 = vmul.f32 %v7164_v15, %v13521_v6  ;;  %6810 = vmatprep.subr.bf16.mxu0 %v6809_v39  ;;  %v5270_v22 = vmul.f32 %v7168_v48, %v13523_v16  ;;  %v7170_v1 = vpop.eup %7169 }
 0x963   : > { %7175 = vrsqrt.f32 %v5210_v52  ;;  %v5271_v0 = vmul.f32 %v7170_v1, %v13524_v38 }
 0x964   : > { %v5306_v27 = vmul.f32 %v12329_v58, %v5268_v9  ;;  %v5308_v33 = vmul.f32 %v12329_v58, %v5270_v22 }
 0x965   : > { %5574 = vmatmul.mubr.f32.gmra.mrb[72].mxu1 %v5338_v26  ;;  %v5269_v26 = vmul.f32 %v7166_v35, %v13522_v25  ;;  %6812 = vmatpush3.bf16.msra.mxu0 %v6809_v39  ;;  %v5309_v57 = vmul.f32 %v12329_v58, %v5271_v0 }
 0x966   : > { %5579 = vmatprep.mubr.f32.mxu1 %v13436_v24  ;;  %v5344_v10 = vadd.f32 %v12333_v37, %v5306_v27  ;;  %v5346_v56 = vadd.f32 %v12333_v37, %v5308_v33 }
 0x967   : > { %v5307_v49 = vmul.f32 %v12329_v58, %v5269_v26  ;;  %v5347_v11 = vadd.f32 %v12333_v37, %v5309_v57 }
 0x969   : > { %5580 = vmatmul.mubr.f32.gmra.mrb[74].mxu1 %v5339_v61  ;;  %v5345_v46 = vadd.f32 %v12333_v37, %v5307_v49  ;;  %v7172_v61 = vpop.eup %7171 }
 0x96a   : > { %5585 = vmatprep.mubr.f32.mxu1 %v13436_v24  ;;  %v5272_v59 = vmul.f32 %v7172_v61, %v13525_v3  ;;  %v7174_v18 = vpop.eup %7173 }
 0x96b   : > { %v5273_v7 = vmul.f32 %v7174_v18, %v13526_v41 }
 0x96c   : > { %v5310_v60 = vmul.f32 %v12329_v58, %v5272_v59 }
 0x96d   : > { %5586 = vmatmul.mubr.f32.gmra.mrb[76].mxu1 %v5340_v47  ;;  %v7176_v44 = vpop.eup %7175  ;;  %v5311_v47 = vmul.f32 %v12329_v58, %v5273_v7 }
 0x96e   : > { %5591 = vmatprep.mubr.f32.mxu1 %v13436_v24  ;;  %v5348_v12 = vadd.f32 %v12333_v37, %v5310_v60  ;;  %v5274_v34 = vmul.f32 %v7176_v44, %v13527_v36 }
 0x96f   : > { %v5349_v20 = vadd.f32 %v12333_v37, %v5311_v47 }
 0x970   : > { %v5312_v51 = vmul.f32 %v12329_v58, %v5274_v34 }
 0x971   : > { %5592 = vmatmul.mubr.f32.gmra.mrb[78].mxu1 %v5341_v29 }
 0x972   : > { %5597 = vmatprep.mubr.f32.mxu1 %v13436_v24  ;;  %v5350_v30 = vadd.f32 %v12333_v37, %v5312_v51 }
 0x975   : > { %5598 = vmatmul.mubr.f32.gmra.mrb[80].mxu1 %v5342_v14 }
 0x976   : > { %5603 = vmatprep.mubr.f32.mxu1 %v13436_v24 }
 0x979   : > { %5604 = vmatmul.mubr.f32.gmra.mrb[82].mxu1 %v5343_v42 }
 0x97a   : > { %5609 = vmatprep.mubr.f32.mxu1 %v13436_v24 }
 0x97d   : > { %5610 = vmatmul.mubr.f32.gmra.mrb[84].mxu1 %v5344_v10 }
 0x97e   : > { %5615 = vmatprep.mubr.f32.mxu1 %v13436_v24 }
 0x981   : > { %5616 = vmatmul.mubr.f32.gmra.mrb[86].mxu1 %v5345_v46 }
 0x982   : > { %5621 = vmatprep.mubr.f32.mxu1 %v13436_v24 }
 0x985   : > { %5622 = vmatmul.mubr.f32.gmra.mrb[88].mxu1 %v5346_v56 }
 0x986   : > { %5627 = vmatprep.mubr.f32.mxu1 %v13436_v24 }
 0x989   : > { %5628 = vmatmul.mubr.f32.gmra.mrb[90].mxu1 %v5347_v11 }
 0x98a   : > { %5633 = vmatprep.mubr.f32.mxu1 %v13436_v24 }
 0x98d   : > { %5634 = vmatmul.mubr.f32.gmra.mrb[92].mxu1 %v5348_v12 }
 0x98e   : > { %5639 = vmatprep.mubr.f32.mxu1 %v13436_v24 }
 0x991   : > { %5640 = vmatmul.mubr.f32.gmra.mrb[94].mxu1 %v5349_v20 }
 0x992   : > { %5645 = vmatprep.mubr.f32.mxu1 %v13436_v24 }
 0x995   : > { %5646 = vmatmul.mubr.f32.gmra.mrb[96].mxu1 %v5350_v30 }
 0x9ec   : > { %v5461_v19 = vpop.f32.mrb[34].mxu1 }
 0x9ed   : > { %v5462_v29 = vadd.f32 %v5461_v19, %v12514_v2  ;;  %v5463_v13 = vpop.f32.mrb[35].mxu1 }
 0x9ee   : > { %v5464_v4 = vadd.f32 %v5463_v13, %v12517_v23 }
 0x9f0   : > { %v5652_v58 = vmul.f32 %v5464_v4, %v5462_v29  ;;  %v5467_v45 = vpop.f32.mrb[36].mxu1 }
 0x9f1   : > { %v5468_v24 = vadd.f32 %v5467_v45, %v12514_v2  ;;  %v5469_v62 = vpop.f32.mrb[37].mxu1 }
 0x9f2   : > { %v5470_v37 = vadd.f32 %v5469_v62, %v12517_v23  ;;  %6613 = vmatprep.mubr.f32.mxu0 %v5652_v58 }
 0x9f4   : > { %v5653_v55 = vmul.f32 %v5470_v37, %v5468_v24  ;;  %v5473_v15 = vpop.f32.mrb[38].mxu1 }
 0x9f5   : > { %v5474_v31 = vadd.f32 %v5473_v15, %v12514_v2  ;;  %v5475_v28 = vpop.f32.mrb[39].mxu1 }
 0x9f6   : > { %v5476_v8 = vadd.f32 %v5475_v28, %v12517_v23  ;;  %6614 = vmatmul.mubr.f32.vlgmr.msra.gmra.mrb[64].mxu0 %v5653_v55 }
 0x9f8   : > { %v5654_v40 = vmul.f32 %v5476_v8, %v5474_v31  ;;  %v5479_v43 = vpop.f32.mrb[40].mxu1 }
 0x9f9   : > { %v5480_v14 = vadd.f32 %v5479_v43, %v12514_v2  ;;  %v5481_v32 = vpop.f32.mrb[41].mxu1 }
 0x9fa   : > { %v5482_v6 = vadd.f32 %v5481_v32, %v12517_v23  ;;  %6616 = vmatprep.mubr.f32.mxu0 %v5654_v40 }
 0x9fc   : > { %v5655_v9 = vmul.f32 %v5482_v6, %v5480_v14  ;;  %v5485_v50 = vpop.f32.mrb[42].mxu1 }
 0x9fd   : > { %v5486_v17 = vadd.f32 %v5485_v50, %v12514_v2  ;;  %v5487_v35 = vpop.f32.mrb[43].mxu1 }
 0x9fe   : > { %v5488_v39 = vadd.f32 %v5487_v35, %v12517_v23  ;;  %6617 = vmatmul.mubr.f32.gmra.mrb[66].mxu0 %v5655_v9 }
 0xa00   : > { %v5656_v63 = vmul.f32 %v5488_v39, %v5486_v17  ;;  %v5491_v54 = vpop.f32.mrb[44].mxu1 }
 0xa01   : > { %v5492_v42 = vadd.f32 %v5491_v54, %v12514_v2  ;;  %v5493_v27 = vpop.f32.mrb[45].mxu1 }
 0xa02   : > { %v5494_v25 = vadd.f32 %v5493_v27, %v12517_v23  ;;  %6619 = vmatprep.mubr.f32.mxu0 %v5656_v63 }
 0xa04   : > { %v5657_v26 = vmul.f32 %v5494_v25, %v5492_v42  ;;  %v5497_v48 = vpop.f32.mrb[46].mxu1 }
 0xa05   : > { %v5498_v52 = vadd.f32 %v5497_v48, %v12514_v2  ;;  %v5499_v10 = vpop.f32.mrb[47].mxu1 }
 0xa06   : > { %v5500_v49 = vadd.f32 %v5499_v10, %v12517_v23  ;;  %6620 = vmatmul.mubr.f32.gmra.mrb[68].mxu0 %v5657_v26 }
 0xa08   : > { %v5658_v16 = vmul.f32 %v5500_v49, %v5498_v52  ;;  %v5503_v22 = vpop.f32.mrb[48].mxu1 }
 0xa09   : > { %v5504_v1 = vadd.f32 %v5503_v22, %v12514_v2  ;;  %v5505_v46 = vpop.f32.mrb[49].mxu1 }
 0xa0a   : > { %v5506_v33 = vadd.f32 %v5505_v46, %v12517_v23  ;;  %6622 = vmatprep.mubr.f32.mxu0 %v5658_v16 }
 0xa0c   : > { %v5659_v38 = vmul.f32 %v5506_v33, %v5504_v1  ;;  %v5509_v0 = vpop.f32.mrb[50].mxu1 }
 0xa0d   : > { %v5510_v61 = vadd.f32 %v5509_v0, %v12514_v2  ;;  %v5511_v56 = vpop.f32.mrb[51].mxu1 }
 0xa0e   : > { %v5512_v57 = vadd.f32 %v5511_v56, %v12517_v23  ;;  %6623 = vmatmul.mubr.f32.gmra.mrb[70].mxu0 %v5659_v38 }
 0xa10   : > { %v5660_v3 = vmul.f32 %v5512_v57, %v5510_v61  ;;  %v5515_v59 = vpop.f32.mrb[52].mxu1 }
 0xa11   : > { %v5516_v18 = vadd.f32 %v5515_v59, %v12514_v2  ;;  %v5517_v11 = vpop.f32.mrb[53].mxu1 }
 0xa12   : > { %v5518_v60 = vadd.f32 %v5517_v11, %v12517_v23  ;;  %6625 = vmatprep.mubr.f32.mxu0 %v5660_v3 }
 0xa14   : > { %v5661_v41 = vmul.f32 %v5518_v60, %v5516_v18  ;;  %v5521_v7 = vpop.f32.mrb[54].mxu1 }
 0xa15   : > { %v5522_v44 = vadd.f32 %v5521_v7, %v12514_v2  ;;  %v5523_v12 = vpop.f32.mrb[55].mxu1 }
 0xa16   : > { %v5524_v47 = vadd.f32 %v5523_v12, %v12517_v23  ;;  %6626 = vmatmul.mubr.f32.gmra.mrb[72].mxu0 %v5661_v41 }
 0xa18   : > { %v5662_v36 = vmul.f32 %v5524_v47, %v5522_v44  ;;  %v5527_v34 = vpop.f32.mrb[56].mxu1 }
 0xa19   : > { %v5528_v20 = vadd.f32 %v5527_v34, %v12514_v2  ;;  %v5529_v51 = vpop.f32.mrb[57].mxu1 }
 0xa1a   : > { %6628 = vmatprep.mubr.f32.mxu0 %v5662_v36  ;;  %v5530_v30 = vadd.f32 %v5529_v51, %v12517_v23 }
 0xa1c   : > { %v5663_v5 = vmul.f32 %v5530_v30, %v5528_v20  ;;  %v5533_v53 = vpop.f32.mrb[58].mxu1 }
 0xa1d   : > { %v5534_v21 = vadd.f32 %v5533_v53, %v12514_v2  ;;  %v5535_v19 = vpop.f32.mrb[59].mxu1 }
 0xa1e   : > { %v5536_v29 = vadd.f32 %v5535_v19, %v12517_v23  ;;  %6629 = vmatmul.mubr.f32.gmra.mrb[74].mxu0 %v5663_v5 }
 0xa20   : > { %v5664_v13 = vmul.f32 %v5536_v29, %v5534_v21  ;;  %v5539_v4 = vpop.f32.mrb[60].mxu1 }
 0xa21   : > { %v5540_v58 = vadd.f32 %v5539_v4, %v12514_v2  ;;  %v5541_v45 = vpop.f32.mrb[61].mxu1 }
 0xa22   : > { %v5542_v24 = vadd.f32 %v5541_v45, %v12517_v23  ;;  %6631 = vmatprep.mubr.f32.mxu0 %v5664_v13 }
 0xa24   : > { %v5665_v62 = vmul.f32 %v5542_v24, %v5540_v58  ;;  %v5545_v37 = vpop.f32.mrb[62].mxu1 }
 0xa25   : > { %v5546_v55 = vadd.f32 %v5545_v37, %v12514_v2  ;;  %v5547_v15 = vpop.f32.mrb[63].mxu1 }
 0xa26   : > { %v5548_v31 = vadd.f32 %v5547_v15, %v12517_v23  ;;  %6632 = vmatmul.mubr.f32.gmra.mrb[76].mxu0 %v5665_v62 }
 0xa28   : > { %v5666_v28 = vmul.f32 %v5548_v31, %v5546_v55  ;;  %v5551_v8 = vpop.f32.mrb[64].mxu1 }
 0xa29   : > { %v5552_v40 = vadd.f32 %v5551_v8, %v12514_v2  ;;  %v5553_v43 = vpop.f32.mrb[65].mxu1 }
 0xa2a   : > { %v5554_v14 = vadd.f32 %v5553_v43, %v12517_v23  ;;  %6634 = vmatprep.mubr.f32.mxu0 %v5666_v28 }
 0xa2c   : > { %v5667_v32 = vmul.f32 %v5554_v14, %v5552_v40  ;;  %v5557_v6 = vpop.f32.mrb[66].mxu1 }
 0xa2d   : > { %v5558_v9 = vadd.f32 %v5557_v6, %v12514_v2  ;;  %v5559_v50 = vpop.f32.mrb[67].mxu1 }
 0xa2e   : > { %v5560_v17 = vadd.f32 %v5559_v50, %v12517_v23  ;;  %6635 = vmatmul.mubr.f32.gmra.mrb[78].mxu0 %v5667_v32 }
 0xa30   : > { %v5668_v35 = vmul.f32 %v5560_v17, %v5558_v9  ;;  %v5563_v39 = vpop.f32.mrb[68].mxu1 }
 0xa31   : > { %v5564_v63 = vadd.f32 %v5563_v39, %v12514_v2  ;;  %v5565_v54 = vpop.f32.mrb[69].mxu1 }
 0xa32   : > { %v5566_v42 = vadd.f32 %v5565_v54, %v12517_v23  ;;  %6637 = vmatprep.mubr.f32.mxu0 %v5668_v35 }
 0xa34   : > { %v5669_v27 = vmul.f32 %v5566_v42, %v5564_v63  ;;  %v5569_v25 = vpop.f32.mrb[70].mxu1 }
 0xa35   : > { %v5570_v26 = vadd.f32 %v5569_v25, %v12514_v2  ;;  %v5571_v48 = vpop.f32.mrb[71].mxu1 }
 0xa36   : > { %v5572_v52 = vadd.f32 %v5571_v48, %v12517_v23  ;;  %6638 = vmatmul.mubr.f32.gmra.mrb[80].mxu0 %v5669_v27 }
 0xa38   : > { %v5670_v10 = vmul.f32 %v5572_v52, %v5570_v26  ;;  %v5575_v49 = vpop.f32.mrb[72].mxu1 }
 0xa39   : > { %v5576_v16 = vadd.f32 %v5575_v49, %v12514_v2  ;;  %v5577_v22 = vpop.f32.mrb[73].mxu1 }
 0xa3a   : > { %v5578_v1 = vadd.f32 %v5577_v22, %v12517_v23  ;;  %6640 = vmatprep.mubr.f32.mxu0 %v5670_v10 }
 0xa3c   : > { %v5671_v46 = vmul.f32 %v5578_v1, %v5576_v16  ;;  %v5581_v33 = vpop.f32.mrb[74].mxu1  ;;  %v12583_v1 = vld [vmem:[#allocation28] ss:$0 sm:$0xff] }
 0xa3d   : > { %v5582_v38 = vadd.f32 %v5581_v33, %v12514_v2  ;;  %v5583_v0 = vpop.f32.mrb[75].mxu1  ;;  %v12585_v33 = vld [vmem:[#allocation31] ss:$0 sm:$0xff] }
 0xa3e   : > { %v5584_v61 = vadd.f32 %v5583_v0, %v12517_v23  ;;  %6641 = vmatmul.mubr.f32.gmra.mrb[82].mxu0 %v5671_v46 }
 0xa40   : > { %v5672_v56 = vmul.f32 %v5584_v61, %v5582_v38  ;;  %v5587_v57 = vpop.f32.mrb[76].mxu1 }
 0xa41   : > { %v5588_v3 = vadd.f32 %v5587_v57, %v12514_v2  ;;  %v5589_v59 = vpop.f32.mrb[77].mxu1  ;;  %v13530_v57 = vld [vmem:[#allocation64_spill] sm:$0xff] }
 0xa42   : > { %v5590_v18 = vadd.f32 %v5589_v59, %v12517_v23  ;;  %6643 = vmatprep.mubr.f32.mxu0 %v5672_v56 }
 0xa44   : > { %v5673_v11 = vmul.f32 %v5590_v18, %v5588_v3  ;;  %v5593_v60 = vpop.f32.mrb[78].mxu1 }
 0xa45   : > { %v5594_v41 = vadd.f32 %v5593_v60, %v12514_v2  ;;  %v5595_v7 = vpop.f32.mrb[79].mxu1 }
 0xa46   : > { %v5596_v44 = vadd.f32 %v5595_v7, %v12517_v23  ;;  %6644 = vmatmul.mubr.f32.gmra.mrb[84].mxu0 %v5673_v11 }
 0xa48   : > { %v5674_v12 = vmul.f32 %v5596_v44, %v5594_v41  ;;  %v5599_v47 = vpop.f32.mrb[80].mxu1 }
 0xa49   : > { %v5600_v36 = vadd.f32 %v5599_v47, %v12514_v2  ;;  %v5601_v34 = vpop.f32.mrb[81].mxu1 }
 0xa4a   : > { %v5602_v20 = vadd.f32 %v5601_v34, %v12517_v23  ;;  %6646 = vmatprep.mubr.f32.mxu0 %v5674_v12  ;;  %v13532_v12 = vld [vmem:[#allocation107_spill] sm:$0xff] }
 0xa4c   : > { %v5675_v51 = vmul.f32 %v5602_v20, %v5600_v36  ;;  %v5605_v30 = vpop.f32.mrb[82].mxu1  ;;  %v13533_v36 = vld [vmem:[#allocation88_spill] sm:$0xff] }
 0xa4d   : > { %v5606_v5 = vadd.f32 %v5605_v30, %v12514_v2  ;;  %v5607_v53 = vpop.f32.mrb[83].mxu1 }
 0xa4e   : > { %v5608_v21 = vadd.f32 %v5607_v53, %v12517_v23  ;;  %6647 = vmatmul.mubr.f32.gmra.mrb[86].mxu0 %v5675_v51 }
 0xa50   : > { %v5676_v19 = vmul.f32 %v5608_v21, %v5606_v5  ;;  %v5611_v29 = vpop.f32.mrb[84].mxu1 }
 0xa51   : > { %v5612_v13 = vadd.f32 %v5611_v29, %v12514_v2  ;;  %v5613_v4 = vpop.f32.mrb[85].mxu1 }
 0xa52   : > { %v5614_v58 = vadd.f32 %v5613_v4, %v12517_v23  ;;  %6649 = vmatprep.mubr.f32.mxu0 %v5676_v19  ;;  %v13534_v19 = vld [vmem:[#allocation66_spill] sm:$0xff] }
 0xa54   : > { %v5677_v45 = vmul.f32 %v5614_v58, %v5612_v13  ;;  %v5617_v24 = vpop.f32.mrb[86].mxu1  ;;  %v13535_v13 = vld [vmem:[#allocation56_spill] sm:$0xff] }
 0xa55   : > { %v5618_v62 = vadd.f32 %v5617_v24, %v12514_v2  ;;  %v5619_v37 = vpop.f32.mrb[87].mxu1 }
 0xa56   : > { %v5620_v55 = vadd.f32 %v5619_v37, %v12517_v23  ;;  %6650 = vmatmul.mubr.f32.gmra.mrb[88].mxu0 %v5677_v45 }
 0xa58   : > { %v5678_v15 = vmul.f32 %v5620_v55, %v5618_v62  ;;  %v5623_v31 = vpop.f32.mrb[88].mxu1 }
 0xa59   : > { %v5624_v28 = vadd.f32 %v5623_v31, %v12514_v2  ;;  %v5625_v8 = vpop.f32.mrb[89].mxu1 }
 0xa5a   : > { %v5626_v40 = vadd.f32 %v5625_v8, %v12517_v23  ;;  %6652 = vmatprep.mubr.f32.mxu0 %v5678_v15  ;;  %v13536_v15 = vld [vmem:[#allocation63_spill] sm:$0xff] }
 0xa5c   : > { %v5679_v43 = vmul.f32 %v5626_v40, %v5624_v28  ;;  %v5629_v14 = vpop.f32.mrb[90].mxu1  ;;  %v13537_v28 = vld [vmem:[#allocation65_spill] sm:$0xff] }
 0xa5d   : > { %v5630_v32 = vadd.f32 %v5629_v14, %v12514_v2  ;;  %v5631_v6 = vpop.f32.mrb[91].mxu1 }
 0xa5e   : > { %v5632_v9 = vadd.f32 %v5631_v6, %v12517_v23  ;;  %6653 = vmatmul.mubr.f32.gmra.mrb[90].mxu0 %v5679_v43 }
 0xa60   : > { %v5680_v50 = vmul.f32 %v5632_v9, %v5630_v32  ;;  %v5635_v17 = vpop.f32.mrb[92].mxu1 }
 0xa61   : > { %v5636_v35 = vadd.f32 %v5635_v17, %v12514_v2  ;;  %v5637_v39 = vpop.f32.mrb[93].mxu1 }
 0xa62   : > { %v5638_v63 = vadd.f32 %v5637_v39, %v12517_v23  ;;  %6655 = vmatprep.mubr.f32.mxu0 %v5680_v50  ;;  %v13538_v50 = vld [vmem:[#allocation80_spill] sm:$0xff] }
 0xa64   : > { %v5681_v54 = vmul.f32 %v5638_v63, %v5636_v35  ;;  %v5641_v42 = vpop.f32.mrb[94].mxu1  ;;  %v13539_v35 = vld [vmem:[#allocation97_spill] sm:$0xff] }
 0xa65   : > { %v5642_v27 = vadd.f32 %v5641_v42, %v12514_v2  ;;  %v5643_v25 = vpop.f32.mrb[95].mxu1 }
 0xa66   : > { %v5644_v26 = vadd.f32 %v5643_v25, %v12517_v23  ;;  %6656 = vmatmul.mubr.f32.gmra.mrb[92].mxu0 %v5681_v54 }
 0xa68   : > { %v5682_v48 = vmul.f32 %v5644_v26, %v5642_v27  ;;  %v5647_v52 = vpop.f32.mrb[96].mxu1 }
 0xa69   : > { %v5648_v10 = vadd.f32 %v5647_v52, %v12514_v2  ;;  %v5649_v49 = vpop.f32.mrb[97].mxu1 }
 0xa6a   : > { %v5650_v16 = vadd.f32 %v5649_v49, %v12517_v23  ;;  %6658 = vmatprep.mubr.f32.mxu0 %v5682_v48  ;;  %v13531_v23 = vld [vmem:[#allocation106_spill] sm:$0xff] }
 0xa6b   : > { %v13540_v48 = vld [vmem:[#allocation78_spill] sm:$0xff] }
 0xa6c   : > { %v5683_v22 = vmul.f32 %v5650_v16, %v5648_v10  ;;  %v13541_v10 = vld [vmem:[#allocation91_spill] sm:$0xff] }
 0xa6e   : > { %6659 = vmatmul.mubr.f32.gmra.mrb[94].mxu0 %v5683_v22 }
 0xac9   : > { %v6615_v46 = vpop.f32.mrb[64].mxu0 }
 0xaca   : > { %v5779_v38 = vadd.f32 %v6615_v46, %v12583_v1  ;;  %v5773_v0 = vpop.f32.mrb[65].mxu0 }
 0xacb   : > { %v5774_v61 = vadd.f32 %v12583_v1, %v5773_v0 }
 0xacc   : > { %v5940_v56 = vmul.f32 %v12585_v33, %v5779_v38 }
 0xacd   : > { %v5939_v2 = vmul.f32 %v12585_v33, %v5774_v61 }
 0xace   : > { %v5972_v3 = vadd.f32 %v5940_v56, %v13530_v57  ;;  %v13542_v56 = vld [vmem:[#allocation75_spill] sm:$0xff]  ;;  %v13543_v57 = vld [vmem:[#allocation76_spill] sm:$0xff] }
 0xacf   : > { %v5971_v59 = vadd.f32 %v5939_v2, %v13531_v23 }
 0xad0   : > { %6004 = vst [vmem:[%s12595_s1 + $0x8] sm:$0xff] %v5972_v3 }
 0xad1   : > { %6003 = vst [vmem:[%s12595_s1] sm:$0xff] %v5971_v59  ;;  %v6618_v18 = vpop.f32.mrb[66].mxu0 }
 0xad2   : > { %v5789_v11 = vadd.f32 %v6618_v18, %v12583_v1  ;;  %v5783_v60 = vpop.f32.mrb[67].mxu0 }
 0xad3   : > { %v5784_v41 = vadd.f32 %v12583_v1, %v5783_v60 }
 0xad4   : > { %v5942_v7 = vmul.f32 %v12585_v33, %v5789_v11 }
 0xad5   : > { %v5941_v44 = vmul.f32 %v12585_v33, %v5784_v41 }
 0xad6   : > { %v5974_v47 = vadd.f32 %v5942_v7, %v13532_v12  ;;  %v13544_v7 = vld [vmem:[#allocation67_spill] sm:$0xff]  ;;  %v13545_v12 = vld [vmem:[#allocation90_spill] sm:$0xff] }
 0xad7   : > { %v5973_v34 = vadd.f32 %v5941_v44, %v13533_v36 }
 0xad8   : > { %6006 = vst [vmem:[%s12595_s1 + $0x18] sm:$0xff] %v5974_v47 }
 0xad9   : > { %6005 = vst [vmem:[%s12595_s1 + $0x10] sm:$0xff] %v5973_v34  ;;  %v6621_v20 = vpop.f32.mrb[68].mxu0 }
 0xada   : > { %v5799_v51 = vadd.f32 %v6621_v20, %v12583_v1  ;;  %v5793_v30 = vpop.f32.mrb[69].mxu0 }
 0xadb   : > { %v5794_v5 = vadd.f32 %v12583_v1, %v5793_v30 }
 0xadc   : > { %v5944_v53 = vmul.f32 %v12585_v33, %v5799_v51 }
 0xadd   : > { %v5943_v21 = vmul.f32 %v12585_v33, %v5794_v5 }
 0xade   : > { %v5976_v29 = vadd.f32 %v5944_v53, %v13534_v19  ;;  %v13546_v53 = vld [vmem:[#allocation60_spill] sm:$0xff]  ;;  %v13547_v19 = vld [vmem:[#allocation89_spill] sm:$0xff] }
 0xadf   : > { %v5975_v4 = vadd.f32 %v5943_v21, %v13535_v13 }
 0xae0   : > { %6008 = vst [vmem:[%s12595_s1 + $0x28] sm:$0xff] %v5976_v29 }
 0xae1   : > { %6007 = vst [vmem:[%s12595_s1 + $0x20] sm:$0xff] %v5975_v4  ;;  %v6624_v58 = vpop.f32.mrb[70].mxu0 }
 0xae2   : > { %v5809_v45 = vadd.f32 %v6624_v58, %v12583_v1  ;;  %v5803_v24 = vpop.f32.mrb[71].mxu0 }
 0xae3   : > { %v5804_v62 = vadd.f32 %v12583_v1, %v5803_v24 }
 0xae4   : > { %v5946_v37 = vmul.f32 %v12585_v33, %v5809_v45 }
 0xae5   : > { %v5945_v55 = vmul.f32 %v12585_v33, %v5804_v62 }
 0xae6   : > { %v5978_v31 = vadd.f32 %v5946_v37, %v13536_v15  ;;  %v13548_v37 = vld [vmem:[#allocation55_spill] sm:$0xff] }
 0xae7   : > { %v5977_v8 = vadd.f32 %v5945_v55, %v13537_v28  ;;  %v13549_v15 = vld [vmem:[#allocation87_spill] sm:$0xff] }
 0xae8   : > { %6010 = vst [vmem:[%s12595_s1 + $0x38] sm:$0xff] %v5978_v31 }
 0xae9   : > { %6009 = vst [vmem:[%s12595_s1 + $0x30] sm:$0xff] %v5977_v8  ;;  %v6627_v40 = vpop.f32.mrb[72].mxu0 }
 0xaea   : > { %v5819_v43 = vadd.f32 %v6627_v40, %v12583_v1  ;;  %v5813_v14 = vpop.f32.mrb[73].mxu0 }
 0xaeb   : > { %v5814_v32 = vadd.f32 %v12583_v1, %v5813_v14 }
 0xaec   : > { %v5948_v6 = vmul.f32 %v12585_v33, %v5819_v43 }
 0xaed   : > { %v5947_v9 = vmul.f32 %v12585_v33, %v5814_v32 }
 0xaee   : > { %v5980_v17 = vadd.f32 %v5948_v6, %v13538_v50  ;;  %v13550_v6 = vld [vmem:[#allocation59_spill] sm:$0xff]  ;;  %v13551_v50 = vld [vmem:[#allocation61_spill] sm:$0xff] }
 0xaef   : > { %v5979_v39 = vadd.f32 %v5947_v9, %v13539_v35 }
 0xaf0   : > { %6012 = vst [vmem:[%s12595_s1 + $0x48] sm:$0xff] %v5980_v17 }
 0xaf1   : > { %6011 = vst [vmem:[%s12595_s1 + $0x40] sm:$0xff] %v5979_v39  ;;  %v6630_v63 = vpop.f32.mrb[74].mxu0 }
 0xaf2   : > { %v5829_v54 = vadd.f32 %v6630_v63, %v12583_v1  ;;  %v5823_v42 = vpop.f32.mrb[75].mxu0 }
 0xaf3   : > { %v5824_v27 = vadd.f32 %v12583_v1, %v5823_v42 }
 0xaf4   : > { %v5950_v25 = vmul.f32 %v12585_v33, %v5829_v54 }
 0xaf5   : > { %v5949_v26 = vmul.f32 %v12585_v33, %v5824_v27 }
 0xaf6   : > { %v5982_v52 = vadd.f32 %v5950_v25, %v13540_v48  ;;  %v13552_v25 = vld [vmem:[#allocation70_spill] sm:$0xff]  ;;  %v13553_v48 = vld [vmem:[#allocation69_spill] sm:$0xff] }
 0xaf7   : > { %v5981_v49 = vadd.f32 %v5949_v26, %v13541_v10 }
 0xaf8   : > { %6014 = vst [vmem:[%s12595_s1 + $0x58] sm:$0xff] %v5982_v52 }
 0xaf9   : > { %6013 = vst [vmem:[%s12595_s1 + $0x50] sm:$0xff] %v5981_v49  ;;  %v6633_v16 = vpop.f32.mrb[76].mxu0 }
 0xafa   : > { %v5839_v22 = vadd.f32 %v6633_v16, %v12583_v1  ;;  %v5833_v46 = vpop.f32.mrb[77].mxu0 }
 0xafb   : > { %v5834_v38 = vadd.f32 %v12583_v1, %v5833_v46 }
 0xafc   : > { %v5952_v0 = vmul.f32 %v12585_v33, %v5839_v22 }
 0xafd   : > { %v5951_v61 = vmul.f32 %v12585_v33, %v5834_v38 }
 0xafe   : > { %v5984_v2 = vadd.f32 %v5952_v0, %v13542_v56  ;;  %v13554_v0 = vld [vmem:[#allocation58_spill] sm:$0xff]  ;;  %v13555_v56 = vld [vmem:[#allocation68_spill] sm:$0xff] }
 0xaff   : > { %v5983_v3 = vadd.f32 %v5951_v61, %v13543_v57 }
 0xb00   : > { %6016 = vst [vmem:[%s12595_s1 + $0x68] sm:$0xff] %v5984_v2 }
 0xb01   : > { %6015 = vst [vmem:[%s12595_s1 + $0x60] sm:$0xff] %v5983_v3  ;;  %v6636_v23 = vpop.f32.mrb[78].mxu0 }
 0xb02   : > { %v5849_v59 = vadd.f32 %v6636_v23, %v12583_v1  ;;  %v5843_v18 = vpop.f32.mrb[79].mxu0 }
 0xb03   : > { %v5844_v11 = vadd.f32 %v12583_v1, %v5843_v18 }
 0xb04   : > { %v5954_v60 = vmul.f32 %v12585_v33, %v5849_v59 }
 0xb05   : > { %v5953_v41 = vmul.f32 %v12585_v33, %v5844_v11 }
 0xb06   : > { %v5986_v44 = vadd.f32 %v5954_v60, %v13544_v7  ;;  %v13556_v60 = vld [vmem:[#allocation62_spill] sm:$0xff]  ;;  %v13557_v7 = vld [vmem:[#allocation71_spill] sm:$0xff] }
 0xb07   : > { %v5985_v47 = vadd.f32 %v5953_v41, %v13545_v12 }
 0xb08   : > { %6018 = vst [vmem:[%s12595_s1 + $0x78] sm:$0xff] %v5986_v44 }
 0xb09   : > { %6017 = vst [vmem:[%s12595_s1 + $0x70] sm:$0xff] %v5985_v47  ;;  %v6639_v36 = vpop.f32.mrb[80].mxu0 }
 0xb0a   : > { %v5859_v34 = vadd.f32 %v6639_v36, %v12583_v1  ;;  %v5853_v20 = vpop.f32.mrb[81].mxu0 }
 0xb0b   : > { %v5854_v51 = vadd.f32 %v12583_v1, %v5853_v20 }
 0xb0c   : > { %v5956_v30 = vmul.f32 %v12585_v33, %v5859_v34 }
 0xb0d   : > { %v5955_v5 = vmul.f32 %v12585_v33, %v5854_v51 }
 0xb0e   : > { %v5988_v21 = vadd.f32 %v5956_v30, %v13546_v53  ;;  %v13558_v30 = vld [vmem:[#allocation79_spill] sm:$0xff]  ;;  %v13559_v53 = vld [vmem:[#allocation82_spill] sm:$0xff] }
 0xb0f   : > { %v5987_v29 = vadd.f32 %v5955_v5, %v13547_v19 }
 0xb10   : > { %6020 = vst [vmem:[%s12595_s1 + $0x88] sm:$0xff] %v5988_v21 }
 0xb11   : > { %6019 = vst [vmem:[%s12595_s1 + $0x80] sm:$0xff] %v5987_v29  ;;  %v6642_v13 = vpop.f32.mrb[82].mxu0 }
 0xb12   : > { %v5869_v4 = vadd.f32 %v6642_v13, %v12583_v1  ;;  %v5863_v58 = vpop.f32.mrb[83].mxu0 }
 0xb13   : > { %v5864_v45 = vadd.f32 %v12583_v1, %v5863_v58 }
 0xb14   : > { %v5958_v24 = vmul.f32 %v12585_v33, %v5869_v4 }
 0xb15   : > { %v5957_v62 = vmul.f32 %v12585_v33, %v5864_v45 }
 0xb16   : > { %v5990_v55 = vadd.f32 %v5958_v24, %v13548_v37  ;;  %v13560_v24 = vld [vmem:[#allocation92_spill] sm:$0xff]  ;;  %v13562_v37 = vld [vmem:[#allocation81_spill] sm:$0xff] }
 0xb17   : > { %v5989_v31 = vadd.f32 %v5957_v62, %v13549_v15 }
 0xb18   : > { %6022 = vst [vmem:[%s12595_s1 + $0x98] sm:$0xff] %v5990_v55 }
 0xb19   : > { %6021 = vst [vmem:[%s12595_s1 + $0x90] sm:$0xff] %v5989_v31  ;;  %v6645_v28 = vpop.f32.mrb[84].mxu0 }
 0xb1a   : > { %v5879_v8 = vadd.f32 %v6645_v28, %v12583_v1  ;;  %v5873_v40 = vpop.f32.mrb[85].mxu0 }
 0xb1b   : > { %v5874_v43 = vadd.f32 %v12583_v1, %v5873_v40 }
 0xb1c   : > { %v5960_v14 = vmul.f32 %v12585_v33, %v5879_v8 }
 0xb1d   : > { %v5959_v32 = vmul.f32 %v12585_v33, %v5874_v43 }
 0xb1e   : > { %v5992_v9 = vadd.f32 %v5960_v14, %v13550_v6 }
 0xb1f   : > { %v5991_v17 = vadd.f32 %v5959_v32, %v13551_v50 }
 0xb20   : > { %6024 = vst [vmem:[%s12595_s1 + $0xa8] sm:$0xff] %v5992_v9 }
 0xb21   : > { %6023 = vst [vmem:[%s12595_s1 + $0xa0] sm:$0xff] %v5991_v17  ;;  %v6648_v35 = vpop.f32.mrb[86].mxu0 }
 0xb22   : > { %v5889_v39 = vadd.f32 %v6648_v35, %v12583_v1  ;;  %v5883_v63 = vpop.f32.mrb[87].mxu0 }
 0xb23   : > { %v5884_v54 = vadd.f32 %v12583_v1, %v5883_v63 }
 0xb24   : > { %v5962_v42 = vmul.f32 %v12585_v33, %v5889_v39 }
 0xb25   : > { %v5961_v27 = vmul.f32 %v12585_v33, %v5884_v54 }
 0xb26   : > { %v5994_v26 = vadd.f32 %v5962_v42, %v13552_v25 }
 0xb27   : > { %v5993_v52 = vadd.f32 %v5961_v27, %v13553_v48 }
 0xb28   : > { %6026 = vst [vmem:[%s12595_s1 + $0xb8] sm:$0xff] %v5994_v26 }
 0xb29   : > { %6025 = vst [vmem:[%s12595_s1 + $0xb0] sm:$0xff] %v5993_v52  ;;  %v6651_v10 = vpop.f32.mrb[88].mxu0 }
 0xb2a   : > { %v5899_v49 = vadd.f32 %v6651_v10, %v12583_v1  ;;  %v5893_v16 = vpop.f32.mrb[89].mxu0 }
 0xb2b   : > { %v5894_v22 = vadd.f32 %v12583_v1, %v5893_v16 }
 0xb2c   : > { %v5964_v46 = vmul.f32 %v12585_v33, %v5899_v49 }
 0xb2d   : > { %v5963_v38 = vmul.f32 %v12585_v33, %v5894_v22 }
 0xb2e   : > { %v5996_v61 = vadd.f32 %v5964_v46, %v13554_v0 }
 0xb2f   : > { %v5995_v2 = vadd.f32 %v5963_v38, %v13555_v56 }
 0xb30   : > { %6028 = vst [vmem:[%s12595_s1 + $0xc8] sm:$0xff] %v5996_v61 }
 0xb31   : > { %6027 = vst [vmem:[%s12595_s1 + $0xc0] sm:$0xff] %v5995_v2  ;;  %v6654_v57 = vpop.f32.mrb[90].mxu0 }
 0xb32   : > { %v5909_v3 = vadd.f32 %v6654_v57, %v12583_v1  ;;  %v5903_v23 = vpop.f32.mrb[91].mxu0 }
 0xb33   : > { %v5904_v59 = vadd.f32 %v12583_v1, %v5903_v23 }
 0xb34   : > { %v5966_v18 = vmul.f32 %v12585_v33, %v5909_v3 }
 0xb35   : > { %v5965_v11 = vmul.f32 %v12585_v33, %v5904_v59 }
 0xb36   : > { %v5998_v41 = vadd.f32 %v5966_v18, %v13556_v60 }
 0xb37   : > { %v5997_v44 = vadd.f32 %v5965_v11, %v13557_v7 }
 0xb38   : > { %6030 = vst [vmem:[%s12595_s1 + $0xd8] sm:$0xff] %v5998_v41 }
 0xb39   : > { %6029 = vst [vmem:[%s12595_s1 + $0xd0] sm:$0xff] %v5997_v44  ;;  %v6657_v12 = vpop.f32.mrb[92].mxu0 }
 0xb3a   : > { %v5919_v47 = vadd.f32 %v6657_v12, %v12583_v1  ;;  %v5913_v36 = vpop.f32.mrb[93].mxu0 }
 0xb3b   : > { %v5914_v34 = vadd.f32 %v12583_v1, %v5913_v36 }
 0xb3c   : > { %v5968_v20 = vmul.f32 %v12585_v33, %v5919_v47 }
 0xb3d   : > { %v5967_v51 = vmul.f32 %v12585_v33, %v5914_v34 }
 0xb3e   : > { %v6000_v5 = vadd.f32 %v5968_v20, %v13558_v30 }
 0xb3f   : > { %v5999_v21 = vadd.f32 %v5967_v51, %v13559_v53 }
 0xb40   : > { %6032 = vst [vmem:[%s12595_s1 + $0xe8] sm:$0xff] %v6000_v5 }
 0xb41   : > { %6031 = vst [vmem:[%s12595_s1 + $0xe0] sm:$0xff] %v5999_v21  ;;  %v6660_v19 = vpop.f32.mrb[94].mxu0 }
 0xb42   : > { %v5929_v29 = vadd.f32 %v6660_v19, %v12583_v1  ;;  %v5923_v13 = vpop.f32.mrb[95].mxu0 }
 0xb43   : > { %v5924_v4 = vadd.f32 %v12583_v1, %v5923_v13 }
 0xb44   : > { %v5970_v58 = vmul.f32 %v12585_v33, %v5929_v29 }
 0xb45   : > { %v5969_v45 = vmul.f32 %v12585_v33, %v5924_v4 }
 0xb46   : > { %v6002_v62 = vadd.f32 %v5970_v58, %v13560_v24 }
 0xb47   : > { %v6001_v1 = vadd.f32 %v5969_v45, %v13562_v37 }
 0xb48   : > { %6034 = vst [vmem:[%s12595_s1 + $0xf8] sm:$0xff] %v6002_v62 }
 0xb49   : > { %6033 = vst [vmem:[%s12595_s1 + $0xf0] sm:$0xff] %v6001_v1 }
 0xb4a   : > { %7756 = shalt.err (!%p7753_p0)
}
 0xb4b   : > { %s7757_s1 = scalar_lea.hbm %s12721_s19, 4096  ;;  %s7761_s29 = scalar_lea.hbm %s13561_s4, 8192 }
 0xb4c   : > { %p7758_p2 = scmp.ne.s32.totalorder %s12721_s19, %s7757_s1  ;;  %p7762_p11 = scmp.lt.u32.totalorder %s12721_s19, %s13561_s4 }
 0xb4d   : > { %p7763_p12 = scmp.lt.u32.totalorder %s7761_s29, %s7757_s1  ;;  %p7765_p5 = scmp.lt.u32.totalorder %s7757_s1, %s12721_s19 }
 0xb4e   : > { %p7759_p8 = pnand %p7758_p2, %p13563_p7 }
 0xb4f   : > { %p7764_p3 = por %p7763_p12, %p7762_p11 }
 0xb50   : > { %p7760_p10 = pneg %p7759_p8 }
 0xb51   : > { %p7766_p6 = por %p7765_p5, %p7764_p3 }
 0xb53   : > { %p7767_p9 = pnand %p7766_p6, %p7760_p10 }
 0xb55   : > { %7770 = shalt.err (!%p7767_p9)
}
 0xb56   : > { %s7874_s20 = smov 128   ;;  %s7875_s6 = smov 8  }
 0xb57   : > { %6887 = dma.vmem_to_hbm [thread:$0]  (%p13563_p7), %s12723_s2, 4096, %s12721_s19, %s6036_s27, %s7874_s20, %s7874_s20, %s7875_s6  }
 0xb58 PF: > { %s13564_s25 = sld [smem:[#allocation44_spill]]  ;;  %s13565_s22 = sld [smem:[#allocation47_spill]] }
 0xb59   : > { %p13566_p4 = scmp.ne.s32.totalorder %s13005_s24, 0 }
 0xb5e   : > { %s6064_s23 = sand.u32 1, %s13564_s25   ;;  %p13567_p1 = scmp.ge.s32.totalorder %s13565_s22, 2 }
 0xb5f   : > { %s6065_s1 = scalar_lea.sflag [#allocation4], %s6064_s23 }
 0xb60   : > { %p6949_p13 = pnand %p13567_p1, %p13566_p4 }
 0xb62   : > { %7828 = dma.done.wait (!%p6949_p13), %s6065_s1, 4096  }
 0xb63   : > { %7830 = vsyncadd (!%p6949_p13), %s6065_s1, 4294963200  ;;  %s13568_s29 = sld [smem:[#allocation45_spill]]  ;;  %s13569_s30 = sld [smem:[#allocation46_spill]] }
 0xb64   : > { %s13570_s3 = smov %s8451_s0  ;;  %p41_p0 = scmp.ge.s32.totalorder %s8440_s21, 4  }
 0xb65   : > { %s13572_s20 = smov %s13570_s3 }
 0xb66   :  { %43 = sbr.rel (!%p41_p0) target bundleno = 23 (0x17), region = 221 }
 0xb69   : > { %s13571_s0 = smov %s13568_s29 }
 0xb6d   :  { %6070 = vsyncpa [#allocation3], 1 }
 0xb6e   :  { %6072 = vsyncpa [#allocation3 + $0x1], 1 }
 0xb6f   :  { %6073 = vsyncpa [#allocation6], 1 }
 0xb70   :  { %6074 = vsyncpa [#allocation9], 1 }
 0xb71   :  { %6075 = vsyncpa [#allocation12], 1 }
 0xb72   :  { %6076 = vsyncpa [#allocation15], 1 }
 0xb73   :  { %6077 = vsyncpa [#allocation18], 1 }
 0xb74   :  { %6078 = vsyncpa [#allocation21], 1 }
 0xb75   :  { %6079 = vsyncpa [#allocation24], 1 }
 0xb76   :  { %6080 = vsyncpa [#allocation27], 1 }
 0xb77   :  { %6081 = vsyncpa [#allocation30], 1 }
 0xb78   :  { %6082 = vsyncpa [#allocation4], 1 }
 0xb79   :  { %6084 = vsyncpa [#allocation4 + $0x1], 1 }

</bundles_post_ra>
